<compile_context>
chip_gen: v6e
topology: v6e:2x2x1
jax: 0.10.0
libtpu: 0.0.40
codegen_flags: <defaults>
</compile_context>

<pallas_src>
import functools

import jax
import jax.numpy as jnp
import numpy as np
from jax.experimental import pallas as pl
from jax.experimental.pallas import tpu as pltpu


_VMEM_LIMIT = 32 * 1024 * 1024  # safe on v5e/v6e/v7x; tiles below use ~1-2 MiB


# ----------------------------------------------------------------------------
# helpers
# ----------------------------------------------------------------------------
def _leaky_relu(x, slope=0.01):
    return jnp.where(x > 0, x, slope * x)


def sinusoidal_pe(max_len, dim):
    pos = np.arange(max_len, dtype=np.float32)[:, None]
    div = np.exp(np.arange(0, dim, 2, dtype=np.float32) * -(np.log(10000.0) / dim))
    pe = np.zeros((max_len, dim), dtype=np.float32)
    pe[:, 0::2] = np.sin(pos * div)
    pe[:, 1::2] = np.cos(pos * div)
    return jnp.asarray(pe)


def _round_up(x, m):
    return ((x + m - 1) // m) * m


def _pick_tile(n, candidates):
    for c in candidates:
        if n % c == 0:
            return c
    return n  # unreachable: n is always a multiple of 128


# ----------------------------------------------------------------------------
# Kernel A: row-tiled linear  h = x @ W   (bf16 inputs, f32 accumulate)
# ----------------------------------------------------------------------------
def _linear_kernel(x_ref, w_ref, o_ref):
    o_ref[...] = jnp.dot(x_ref[...], w_ref[...], preferred_element_type=jnp.float32)


def linear_rows(x, w, tm):
    n, f = x.shape
    o = w.shape[1]
    return pl.pallas_call(
        _linear_kernel,
        out_shape=jax.ShapeDtypeStruct((n, o), jnp.float32),
        grid_spec=pltpu.PrefetchScalarGridSpec(
            num_scalar_prefetch=0,
            grid=(n // tm,),
            in_specs=[
                pl.BlockSpec((tm, f), lambda i: (i, 0)),
                pl.BlockSpec((f, o), lambda i: (0, 0)),
            ],
            out_specs=pl.BlockSpec((tm, o), lambda i: (i, 0)),
        ),
        compiler_params=pltpu.CompilerParams(
            dimension_semantics=("parallel",),
            vmem_limit_bytes=_VMEM_LIMIT),
    )(x, w)


# ----------------------------------------------------------------------------
# Kernel B: tiled SAGE aggregation + degree-debias (FiLM) + fused tail linear
#           (tail = next layer's W, or fc + log_softmax for the last layer)
# ----------------------------------------------------------------------------
def _debias_block_kernel(adj_ref, hall_ref, hself_ref, pe_ref, r_ref,
                         wgb_ref, bgb_ref, war_ref,
                         wth_ref, wtn_ref, tb_ref,
                         out_ref, loss_ref, acc_ref, *, omega, o, final):
    k = pl.program_id(1)

    @pl.when(k == 0)
    def _():
        acc_ref[...] = jnp.zeros_like(acc_ref)

    # mean-neighbour aggregation, tiled over neighbour blocks (bf16 MXU, f32 acc)
    acc_ref[...] += jnp.dot(adj_ref[...], hall_ref[...],
                            preferred_element_type=jnp.float32)

    @pl.when(k == pl.num_programs(1) - 1)
    def _():
        agg = acc_ref[...]

        # FiLM from the degree encoding: one packed (m, 2o) matmul -> gamma|beta
        gb = _leaky_relu(
            jnp.dot(pe_ref[...], wgb_ref[...], preferred_element_type=jnp.float32)
            + bgb_ref[...])
        gamma = gb[:, :o]
        beta = gb[:, o:]

        # packed (o, 2o) matmul -> add|rev debiasing contexts
        ar = jnp.dot(agg, war_ref[...], preferred_element_type=jnp.float32)
        g1 = gamma + 1.0
        b_add = g1 * ar[:, :o] + beta
        b_rev = g1 * ar[:, o:] + beta

        r = r_ref[...]  # 1.0 for low-degree nodes, 0.0 for high-degree nodes
        neigh = agg + omega * (r * b_add - (1.0 - r) * b_rev)

        # fused tail: concat([h_self, neigh]) @ W_tail + b_tail
        z = (jnp.dot(hself_ref[...], wth_ref[...], preferred_element_type=jnp.float32)
             + jnp.dot(neigh, wtn_ref[...], preferred_element_type=jnp.float32)
             + tb_ref[...])
        if final:  # last layer: log_softmax over classes
            mx = jnp.max(z, axis=1, keepdims=True)
            z = z - (mx + jnp.log(jnp.sum(jnp.exp(z - mx), axis=1, keepdims=True)))
        out_ref[...] = z

        # packed per-row loss partials: [ ||b_add||^2+||b_rev||^2 , ||gamma||^2+||beta||^2 ]
        bsum = jnp.sum(b_add * b_add + b_rev * b_rev, axis=1, keepdims=True)
        fsum = jnp.sum(gb * gb, axis=1, keepdims=True)
        loss_ref[...] = jnp.concatenate([bsum, fsum], axis=1)


def debias_layer(adj_b, h, h_b, pe_d, r, p, w_tail, b_tail, *,
                 omega, final, tm, tk):
    """One Debias_v2 layer with the following linear fused into the epilogue."""
    n = adj_b.shape[0]
    o = p["W_gamma"].shape[1]
    m = pe_d.shape[1]
    ot = w_tail.shape[1]

    # pack small weight pairs -> single lane-dense MXU passes
    w_gb = jnp.concatenate([p["W_gamma"], p["W_beta"]], axis=1)   # (m, 2o)
    b_gb = jnp.concatenate([p["b_gamma"], p["b_beta"]], axis=1)   # (1, 2o)
    w_ar = jnp.concatenate([p["W_add"], p["W_rev"]], axis=1)      # (o, 2o)
    w_th = w_tail[:o]                                             # (o, ot) for h half
    w_tn = w_tail[o:]                                             # (o, ot) for neigh half

    kernel = functools.partial(_debias_block_kernel, omega=omega, o=o, final=final)
    out, loss = pl.pallas_call(
        kernel,
        out_shape=(
            jax.ShapeDtypeStruct((n, ot), jnp.float32),
            jax.ShapeDtypeStruct((n, 2), jnp.float32),
        ),
        grid_spec=pltpu.PrefetchScalarGridSpec(
            num_scalar_prefetch=0,
            grid=(n // tm, n // tk),
            in_specs=[
                pl.BlockSpec((tm, tk), lambda i, k: (i, k)),    # adj tile (bf16)
                pl.BlockSpec((tk, o), lambda i, k: (k, 0)),     # h, neighbour rows (bf16)
                pl.BlockSpec((tm, o), lambda i, k: (i, 0)),     # h, self rows (f32)
                pl.BlockSpec((tm, m), lambda i, k: (i, 0)),     # degree encoding
                pl.BlockSpec((tm, 1), lambda i, k: (i, 0)),     # low-degree mask
                pl.BlockSpec((m, 2 * o), lambda i, k: (0, 0)),  # W_gamma|W_beta
                pl.BlockSpec((1, 2 * o), lambda i, k: (0, 0)),  # b_gamma|b_beta
                pl.BlockSpec((o, 2 * o), lambda i, k: (0, 0)),  # W_add|W_rev
                pl.BlockSpec((o, ot), lambda i, k: (0, 0)),     # W_tail (h half)
                pl.BlockSpec((o, ot), lambda i, k: (0, 0)),     # W_tail (neigh half)
                pl.BlockSpec((1, ot), lambda i, k: (0, 0)),     # b_tail
            ],
            out_specs=(
                pl.BlockSpec((tm, ot), lambda i, k: (i, 0)),
                pl.BlockSpec((tm, 2), lambda i, k: (i, 0)),
            ),
            scratch_shapes=[pltpu.VMEM((tm, o), jnp.float32)],  # agg accumulator
        ),
        compiler_params=pltpu.CompilerParams(
            dimension_semantics=("parallel", "arbitrary"),
            vmem_limit_bytes=_VMEM_LIMIT),
    )(adj_b, h_b, h, pe_d, r, w_gb, b_gb, w_ar, w_th, w_tn, b_tail)
    return out, loss


# ----------------------------------------------------------------------------
# DFairGNN_2 forward (inference: dropout = identity)
# ----------------------------------------------------------------------------
def dfair_forward(x, adj, d, idx, params, *, omega, max_degree, tm=256, tk=512):
    # TODO(synk): `idx` is only used for sparse spmm bookkeeping in the original
    # Debias_v2; the dense row-normalized `adj` makes it unused here.
    del idx
    n = x.shape[0]
    o2 = params["l2"]["W"].shape[1]

    # degree features / masks (computed on the real nodes only; XLA glue)
    d_f = d.astype(jnp.float32)
    d_i = jnp.clip(d, 0, max_degree).astype(jnp.int32)
    pe_d = params["PE"][d_i]                                      # (n, dim_d) gather
    r = (d_f < jnp.mean(d_f)).astype(jnp.float32)[:, None]

    # pad node dim to a multiple of 128 so every tile divides it (no tail drop)
    n_pad = max(_round_up(n, 128), 128)
    tm = _pick_tile(n_pad, (tm, 256, 128))
    tk = _pick_tile(n_pad, (tk, 512, 256, 128))
    pad = n_pad - n
    if pad:
        x = jnp.pad(x, ((0, pad), (0, 0)))
        adj = jnp.pad(adj, ((0, pad), (0, pad)))
        pe_d = jnp.pad(pe_d, ((0, pad), (0, 0)))
        r = jnp.pad(r, ((0, pad), (0, 0)))

    adj_b = adj.astype(jnp.bfloat16)
    x_b = x.astype(jnp.bfloat16)

    # layer 1: h1 = x @ W1; fused tail emits h2 = concat([h1, neigh1]) @ W2
    h1 = linear_rows(x_b, params["l1"]["W"].astype(jnp.bfloat16), tm)
    h2, loss1 = debias_layer(
        adj_b, h1, h1.astype(jnp.bfloat16), pe_d, r, params["l1"],
        params["l2"]["W"], jnp.zeros((1, o2), jnp.float32),
        omega=omega, final=False, tm=tm, tk=tk)

    # layer 2: fused tail emits log_softmax(concat([h2, neigh2]) @ fc_w + fc_b)
    logp, loss2 = debias_layer(
        adj_b, h2, h2.astype(jnp.bfloat16), pe_d, r, params["l2"],
        params["fc_w"], params["fc_b"],
        omega=omega, final=True, tm=tm, tk=tk)

    loss = (jnp.sum(loss1[:n], axis=0) + jnp.sum(loss2[:n], axis=0)) / n
    return logp[:n], loss[0], loss[1]


# ----------------------------------------------------------------------------
# pure-JAX reference (mirrors the kernel's bf16-input / f32-accumulate matmuls)
# ----------------------------------------------------------------------------
def ref_forward(x, adj, d, params, *, omega, max_degree):
    n = x.shape[0]
    d_i = jnp.clip(d, 0, max_degree).astype(jnp.int32)
    pe_d = params["PE"][d_i]
    r = (d.astype(jnp.float32) <
         jnp.mean(d.astype(jnp.float32))).astype(jnp.float32)[:, None]
    adj_b = adj.astype(jnp.bfloat16)

    def layer(h, p):
        gamma = _leaky_relu(pe_d @ p["W_gamma"] + p["b_gamma"])
        beta = _leaky_relu(pe_d @ p["W_beta"] + p["b_beta"])
        agg = jnp.dot(adj_b, h.astype(jnp.bfloat16),
                      preferred_element_type=jnp.float32)
        b_add = (gamma + 1.0) * (agg @ p["W_add"]) + beta
        b_rev = (gamma + 1.0) * (agg @ p["W_rev"]) + beta
        neigh = agg + omega * (r * b_add - (1.0 - r) * b_rev)
        out = jnp.concatenate([h, neigh], axis=1)
        bl = (jnp.sum(b_add ** 2) + jnp.sum(b_rev ** 2)) / n
        fl = (jnp.sum(gamma ** 2) + jnp.sum(beta ** 2)) / n
        return out, bl, fl

    h1 = jnp.dot(x.astype(jnp.bfloat16),
                 params["l1"]["W"].astype(jnp.bfloat16),
                 preferred_element_type=jnp.float32)
    x1, b1, f1 = layer(h1, params["l1"])
    h2 = x1 @ params["l2"]["W"]
    x2, b2, f2 = layer(h2, params["l2"])
    logits = x2 @ params["fc_w"] + params["fc_b"]
    return jax.nn.log_softmax(logits, axis=1), b1 + b2, f1 + f2


# ----------------------------------------------------------------------------
# deterministic parameter init
# ----------------------------------------------------------------------------
def glorot(key, shape):
    lim = np.sqrt(6.0 / (shape[0] + shape[1]))
    return jax.random.uniform(key, shape, jnp.float32, -lim, lim)


def init_params(key, nfeat, dim, nclass, max_degree, dim_d):
    ks = jax.random.split(key, 15)

    def layer_params(keys, fin, fout):
        return {
            "W": glorot(keys[0], (fin, fout)),
            "W_gamma": glorot(keys[1], (dim_d, fout)),
            "b_gamma": glorot(keys[2], (1, fout)),
            "W_beta": glorot(keys[3], (dim_d, fout)),
            "b_beta": glorot(keys[4], (1, fout)),
            "W_add": glorot(keys[5], (fout, fout)),
            "W_rev": glorot(keys[6], (fout, fout)),
        }

    return {
        "PE": sinusoidal_pe(max_degree + 1, dim_d),
        "l1": layer_params(ks[0:7], nfeat, dim),
        "l2": layer_params(ks[7:14], dim * 2, dim),
        "fc_w": glorot(ks[14], (dim * 2, nclass)),
        "fc_b": jnp.zeros((1, nclass), jnp.float32),
    }


# ----------------------------------------------------------------------------
if __name__ == "__main__":
    N, NFEAT, DIM, NCLASS = 200, 96, 64, 5
    MAX_DEGREE, DIM_D, OMEGA = 64, 32, 0.1

    key = jax.random.PRNGKey(0)
    k_x, k_adj, k_p = jax.random.split(key, 3)

    x = jax.random.normal(k_x, (N, NFEAT), jnp.float32)

    # random undirected graph, row-normalized adjacency (mean aggregator)
    a = (jax.random.uniform(k_adj, (N, N)) < 0.05).astype(jnp.float32)
    a = jnp.maximum(a, a.T)
    a = a * (1.0 - jnp.eye(N, dtype=jnp.float32))
    deg = jnp.sum(a, axis=1)
    adj = a / jnp.maximum(deg, 1.0)[:, None]
    d = deg.astype(jnp.int32)
    idx = jnp.arange(N, dtype=jnp.int32)

    params = init_params(k_p, NFEAT, DIM, NCLASS, MAX_DEGREE, DIM_D)

    fwd = jax.jit(functools.partial(dfair_forward, omega=OMEGA,
                                    max_degree=MAX_DEGREE))
    logp, b_loss, film_loss = fwd(x, adj, d, idx, params)
    jax.block_until_ready((logp, b_loss, film_loss))

    ref_logp, ref_b, ref_f = ref_forward(x, adj, d, params,
                                         omega=OMEGA, max_degree=MAX_DEGREE)
    np.testing.assert_allclose(np.asarray(logp), np.asarray(ref_logp),
                               rtol=1e-3, atol=1e-3)
    np.testing.assert_allclose(np.asarray(b_loss), np.asarray(ref_b),
                               rtol=1e-3, atol=1e-3)
    np.testing.assert_allclose(np.asarray(film_loss), np.asarray(ref_f),
                               rtol=1e-3, atol=1e-3)

    print("KERNEL_OK")
</pallas_src>

<mosaic_0001>
module attributes {stable_mosaic.version = 11 : i64} {
  func.func @_linear_kernel(%arg0: i32, %arg1: memref<256x96xbf16, #tpu.memory_space<vmem>>, %arg2: memref<96x64xbf16, #tpu.memory_space<vmem>>, %arg3: memref<256x64xf32, #tpu.memory_space<vmem>>) attributes {dimension_semantics = [#tpu.dimension_semantics<parallel>], iteration_bounds = array<i64: 1>, scalar_prefetch = 0 : i64, scratch_operands = 0 : i64, tpu.core_type = #tpu.core_type<tc>, window_params = [{transform_indices = @transform_0, window_bounds = array<i64: 256, 96>}, {pipeline_mode = #tpu.pipeline_mode<synchronous>, transform_indices = @transform_1, window_bounds = array<i64: 96, 64>}, {transform_indices = @transform_2, window_bounds = array<i64: 256, 64>}]} {
    %c0 = arith.constant 0 : index
    %c0_0 = arith.constant 0 : index
    %0 = vector.load %arg1[%c0, %c0_0] : memref<256x96xbf16, #tpu.memory_space<vmem>>, vector<256x96xbf16>
    %c0_1 = arith.constant 0 : index
    %c0_2 = arith.constant 0 : index
    %1 = vector.load %arg2[%c0_1, %c0_2] : memref<96x64xbf16, #tpu.memory_space<vmem>>, vector<96x64xbf16>
    %cst = arith.constant dense<0.000000e+00> : vector<256x64xf32>
    %2 = tpu.matmul %0, %1, %cst {dimension_numbers = #tpu.dot_dimension_numbers<[1], [0], [0], [1], [0, 0, 1, 1], [], []>} : vector<256x96xbf16>, vector<96x64xbf16>, vector<256x64xf32> -> vector<256x64xf32>
    %c0_3 = arith.constant 0 : index
    %c0_4 = arith.constant 0 : index
    %3 = vector.load %arg3[%c0_3, %c0_4] : memref<256x64xf32, #tpu.memory_space<vmem>>, vector<256x64xf32>
    tpu.vector_store %arg3[%c0_3, %c0_4], %2 {strides = array<i32>} : memref<256x64xf32, #tpu.memory_space<vmem>>, vector<256x64xf32>,
    return
  }
  func.func @transform_0(%arg0: i32) -> (i32, i32) {
    %c0_i32 = arith.constant 0 : i32
    %c0_i32_0 = arith.constant 0 : i32
    return %arg0, %c0_i32 : i32, i32
  }
  func.func @transform_1(%arg0: i32) -> (i32, i32) {
    %c0_i32 = arith.constant 0 : i32
    %c0_i32_0 = arith.constant 0 : i32
    %c0_i32_1 = arith.constant 0 : i32
    return %c0_i32, %c0_i32_0 : i32, i32
  }
  func.func @transform_2(%arg0: i32) -> (i32, i32) {
    %c0_i32 = arith.constant 0 : i32
    %c0_i32_0 = arith.constant 0 : i32
    return %arg0, %c0_i32 : i32, i32
  }
}

module attributes {stable_mosaic.version = 11 : i64} {
  func.func @_debias_block_kernel(%arg0: i32, %arg1: i32, %arg2: memref<256x256xbf16, #tpu.memory_space<vmem>>, %arg3: memref<256x64xbf16, #tpu.memory_space<vmem>>, %arg4: memref<256x64xf32, #tpu.memory_space<vmem>>, %arg5: memref<256x32xf32, #tpu.memory_space<vmem>>, %arg6: memref<256x1xf32, #tpu.memory_space<vmem>>, %arg7: memref<32x128xf32, #tpu.memory_space<vmem>>, %arg8: memref<1x128xf32, #tpu.memory_space<vmem>>, %arg9: memref<64x128xf32, #tpu.memory_space<vmem>>, %arg10: memref<64x64xf32, #tpu.memory_space<vmem>>, %arg11: memref<64x64xf32, #tpu.memory_space<vmem>>, %arg12: memref<1x64xf32, #tpu.memory_space<vmem>>, %arg13: memref<256x64xf32, #tpu.memory_space<vmem>>, %arg14: memref<256x2xf32, #tpu.memory_space<vmem>>, %arg15: memref<256x64xf32, #tpu.memory_space<vmem>>) attributes {dimension_semantics = [#tpu.dimension_semantics<parallel>, #tpu.dimension_semantics<arbitrary>], iteration_bounds = array<i64: 1, 1>, scalar_prefetch = 0 : i64, scratch_operands = 1 : i64, tpu.core_type = #tpu.core_type<tc>, window_params = [{transform_indices = @transform_0, window_bounds = array<i64: 256, 256>}, {transform_indices = @transform_1, window_bounds = array<i64: 256, 64>}, {transform_indices = @transform_2, window_bounds = array<i64: 256, 64>}, {transform_indices = @transform_3, window_bounds = array<i64: 256, 32>}, {transform_indices = @transform_4, window_bounds = array<i64: 256, 1>}, {pipeline_mode = #tpu.pipeline_mode<synchronous>, transform_indices = @transform_5, window_bounds = array<i64: 32, 128>}, {pipeline_mode = #tpu.pipeline_mode<synchronous>, transform_indices = @transform_6, window_bounds = array<i64: 1, 128>}, {pipeline_mode = #tpu.pipeline_mode<synchronous>, transform_indices = @transform_7, window_bounds = array<i64: 64, 128>}, {pipeline_mode = #tpu.pipeline_mode<synchronous>, transform_indices = @transform_8, window_bounds = array<i64: 64, 64>}, {pipeline_mode = #tpu.pipeline_mode<synchronous>, transform_indices = @transform_9, window_bounds = array<i64: 64, 64>}, {pipeline_mode = #tpu.pipeline_mode<synchronous>, transform_indices = @transform_10, window_bounds = array<i64: 1, 64>}, {transform_indices = @transform_11, window_bounds = array<i64: 256, 64>}, {transform_indices = @transform_12, window_bounds = array<i64: 256, 2>}]} {
    %c0_i32 = arith.constant 0 : i32
    %0 = arith.cmpi eq, %arg1, %c0_i32 : i32
    %1 = arith.extui %0 : i1 to i32
    %c0_i32_0 = arith.constant 0 : i32
    %2 = arith.cmpi ne, %1, %c0_i32_0 : i32
    scf.if %2 {
      %cst_10 = arith.constant 0.000000e+00 : f32
      %12 = vector.broadcast %cst_10 : f32 to vector<256x64xf32>
      %c0_11 = arith.constant 0 : index
      %c0_12 = arith.constant 0 : index
      %13 = vector.load %arg15[%c0_11, %c0_12] : memref<256x64xf32, #tpu.memory_space<vmem>>, vector<256x64xf32>
      tpu.vector_store %arg15[%c0_11, %c0_12], %12 {strides = array<i32>} : memref<256x64xf32, #tpu.memory_space<vmem>>, vector<256x64xf32>,
    } else {
    }
    %c0 = arith.constant 0 : index
    %c0_1 = arith.constant 0 : index
    %3 = vector.load %arg15[%c0, %c0_1] : memref<256x64xf32, #tpu.memory_space<vmem>>, vector<256x64xf32>
    %c0_2 = arith.constant 0 : index
    %c0_3 = arith.constant 0 : index
    %4 = vector.load %arg2[%c0_2, %c0_3] : memref<256x256xbf16, #tpu.memory_space<vmem>>, vector<256x256xbf16>
    %c0_4 = arith.constant 0 : index
    %c0_5 = arith.constant 0 : index
    %5 = vector.load %arg3[%c0_4, %c0_5] : memref<256x64xbf16, #tpu.memory_space<vmem>>, vector<256x64xbf16>
    %cst = arith.constant dense<0.000000e+00> : vector<256x64xf32>
    %6 = tpu.matmul %4, %5, %cst {dimension_numbers = #tpu.dot_dimension_numbers<[1], [0], [0], [1], [0, 0, 1, 1], [], []>} : vector<256x256xbf16>, vector<256x64xbf16>, vector<256x64xf32> -> vector<256x64xf32>
    %7 = arith.addf %3, %6 : vector<256x64xf32>
    %c0_6 = arith.constant 0 : index
    %c0_7 = arith.constant 0 : index
    %8 = vector.load %arg15[%c0_6, %c0_7] : memref<256x64xf32, #tpu.memory_space<vmem>>, vector<256x64xf32>
    tpu.vector_store %arg15[%c0_6, %c0_7], %7 {strides = array<i32>} : memref<256x64xf32, #tpu.memory_space<vmem>>, vector<256x64xf32>,
    %c0_i32_8 = arith.constant 0 : i32
    %9 = arith.cmpi eq, %arg1, %c0_i32_8 : i32
    %10 = arith.extui %9 : i1 to i32
    %c0_i32_9 = arith.constant 0 : i32
    %11 = arith.cmpi ne, %10, %c0_i32_9 : i32
    scf.if %11 {
      %c0_10 = arith.constant 0 : index
      %c0_11 = arith.constant 0 : index
      %12 = vector.load %arg15[%c0_10, %c0_11] : memref<256x64xf32, #tpu.memory_space<vmem>>, vector<256x64xf32>
      %c0_12 = arith.constant 0 : index
      %c0_13 = arith.constant 0 : index
      %13 = vector.load %arg5[%c0_12, %c0_13] : memref<256x32xf32, #tpu.memory_space<vmem>>, vector<256x32xf32>
      %c0_14 = arith.constant 0 : index
      %c0_15 = arith.constant 0 : index
      %14 = vector.load %arg7[%c0_14, %c0_15] : memref<32x128xf32, #tpu.memory_space<vmem>>, vector<32x128xf32>
      %cst_16 = arith.constant dense<0.000000e+00> : vector<256x128xf32>
      %15 = tpu.matmul %13, %14, %cst_16 {dimension_numbers = #tpu.dot_dimension_numbers<[1], [0], [0], [1], [0, 0, 1, 1], [], []>} : vector<256x32xf32>, vector<32x128xf32>, vector<256x128xf32> -> vector<256x128xf32>
      %c0_17 = arith.constant 0 : index
      %c0_18 = arith.constant 0 : index
      %16 = vector.load %arg8[%c0_17, %c0_18] : memref<1x128xf32, #tpu.memory_space<vmem>>, vector<1x128xf32>
      %17 = vector.broadcast %16 : vector<1x128xf32> to vector<256x128xf32>
      %18 = arith.addf %15, %17 : vector<256x128xf32>
      %cst_19 = arith.constant 0.000000e+00 : f32
      %19 = vector.broadcast %cst_19 : f32 to vector<256x128xf32>
      %20 = arith.cmpf ogt, %18, %19 : vector<256x128xf32>
      %cst_20 = arith.constant 0.00999999977 : f32
      %21 = vector.broadcast %cst_20 : f32 to vector<256x128xf32>
      %22 = arith.mulf %21, %18 : vector<256x128xf32>
      %23 = arith.select %20, %18, %22 : vector<256x128xi1>, vector<256x128xf32>
      %24 = vector.extract_strided_slice %23 {offsets = [0, 0], sizes = [256, 64], strides = [1, 1]} : vector<256x128xf32> to vector<256x64xf32>
      %25 = vector.extract_strided_slice %23 {offsets = [0, 64], sizes = [256, 64], strides = [1, 1]} : vector<256x128xf32> to vector<256x64xf32>
      %c0_21 = arith.constant 0 : index
      %c0_22 = arith.constant 0 : index
      %26 = vector.load %arg9[%c0_21, %c0_22] : memref<64x128xf32, #tpu.memory_space<vmem>>, vector<64x128xf32>
      %cst_23 = arith.constant dense<0.000000e+00> : vector<256x128xf32>
      %27 = tpu.matmul %12, %26, %cst_23 {dimension_numbers = #tpu.dot_dimension_numbers<[1], [0], [0], [1], [0, 0, 1, 1], [], []>} : vector<256x64xf32>, vector<64x128xf32>, vector<256x128xf32> -> vector<256x128xf32>
      %cst_24 = arith.constant 1.000000e+00 : f32
      %28 = vector.broadcast %cst_24 : f32 to vector<256x64xf32>
      %29 = arith.addf %24, %28 : vector<256x64xf32>
      %30 = vector.extract_strided_slice %27 {offsets = [0, 0], sizes = [256, 64], strides = [1, 1]} : vector<256x128xf32> to vector<256x64xf32>
      %31 = arith.mulf %29, %30 : vector<256x64xf32>
      %32 = arith.addf %31, %25 : vector<256x64xf32>
      %33 = vector.extract_strided_slice %27 {offsets = [0, 64], sizes = [256, 64], strides = [1, 1]} : vector<256x128xf32> to vector<256x64xf32>
      %34 = arith.mulf %29, %33 : vector<256x64xf32>
      %35 = arith.addf %34, %25 : vector<256x64xf32>
      %c0_25 = arith.constant 0 : index
      %c0_26 = arith.constant 0 : index
      %36 = vector.load %arg6[%c0_25, %c0_26] : memref<256x1xf32, #tpu.memory_space<vmem>>, vector<256x1xf32>
      %37 = vector.broadcast %36 : vector<256x1xf32> to vector<256x64xf32>
      %38 = arith.mulf %37, %32 : vector<256x64xf32>
      %cst_27 = arith.constant 1.000000e+00 : f32
      %39 = vector.broadcast %cst_27 : f32 to vector<256x1xf32>
      %40 = arith.subf %39, %36 : vector<256x1xf32>
      %41 = vector.broadcast %40 : vector<256x1xf32> to vector<256x64xf32>
      %42 = arith.mulf %41, %35 : vector<256x64xf32>
      %43 = arith.subf %38, %42 : vector<256x64xf32>
      %cst_28 = arith.constant 1.000000e-01 : f32
      %44 = vector.broadcast %cst_28 : f32 to vector<256x64xf32>
      %45 = arith.mulf %44, %43 : vector<256x64xf32>
      %46 = arith.addf %12, %45 : vector<256x64xf32>
      %c0_29 = arith.constant 0 : index
      %c0_30 = arith.constant 0 : index
      %47 = vector.load %arg4[%c0_29, %c0_30] : memref<256x64xf32, #tpu.memory_space<vmem>>, vector<256x64xf32>
      %c0_31 = arith.constant 0 : index
      %c0_32 = arith.constant 0 : index
      %48 = vector.load %arg10[%c0_31, %c0_32] : memref<64x64xf32, #tpu.memory_space<vmem>>, vector<64x64xf32>
      %cst_33 = arith.constant dense<0.000000e+00> : vector<256x64xf32>
      %49 = tpu.matmul %47, %48, %cst_33 {dimension_numbers = #tpu.dot_dimension_numbers<[1], [0], [0], [1], [0, 0, 1, 1], [], []>} : vector<256x64xf32>, vector<64x64xf32>, vector<256x64xf32> -> vector<256x64xf32>
      %c0_34 = arith.constant 0 : index
      %c0_35 = arith.constant 0 : index
      %50 = vector.load %arg11[%c0_34, %c0_35] : memref<64x64xf32, #tpu.memory_space<vmem>>, vector<64x64xf32>
      %cst_36 = arith.constant dense<0.000000e+00> : vector<256x64xf32>
      %51 = tpu.matmul %46, %50, %cst_36 {dimension_numbers = #tpu.dot_dimension_numbers<[1], [0], [0], [1], [0, 0, 1, 1], [], []>} : vector<256x64xf32>, vector<64x64xf32>, vector<256x64xf32> -> vector<256x64xf32>
      %52 = arith.addf %49, %51 : vector<256x64xf32>
      %c0_37 = arith.constant 0 : index
      %c0_38 = arith.constant 0 : index
      %53 = vector.load %arg12[%c0_37, %c0_38] : memref<1x64xf32, #tpu.memory_space<vmem>>, vector<1x64xf32>
      %54 = vector.broadcast %53 : vector<1x64xf32> to vector<256x64xf32>
      %55 = arith.addf %52, %54 : vector<256x64xf32>
      %c0_39 = arith.constant 0 : index
      %c0_40 = arith.constant 0 : index
      %56 = vector.load %arg13[%c0_39, %c0_40] : memref<256x64xf32, #tpu.memory_space<vmem>>, vector<256x64xf32>
      tpu.vector_store %arg13[%c0_39, %c0_40], %55 {strides = array<i32>} : memref<256x64xf32, #tpu.memory_space<vmem>>, vector<256x64xf32>,
      %57 = arith.mulf %32, %32 : vector<256x64xf32>
      %58 = arith.mulf %35, %35 : vector<256x64xf32>
      %59 = arith.addf %57, %58 : vector<256x64xf32>
      %cst_41 = arith.constant dense<0.000000e+00> : vector<256xf32>
      %60 = vector.multi_reduction <add>, %59, %cst_41 [1] : vector<256x64xf32> to vector<256xf32>
      %61 = vector.shape_cast %60 : vector<256xf32> to vector<256x1xf32>
      %62 = arith.mulf %23, %23 : vector<256x128xf32>
      %cst_42 = arith.constant dense<0.000000e+00> : vector<256xf32>
      %63 = vector.multi_reduction <add>, %62, %cst_42 [1] : vector<256x128xf32> to vector<256xf32>
      %64 = vector.shape_cast %63 : vector<256xf32> to vector<256x1xf32>
      %65 = tpu.concatenate %61, %64 in 1 : vector<256x1xf32>, vector<256x1xf32> -> vector<256x2xf32>
      %c0_43 = arith.constant 0 : index
      %c0_44 = arith.constant 0 : index
      %66 = vector.load %arg14[%c0_43, %c0_44] : memref<256x2xf32, #tpu.memory_space<vmem>>, vector<256x2xf32>
      tpu.vector_store %arg14[%c0_43, %c0_44], %65 {strides = array<i32>} : memref<256x2xf32, #tpu.memory_space<vmem>>, vector<256x2xf32>,
    } else {
    }
    return
  }
  func.func @transform_0(%arg0: i32, %arg1: i32) -> (i32, i32) {
    %c0_i32 = arith.constant 0 : i32
    return %arg0, %arg1 : i32, i32
  }
  func.func @transform_1(%arg0: i32, %arg1: i32) -> (i32, i32) {
    %c0_i32 = arith.constant 0 : i32
    %c0_i32_0 = arith.constant 0 : i32
    return %arg1, %c0_i32 : i32, i32
  }
  func.func @transform_2(%arg0: i32, %arg1: i32) -> (i32, i32) {
    %c0_i32 = arith.constant 0 : i32
    %c0_i32_0 = arith.constant 0 : i32
    return %arg0, %c0_i32 : i32, i32
  }
  func.func @transform_3(%arg0: i32, %arg1: i32) -> (i32, i32) {
    %c0_i32 = arith.constant 0 : i32
    %c0_i32_0 = arith.constant 0 : i32
    return %arg0, %c0_i32 : i32, i32
  }
  func.func @transform_4(%arg0: i32, %arg1: i32) -> (i32, i32) {
    %c0_i32 = arith.constant 0 : i32
    %c0_i32_0 = arith.constant 0 : i32
    return %arg0, %c0_i32 : i32, i32
  }
  func.func @transform_5(%arg0: i32, %arg1: i32) -> (i32, i32) {
    %c0_i32 = arith.constant 0 : i32
    %c0_i32_0 = arith.constant 0 : i32
    %c0_i32_1 = arith.constant 0 : i32
    return %c0_i32, %c0_i32_0 : i32, i32
  }
  func.func @transform_6(%arg0: i32, %arg1: i32) -> (i32, i32) {
    %c0_i32 = arith.constant 0 : i32
    %c0_i32_0 = arith.constant 0 : i32
    %c0_i32_1 = arith.constant 0 : i32
    return %c0_i32, %c0_i32_0 : i32, i32
  }
  func.func @transform_7(%arg0: i32, %arg1: i32) -> (i32, i32) {
    %c0_i32 = arith.constant 0 : i32
    %c0_i32_0 = arith.constant 0 : i32
    %c0_i32_1 = arith.constant 0 : i32
    return %c0_i32, %c0_i32_0 : i32, i32
  }
  func.func @transform_8(%arg0: i32, %arg1: i32) -> (i32, i32) {
    %c0_i32 = arith.constant 0 : i32
    %c0_i32_0 = arith.constant 0 : i32
    %c0_i32_1 = arith.constant 0 : i32
    return %c0_i32, %c0_i32_0 : i32, i32
  }
  func.func @transform_9(%arg0: i32, %arg1: i32) -> (i32, i32) {
    %c0_i32 = arith.constant 0 : i32
    %c0_i32_0 = arith.constant 0 : i32
    %c0_i32_1 = arith.constant 0 : i32
    return %c0_i32, %c0_i32_0 : i32, i32
  }
  func.func @transform_10(%arg0: i32, %arg1: i32) -> (i32, i32) {
    %c0_i32 = arith.constant 0 : i32
    %c0_i32_0 = arith.constant 0 : i32
    %c0_i32_1 = arith.constant 0 : i32
    return %c0_i32, %c0_i32_0 : i32, i32
  }
  func.func @transform_11(%arg0: i32, %arg1: i32) -> (i32, i32) {
    %c0_i32 = arith.constant 0 : i32
    %c0_i32_0 = arith.constant 0 : i32
    return %arg0, %c0_i32 : i32, i32
  }
  func.func @transform_12(%arg0: i32, %arg1: i32) -> (i32, i32) {
    %c0_i32 = arith.constant 0 : i32
    %c0_i32_0 = arith.constant 0 : i32
    return %arg0, %c0_i32 : i32, i32
  }
}

module attributes {stable_mosaic.version = 11 : i64} {
  func.func @_debias_block_kernel(%arg0: i32, %arg1: i32, %arg2: memref<256x256xbf16, #tpu.memory_space<vmem>>, %arg3: memref<256x64xbf16, #tpu.memory_space<vmem>>, %arg4: memref<256x64xf32, #tpu.memory_space<vmem>>, %arg5: memref<256x32xf32, #tpu.memory_space<vmem>>, %arg6: memref<256x1xf32, #tpu.memory_space<vmem>>, %arg7: memref<32x128xf32, #tpu.memory_space<vmem>>, %arg8: memref<1x128xf32, #tpu.memory_space<vmem>>, %arg9: memref<64x128xf32, #tpu.memory_space<vmem>>, %arg10: memref<64x5xf32, #tpu.memory_space<vmem>>, %arg11: memref<64x5xf32, #tpu.memory_space<vmem>>, %arg12: memref<1x5xf32, #tpu.memory_space<vmem>>, %arg13: memref<256x5xf32, #tpu.memory_space<vmem>>, %arg14: memref<256x2xf32, #tpu.memory_space<vmem>>, %arg15: memref<256x64xf32, #tpu.memory_space<vmem>>) attributes {dimension_semantics = [#tpu.dimension_semantics<parallel>, #tpu.dimension_semantics<arbitrary>], iteration_bounds = array<i64: 1, 1>, scalar_prefetch = 0 : i64, scratch_operands = 1 : i64, tpu.core_type = #tpu.core_type<tc>, window_params = [{transform_indices = @transform_0, window_bounds = array<i64: 256, 256>}, {transform_indices = @transform_1, window_bounds = array<i64: 256, 64>}, {transform_indices = @transform_2, window_bounds = array<i64: 256, 64>}, {transform_indices = @transform_3, window_bounds = array<i64: 256, 32>}, {transform_indices = @transform_4, window_bounds = array<i64: 256, 1>}, {pipeline_mode = #tpu.pipeline_mode<synchronous>, transform_indices = @transform_5, window_bounds = array<i64: 32, 128>}, {pipeline_mode = #tpu.pipeline_mode<synchronous>, transform_indices = @transform_6, window_bounds = array<i64: 1, 128>}, {pipeline_mode = #tpu.pipeline_mode<synchronous>, transform_indices = @transform_7, window_bounds = array<i64: 64, 128>}, {pipeline_mode = #tpu.pipeline_mode<synchronous>, transform_indices = @transform_8, window_bounds = array<i64: 64, 5>}, {pipeline_mode = #tpu.pipeline_mode<synchronous>, transform_indices = @transform_9, window_bounds = array<i64: 64, 5>}, {pipeline_mode = #tpu.pipeline_mode<synchronous>, transform_indices = @transform_10, window_bounds = array<i64: 1, 5>}, {transform_indices = @transform_11, window_bounds = array<i64: 256, 5>}, {transform_indices = @transform_12, window_bounds = array<i64: 256, 2>}]} {
    %c0_i32 = arith.constant 0 : i32
    %0 = arith.cmpi eq, %arg1, %c0_i32 : i32
    %1 = arith.extui %0 : i1 to i32
    %c0_i32_0 = arith.constant 0 : i32
    %2 = arith.cmpi ne, %1, %c0_i32_0 : i32
    scf.if %2 {
      %cst_10 = arith.constant 0.000000e+00 : f32
      %12 = vector.broadcast %cst_10 : f32 to vector<256x64xf32>
      %c0_11 = arith.constant 0 : index
      %c0_12 = arith.constant 0 : index
      %13 = vector.load %arg15[%c0_11, %c0_12] : memref<256x64xf32, #tpu.memory_space<vmem>>, vector<256x64xf32>
      tpu.vector_store %arg15[%c0_11, %c0_12], %12 {strides = array<i32>} : memref<256x64xf32, #tpu.memory_space<vmem>>, vector<256x64xf32>,
    } else {
    }
    %c0 = arith.constant 0 : index
    %c0_1 = arith.constant 0 : index
    %3 = vector.load %arg15[%c0, %c0_1] : memref<256x64xf32, #tpu.memory_space<vmem>>, vector<256x64xf32>
    %c0_2 = arith.constant 0 : index
    %c0_3 = arith.constant 0 : index
    %4 = vector.load %arg2[%c0_2, %c0_3] : memref<256x256xbf16, #tpu.memory_space<vmem>>, vector<256x256xbf16>
    %c0_4 = arith.constant 0 : index
    %c0_5 = arith.constant 0 : index
    %5 = vector.load %arg3[%c0_4, %c0_5] : memref<256x64xbf16, #tpu.memory_space<vmem>>, vector<256x64xbf16>
    %cst = arith.constant dense<0.000000e+00> : vector<256x64xf32>
    %6 = tpu.matmul %4, %5, %cst {dimension_numbers = #tpu.dot_dimension_numbers<[1], [0], [0], [1], [0, 0, 1, 1], [], []>} : vector<256x256xbf16>, vector<256x64xbf16>, vector<256x64xf32> -> vector<256x64xf32>
    %7 = arith.addf %3, %6 : vector<256x64xf32>
    %c0_6 = arith.constant 0 : index
    %c0_7 = arith.constant 0 : index
    %8 = vector.load %arg15[%c0_6, %c0_7] : memref<256x64xf32, #tpu.memory_space<vmem>>, vector<256x64xf32>
    tpu.vector_store %arg15[%c0_6, %c0_7], %7 {strides = array<i32>} : memref<256x64xf32, #tpu.memory_space<vmem>>, vector<256x64xf32>,
    %c0_i32_8 = arith.constant 0 : i32
    %9 = arith.cmpi eq, %arg1, %c0_i32_8 : i32
    %10 = arith.extui %9 : i1 to i32
    %c0_i32_9 = arith.constant 0 : i32
    %11 = arith.cmpi ne, %10, %c0_i32_9 : i32
    scf.if %11 {
      %c0_10 = arith.constant 0 : index
      %c0_11 = arith.constant 0 : index
      %12 = vector.load %arg15[%c0_10, %c0_11] : memref<256x64xf32, #tpu.memory_space<vmem>>, vector<256x64xf32>
      %c0_12 = arith.constant 0 : index
      %c0_13 = arith.constant 0 : index
      %13 = vector.load %arg5[%c0_12, %c0_13] : memref<256x32xf32, #tpu.memory_space<vmem>>, vector<256x32xf32>
      %c0_14 = arith.constant 0 : index
      %c0_15 = arith.constant 0 : index
      %14 = vector.load %arg7[%c0_14, %c0_15] : memref<32x128xf32, #tpu.memory_space<vmem>>, vector<32x128xf32>
      %cst_16 = arith.constant dense<0.000000e+00> : vector<256x128xf32>
      %15 = tpu.matmul %13, %14, %cst_16 {dimension_numbers = #tpu.dot_dimension_numbers<[1], [0], [0], [1], [0, 0, 1, 1], [], []>} : vector<256x32xf32>, vector<32x128xf32>, vector<256x128xf32> -> vector<256x128xf32>
      %c0_17 = arith.constant 0 : index
      %c0_18 = arith.constant 0 : index
      %16 = vector.load %arg8[%c0_17, %c0_18] : memref<1x128xf32, #tpu.memory_space<vmem>>, vector<1x128xf32>
      %17 = vector.broadcast %16 : vector<1x128xf32> to vector<256x128xf32>
      %18 = arith.addf %15, %17 : vector<256x128xf32>
      %cst_19 = arith.constant 0.000000e+00 : f32
      %19 = vector.broadcast %cst_19 : f32 to vector<256x128xf32>
      %20 = arith.cmpf ogt, %18, %19 : vector<256x128xf32>
      %cst_20 = arith.constant 0.00999999977 : f32
      %21 = vector.broadcast %cst_20 : f32 to vector<256x128xf32>
      %22 = arith.mulf %21, %18 : vector<256x128xf32>
      %23 = arith.select %20, %18, %22 : vector<256x128xi1>, vector<256x128xf32>
      %24 = vector.extract_strided_slice %23 {offsets = [0, 0], sizes = [256, 64], strides = [1, 1]} : vector<256x128xf32> to vector<256x64xf32>
      %25 = vector.extract_strided_slice %23 {offsets = [0, 64], sizes = [256, 64], strides = [1, 1]} : vector<256x128xf32> to vector<256x64xf32>
      %c0_21 = arith.constant 0 : index
      %c0_22 = arith.constant 0 : index
      %26 = vector.load %arg9[%c0_21, %c0_22] : memref<64x128xf32, #tpu.memory_space<vmem>>, vector<64x128xf32>
      %cst_23 = arith.constant dense<0.000000e+00> : vector<256x128xf32>
      %27 = tpu.matmul %12, %26, %cst_23 {dimension_numbers = #tpu.dot_dimension_numbers<[1], [0], [0], [1], [0, 0, 1, 1], [], []>} : vector<256x64xf32>, vector<64x128xf32>, vector<256x128xf32> -> vector<256x128xf32>
      %cst_24 = arith.constant 1.000000e+00 : f32
      %28 = vector.broadcast %cst_24 : f32 to vector<256x64xf32>
      %29 = arith.addf %24, %28 : vector<256x64xf32>
      %30 = vector.extract_strided_slice %27 {offsets = [0, 0], sizes = [256, 64], strides = [1, 1]} : vector<256x128xf32> to vector<256x64xf32>
      %31 = arith.mulf %29, %30 : vector<256x64xf32>
      %32 = arith.addf %31, %25 : vector<256x64xf32>
      %33 = vector.extract_strided_slice %27 {offsets = [0, 64], sizes = [256, 64], strides = [1, 1]} : vector<256x128xf32> to vector<256x64xf32>
      %34 = arith.mulf %29, %33 : vector<256x64xf32>
      %35 = arith.addf %34, %25 : vector<256x64xf32>
      %c0_25 = arith.constant 0 : index
      %c0_26 = arith.constant 0 : index
      %36 = vector.load %arg6[%c0_25, %c0_26] : memref<256x1xf32, #tpu.memory_space<vmem>>, vector<256x1xf32>
      %37 = vector.broadcast %36 : vector<256x1xf32> to vector<256x64xf32>
      %38 = arith.mulf %37, %32 : vector<256x64xf32>
      %cst_27 = arith.constant 1.000000e+00 : f32
      %39 = vector.broadcast %cst_27 : f32 to vector<256x1xf32>
      %40 = arith.subf %39, %36 : vector<256x1xf32>
      %41 = vector.broadcast %40 : vector<256x1xf32> to vector<256x64xf32>
      %42 = arith.mulf %41, %35 : vector<256x64xf32>
      %43 = arith.subf %38, %42 : vector<256x64xf32>
      %cst_28 = arith.constant 1.000000e-01 : f32
      %44 = vector.broadcast %cst_28 : f32 to vector<256x64xf32>
      %45 = arith.mulf %44, %43 : vector<256x64xf32>
      %46 = arith.addf %12, %45 : vector<256x64xf32>
      %c0_29 = arith.constant 0 : index
      %c0_30 = arith.constant 0 : index
      %47 = vector.load %arg4[%c0_29, %c0_30] : memref<256x64xf32, #tpu.memory_space<vmem>>, vector<256x64xf32>
      %c0_31 = arith.constant 0 : index
      %c0_32 = arith.constant 0 : index
      %48 = vector.load %arg10[%c0_31, %c0_32] : memref<64x5xf32, #tpu.memory_space<vmem>>, vector<64x5xf32>
      %cst_33 = arith.constant dense<0.000000e+00> : vector<256x5xf32>
      %49 = tpu.matmul %47, %48, %cst_33 {dimension_numbers = #tpu.dot_dimension_numbers<[1], [0], [0], [1], [0, 0, 1, 1], [], []>} : vector<256x64xf32>, vector<64x5xf32>, vector<256x5xf32> -> vector<256x5xf32>
      %c0_34 = arith.constant 0 : index
      %c0_35 = arith.constant 0 : index
      %50 = vector.load %arg11[%c0_34, %c0_35] : memref<64x5xf32, #tpu.memory_space<vmem>>, vector<64x5xf32>
      %cst_36 = arith.constant dense<0.000000e+00> : vector<256x5xf32>
      %51 = tpu.matmul %46, %50, %cst_36 {dimension_numbers = #tpu.dot_dimension_numbers<[1], [0], [0], [1], [0, 0, 1, 1], [], []>} : vector<256x64xf32>, vector<64x5xf32>, vector<256x5xf32> -> vector<256x5xf32>
      %52 = arith.addf %49, %51 : vector<256x5xf32>
      %c0_37 = arith.constant 0 : index
      %c0_38 = arith.constant 0 : index
      %53 = vector.load %arg12[%c0_37, %c0_38] : memref<1x5xf32, #tpu.memory_space<vmem>>, vector<1x5xf32>
      %54 = vector.broadcast %53 : vector<1x5xf32> to vector<256x5xf32>
      %55 = arith.addf %52, %54 : vector<256x5xf32>
      %cst_39 = arith.constant dense<0xFF800000> : vector<256xf32>
      %56 = vector.multi_reduction <maximumf>, %55, %cst_39 [1] : vector<256x5xf32> to vector<256xf32>
      %57 = vector.shape_cast %56 : vector<256xf32> to vector<256x1xf32>
      %58 = vector.broadcast %57 : vector<256x1xf32> to vector<256x5xf32>
      %59 = arith.subf %55, %58 : vector<256x5xf32>
      %60 = math.exp %59 : vector<256x5xf32>
      %cst_40 = arith.constant dense<0.000000e+00> : vector<256xf32>
      %61 = vector.multi_reduction <add>, %60, %cst_40 [1] : vector<256x5xf32> to vector<256xf32>
      %62 = vector.shape_cast %61 : vector<256xf32> to vector<256x1xf32>
      %63 = math.log %62 : vector<256x1xf32>
      %64 = arith.addf %57, %63 : vector<256x1xf32>
      %65 = vector.broadcast %64 : vector<256x1xf32> to vector<256x5xf32>
      %66 = arith.subf %55, %65 : vector<256x5xf32>
      %c0_41 = arith.constant 0 : index
      %c0_42 = arith.constant 0 : index
      %67 = vector.load %arg13[%c0_41, %c0_42] : memref<256x5xf32, #tpu.memory_space<vmem>>, vector<256x5xf32>
      tpu.vector_store %arg13[%c0_41, %c0_42], %66 {strides = array<i32>} : memref<256x5xf32, #tpu.memory_space<vmem>>, vector<256x5xf32>,
      %68 = arith.mulf %32, %32 : vector<256x64xf32>
      %69 = arith.mulf %35, %35 : vector<256x64xf32>
      %70 = arith.addf %68, %69 : vector<256x64xf32>
      %cst_43 = arith.constant dense<0.000000e+00> : vector<256xf32>
      %71 = vector.multi_reduction <add>, %70, %cst_43 [1] : vector<256x64xf32> to vector<256xf32>
      %72 = vector.shape_cast %71 : vector<256xf32> to vector<256x1xf32>
      %73 = arith.mulf %23, %23 : vector<256x128xf32>
      %cst_44 = arith.constant dense<0.000000e+00> : vector<256xf32>
      %74 = vector.multi_reduction <add>, %73, %cst_44 [1] : vector<256x128xf32> to vector<256xf32>
      %75 = vector.shape_cast %74 : vector<256xf32> to vector<256x1xf32>
      %76 = tpu.concatenate %72, %75 in 1 : vector<256x1xf32>, vector<256x1xf32> -> vector<256x2xf32>
      %c0_45 = arith.constant 0 : index
      %c0_46 = arith.constant 0 : index
      %77 = vector.load %arg14[%c0_45, %c0_46] : memref<256x2xf32, #tpu.memory_space<vmem>>, vector<256x2xf32>
      tpu.vector_store %arg14[%c0_45, %c0_46], %76 {strides = array<i32>} : memref<256x2xf32, #tpu.memory_space<vmem>>, vector<256x2xf32>,
    } else {
    }
    return
  }
  func.func @transform_0(%arg0: i32, %arg1: i32) -> (i32, i32) {
    %c0_i32 = arith.constant 0 : i32
    return %arg0, %arg1 : i32, i32
  }
  func.func @transform_1(%arg0: i32, %arg1: i32) -> (i32, i32) {
    %c0_i32 = arith.constant 0 : i32
    %c0_i32_0 = arith.constant 0 : i32
    return %arg1, %c0_i32 : i32, i32
  }
  func.func @transform_2(%arg0: i32, %arg1: i32) -> (i32, i32) {
    %c0_i32 = arith.constant 0 : i32
    %c0_i32_0 = arith.constant 0 : i32
    return %arg0, %c0_i32 : i32, i32
  }
  func.func @transform_3(%arg0: i32, %arg1: i32) -> (i32, i32) {
    %c0_i32 = arith.constant 0 : i32
    %c0_i32_0 = arith.constant 0 : i32
    return %arg0, %c0_i32 : i32, i32
  }
  func.func @transform_4(%arg0: i32, %arg1: i32) -> (i32, i32) {
    %c0_i32 = arith.constant 0 : i32
    %c0_i32_0 = arith.constant 0 : i32
    return %arg0, %c0_i32 : i32, i32
  }
  func.func @transform_5(%arg0: i32, %arg1: i32) -> (i32, i32) {
    %c0_i32 = arith.constant 0 : i32
    %c0_i32_0 = arith.constant 0 : i32
    %c0_i32_1 = arith.constant 0 : i32
    return %c0_i32, %c0_i32_0 : i32, i32
  }
  func.func @transform_6(%arg0: i32, %arg1: i32) -> (i32, i32) {
    %c0_i32 = arith.constant 0 : i32
    %c0_i32_0 = arith.constant 0 : i32
    %c0_i32_1 = arith.constant 0 : i32
    return %c0_i32, %c0_i32_0 : i32, i32
  }
  func.func @transform_7(%arg0: i32, %arg1: i32) -> (i32, i32) {
    %c0_i32 = arith.constant 0 : i32
    %c0_i32_0 = arith.constant 0 : i32
    %c0_i32_1 = arith.constant 0 : i32
    return %c0_i32, %c0_i32_0 : i32, i32
  }
  func.func @transform_8(%arg0: i32, %arg1: i32) -> (i32, i32) {
    %c0_i32 = arith.constant 0 : i32
    %c0_i32_0 = arith.constant 0 : i32
    %c0_i32_1 = arith.constant 0 : i32
    return %c0_i32, %c0_i32_0 : i32, i32
  }
  func.func @transform_9(%arg0: i32, %arg1: i32) -> (i32, i32) {
    %c0_i32 = arith.constant 0 : i32
    %c0_i32_0 = arith.constant 0 : i32
    %c0_i32_1 = arith.constant 0 : i32
    return %c0_i32, %c0_i32_0 : i32, i32
  }
  func.func @transform_10(%arg0: i32, %arg1: i32) -> (i32, i32) {
    %c0_i32 = arith.constant 0 : i32
    %c0_i32_0 = arith.constant 0 : i32
    %c0_i32_1 = arith.constant 0 : i32
    return %c0_i32, %c0_i32_0 : i32, i32
  }
  func.func @transform_11(%arg0: i32, %arg1: i32) -> (i32, i32) {
    %c0_i32 = arith.constant 0 : i32
    %c0_i32_0 = arith.constant 0 : i32
    return %arg0, %c0_i32 : i32, i32
  }
  func.func @transform_12(%arg0: i32, %arg1: i32) -> (i32, i32) {
    %c0_i32 = arith.constant 0 : i32
    %c0_i32_0 = arith.constant 0 : i32
    return %arg0, %c0_i32 : i32, i32
  }
}

</mosaic_0001>

<bundles_post_ra>
// kernel: dfair_forward.3
= control target key start
LH: loop header
LB: loop body
LE: loop exit
PB: predicated region body
PF: predicated region fallthrough
CT: control target
= control target key end

     0   :  { %vm172_vm0 = vcmask 785408   ;;  %vm382_vm1 = vcmask 523264   ;;  %s782_s1 = inlined_call_operand.vmem [shape: bf16[96,64], index: 1, kind: input, shape index: {}]   ;;  %s783_s0 = inlined_call_operand.vmem [shape: bf16[256,96], index: 0, kind: input, shape index: {}]   ;;  %s784_s2 = inlined_call_operand.vmem [shape: f32[256,64], index: 2, kind: output, shape index: {}]  }
   0x1   :  { %v535_v0 = vld [vmem:[%s782_s1 + $0x28] sm:$0xff]   ;;  %v536_v1 = vld [vmem:[%s782_s1 + $0x20] sm:$0xff]   ;;  %v537_v2 = vld [vmem:[%s782_s1 + $0x18] sm:$0xff]  }
   0x2   :  { %479 = vmatprep.subr.bf16.mxu0 %v535_v0  ;;  %523 = vmatprep.subr.bf16.mxu1 %v535_v0  ;;  %v541_v3 = vld [vmem:[%s783_s0] sm:$0xff]   ;;  %v538_v5 = vld [vmem:[%s782_s1 + $0x10] sm:$0xff]   ;;  %v539_v6 = vld [vmem:[%s782_s1 + $0x8] sm:$0xff]  }
   0x3   :  { %480 = vmatpush3.bf16.msra.mxu0 %v535_v0  ;;  %529 = vmatpush3.bf16.msra.mxu1 %v535_v0  ;;  %v542_v4 = vld [vmem:[%s783_s0 + $0x40] sm:$0xff]   ;;  %v543_v8 = vld [vmem:[%s783_s0 + $0x8] sm:$0xff]   ;;  %v545_v10 = vld [vmem:[%s783_s0 + $0x10] sm:$0xff]  }
   0x4   :  { %481 = vmatprep.subr.bf16.mxu0 %v536_v1  ;;  %524 = vmatprep.subr.bf16.mxu1 %v536_v1  ;;  %v540_v7 = vld [vmem:[%s782_s1] sm:$0xff]   ;;  %v544_v9 = vld [vmem:[%s783_s0 + $0x48] sm:$0xff]   ;;  %v546_v11 = vld [vmem:[%s783_s0 + $0x50] sm:$0xff]  }
   0x5   :  { %491 = vmatprep.mubr.msk.bf16.mxu0 %vm172_vm0, %v541_v3  ;;  %507 = vmatprep.mubr.msk.bf16.mxu1 %vm172_vm0, %v542_v4  ;;  %v547_v12 = vld [vmem:[%s783_s0 + $0x18] sm:$0xff]   ;;  %v549_v14 = vld [vmem:[%s783_s0 + $0x20] sm:$0xff]   ;;  %v551_v16 = vld [vmem:[%s783_s0 + $0x28] sm:$0xff]  }
   0x6   :  { %v548_v13 = vld [vmem:[%s783_s0 + $0x58] sm:$0xff]   ;;  %v550_v15 = vld [vmem:[%s783_s0 + $0x60] sm:$0xff]   ;;  %v552_v17 = vld [vmem:[%s783_s0 + $0x68] sm:$0xff]  }
   0x7   :  { %482 = vmatpush3.bf16.msra.mxu0 %v536_v1  ;;  %530 = vmatpush3.bf16.msra.mxu1 %v536_v1  ;;  %v553_v18 = vld [vmem:[%s783_s0 + $0x30] sm:$0xff]   ;;  %v555_v20 = vld [vmem:[%s783_s0 + $0x38] sm:$0xff]  }
   0x8   :  { %483 = vmatprep.subr.bf16.mxu0 %v537_v2  ;;  %525 = vmatprep.subr.bf16.mxu1 %v537_v2  ;;  %v554_v19 = vld [vmem:[%s783_s0 + $0x70] sm:$0xff]   ;;  %v556_v21 = vld [vmem:[%s783_s0 + $0x78] sm:$0xff]  }
   0xb   :  { %484 = vmatpush3.bf16.msra.mxu0 %v537_v2  ;;  %531 = vmatpush3.bf16.msra.mxu1 %v537_v2 }
   0xc   :  { %485 = vmatprep.subr.bf16.mxu0 %v538_v5  ;;  %526 = vmatprep.subr.bf16.mxu1 %v538_v5 }
   0xf   :  { %486 = vmatpush3.bf16.msra.mxu0 %v538_v5  ;;  %532 = vmatpush3.bf16.msra.mxu1 %v538_v5 }
  0x10   :  { %487 = vmatprep.subr.bf16.mxu0 %v539_v6  ;;  %527 = vmatprep.subr.bf16.mxu1 %v539_v6 }
  0x13   :  { %488 = vmatpush3.bf16.msra.mxu0 %v539_v6  ;;  %533 = vmatpush3.bf16.msra.mxu1 %v539_v6 }
  0x14   :  { %489 = vmatprep.subr.bf16.mxu0 %v540_v7  ;;  %528 = vmatprep.subr.bf16.mxu1 %v540_v7 }
  0x17   :  { %490 = vmatpush3.bf16.msra.mxu0 %v540_v7  ;;  %534 = vmatpush3.bf16.msra.mxu1 %v540_v7 }
  0x1a   :  { %492 = vmatmul.mubr.msk.bf16.vlgmr.msra.gmra.mxu0 %vm172_vm0, %v543_v8  ;;  %508 = vmatmul.mubr.msk.bf16.vlgmr.msra.gmra.mxu1 %vm172_vm0, %v544_v9 }
  0x1b   :  { %495 = vmatprep.mubr.msk.bf16.mxu0 %vm172_vm0, %v545_v10  ;;  %511 = vmatprep.mubr.msk.bf16.mxu1 %vm172_vm0, %v546_v11 }
  0x22   :  { %496 = vmatmul.mubr.msk.bf16.gmra.mxu0 %vm172_vm0, %v547_v12  ;;  %512 = vmatmul.mubr.msk.bf16.gmra.mxu1 %vm172_vm0, %v548_v13 }
  0x23   :  { %499 = vmatprep.mubr.msk.bf16.mxu0 %vm172_vm0, %v549_v14  ;;  %515 = vmatprep.mubr.msk.bf16.mxu1 %vm172_vm0, %v550_v15 }
  0x2a   :  { %500 = vmatmul.mubr.msk.bf16.gmra.mxu0 %vm172_vm0, %v551_v16  ;;  %516 = vmatmul.mubr.msk.bf16.gmra.mxu1 %vm172_vm0, %v552_v17 }
  0x2b   :  { %503 = vmatprep.mubr.msk.bf16.mxu0 %vm172_vm0, %v553_v18  ;;  %519 = vmatprep.mubr.msk.bf16.mxu1 %vm172_vm0, %v554_v19 }
  0x32   :  { %504 = vmatmul.mubr.msk.bf16.gmra.mxu0 %vm172_vm0, %v555_v20  ;;  %520 = vmatmul.mubr.msk.bf16.gmra.mxu1 %vm172_vm0, %v556_v21 }
  0xda   :  { %v493_v22 = vpop.f32.mrf.mxu0  ;;  %v509_v23 = vpop.f32.mrf.mxu1 }
  0xdb   :  { %385 = vst.msk [vmem:[%s784_s2 + $0x10] sm:$0xff] %vm382_vm1, %v493_v22  ;;  %401 = vst.msk [vmem:[%s784_s2 + $0x90] sm:$0xff] %vm382_vm1, %v509_v23 }
  0xdc   :  { %v255_v24 = vpop.f32.mrf.mxu0  ;;  %v319_v25 = vpop.f32.mrf.mxu1 }
  0xdd   :  { %383 = vst.msk [vmem:[%s784_s2] sm:$0xff] %vm382_vm1, %v255_v24  ;;  %399 = vst.msk [vmem:[%s784_s2 + $0x80] sm:$0xff] %vm382_vm1, %v319_v25 }
  0xde   :  { %v494_v26 = vpop.f32.mrf.mxu0  ;;  %v510_v27 = vpop.f32.mrf.mxu1 }
  0xdf   :  { %386 = vst.msk [vmem:[%s784_s2 + $0x18] sm:$0xff] %vm382_vm1, %v494_v26  ;;  %402 = vst.msk [vmem:[%s784_s2 + $0x98] sm:$0xff] %vm382_vm1, %v510_v27 }
  0xe0   :  { %v258_v28 = vpop.f32.mrf.mxu0  ;;  %v322_v29 = vpop.f32.mrf.mxu1 }
  0xe1   :  { %384 = vst.msk [vmem:[%s784_s2 + $0x8] sm:$0xff] %vm382_vm1, %v258_v28  ;;  %400 = vst.msk [vmem:[%s784_s2 + $0x88] sm:$0xff] %vm382_vm1, %v322_v29 }
  0xe2   :  { %v497_v30 = vpop.f32.mrf.mxu0  ;;  %v513_v31 = vpop.f32.mrf.mxu1 }
  0xe3   :  { %389 = vst.msk [vmem:[%s784_s2 + $0x30] sm:$0xff] %vm382_vm1, %v497_v30  ;;  %405 = vst.msk [vmem:[%s784_s2 + $0xb0] sm:$0xff] %vm382_vm1, %v513_v31 }
  0xe4   :  { %v271_v32 = vpop.f32.mrf.mxu0  ;;  %v335_v33 = vpop.f32.mrf.mxu1 }
  0xe5   :  { %387 = vst.msk [vmem:[%s784_s2 + $0x20] sm:$0xff] %vm382_vm1, %v271_v32  ;;  %403 = vst.msk [vmem:[%s784_s2 + $0xa0] sm:$0xff] %vm382_vm1, %v335_v33 }
  0xe6   :  { %v498_v34 = vpop.f32.mrf.mxu0  ;;  %v514_v35 = vpop.f32.mrf.mxu1 }
  0xe7   :  { %390 = vst.msk [vmem:[%s784_s2 + $0x38] sm:$0xff] %vm382_vm1, %v498_v34  ;;  %406 = vst.msk [vmem:[%s784_s2 + $0xb8] sm:$0xff] %vm382_vm1, %v514_v35 }
  0xe8   :  { %v274_v36 = vpop.f32.mrf.mxu0  ;;  %v338_v37 = vpop.f32.mrf.mxu1 }
  0xe9   :  { %388 = vst.msk [vmem:[%s784_s2 + $0x28] sm:$0xff] %vm382_vm1, %v274_v36  ;;  %404 = vst.msk [vmem:[%s784_s2 + $0xa8] sm:$0xff] %vm382_vm1, %v338_v37 }
  0xea   :  { %v501_v38 = vpop.f32.mrf.mxu0  ;;  %v517_v39 = vpop.f32.mrf.mxu1 }
  0xeb   :  { %393 = vst.msk [vmem:[%s784_s2 + $0x50] sm:$0xff] %vm382_vm1, %v501_v38  ;;  %409 = vst.msk [vmem:[%s784_s2 + $0xd0] sm:$0xff] %vm382_vm1, %v517_v39 }
  0xec   :  { %v287_v40 = vpop.f32.mrf.mxu0  ;;  %v351_v41 = vpop.f32.mrf.mxu1 }
  0xed   :  { %391 = vst.msk [vmem:[%s784_s2 + $0x40] sm:$0xff] %vm382_vm1, %v287_v40  ;;  %407 = vst.msk [vmem:[%s784_s2 + $0xc0] sm:$0xff] %vm382_vm1, %v351_v41 }
  0xee   :  { %v502_v42 = vpop.f32.mrf.mxu0  ;;  %v518_v43 = vpop.f32.mrf.mxu1 }
  0xef   :  { %394 = vst.msk [vmem:[%s784_s2 + $0x58] sm:$0xff] %vm382_vm1, %v502_v42  ;;  %410 = vst.msk [vmem:[%s784_s2 + $0xd8] sm:$0xff] %vm382_vm1, %v518_v43 }
  0xf0   :  { %v290_v44 = vpop.f32.mrf.mxu0  ;;  %v354_v45 = vpop.f32.mrf.mxu1 }
  0xf1   :  { %392 = vst.msk [vmem:[%s784_s2 + $0x48] sm:$0xff] %vm382_vm1, %v290_v44  ;;  %408 = vst.msk [vmem:[%s784_s2 + $0xc8] sm:$0xff] %vm382_vm1, %v354_v45 }
  0xf2   :  { %v505_v46 = vpop.f32.mrf.mxu0  ;;  %v521_v47 = vpop.f32.mrf.mxu1 }
  0xf3   :  { %397 = vst.msk [vmem:[%s784_s2 + $0x70] sm:$0xff] %vm382_vm1, %v505_v46  ;;  %413 = vst.msk [vmem:[%s784_s2 + $0xf0] sm:$0xff] %vm382_vm1, %v521_v47 }
  0xf4   :  { %v303_v48 = vpop.f32.mrf.mxu0  ;;  %v367_v49 = vpop.f32.mrf.mxu1 }
  0xf5   :  { %395 = vst.msk [vmem:[%s784_s2 + $0x60] sm:$0xff] %vm382_vm1, %v303_v48  ;;  %411 = vst.msk [vmem:[%s784_s2 + $0xe0] sm:$0xff] %vm382_vm1, %v367_v49 }
  0xf6   :  { %v506_v50 = vpop.f32.mrf.mxu0  ;;  %v522_v51 = vpop.f32.mrf.mxu1 }
  0xf7   :  { %398 = vst.msk [vmem:[%s784_s2 + $0x78] sm:$0xff] %vm382_vm1, %v506_v50  ;;  %414 = vst.msk [vmem:[%s784_s2 + $0xf8] sm:$0xff] %vm382_vm1, %v522_v51 }
  0xf8   :  { %v306_v52 = vpop.f32.mrf.mxu0  ;;  %v370_v53 = vpop.f32.mrf.mxu1 }
  0xf9   :  { %396 = vst.msk [vmem:[%s784_s2 + $0x68] sm:$0xff] %vm382_vm1, %v306_v52  ;;  %412 = vst.msk [vmem:[%s784_s2 + $0xe8] sm:$0xff] %vm382_vm1, %v370_v53 }

// kernel: dfair_forward.4
= control target key start
LH: loop header
LB: loop body
LE: loop exit
PB: predicated region body
PF: predicated region fallthrough
CT: control target
= control target key end

     0   :  { %v4375_v17 = vmov 0   ;;  %vm734_vm0 = vcmask 261120   ;;  %vm45_vm1 = vcmask 523264   ;;  %s6629_s1 = inlined_call_operand.vmem [shape: bf16[256,64], index: 1, kind: input, shape index: {}]   ;;  %s6630_s0 = inlined_call_operand.vmem [shape: bf16[256,256], index: 0, kind: input, shape index: {}]   ;;  %s6631_s5 = inlined_call_operand.vmem [shape: f32[32,128], index: 5, kind: input, shape index: {}]   ;;  %s6632_s3 = inlined_call_operand.vmem [shape: f32[256,32], index: 3, kind: input, shape index: {}]   ;;  %s6633_s4 = inlined_call_operand.vmem [shape: f32[256,1], index: 4, kind: input, shape index: {}]   ;;  %s6634_s7 = inlined_call_operand.vmem [shape: f32[64,128], index: 7, kind: input, shape index: {}]   ;;  %s6635_s6 = inlined_call_operand.vmem [shape: f32[1,128], index: 6, kind: input, shape index: {}]   ;;  %s6636_s8 = inlined_call_operand.vmem [shape: f32[64,64], index: 8, kind: input, shape index: {}]   ;;  %s6637_s9 = inlined_call_operand.vmem [shape: f32[64,64], index: 9, kind: input, shape index: {}]   ;;  %s6638_s2 = inlined_call_operand.vmem [shape: f32[256,64], index: 2, kind: input, shape index: {}]   ;;  %s6639_s10 = inlined_call_operand.vmem [shape: f32[1,64], index: 10, kind: input, shape index: {}]   ;;  %s6640_s11 = inlined_call_operand.vmem [shape: f32[256,64], index: 11, kind: output, shape index: {0}]   ;;  %s6641_s12 = inlined_call_operand.vmem [shape: f32[256,2], index: 12, kind: output, shape index: {1}]  }
   0x1   :  { %v4279_v0 = vld [vmem:[%s6629_s1 + $0x78] sm:$0xff]   ;;  %v4281_v2 = vld [vmem:[%s6629_s1 + $0x70] sm:$0xff]   ;;  %v4283_v4 = vld [vmem:[%s6629_s1 + $0x68] sm:$0xff]   ;;  %4277 = vset.pattern.permute.xlu0 %v4375_v17  ;;  %4278 = vset.pattern.permute.xlu1 %v4375_v17 }
   0x2   :  { %v4280_v1 = vld [vmem:[%s6629_s1 + $0x38] sm:$0xff]   ;;  %3742 = vmatprep.subr.bf16.mxu0 %v4279_v0  ;;  %v4282_v3 = vld [vmem:[%s6629_s1 + $0x30] sm:$0xff]   ;;  %v4284_v5 = vld [vmem:[%s6629_s1 + $0x28] sm:$0xff]  }
   0x3   :  { %3743 = vmatpush3.bf16.msra.mxu0 %v4280_v1  ;;  %v4285_v6 = vld [vmem:[%s6629_s1 + $0x60] sm:$0xff]   ;;  %v4287_v8 = vld [vmem:[%s6629_s1 + $0x58] sm:$0xff]   ;;  %v4289_v10 = vld [vmem:[%s6629_s1 + $0x50] sm:$0xff]  }
   0x4   :  { %3744 = vmatprep.subr.bf16.mxu0 %v4281_v2  ;;  %v4286_v7 = vld [vmem:[%s6629_s1 + $0x20] sm:$0xff]   ;;  %v4288_v9 = vld [vmem:[%s6629_s1 + $0x18] sm:$0xff]   ;;  %v4290_v12 = vld [vmem:[%s6629_s1 + $0x10] sm:$0xff]  }
   0x5   :  { %v4297_v11 = vld [vmem:[%s6630_s0 + $0x4] ss:$8 sps:$4 sm:$0xff]   ;;  %v4295_v18 = vld [vmem:[%s6630_s0] ss:$8 sps:$4 sm:$0xff]   ;;  %v4298_v19 = vld [vmem:[%s6630_s0 + $0x14] ss:$8 sps:$4 sm:$0xff]  }
   0x6   :  { %462 = vmatprep.mubr.bf16.mxu0 %v4297_v11  ;;  %v4291_v13 = vld [vmem:[%s6629_s1 + $0x48] sm:$0xff]   ;;  %v4293_v15 = vld [vmem:[%s6629_s1 + $0x40] sm:$0xff]   ;;  %v726_v20 = vld [vmem:[%s6631_s5 + $0x18] sm:$0xff] }
   0x7   :  { %3745 = vmatpush3.bf16.msra.mxu0 %v4282_v3  ;;  %v4292_v14 = vld [vmem:[%s6629_s1 + $0x8] sm:$0xff]   ;;  %v4294_v16 = vld [vmem:[%s6629_s1] sm:$0xff]   ;;  %4010 = vmatprep.subr.mxu1 %v726_v20  ;;  %v725_v21 = vld [vmem:[%s6631_s5 + $0x10] sm:$0xff] }
   0x8   :  { %3746 = vmatprep.subr.bf16.mxu0 %v4283_v4  ;;  %4011 = vmatpush3.msra.mxu1 %v726_v20  ;;  %v724_v22 = vld [vmem:[%s6631_s5 + $0x8] sm:$0xff]  ;;  %v691_v23 = vld [vmem:[%s6632_s3] sm:$0xff]  ;;  %v693_v26 = vld [vmem:[%s6632_s3 + $0x10] sm:$0xff] }
   0x9   :  { %4012 = vmatprep.subr.mxu1 %v725_v21  ;;  %v723_v24 = vld [vmem:[%s6631_s5] sm:$0xff]  ;;  %4018 = vmatprep.mubr.msk.f32.mxu1 %vm734_vm0, %v691_v23  ;;  %v692_v25 = vld [vmem:[%s6632_s3 + $0x8] sm:$0xff]  ;;  %v4300_v27 = vld [vmem:[%s6630_s0 + $0x10] ss:$8 sps:$4 sm:$0xff]  }
   0xa   :  { %4013 = vmatpush3.msra.mxu1 %v725_v21  ;;  %v4301_v28 = vld [vmem:[%s6630_s0 + $0x24] ss:$8 sps:$4 sm:$0xff]   ;;  %v694_v29 = vld [vmem:[%s6632_s3 + $0x18] sm:$0xff]  ;;  %v697_v33 = vld [vmem:[%s6632_s3 + $0x30] sm:$0xff] }
   0xb   :  { %3747 = vmatpush3.bf16.msra.mxu0 %v4284_v5  ;;  %4014 = vmatprep.subr.mxu1 %v724_v22  ;;  %v695_v30 = vld [vmem:[%s6632_s3 + $0x20] sm:$0xff]  ;;  %v696_v31 = vld [vmem:[%s6632_s3 + $0x28] sm:$0xff]  ;;  %v4562_v36 = vld [vmem:[%s6633_s4 + $0x18] sm:$0xff] }
   0xc   :  { %3748 = vmatprep.subr.bf16.mxu0 %v4285_v6  ;;  %4015 = vmatpush3.msra.mxu1 %v724_v22  ;;  %v4544_v32 = vld [vmem:[%s6633_s4] sm:$0xff]  ;;  %v4553_v34 = vld [vmem:[%s6633_s4 + $0x8] sm:$0xff]  ;;  %v4304_v37 = vld [vmem:[%s6630_s0 + $0x34] ss:$8 sps:$4 sm:$0xff]   ;;  %v2124_v6 = vsub.f32 1.0, %v4562_v36 }
   0xd   :  { %4016 = vmatprep.subr.mxu1 %v723_v24  ;;  %1931 = vperm.xlu0 %4277, %v4544_v32   ;;  %v4303_v35 = vld [vmem:[%s6630_s0 + $0x20] ss:$8 sps:$4 sm:$0xff]   ;;  %v4571_v38 = vld [vmem:[%s6633_s4 + $0x10] sm:$0xff]  ;;  %v698_v39 = vld [vmem:[%s6632_s3 + $0x38] sm:$0xff]  ;;  %v2122_v0 = vsub.f32 1.0, %v4553_v34  ;;  %v2121_v3 = vsub.f32 1.0, %v4544_v32 }
   0xe   :  { %4017 = vmatpush3.msra.mxu1 %v723_v24  ;;  %1936 = vperm.xlu1 %4278, %v4553_v34   ;;  %v699_v40 = vld [vmem:[%s6632_s3 + $0x40] sm:$0xff]  ;;  %v4585_v41 = vld [vmem:[%s6633_s4 + $0x28] sm:$0xff]  ;;  %v701_v44 = vld [vmem:[%s6632_s3 + $0x50] sm:$0xff] }
   0xf   :  { %3749 = vmatpush3.bf16.msra.mxu0 %v4286_v7  ;;  %4019 = vmatmul.mubr.msk.f32.vlgmr.msra.gmra.mxu1 %vm734_vm0, %v692_v25  ;;  %v4591_v42 = vld [vmem:[%s6633_s4 + $0x20] sm:$0xff]  ;;  %v700_v43 = vld [vmem:[%s6632_s3 + $0x48] sm:$0xff]  ;;  %v4306_v45 = vld [vmem:[%s6630_s0 + $0x30] ss:$8 sps:$4 sm:$0xff]  }
  0x10   :  { %3750 = vmatprep.subr.bf16.mxu0 %v4287_v8  ;;  %4021 = vmatprep.mubr.msk.f32.mxu1 %vm734_vm0, %v693_v26  ;;  %v4608_v46 = vld [vmem:[%s6633_s4 + $0x38] sm:$0xff]  ;;  %v4307_v47 = vld [vmem:[%s6630_s0 + $0x44] ss:$8 sps:$4 sm:$0xff]   ;;  %v4617_v48 = vld [vmem:[%s6633_s4 + $0x30] sm:$0xff]  ;;  %v2123_v8 = vsub.f32 1.0, %v4571_v38 }
  0x11   :  { %1946 = vperm.xlu0 %4277, %v4562_v36   ;;  %v702_v49 = vld [vmem:[%s6632_s3 + $0x58] sm:$0xff]  ;;  %v703_v50 = vld [vmem:[%s6632_s3 + $0x60] sm:$0xff]  ;;  %v4631_v51 = vld [vmem:[%s6633_s4 + $0x48] sm:$0xff] }
  0x12   :  { %1941 = vperm.xlu1 %4278, %v4571_v38   ;;  %v4637_v52 = vld [vmem:[%s6633_s4 + $0x40] sm:$0xff]  ;;  %v704_v53 = vld [vmem:[%s6632_s3 + $0x68] sm:$0xff]  ;;  %v705_v54 = vld [vmem:[%s6632_s3 + $0x70] sm:$0xff]  ;;  %v2130_v20 = vsub.f32 1.0, %v4631_v51 }
  0x13   :  { %3751 = vmatpush3.bf16.msra.mxu0 %v4288_v9  ;;  %4022 = vmatmul.mubr.msk.f32.gmra.mxu1 %vm734_vm0, %v694_v29  ;;  %v4309_v55 = vld [vmem:[%s6630_s0 + $0x40] ss:$8 sps:$4 sm:$0xff]   ;;  %v4654_v56 = vld [vmem:[%s6633_s4 + $0x58] sm:$0xff]  ;;  %v4663_v58 = vld [vmem:[%s6633_s4 + $0x50] sm:$0xff]  ;;  %v2129_v22 = vsub.f32 1.0, %v4637_v52 }
  0x14   :  { %3752 = vmatprep.subr.bf16.mxu0 %v4289_v10  ;;  %4024 = vmatprep.mubr.msk.f32.mxu1 %vm734_vm0, %v695_v30  ;;  %v4310_v57 = vld [vmem:[%s6630_s0 + $0x54] ss:$8 sps:$4 sm:$0xff]   ;;  %v707_v60 = vld [vmem:[%s6632_s3 + $0x80] sm:$0xff]  ;;  %v4677_v61 = vld [vmem:[%s6633_s4 + $0x68] sm:$0xff]  ;;  %v2126_v10 = vsub.f32 1.0, %v4585_v41  ;;  %v2132_v24 = vsub.f32 1.0, %v4654_v56 }
  0x15   :  { %1956 = vperm.xlu0 %4277, %v4585_v41   ;;  %v706_v59 = vld [vmem:[%s6632_s3 + $0x78] sm:$0xff]  ;;  %v4683_v62 = vld [vmem:[%s6633_s4 + $0x60] sm:$0xff]  ;;  %v708_v63 = vld [vmem:[%s6632_s3 + $0x88] sm:$0xff]  ;;  %v2131_v25 = vsub.f32 1.0, %v4663_v58  ;;  %v2134_v26 = vsub.f32 1.0, %v4677_v61  ;;  %v4376_v30 = vmov 0.0  }
  0x16   :  { %1951 = vperm.xlu1 %4278, %v4591_v42   ;;  %v709_v1 = vld [vmem:[%s6632_s3 + $0x90] sm:$0xff]  ;;  %v4313_v4 = vld [vmem:[%s6630_s0 + $0x64] ss:$8 sps:$4 sm:$0xff]   ;;  %v710_v5 = vld [vmem:[%s6632_s3 + $0x98] sm:$0xff]  ;;  %46 = vst.msk [vmem:[#allocation2] sm:$0xff] %vm45_vm1, %v4376_v30 }
  0x17   :  { %3753 = vmatpush3.bf16.msra.mxu0 %v4290_v12  ;;  %4025 = vmatmul.mubr.msk.f32.gmra.mxu1 %vm734_vm0, %v696_v31  ;;  %v4312_v2 = vld [vmem:[%s6630_s0 + $0x50] ss:$8 sps:$4 sm:$0xff]   ;;  %v711_v7 = vld [vmem:[%s6632_s3 + $0xa0] sm:$0xff]  ;;  %v712_v9 = vld [vmem:[%s6632_s3 + $0xa8] sm:$0xff]  ;;  %47 = vst.msk [vmem:[#allocation2 + $0x8] sm:$0xff] %vm45_vm1, %v4376_v30 }
  0x18   :  { %3754 = vmatprep.subr.bf16.mxu0 %v4291_v13  ;;  %4027 = vmatprep.mubr.msk.f32.mxu1 %vm734_vm0, %v697_v33  ;;  %v713_v11 = vld [vmem:[%s6632_s3 + $0xb0] sm:$0xff]  ;;  %v4315_v12 = vld [vmem:[%s6630_s0 + $0x60] ss:$8 sps:$4 sm:$0xff]   ;;  %v2125_v13 = vsub.f32 1.0, %v4591_v42  ;;  %v4319_v23 = vld [vmem:[%s6630_s0 + $0x84] ss:$8 sps:$4 sm:$0xff]  }
  0x19   :  { %1966 = vperm.xlu0 %4277, %v4608_v46   ;;  %v715_v17 = vld [vmem:[%s6632_s3 + $0xc0] sm:$0xff]  ;;  %v4318_v21 = vld [vmem:[%s6630_s0 + $0x70] ss:$8 sps:$4 sm:$0xff]   ;;  %v4322_v29 = vld [vmem:[%s6630_s0 + $0x94] ss:$8 sps:$4 sm:$0xff]   ;;  %48 = vst.msk [vmem:[#allocation2 + $0x10] sm:$0xff] %vm45_vm1, %v4376_v30 }
  0x1a   :  { %1961 = vperm.xlu1 %4278, %v4617_v48   ;;  %49 = vst.msk [vmem:[#allocation2 + $0x18] sm:$0xff] %vm45_vm1, %v4376_v30  ;;  %50 = vst.msk [vmem:[#allocation2 + $0x20] sm:$0xff] %vm45_vm1, %v4376_v30  ;;  %v717_v31 = vld [vmem:[%s6632_s3 + $0xd0] sm:$0xff]  ;;  %v718_v32 = vld [vmem:[%s6632_s3 + $0xd8] sm:$0xff] }
  0x1b   :  { %3755 = vmatpush3.bf16.msra.mxu0 %v4292_v14  ;;  %4028 = vmatmul.mubr.msk.f32.gmra.mxu1 %vm734_vm0, %v698_v39  ;;  %v4316_v14 = vld [vmem:[%s6630_s0 + $0x74] ss:$8 sps:$4 sm:$0xff]   ;;  %51 = vst.msk [vmem:[#allocation2 + $0x28] sm:$0xff] %vm45_vm1, %v4376_v30  ;;  %52 = vst.msk [vmem:[#allocation2 + $0x30] sm:$0xff] %vm45_vm1, %v4376_v30  ;;  %v4324_v34 = vld [vmem:[%s6630_s0 + $0x90] ss:$8 sps:$4 sm:$0xff]  }
  0x1c   :  { %3756 = vmatprep.subr.bf16.mxu0 %v4293_v15  ;;  %4030 = vmatprep.mubr.msk.f32.mxu1 %vm734_vm0, %v699_v40  ;;  %v714_v15 = vld [vmem:[%s6632_s3 + $0xb8] sm:$0xff]  ;;  %53 = vst.msk [vmem:[#allocation2 + $0x38] sm:$0xff] %vm45_vm1, %v4376_v30  ;;  %54 = vst.msk [vmem:[#allocation2 + $0x40] sm:$0xff] %vm45_vm1, %v4376_v30  ;;  %v1158_v36 = vld [vmem:[%s6634_s7 + $0x30] sm:$0xff] }
  0x1d   :  { %1976 = vperm.xlu0 %4277, %v4631_v51   ;;  %55 = vst.msk [vmem:[#allocation2 + $0x48] sm:$0xff] %vm45_vm1, %v4376_v30  ;;  %56 = vst.msk [vmem:[#allocation2 + $0x50] sm:$0xff] %vm45_vm1, %v4376_v30  ;;  %v1159_v33 = vld [vmem:[%s6634_s7 + $0x38] sm:$0xff]  ;;  %v720_v38 = vld [vmem:[%s6632_s3 + $0xe8] sm:$0xff] }
  0x1e   :  { %1971 = vperm.xlu1 %4278, %v4637_v52   ;;  %57 = vst.msk [vmem:[#allocation2 + $0x58] sm:$0xff] %vm45_vm1, %v4376_v30  ;;  %58 = vst.msk [vmem:[#allocation2 + $0x60] sm:$0xff] %vm45_vm1, %v4376_v30  ;;  %4066 = vmatprep.subr.mxu1 %v1159_v33  ;;  %v1157_v39 = vld [vmem:[%s6634_s7 + $0x28] sm:$0xff]  ;;  %v721_v40 = vld [vmem:[%s6632_s3 + $0xf0] sm:$0xff] }
  0x1f   :  { %3757 = vmatpush3.bf16.msra.mxu0 %v4294_v16  ;;  %4031 = vmatmul.mubr.msk.f32.gmra.mxu1 %vm734_vm0, %v700_v43  ;;  %v2128_v16 = vsub.f32 1.0, %v4608_v46  ;;  %59 = vst.msk [vmem:[#allocation2 + $0x68] sm:$0xff] %vm45_vm1, %v4376_v30  ;;  %60 = vst.msk [vmem:[#allocation2 + $0x70] sm:$0xff] %vm45_vm1, %v4376_v30  ;;  %v1156_v41 = vld [vmem:[%s6634_s7 + $0x20] sm:$0xff]  ;;  %v722_v42 = vld [vmem:[%s6632_s3 + $0xf8] sm:$0xff] }
  0x20   :  { %4033 = vmatprep.mubr.msk.f32.mxu1 %vm734_vm0, %v701_v44  ;;  %61 = vst.msk [vmem:[#allocation2 + $0x78] sm:$0xff] %vm45_vm1, %v4376_v30  ;;  %62 = vst.msk [vmem:[#allocation2 + $0x80] sm:$0xff] %vm45_vm1, %v4376_v30  ;;  %4067 = vmatpush3.msra.mxu1 %v1159_v33  ;;  %v1155_v43 = vld [vmem:[%s6634_s7 + $0x18] sm:$0xff]  ;;  %v4327_v44 = vld [vmem:[%s6630_s0 + $0xa0] ss:$8 sps:$4 sm:$0xff]  }
  0x21   :  { %1986 = vperm.xlu0 %4277, %v4654_v56   ;;  %63 = vst.msk [vmem:[#allocation2 + $0x88] sm:$0xff] %vm45_vm1, %v4376_v30  ;;  %64 = vst.msk [vmem:[#allocation2 + $0x90] sm:$0xff] %vm45_vm1, %v4376_v30  ;;  %4068 = vmatprep.subr.mxu1 %v1158_v36  ;;  %v4328_v46 = vld [vmem:[%s6630_s0 + $0xb4] ss:$8 sps:$4 sm:$0xff]   ;;  %v4330_v51 = vld [vmem:[%s6630_s0 + $0xb0] ss:$8 sps:$4 sm:$0xff]  }
  0x22   :  { %463 = vmatmul.mubr.bf16.vlgmr.msra.gmra.mxu0 %v4295_v18  ;;  %1981 = vperm.xlu1 %4278, %v4663_v58   ;;  %v2127_v18 = vsub.f32 1.0, %v4617_v48  ;;  %65 = vst.msk [vmem:[#allocation2 + $0x98] sm:$0xff] %vm45_vm1, %v4376_v30  ;;  %66 = vst.msk [vmem:[#allocation2 + $0xa0] sm:$0xff] %vm45_vm1, %v4376_v30  ;;  %v1152_v48 = vld [vmem:[%s6634_s7] sm:$0xff]  ;;  %v4334_v58 = vld [vmem:[%s6630_s0 + $0xd4] ss:$8 sps:$4 sm:$0xff]  }
  0x23   :  { %470 = vmatprep.mubr.bf16.mxu0 %v4298_v19  ;;  %4034 = vmatmul.mubr.msk.f32.gmra.mxu1 %vm734_vm0, %v702_v49  ;;  %v716_v19 = vld [vmem:[%s6632_s3 + $0xc8] sm:$0xff]  ;;  %67 = vst.msk [vmem:[#allocation2 + $0xa8] sm:$0xff] %vm45_vm1, %v4376_v30  ;;  %68 = vst.msk [vmem:[#allocation2 + $0xb0] sm:$0xff] %vm45_vm1, %v4376_v30  ;;  %v1911_v49 = vld [vmem:[%s6633_s4 + $0x70] sm:$0xff] }
  0x24   :  { %4036 = vmatprep.mubr.msk.f32.mxu1 %vm734_vm0, %v703_v50  ;;  %69 = vst.msk [vmem:[#allocation2 + $0xb8] sm:$0xff] %vm45_vm1, %v4376_v30  ;;  %70 = vst.msk [vmem:[#allocation2 + $0xc0] sm:$0xff] %vm45_vm1, %v4376_v30  ;;  %4069 = vmatpush3.msra.mxu1 %v1158_v36  ;;  %v2135_v50 = vsub.f32 1.0, %v1911_v49  ;;  %v4331_v52 = vld [vmem:[%s6630_s0 + $0xc4] ss:$8 sps:$4 sm:$0xff]  }
  0x25   :  { %1996 = vperm.xlu0 %4277, %v4677_v61   ;;  %71 = vst.msk [vmem:[#allocation2 + $0xc8] sm:$0xff] %vm45_vm1, %v4376_v30  ;;  %72 = vst.msk [vmem:[#allocation2 + $0xd0] sm:$0xff] %vm45_vm1, %v4376_v30  ;;  %4070 = vmatprep.subr.mxu1 %v1157_v39  ;;  %v1915_v61 = vld [vmem:[%s6633_s4 + $0x90] sm:$0xff]  ;;  %v79_v36 = vld [vmem:[#allocation2 + $0x8] sm:$0xff] }
  0x26   :  { %1991 = vperm.xlu1 %4278, %v4683_v62   ;;  %73 = vst.msk [vmem:[#allocation2 + $0xd8] sm:$0xff] %vm45_vm1, %v4376_v30  ;;  %74 = vst.msk [vmem:[#allocation2 + $0xe0] sm:$0xff] %vm45_vm1, %v4376_v30  ;;  %4071 = vmatpush3.msra.mxu1 %v1157_v39 }
  0x27   :  { %4037 = vmatmul.mubr.msk.f32.gmra.mxu1 %vm734_vm0, %v704_v53  ;;  %75 = vst.msk [vmem:[#allocation2 + $0xe8] sm:$0xff] %vm45_vm1, %v4376_v30  ;;  %76 = vst.msk [vmem:[#allocation2 + $0xf0] sm:$0xff] %vm45_vm1, %v4376_v30  ;;  %4072 = vmatprep.subr.mxu1 %v1156_v41  ;;  %v1912_v53 = vld [vmem:[%s6633_s4 + $0x78] sm:$0xff] }
  0x28   :  { %4039 = vmatprep.mubr.msk.f32.mxu1 %vm734_vm0, %v705_v54  ;;  %77 = vst.msk [vmem:[#allocation2 + $0xf8] sm:$0xff] %vm45_vm1, %v4376_v30  ;;  %4073 = vmatpush3.msra.mxu1 %v1156_v41  ;;  %v2136_v54 = vsub.f32 1.0, %v1912_v53 }
  0x29   :  { %2160 = vperm.xlu0 %4277, %v2122_v0   ;;  %4074 = vmatprep.subr.mxu1 %v1155_v43  ;;  %v4337_v0 = vld [vmem:[%s6630_s0 + $0xe4] ss:$8 sps:$4 sm:$0xff]  }
  0x2a   :  { %471 = vmatmul.mubr.bf16.gmra.mxu0 %v4300_v27  ;;  %2155 = vperm.xlu1 %4278, %v2121_v3   ;;  %v4321_v27 = vld [vmem:[%s6630_s0 + $0x80] ss:$8 sps:$4 sm:$0xff]  }
  0x2b   :  { %478 = vmatprep.mubr.bf16.mxu0 %v4301_v28  ;;  %4040 = vmatmul.mubr.msk.f32.gmra.mxu1 %vm734_vm0, %v706_v59  ;;  %v2133_v28 = vsub.f32 1.0, %v4683_v62  ;;  %v1914_v59 = vld [vmem:[%s6633_s4 + $0x88] sm:$0xff]  ;;  %v2139_v62 = vsub.f32 1.0, %v1915_v61  ;;  %v1917_v3 = vld [vmem:[%s6633_s4 + $0xa0] sm:$0xff] }
  0x2c   :  { %4042 = vmatprep.mubr.msk.f32.mxu1 %vm734_vm0, %v707_v60  ;;  %4075 = vmatpush3.msra.mxu1 %v1155_v43  ;;  %v2138_v60 = vsub.f32 1.0, %v1914_v59 }
  0x2d   :  { %2170 = vperm.xlu0 %4277, %v2124_v6   ;;  %v4340_v6 = vld [vmem:[%s6630_s0 + $0xf4] ss:$8 sps:$4 sm:$0xff]  }
  0x2e   :  { %2165 = vperm.xlu1 %4278, %v2123_v8  }
  0x2f   :  { %4043 = vmatmul.mubr.msk.f32.gmra.mxu1 %vm734_vm0, %v708_v63  ;;  %v4336_v63 = vld [vmem:[%s6630_s0 + $0xd0] ss:$8 sps:$4 sm:$0xff]  }
  0x30   :  { %4045 = vmatprep.mubr.msk.f32.mxu1 %vm734_vm0, %v709_v1  ;;  %v1916_v1 = vld [vmem:[%s6633_s4 + $0x98] sm:$0xff] }
  0x31   :  { %2180 = vperm.xlu0 %4277, %v2126_v10  }
  0x32   :  { %479 = vmatmul.mubr.bf16.gmra.mxu0 %v4303_v35  ;;  %2175 = vperm.xlu1 %4278, %v2125_v13   ;;  %v719_v35 = vld [vmem:[%s6632_s3 + $0xe0] sm:$0xff] }
  0x33   :  { %486 = vmatprep.mubr.bf16.mxu0 %v4304_v37  ;;  %4046 = vmatmul.mubr.msk.f32.gmra.mxu1 %vm734_vm0, %v710_v5  ;;  %v4325_v37 = vld [vmem:[%s6630_s0 + $0xa4] ss:$8 sps:$4 sm:$0xff]   ;;  %v4339_v5 = vld [vmem:[%s6630_s0 + $0xe0] ss:$8 sps:$4 sm:$0xff]  }
  0x34   :  { %4048 = vmatprep.mubr.msk.f32.mxu1 %vm734_vm0, %v711_v7  ;;  %v1918_v7 = vld [vmem:[%s6633_s4 + $0xa8] sm:$0xff] }
  0x35   :  { %2190 = vperm.xlu0 %4277, %v2128_v16   ;;  %v2142_v8 = vsub.f32 1.0, %v1918_v7  ;;  %v1922_v16 = vld [vmem:[%s6633_s4 + $0xc8] sm:$0xff] }
  0x36   :  { %2185 = vperm.xlu1 %4278, %v2127_v18   ;;  %v1923_v18 = vld [vmem:[%s6633_s4 + $0xd0] sm:$0xff] }
  0x37   :  { %4049 = vmatmul.mubr.msk.f32.gmra.mxu1 %vm734_vm0, %v712_v9  ;;  %v1919_v9 = vld [vmem:[%s6633_s4 + $0xb0] sm:$0xff] }
  0x38   :  { %4051 = vmatprep.mubr.msk.f32.mxu1 %vm734_vm0, %v713_v11  ;;  %v2143_v10 = vsub.f32 1.0, %v1919_v9  ;;  %v4342_v11 = vld [vmem:[%s6630_s0 + $0xf0] ss:$8 sps:$4 sm:$0xff]  }
  0x39   :  { %2200 = vperm.xlu0 %4277, %v2130_v20   ;;  %v1924_v20 = vld [vmem:[%s6633_s4 + $0xd8] sm:$0xff] }
  0x3a   :  { %487 = vmatmul.mubr.bf16.gmra.mxu0 %v4306_v45  ;;  %2195 = vperm.xlu1 %4278, %v2129_v22   ;;  %v1154_v45 = vld [vmem:[%s6634_s7 + $0x10] sm:$0xff]  ;;  %v1925_v22 = vld [vmem:[%s6633_s4 + $0xe0] sm:$0xff] }
  0x3b   :  { %494 = vmatprep.mubr.bf16.mxu0 %v4307_v47  ;;  %4052 = vmatmul.mubr.msk.f32.gmra.mxu1 %vm734_vm0, %v714_v15  ;;  %v1153_v47 = vld [vmem:[%s6634_s7 + $0x8] sm:$0xff] }
  0x3c   :  { %4054 = vmatprep.mubr.msk.f32.mxu1 %vm734_vm0, %v715_v17  ;;  %4076 = vmatprep.subr.mxu1 %v1154_v45  ;;  %v2146_v17 = vsub.f32 1.0, %v1922_v16 }
  0x3d   :  { %2210 = vperm.xlu0 %4277, %v2132_v24   ;;  %4077 = vmatpush3.msra.mxu1 %v1154_v45  ;;  %v1926_v24 = vld [vmem:[%s6633_s4 + $0xe8] sm:$0xff] }
  0x3e   :  { %2205 = vperm.xlu1 %4278, %v2131_v25   ;;  %4078 = vmatprep.subr.mxu1 %v1153_v47  ;;  %v2150_v25 = vsub.f32 1.0, %v1926_v24 }
  0x3f   :  { %4055 = vmatmul.mubr.msk.f32.gmra.mxu1 %vm734_vm0, %v716_v19  ;;  %v2147_v19 = vsub.f32 1.0, %v1923_v18 }
  0x40   :  { %4057 = vmatprep.mubr.msk.f32.mxu1 %vm734_vm0, %v717_v31  ;;  %4079 = vmatpush3.msra.mxu1 %v1153_v47 }
  0x41   :  { %2220 = vperm.xlu0 %4277, %v2134_v26   ;;  %4080 = vmatprep.subr.mxu1 %v1152_v48  ;;  %v1927_v26 = vld [vmem:[%s6633_s4 + $0xf0] sm:$0xff] }
  0x42   :  { %495 = vmatmul.mubr.bf16.gmra.mxu0 %v4309_v55  ;;  %2215 = vperm.xlu1 %4278, %v2133_v28   ;;  %v1913_v55 = vld [vmem:[%s6633_s4 + $0x80] sm:$0xff] }
  0x43   :  { %502 = vmatprep.mubr.bf16.mxu0 %v4310_v57  ;;  %4058 = vmatmul.mubr.msk.f32.gmra.mxu1 %vm734_vm0, %v718_v32  ;;  %v2137_v56 = vsub.f32 1.0, %v1913_v55  ;;  %v4333_v57 = vld [vmem:[%s6630_s0 + $0xc0] ss:$8 sps:$4 sm:$0xff]  }
  0x44   :  { %4060 = vmatprep.mubr.msk.f32.mxu1 %vm734_vm0, %v719_v35  ;;  %4081 = vmatpush3.msra.mxu1 %v1152_v48  ;;  %v4935_v32 = vld [vmem:[%s6635_s6] ss:$0 sm:$0xff]  ;;  %s4377_s6 = smov 64  }
  0x45   :  { %2225 = vperm.xlu0 %4277, %v2135_v50  }
  0x46   :  { %2001 = vperm.xlu1 %4278, %v1911_v49  }
  0x47   :  { %4061 = vmatmul.mubr.msk.f32.gmra.mxu1 %vm734_vm0, %v720_v38 }
  0x48   :  { %4063 = vmatprep.mubr.msk.f32.mxu1 %vm734_vm0, %v721_v40 }
  0x49   :  { %2230 = vperm.xlu0 %4277, %v2136_v54  }
  0x4a   :  { %503 = vmatmul.mubr.bf16.gmra.mxu0 %v4312_v2  ;;  %2006 = vperm.xlu1 %4278, %v1912_v53   ;;  %v2140_v2 = vsub.f32 1.0, %v1916_v1 }
  0x4b   :  { %510 = vmatprep.mubr.bf16.mxu0 %v4313_v4  ;;  %4064 = vmatmul.mubr.msk.f32.gmra.mxu1 %vm734_vm0, %v722_v42  ;;  %v2141_v4 = vsub.f32 1.0, %v1917_v3 }
  0x4d   :  { %2235 = vperm.xlu0 %4277, %v2137_v56  }
  0x4e   :  { %2011 = vperm.xlu1 %4278, %v1913_v55  }
  0x51   :  { %2240 = vperm.xlu0 %4277, %v2138_v60  }
  0x52   :  { %511 = vmatmul.mubr.bf16.gmra.mxu0 %v4315_v12  ;;  %2016 = vperm.xlu1 %4278, %v1914_v59   ;;  %v1920_v12 = vld [vmem:[%s6633_s4 + $0xb8] sm:$0xff] }
  0x53   :  { %518 = vmatprep.mubr.bf16.mxu0 %v4316_v14  ;;  %v2144_v13 = vsub.f32 1.0, %v1920_v12  ;;  %v1921_v14 = vld [vmem:[%s6633_s4 + $0xc0] sm:$0xff]  ;;  %v81_v59 = vld [vmem:[#allocation2 + $0x18] sm:$0xff] }
  0x54   :  { %v2145_v15 = vsub.f32 1.0, %v1921_v14 }
  0x55   :  { %2245 = vperm.xlu0 %4277, %v2139_v62  }
  0x56   :  { %2021 = vperm.xlu1 %4278, %v1915_v61  }
  0x59   :  { %2250 = vperm.xlu0 %4277, %v2140_v2  }
  0x5a   :  { %519 = vmatmul.mubr.bf16.gmra.mxu0 %v4318_v21  ;;  %2026 = vperm.xlu1 %4278, %v1916_v1   ;;  %v2148_v21 = vsub.f32 1.0, %v1924_v20 }
  0x5b   :  { %526 = vmatprep.mubr.bf16.mxu0 %v4319_v23  ;;  %v2149_v23 = vsub.f32 1.0, %v1925_v22 }
  0x5d   :  { %2255 = vperm.xlu0 %4277, %v2141_v4  }
  0x5e   :  { %2031 = vperm.xlu1 %4278, %v1917_v3  }
  0x61   :  { %2260 = vperm.xlu0 %4277, %v2142_v8  }
  0x62   :  { %527 = vmatmul.mubr.bf16.gmra.mxu0 %v4321_v27  ;;  %2036 = vperm.xlu1 %4278, %v1918_v7   ;;  %v2151_v27 = vsub.f32 1.0, %v1927_v26 }
  0x63   :  { %534 = vmatprep.mubr.bf16.mxu0 %v4322_v29  ;;  %v78_v29 = vld [vmem:[#allocation2] sm:$0xff] }
  0x65   :  { %2265 = vperm.xlu0 %4277, %v2143_v10  }
  0x66   :  { %2041 = vperm.xlu1 %4278, %v1919_v9   ;;  %v82_v9 = vld [vmem:[#allocation2 + $0x20] sm:$0xff] }
  0x69   :  { %2270 = vperm.xlu0 %4277, %v2144_v13  }
  0x6a   :  { %535 = vmatmul.mubr.bf16.gmra.mxu0 %v4324_v34  ;;  %2046 = vperm.xlu1 %4278, %v1920_v12  }
  0x6b   :  { %542 = vmatprep.mubr.bf16.mxu0 %v4325_v37 }
  0x6d   :  { %2275 = vperm.xlu0 %4277, %v2145_v15  }
  0x6e   :  { %2051 = vperm.xlu1 %4278, %v1921_v14  }
  0x71   :  { %2280 = vperm.xlu0 %4277, %v2146_v17  }
  0x72   :  { %543 = vmatmul.mubr.bf16.gmra.mxu0 %v4327_v44  ;;  %2056 = vperm.xlu1 %4278, %v1922_v16  }
  0x73   :  { %550 = vmatprep.mubr.bf16.mxu0 %v4328_v46  ;;  %v80_v46 = vld [vmem:[#allocation2 + $0x10] sm:$0xff] }
  0x75   :  { %2285 = vperm.xlu0 %4277, %v2147_v19  }
  0x76   :  { %2061 = vperm.xlu1 %4278, %v1923_v18  }
  0x79   :  { %2290 = vperm.xlu0 %4277, %v2148_v21  }
  0x7a   :  { %551 = vmatmul.mubr.bf16.gmra.mxu0 %v4330_v51  ;;  %2066 = vperm.xlu1 %4278, %v1924_v20  }
  0x7b   :  { %558 = vmatprep.mubr.bf16.mxu0 %v4331_v52 }
  0x7d   :  { %2295 = vperm.xlu0 %4277, %v2149_v23   ;;  %v83_v23 = vld [vmem:[#allocation2 + $0x28] sm:$0xff] }
  0x7e   :  { %2071 = vperm.xlu1 %4278, %v1925_v22  }
  0x81   :  { %2300 = vperm.xlu0 %4277, %v2150_v25  }
  0x82   :  { %559 = vmatmul.mubr.bf16.gmra.mxu0 %v4333_v57  ;;  %2076 = vperm.xlu1 %4278, %v1926_v24  }
  0x83   :  { %566 = vmatprep.mubr.bf16.mxu0 %v4334_v58 }
  0x85   :  { %2305 = vperm.xlu0 %4277, %v2151_v27  }
  0x86   :  { %2081 = vperm.xlu1 %4278, %v1927_v26  }
  0x8a   :  { %567 = vmatmul.mubr.bf16.gmra.mxu0 %v4336_v63 }
  0x8b   :  { %574 = vmatprep.mubr.bf16.mxu0 %v4337_v0 }
  0x92   :  { %575 = vmatmul.mubr.bf16.gmra.mxu0 %v4339_v5 }
  0x93   :  { %582 = vmatprep.mubr.bf16.mxu0 %v4340_v6 }
  0x9a   :  { %583 = vmatmul.mubr.bf16.gmra.mxu0 %v4342_v11 }
  0xcf   :  { %v4020_v35 = vpop.f32.mrf.mxu1 }
  0xd0   :  { %v903_v38 = vadd.f32 %v4020_v35, %v4935_v32 }
  0xd1   :  { %v897_v40 = vpop.f32.mrf.mxu1 }
  0xd2   :  { %v1089_v42 = vmul.f32 0.01, %v903_v38  ;;  %v898_v43 = vadd.f32 %v4935_v32, %v897_v40  ;;  %vm1057_vm2 = vcmp.gt.f32.partialorder %v903_v38, 0.0 }
  0xd3   :  { %v4023_v45 = vpop.f32.mrf.mxu1 }
  0xd4   :  { %v1088_v48 = vmul.f32 0.01, %v898_v43  ;;  %v4940_v49 = vsel %vm1057_vm2, %v903_v38, %v1089_v42  ;;  %v913_v50 = vadd.f32 %v4023_v45, %v4935_v32  ;;  %vm1056_vm3 = vcmp.gt.f32.partialorder %v898_v43, 0.0  ;;  %v84_v38 = vld [vmem:[#allocation2 + $0x30] sm:$0xff] }
  0xd5   :  { %1579 = vrot.lane.b32.xlu0 %v4940_v49, %s4377_s6  ;;  %v907_v52 = vpop.f32.mrf.mxu1 }
  0xd6   :  { %v1091_v54 = vmul.f32 0.01, %v913_v50  ;;  %v4946_v55 = vsel %vm1056_vm3, %v898_v43, %v1088_v48  ;;  %v908_v56 = vadd.f32 %v4935_v32, %v907_v52  ;;  %vm1059_vm4 = vcmp.gt.f32.partialorder %v913_v50, 0.0 }
  0xd7   :  { %6722 = vst [vmem:[#allocation3_spill] sm:$0xff] %v4946_v55  ;;  %v4026_v58 = vpop.f32.mrf.mxu1 }
  0xd8   :  { %v1090_v62 = vmul.f32 0.01, %v908_v56  ;;  %v4949_v63 = vsel %vm1059_vm4, %v913_v50, %v1091_v54  ;;  %v923_v0 = vadd.f32 %v4026_v58, %v4935_v32  ;;  %vm1058_vm5 = vcmp.gt.f32.partialorder %v908_v56, 0.0 }
  0xd9   :  { %1577 = vrot.lane.b32.xlu0 %v4946_v55, %s4377_s6  ;;  %v917_v2 = vpop.f32.mrf.mxu1  ;;  %1583 = vrot.lane.b32.xlu1 %v4949_v63, %s4377_s6 }
  0xda   :  { %v918_v4 = vadd.f32 %v4935_v32, %v917_v2  ;;  %v1093_v6 = vmul.f32 0.01, %v923_v0  ;;  %v4959_v7 = vsel %vm1058_vm5, %v908_v56, %v1090_v62  ;;  %vm1061_vm6 = vcmp.gt.f32.partialorder %v923_v0, 0.0 }
  0xdb   :  { %6723 = vst [vmem:[#allocation4_spill] sm:$0xff] %v4959_v7  ;;  %v4029_v8 = vpop.f32.mrf.mxu1 }
  0xdc   :  { %v1092_v12 = vmul.f32 0.01, %v918_v4  ;;  %v933_v13 = vadd.f32 %v4029_v8, %v4935_v32  ;;  %vm1060_vm7 = vcmp.gt.f32.partialorder %v918_v4, 0.0  ;;  %v4969_v20 = vsel %vm1061_vm6, %v923_v0, %v1093_v6 }
  0xdd   :  { %v927_v15 = vpop.f32.mrf.mxu1  ;;  %1581 = vrot.lane.b32.xlu1 %v4959_v7, %s4377_s6  ;;  %6724 = vst [vmem:[#allocation5_spill] sm:$0xff] %v4969_v20 }
  0xde   :  { %v4966_v17 = vsel %vm1060_vm7, %v918_v4, %v1092_v12  ;;  %v928_v18 = vadd.f32 %v4935_v32, %v927_v15  ;;  %v1095_v21 = vmul.f32 0.01, %v933_v13  ;;  %vm1063_vm8 = vcmp.gt.f32.partialorder %v933_v13, 0.0 }
  0xdf   :  { %1585 = vrot.lane.b32.xlu0 %v4966_v17, %s4377_s6  ;;  %v4032_v22 = vpop.f32.mrf.mxu1 }
  0xe0   :  { %v1094_v26 = vmul.f32 0.01, %v928_v18  ;;  %v943_v27 = vadd.f32 %v4032_v22, %v4935_v32  ;;  %vm1062_vm9 = vcmp.gt.f32.partialorder %v928_v18, 0.0  ;;  %v4981_v35 = vsel %vm1063_vm8, %v933_v13, %v1095_v21  ;;  %v87_v22 = vld [vmem:[#allocation2 + $0x48] sm:$0xff] }
  0xe1   :  { %1587 = vrot.lane.b32.xlu1 %v4969_v20, %s4377_s6  ;;  %6725 = vst [vmem:[#allocation6_spill] sm:$0xff] %v4981_v35 }
  0xe2   :  { %v3758_v28 = vpop.f32.mrf.mxu0  ;;  %vm1065_vm10 = vcmp.gt.f32.partialorder %v943_v27, 0.0 }
  0xe4   :  { %v3759_v30 = vpop.f32.mrf.mxu0 }
  0xe5   :  { %v3760_v31 = vadd.f32 %v3759_v30, %v3758_v28  ;;  %1591 = vrot.lane.b32.xlu1 %v4981_v35, %s4377_s6 }
  0xe6   :  { %v3761_v33 = vpop.f32.mrf.mxu0 }
  0xe7   :  { %v591_v34 = vadd.f32 %v3760_v31, %v78_v29  ;;  %v937_v29 = vpop.f32.mrf.mxu1  ;;  %v4978_v31 = vsel %vm1062_vm9, %v928_v18, %v1094_v26 }
  0xe8   :  { %v3762_v37 = vpop.f32.mrf.mxu0  ;;  %1589 = vrot.lane.b32.xlu0 %v4978_v31, %s4377_s6 }
  0xe9   :  { %624 = vst.msk [vmem:[#allocation2] sm:$0xff] %vm45_vm1, %v591_v34  ;;  %v3763_v39 = vadd.f32 %v3762_v37, %v3761_v33  ;;  %v938_v33 = vadd.f32 %v4935_v32, %v937_v29  ;;  %v4035_v37 = vpop.f32.mrf.mxu1 }
  0xea   :  { %v3764_v41 = vpop.f32.mrf.mxu0  ;;  %v953_v42 = vadd.f32 %v4035_v37, %v4935_v32 }
  0xeb   :  { %v592_v44 = vadd.f32 %v3763_v39, %v79_v36  ;;  %v1097_v36 = vmul.f32 0.01, %v943_v27  ;;  %vm1064_vm11 = vcmp.gt.f32.partialorder %v938_v33, 0.0 }
  0xec   :  { %v3765_v47 = vpop.f32.mrf.mxu0  ;;  %vm1067_vm12 = vcmp.gt.f32.partialorder %v953_v42, 0.0 }
  0xed   :  { %625 = vst.msk [vmem:[#allocation2 + $0x8] sm:$0xff] %vm45_vm1, %v592_v44  ;;  %v3766_v51 = vadd.f32 %v3765_v47, %v3764_v41  ;;  %v1096_v41 = vmul.f32 0.01, %v938_v33  ;;  %v947_v44 = vpop.f32.mrf.mxu1  ;;  %v4993_v50 = vsel %vm1065_vm10, %v943_v27, %v1097_v36 }
  0xee   :  { %v3767_v53 = vpop.f32.mrf.mxu0  ;;  %v948_v47 = vadd.f32 %v4935_v32, %v947_v44  ;;  %6726 = vst [vmem:[#allocation7_spill] sm:$0xff] %v4993_v50  ;;  %1595 = vrot.lane.b32.xlu1 %v4993_v50, %s4377_s6 }
  0xef   :  { %v593_v57 = vadd.f32 %v3766_v51, %v80_v46  ;;  %v4990_v46 = vsel %vm1064_vm11, %v938_v33, %v1096_v41  ;;  %v1099_v51 = vmul.f32 0.01, %v953_v42  ;;  %v4038_v52 = vpop.f32.mrf.mxu1 }
  0xf0   :  { %v3768_v60 = vpop.f32.mrf.mxu0  ;;  %v659_v61 = vld [vmem:[#allocation2] sm:$0xff]  ;;  %1593 = vrot.lane.b32.xlu0 %v4990_v46, %s4377_s6  ;;  %v963_v58 = vadd.f32 %v4038_v52, %v4935_v32  ;;  %vm1066_vm13 = vcmp.gt.f32.partialorder %v948_v47, 0.0 }
  0xf1   :  { %626 = vst.msk [vmem:[#allocation2 + $0x10] sm:$0xff] %vm45_vm1, %v593_v57  ;;  %v3769_v1 = vadd.f32 %v3768_v60, %v3767_v53  ;;  %4082 = vmatprep.mubr.msk.f32.mxu1 %vm45_vm1, %v659_v61  ;;  %v85_v53 = vld [vmem:[#allocation2 + $0x38] sm:$0xff]  ;;  %v1098_v57 = vmul.f32 0.01, %v948_v47  ;;  %v957_v60 = vpop.f32.mrf.mxu1  ;;  %v5005_v2 = vsel %vm1067_vm12, %v953_v42, %v1099_v51 }
  0xf2   :  { %v3770_v3 = vpop.f32.mrf.mxu0  ;;  %v958_v0 = vadd.f32 %v4935_v32, %v957_v60  ;;  %6728 = vst [vmem:[#allocation9_spill] sm:$0xff] %v5005_v2  ;;  %vm1069_vm14 = vcmp.gt.f32.partialorder %v963_v58, 0.0  ;;  %1599 = vrot.lane.b32.xlu1 %v5005_v2, %s4377_s6 }
  0xf3   :  { %v594_v5 = vadd.f32 %v3769_v1, %v81_v59  ;;  %v5002_v62 = vsel %vm1066_vm13, %v948_v47, %v1098_v57  ;;  %v4041_v4 = vpop.f32.mrf.mxu1  ;;  %v89_v57 = vld [vmem:[#allocation2 + $0x58] sm:$0xff] }
  0xf4   :  { %v3771_v10 = vpop.f32.mrf.mxu0  ;;  %v660_v11 = vld [vmem:[#allocation2 + $0x8] sm:$0xff]  ;;  %6727 = vst [vmem:[#allocation8_spill] sm:$0xff] %v5002_v62  ;;  %1597 = vrot.lane.b32.xlu0 %v5002_v62, %s4377_s6  ;;  %vm1068_vm15 = vcmp.gt.f32.partialorder %v958_v0, 0.0 }
  0xf5   :  { %627 = vst.msk [vmem:[#allocation2 + $0x18] sm:$0xff] %vm45_vm1, %v594_v5  ;;  %v3772_v14 = vadd.f32 %v3771_v10, %v3770_v3  ;;  %4083 = vmatmul.mubr.msk.f32.vlgmr.msra.gmra.mxu1 %vm45_vm1, %v660_v11  ;;  %v1101_v3 = vmul.f32 0.01, %v963_v58  ;;  %v86_v5 = vld [vmem:[#allocation2 + $0x40] sm:$0xff]  ;;  %v973_v10 = vadd.f32 %v4041_v4, %v4935_v32  ;;  %v967_v12 = vpop.f32.mrf.mxu1 }
  0xf6   :  { %v3773_v16 = vpop.f32.mrf.mxu0  ;;  %v968_v15 = vadd.f32 %v4935_v32, %v967_v12 }
  0xf7   :  { %v595_v19 = vadd.f32 %v3772_v14, %v82_v9  ;;  %v1100_v9 = vmul.f32 0.01, %v958_v0  ;;  %v5017_v18 = vsel %vm1069_vm14, %v963_v58, %v1101_v3  ;;  %v4044_v21 = vpop.f32.mrf.mxu1  ;;  %vm1071_vm0 = vcmp.gt.f32.partialorder %v973_v10, 0.0 }
  0xf8   :  { %v3774_v24 = vpop.f32.mrf.mxu0  ;;  %v661_v25 = vld [vmem:[#allocation2 + $0x10] sm:$0xff]  ;;  %6730 = vst [vmem:[#allocation11_spill] sm:$0xff] %v5017_v18  ;;  %v983_v26 = vadd.f32 %v4044_v21, %v4935_v32  ;;  %vm1070_vm2 = vcmp.gt.f32.partialorder %v968_v15, 0.0  ;;  %1603 = vrot.lane.b32.xlu1 %v5017_v18, %s4377_s6 }
  0xf9   :  { %628 = vst.msk [vmem:[#allocation2 + $0x20] sm:$0xff] %vm45_vm1, %v595_v19  ;;  %v3775_v28 = vadd.f32 %v3774_v24, %v3773_v16  ;;  %4085 = vmatprep.mubr.msk.f32.mxu1 %vm45_vm1, %v661_v25  ;;  %v5014_v14 = vsel %vm1068_vm15, %v958_v0, %v1100_v9  ;;  %v1103_v19 = vmul.f32 0.01, %v973_v10  ;;  %v1102_v25 = vmul.f32 0.01, %v968_v15 }
  0xfa   :  { %v3776_v30 = vpop.f32.mrf.mxu0  ;;  %6729 = vst [vmem:[#allocation10_spill] sm:$0xff] %v5014_v14  ;;  %1601 = vrot.lane.b32.xlu0 %v5014_v14, %s4377_s6  ;;  %v1105_v37 = vmul.f32 0.01, %v983_v26  ;;  %vm1073_vm3 = vcmp.gt.f32.partialorder %v983_v26, 0.0  ;;  %v5389_v14 = vadd.f32 1.0, %v4969_v20 }
  0xfb   :  { %v596_v34 = vadd.f32 %v3775_v28, %v83_v23  ;;  %v977_v28 = vpop.f32.mrf.mxu1  ;;  %v5029_v36 = vsel %vm1071_vm0, %v973_v10, %v1103_v19 }
  0xfc   :  { %v3777_v39 = vpop.f32.mrf.mxu0  ;;  %v662_v40 = vld [vmem:[#allocation2 + $0x18] sm:$0xff]  ;;  %v978_v33 = vadd.f32 %v4935_v32, %v977_v28  ;;  %6732 = vst [vmem:[#allocation13_spill] sm:$0xff] %v5029_v36  ;;  %1607 = vrot.lane.b32.xlu1 %v5029_v36, %s4377_s6 }
  0xfd   :  { %629 = vst.msk [vmem:[#allocation2 + $0x28] sm:$0xff] %vm45_vm1, %v596_v34  ;;  %v3778_v43 = vadd.f32 %v3777_v39, %v3776_v30  ;;  %4086 = vmatmul.mubr.msk.f32.gmra.mxu1 %vm45_vm1, %v662_v40  ;;  %v5026_v30 = vsel %vm1070_vm2, %v968_v15, %v1102_v25  ;;  %v88_v39 = vld [vmem:[#allocation2 + $0x50] sm:$0xff] }
  0xfe   :  { %v3779_v45 = vpop.f32.mrf.mxu0  ;;  %6731 = vst [vmem:[#allocation12_spill] sm:$0xff] %v5026_v30  ;;  %1605 = vrot.lane.b32.xlu0 %v5026_v30, %s4377_s6  ;;  %v1104_v42 = vmul.f32 0.01, %v978_v33  ;;  %vm1072_vm4 = vcmp.gt.f32.partialorder %v978_v33, 0.0  ;;  %v2441_v30 = vld [vmem:[%s6638_s2] sm:$0xff] }
  0xff   :  { %v597_v48 = vadd.f32 %v3778_v43, %v84_v38  ;;  %v4047_v38 = vpop.f32.mrf.mxu1  ;;  %4210 = vmatprep.mubr.msk.f32.mxu0 %vm45_vm1, %v2441_v30  ;;  %v2443_v30 = vld [vmem:[%s6638_s2 + $0x10] sm:$0xff] }
 0x100   :  { %v3780_v54 = vpop.f32.mrf.mxu0  ;;  %v663_v56 = vld [vmem:[#allocation2 + $0x20] sm:$0xff]  ;;  %v993_v43 = vadd.f32 %v4047_v38, %v4935_v32 }
 0x101   :  { %630 = vst.msk [vmem:[#allocation2 + $0x30] sm:$0xff] %vm45_vm1, %v597_v48  ;;  %v3781_v59 = vadd.f32 %v3780_v54, %v3779_v45  ;;  %4088 = vmatprep.mubr.msk.f32.mxu1 %vm45_vm1, %v663_v56  ;;  %v987_v45 = vpop.f32.mrf.mxu1  ;;  %v5038_v48 = vsel %vm1072_vm4, %v978_v33, %v1104_v42  ;;  %vm3490_vm4 = vcmask 7168  }
 0x102   :  { %v3782_v61 = vpop.f32.mrf.mxu0  ;;  %6733 = vst [vmem:[#allocation14_spill] sm:$0xff] %v5038_v48  ;;  %v988_v51 = vadd.f32 %v4935_v32, %v987_v45  ;;  %v1107_v54 = vmul.f32 0.01, %v993_v43  ;;  %1609 = vrot.lane.b32.xlu0 %v5038_v48, %s4377_s6  ;;  %vm1075_vm5 = vcmp.gt.f32.partialorder %v993_v43, 0.0 }
 0x103   :  { %v598_v1 = vadd.f32 %v3781_v59, %v85_v53  ;;  %v5041_v53 = vsel %vm1073_vm3, %v983_v26, %v1105_v37  ;;  %v4050_v56 = vpop.f32.mrf.mxu1 }
 0x104   :  { %v3783_v6 = vpop.f32.mrf.mxu0  ;;  %v664_v8 = vld [vmem:[#allocation2 + $0x28] sm:$0xff]  ;;  %6734 = vst [vmem:[#allocation15_spill] sm:$0xff] %v5041_v53  ;;  %v1106_v60 = vmul.f32 0.01, %v988_v51  ;;  %vm1074_vm6 = vcmp.gt.f32.partialorder %v988_v51, 0.0  ;;  %1611 = vrot.lane.b32.xlu1 %v5041_v53, %s4377_s6 }
 0x105   :  { %631 = vst.msk [vmem:[#allocation2 + $0x38] sm:$0xff] %vm45_vm1, %v598_v1  ;;  %v3784_v11 = vadd.f32 %v3783_v6, %v3782_v61  ;;  %4089 = vmatmul.mubr.msk.f32.gmra.mxu1 %vm45_vm1, %v664_v8  ;;  %v1003_v61 = vadd.f32 %v4050_v56, %v4935_v32  ;;  %v997_v1 = vpop.f32.mrf.mxu1  ;;  %v5053_v8 = vsel %vm1075_vm5, %v993_v43, %v1107_v54  ;;  %vm3523_vm5 = vcmask 15360  }
 0x106   :  { %v3785_v13 = vpop.f32.mrf.mxu0  ;;  %v5050_v4 = vsel %vm1074_vm6, %v988_v51, %v1106_v60  ;;  %6736 = vst [vmem:[#allocation17_spill] sm:$0xff] %v5053_v8  ;;  %v92_v51 = vld [vmem:[#allocation2 + $0x70] sm:$0xff] }
 0x107   :  { %v599_v16 = vadd.f32 %v3784_v11, %v86_v5  ;;  %6735 = vst [vmem:[#allocation16_spill] sm:$0xff] %v5050_v4  ;;  %v998_v5 = vadd.f32 %v4935_v32, %v997_v1  ;;  %v1109_v9 = vmul.f32 0.01, %v1003_v61  ;;  %1613 = vrot.lane.b32.xlu0 %v5050_v4, %s4377_s6  ;;  %v4053_v10 = vpop.f32.mrf.mxu1  ;;  %v90_v11 = vld [vmem:[#allocation2 + $0x60] sm:$0xff]  ;;  %vm1077_vm7 = vcmp.gt.f32.partialorder %v1003_v61, 0.0 }
 0x108   :  { %v3786_v23 = vpop.f32.mrf.mxu0  ;;  %v665_v24 = vld [vmem:[#allocation2 + $0x30] sm:$0xff]  ;;  %1615 = vrot.lane.b32.xlu1 %v5053_v8, %s4377_s6 }
 0x109   :  { %632 = vst.msk [vmem:[#allocation2 + $0x40] sm:$0xff] %vm45_vm1, %v599_v16  ;;  %v3787_v27 = vadd.f32 %v3786_v23, %v3785_v13  ;;  %4091 = vmatprep.mubr.msk.f32.mxu1 %vm45_vm1, %v665_v24  ;;  %v1108_v15 = vmul.f32 0.01, %v998_v5  ;;  %v1013_v16 = vadd.f32 %v4053_v10, %v4935_v32  ;;  %vm1076_vm8 = vcmp.gt.f32.partialorder %v998_v5, 0.0  ;;  %v1007_v21 = vpop.f32.mrf.mxu1  ;;  %v94_v10 = vld [vmem:[#allocation2 + $0x80] sm:$0xff] }
 0x10a   :  { %v3788_v29 = vpop.f32.mrf.mxu0  ;;  %v1008_v24 = vadd.f32 %v4935_v32, %v1007_v21  ;;  %v5065_v26 = vsel %vm1077_vm7, %v1003_v61, %v1109_v9 }
 0x10b   :  { %v600_v34 = vadd.f32 %v3787_v27, %v87_v22  ;;  %v5062_v23 = vsel %vm1076_vm8, %v998_v5, %v1108_v15  ;;  %6738 = vst [vmem:[#allocation19_spill] sm:$0xff] %v5065_v26  ;;  %v1111_v27 = vmul.f32 0.01, %v1013_v16  ;;  %v4056_v28 = vpop.f32.mrf.mxu1  ;;  %vm1079_vm9 = vcmp.gt.f32.partialorder %v1013_v16, 0.0 }
 0x10c   :  { %v3789_v40 = vpop.f32.mrf.mxu0  ;;  %v666_v41 = vld [vmem:[#allocation2 + $0x38] sm:$0xff]  ;;  %6737 = vst [vmem:[#allocation18_spill] sm:$0xff] %v5062_v23  ;;  %1617 = vrot.lane.b32.xlu0 %v5062_v23, %s4377_s6  ;;  %v1110_v37 = vmul.f32 0.01, %v1008_v24  ;;  %v1023_v38 = vadd.f32 %v4056_v28, %v4935_v32  ;;  %vm1078_vm10 = vcmp.gt.f32.partialorder %v1008_v24, 0.0  ;;  %1619 = vrot.lane.b32.xlu1 %v5065_v26, %s4377_s6 }
 0x10d   :  { %633 = vst.msk [vmem:[#allocation2 + $0x48] sm:$0xff] %vm45_vm1, %v600_v34  ;;  %v3790_v44 = vadd.f32 %v3789_v40, %v3788_v29  ;;  %4092 = vmatmul.mubr.msk.f32.gmra.mxu1 %vm45_vm1, %v666_v41  ;;  %v91_v29 = vld [vmem:[#allocation2 + $0x68] sm:$0xff]  ;;  %v1017_v40 = vpop.f32.mrf.mxu1  ;;  %v5077_v45 = vsel %vm1079_vm9, %v1013_v16, %v1111_v27  ;;  %v5097_v16 = vpop.permute.xlu0 %1931 }
 0x10e   :  { %v3791_v47 = vpop.f32.mrf.mxu0  ;;  %v5074_v42 = vsel %vm1078_vm10, %v1008_v24, %v1110_v37  ;;  %v1018_v43 = vadd.f32 %v4935_v32, %v1017_v40  ;;  %6740 = vst [vmem:[#allocation21_spill] sm:$0xff] %v5077_v45  ;;  %vm1081_vm11 = vcmp.gt.f32.partialorder %v1023_v38, 0.0 }
 0x10f   :  { %v601_v52 = vadd.f32 %v3790_v44, %v88_v39  ;;  %6739 = vst [vmem:[#allocation20_spill] sm:$0xff] %v5074_v42 }
 0x110   :  { %v3792_v58 = vpop.f32.mrf.mxu0  ;;  %v667_v59 = vld [vmem:[#allocation2 + $0x40] sm:$0xff]  ;;  %1621 = vrot.lane.b32.xlu0 %v5074_v42, %s4377_s6  ;;  %v1112_v56 = vmul.f32 0.01, %v1018_v43  ;;  %vm1080_vm12 = vcmp.gt.f32.partialorder %v1018_v43, 0.0  ;;  %1623 = vrot.lane.b32.xlu1 %v5077_v45, %s4377_s6 }
 0x111   :  { %634 = vst.msk [vmem:[#allocation2 + $0x50] sm:$0xff] %vm45_vm1, %v601_v52  ;;  %v3793_v0 = vadd.f32 %v3792_v58, %v3791_v47  ;;  %4094 = vmatprep.mubr.msk.f32.mxu1 %vm45_vm1, %v667_v59  ;;  %v1113_v47 = vmul.f32 0.01, %v1023_v38 }
 0x112   :  { %v3794_v3 = vpop.f32.mrf.mxu0  ;;  %v5085_v59 = vsel %vm1080_vm12, %v1018_v43, %v1112_v56 }
 0x113   :  { %v602_v6 = vadd.f32 %v3793_v0, %v89_v57  ;;  %6741 = vst [vmem:[#allocation22_spill] sm:$0xff] %v5085_v59  ;;  %v5087_v61 = vsel %vm1081_vm11, %v1023_v38, %v1113_v47  ;;  %v93_v0 = vld [vmem:[#allocation2 + $0x78] sm:$0xff] }
 0x114   :  { %v3795_v12 = vpop.f32.mrf.mxu0  ;;  %v668_v13 = vld [vmem:[#allocation2 + $0x48] sm:$0xff]  ;;  %6742 = vst [vmem:[#allocation23_spill] sm:$0xff] %v5087_v61  ;;  %1625 = vrot.lane.b32.xlu0 %v5085_v59, %s4377_s6  ;;  %1627 = vrot.lane.b32.xlu1 %v5087_v61, %s4377_s6 }
 0x115   :  { %635 = vst.msk [vmem:[#allocation2 + $0x58] sm:$0xff] %vm45_vm1, %v602_v6  ;;  %v3796_v19 = vadd.f32 %v3795_v12, %v3794_v3  ;;  %4095 = vmatmul.mubr.msk.f32.gmra.mxu1 %vm45_vm1, %v668_v13  ;;  %v4059_v13 = vpop.f32.mrf.mxu1 }
 0x116   :  { %v3797_v22 = vpop.f32.mrf.mxu0  ;;  %v1033_v21 = vadd.f32 %v4059_v13, %v4935_v32 }
 0x117   :  { %v603_v25 = vadd.f32 %v3796_v19, %v90_v11  ;;  %v5099_v19 = vpop.permute.xlu1 %1936  ;;  %v1027_v24 = vpop.f32.mrf.mxu1 }
 0x118   :  { %v3798_v33 = vpop.f32.mrf.mxu0  ;;  %v669_v34 = vld [vmem:[#allocation2 + $0x50] sm:$0xff]  ;;  %v1115_v27 = vmul.f32 0.01, %v1033_v21  ;;  %v1028_v28 = vadd.f32 %v4935_v32, %v1027_v24  ;;  %vm1083_vm13 = vcmp.gt.f32.partialorder %v1033_v21, 0.0 }
 0x119   :  { %636 = vst.msk [vmem:[#allocation2 + $0x60] sm:$0xff] %vm45_vm1, %v603_v25  ;;  %v3799_v39 = vadd.f32 %v3798_v33, %v3797_v22  ;;  %4097 = vmatprep.mubr.msk.f32.mxu1 %vm45_vm1, %v669_v34  ;;  %v4062_v37 = vpop.f32.mrf.mxu1 }
 0x11a   :  { %v3800_v41 = vpop.f32.mrf.mxu0  ;;  %v1043_v40 = vadd.f32 %v4062_v37, %v4935_v32  ;;  %vm1082_vm14 = vcmp.gt.f32.partialorder %v1028_v28, 0.0 }
 0x11b   :  { %v604_v44 = vadd.f32 %v3799_v39, %v91_v29  ;;  %v95_v29 = vld [vmem:[#allocation2 + $0x88] sm:$0xff]  ;;  %v1114_v39 = vmul.f32 0.01, %v1028_v28 }
 0x11c   :  { %v3801_v52 = vpop.f32.mrf.mxu0  ;;  %v670_v54 = vld [vmem:[#allocation2 + $0x58] sm:$0xff]  ;;  %vm1085_vm15 = vcmp.gt.f32.partialorder %v1043_v40, 0.0 }
 0x11d   :  { %637 = vst.msk [vmem:[#allocation2 + $0x68] sm:$0xff] %vm45_vm1, %v604_v44  ;;  %v3802_v57 = vadd.f32 %v3801_v52, %v3800_v41  ;;  %4098 = vmatmul.mubr.msk.f32.gmra.mxu1 %vm45_vm1, %v670_v54  ;;  %v5106_v41 = vsel %vm1083_vm13, %v1033_v21, %v1115_v27  ;;  %v1037_v44 = vpop.f32.mrf.mxu1  ;;  %v1117_v52 = vmul.f32 0.01, %v1043_v40  ;;  %v5113_v56 = vsel %vm1082_vm14, %v1028_v28, %v1114_v39 }
 0x11e   :  { %v3803_v58 = vpop.f32.mrf.mxu0  ;;  %6743 = vst [vmem:[#allocation24_spill] sm:$0xff] %v5106_v41  ;;  %1631 = vrot.lane.b32.xlu1 %v5106_v41, %s4377_s6  ;;  %v1038_v54 = vadd.f32 %v4935_v32, %v1037_v44  ;;  %6744 = vst [vmem:[#allocation25_spill] sm:$0xff] %v5113_v56  ;;  %1629 = vrot.lane.b32.xlu0 %v5113_v56, %s4377_s6 }
 0x11f   :  { %v605_v60 = vadd.f32 %v3802_v57, %v92_v51  ;;  %v5110_v51 = vpop.permute.xlu0 %1946  ;;  %v96_v57 = vld [vmem:[#allocation2 + $0x90] sm:$0xff] }
 0x120   :  { %v3804_v1 = vpop.f32.mrf.mxu0  ;;  %v671_v3 = vld [vmem:[#allocation2 + $0x60] sm:$0xff]  ;;  %vm1084_vm0 = vcmp.gt.f32.partialorder %v1038_v54, 0.0 }
 0x121   :  { %638 = vst.msk [vmem:[#allocation2 + $0x70] sm:$0xff] %vm45_vm1, %v605_v60  ;;  %v3805_v5 = vadd.f32 %v3804_v1, %v3803_v58  ;;  %4100 = vmatprep.mubr.msk.f32.mxu1 %vm45_vm1, %v671_v3  ;;  %v1116_v3 = vmul.f32 0.01, %v1038_v54 }
 0x122   :  { %v3806_v6 = vpop.f32.mrf.mxu0 }
 0x123   :  { %v606_v9 = vadd.f32 %v3805_v5, %v93_v0  ;;  %v5115_v0 = vpop.permute.xlu1 %1941  ;;  %v4065_v5 = vpop.f32.mrf.mxu1  ;;  %v5126_v13 = vsel %vm1084_vm0, %v1038_v54, %v1116_v3 }
 0x124   :  { %v3807_v11 = vpop.f32.mrf.mxu0  ;;  %v672_v12 = vld [vmem:[#allocation2 + $0x68] sm:$0xff]  ;;  %6746 = vst [vmem:[#allocation27_spill] sm:$0xff] %v5126_v13  ;;  %1633 = vrot.lane.b32.xlu0 %v5126_v13, %s4377_s6  ;;  %v5133_v28 = vpop.permute.xlu0 %1956 }
 0x125   :  { %639 = vst.msk [vmem:[#allocation2 + $0x78] sm:$0xff] %vm45_vm1, %v606_v9  ;;  %v3808_v15 = vadd.f32 %v3807_v11, %v3806_v6  ;;  %4101 = vmatmul.mubr.msk.f32.gmra.mxu1 %vm45_vm1, %v672_v12  ;;  %v5121_v6 = vsel %vm1085_vm15, %v1043_v40, %v1117_v52  ;;  %v1047_v12 = vpop.f32.mrf.mxu1 }
 0x126   :  { %v3809_v22 = vpop.f32.mrf.mxu0  ;;  %6745 = vst [vmem:[#allocation26_spill] sm:$0xff] %v5121_v6  ;;  %1635 = vrot.lane.b32.xlu1 %v5121_v6, %s4377_s6 }
 0x127   :  { %v607_v25 = vadd.f32 %v3808_v15, %v94_v10  ;;  %v1053_v10 = vadd.f32 %v4065_v5, %v4935_v32  ;;  %v97_v15 = vld [vmem:[#allocation2 + $0x98] sm:$0xff] }
 0x128   :  { %v3810_v33 = vpop.f32.mrf.mxu0  ;;  %v673_v34 = vld [vmem:[#allocation2 + $0x70] sm:$0xff]  ;;  %v5147_v54 = vpop.permute.xlu0 %1966 }
 0x129   :  { %640 = vst.msk [vmem:[#allocation2 + $0x80] sm:$0xff] %vm45_vm1, %v607_v25  ;;  %v3811_v38 = vadd.f32 %v3810_v33, %v3809_v22  ;;  %4103 = vmatprep.mubr.msk.f32.mxu1 %vm45_vm1, %v673_v34  ;;  %v1119_v24 = vmul.f32 0.01, %v1053_v10  ;;  %v1048_v25 = vadd.f32 %v4935_v32, %v1047_v12  ;;  %vm1087_vm2 = vcmp.gt.f32.partialorder %v1053_v10, 0.0  ;;  %v5135_v33 = vpop.permute.xlu1 %1951  ;;  %v98_v32 = vld [vmem:[#allocation2 + $0xa0] sm:$0xff] }
 0x12a   :  { %v3812_v43 = vpop.f32.mrf.mxu0 }
 0x12b   :  { %v608_v47 = vadd.f32 %v3811_v38, %v95_v29  ;;  %v1118_v34 = vmul.f32 0.01, %v1048_v25  ;;  %v5137_v37 = vsel %vm1087_vm2, %v1053_v10, %v1119_v24  ;;  %vm1086_vm3 = vcmp.gt.f32.partialorder %v1048_v25, 0.0  ;;  %v100_v10 = vld [vmem:[#allocation2 + $0xb0] sm:$0xff] }
 0x12c   :  { %v3813_v58 = vpop.f32.mrf.mxu0  ;;  %v674_v60 = vld [vmem:[#allocation2 + $0x78] sm:$0xff]  ;;  %6747 = vst [vmem:[#allocation28_spill] sm:$0xff] %v5137_v37  ;;  %1639 = vrot.lane.b32.xlu1 %v5137_v37, %s4377_s6 }
 0x12d   :  { %641 = vst.msk [vmem:[#allocation2 + $0x88] sm:$0xff] %vm45_vm1, %v608_v47  ;;  %v3814_v1 = vadd.f32 %v3813_v58, %v3812_v43  ;;  %4104 = vmatmul.mubr.msk.f32.gmra.mxu1 %vm45_vm1, %v674_v60  ;;  %v5141_v43 = vsel %vm1086_vm3, %v1048_v25, %v1118_v34 }
 0x12e   :  { %v3815_v9 = vpop.f32.mrf.mxu0  ;;  %6748 = vst [vmem:[#allocation29_spill] sm:$0xff] %v5141_v43  ;;  %1637 = vrot.lane.b32.xlu0 %v5141_v43, %s4377_s6 }
 0x12f   :  { %v609_v11 = vadd.f32 %v3814_v1, %v96_v57  ;;  %v99_v57 = vld [vmem:[#allocation2 + $0xa8] sm:$0xff]  ;;  %v5149_v1 = vpop.permute.xlu1 %1961 }
 0x130   :  { %v3816_v21 = vpop.f32.mrf.mxu0  ;;  %v675_v22 = vld [vmem:[#allocation2 + $0x80] sm:$0xff]  ;;  %6749 = vst [vmem:[#allocation30_spill] sm:$0xff] %v5149_v1 }
 0x131   :  { %642 = vst.msk [vmem:[#allocation2 + $0x90] sm:$0xff] %vm45_vm1, %v609_v11  ;;  %v3817_v27 = vadd.f32 %v3816_v21, %v3815_v9  ;;  %4106 = vmatprep.mubr.msk.f32.mxu1 %vm45_vm1, %v675_v22  ;;  %v5155_v21 = vpop.permute.xlu0 %1976 }
 0x132   :  { %v3818_v29 = vpop.f32.mrf.mxu0  ;;  %6750 = vst [vmem:[#allocation31_spill] sm:$0xff] %v5155_v21 }
 0x133   :  { %v610_v38 = vadd.f32 %v3817_v27, %v97_v15  ;;  %v5157_v24 = vpop.permute.xlu1 %1971  ;;  %v101_v27 = vld [vmem:[#allocation2 + $0xb8] sm:$0xff] }
 0x134   :  { %v3819_v39 = vpop.f32.mrf.mxu0  ;;  %v676_v40 = vld [vmem:[#allocation2 + $0x88] sm:$0xff]  ;;  %6751 = vst [vmem:[#allocation32_spill] sm:$0xff] %v5157_v24 }
 0x135   :  { %643 = vst.msk [vmem:[#allocation2 + $0x98] sm:$0xff] %vm45_vm1, %v610_v38  ;;  %v3820_v44 = vadd.f32 %v3819_v39, %v3818_v29  ;;  %4107 = vmatmul.mubr.msk.f32.gmra.mxu1 %vm45_vm1, %v676_v40  ;;  %v5161_v40 = vpop.permute.xlu0 %1986 }
 0x136   :  { %v3821_v47 = vpop.f32.mrf.mxu0  ;;  %6752 = vst [vmem:[#allocation33_spill] sm:$0xff] %v5161_v40 }
 0x137   :  { %v611_v52 = vadd.f32 %v3820_v44, %v98_v32  ;;  %v102_v44 = vld [vmem:[#allocation2 + $0xc0] sm:$0xff] }
 0x138   :  { %v3822_v58 = vpop.f32.mrf.mxu0  ;;  %v677_v60 = vld [vmem:[#allocation2 + $0x90] sm:$0xff] }
 0x139   :  { %644 = vst.msk [vmem:[#allocation2 + $0xa0] sm:$0xff] %vm45_vm1, %v611_v52  ;;  %v3823_v3 = vadd.f32 %v3822_v58, %v3821_v47  ;;  %4109 = vmatprep.mubr.msk.f32.mxu1 %vm45_vm1, %v677_v60 }
 0x13a   :  { %v3824_v5 = vpop.f32.mrf.mxu0 }
 0x13b   :  { %v612_v9 = vadd.f32 %v3823_v3, %v99_v57  ;;  %v5163_v57 = vpop.permute.xlu1 %1981 }
 0x13c   :  { %v3825_v11 = vpop.f32.mrf.mxu0  ;;  %v678_v12 = vld [vmem:[#allocation2 + $0x98] sm:$0xff]  ;;  %6753 = vst [vmem:[#allocation34_spill] sm:$0xff] %v5163_v57 }
 0x13d   :  { %645 = vst.msk [vmem:[#allocation2 + $0xa8] sm:$0xff] %vm45_vm1, %v612_v9  ;;  %v3826_v15 = vadd.f32 %v3825_v11, %v3824_v5  ;;  %4110 = vmatmul.mubr.msk.f32.gmra.mxu1 %vm45_vm1, %v678_v12  ;;  %v103_v5 = vld [vmem:[#allocation2 + $0xc8] sm:$0xff]  ;;  %v5169_v12 = vpop.permute.xlu0 %1996 }
 0x13e   :  { %v3827_v22 = vpop.f32.mrf.mxu0  ;;  %6754 = vst [vmem:[#allocation35_spill] sm:$0xff] %v5169_v12 }
 0x13f   :  { %v613_v25 = vadd.f32 %v3826_v15, %v100_v10 }
 0x140   :  { %v3828_v29 = vpop.f32.mrf.mxu0  ;;  %v679_v34 = vld [vmem:[#allocation2 + $0xa0] sm:$0xff] }
 0x141   :  { %646 = vst.msk [vmem:[#allocation2 + $0xb0] sm:$0xff] %vm45_vm1, %v613_v25  ;;  %v3829_v38 = vadd.f32 %v3828_v29, %v3827_v22  ;;  %4112 = vmatprep.mubr.msk.f32.mxu1 %vm45_vm1, %v679_v34  ;;  %v5171_v22 = vpop.permute.xlu1 %1991 }
 0x142   :  { %v3830_v32 = vpop.f32.mrf.mxu0  ;;  %6755 = vst [vmem:[#allocation36_spill] sm:$0xff] %v5171_v22 }
 0x143   :  { %v614_v39 = vadd.f32 %v3829_v38, %v101_v27  ;;  %v104_v27 = vld [vmem:[#allocation2 + $0xd0] sm:$0xff] }
 0x144   :  { %v3831_v47 = vpop.f32.mrf.mxu0  ;;  %v680_v52 = vld [vmem:[#allocation2 + $0xa8] sm:$0xff] }
 0x145   :  { %647 = vst.msk [vmem:[#allocation2 + $0xb8] sm:$0xff] %vm45_vm1, %v614_v39  ;;  %v3832_v58 = vadd.f32 %v3831_v47, %v3830_v32  ;;  %4113 = vmatmul.mubr.msk.f32.gmra.mxu1 %vm45_vm1, %v680_v52  ;;  %v105_v47 = vld [vmem:[#allocation2 + $0xd8] sm:$0xff] }
 0x146   :  { %v3833_v60 = vpop.f32.mrf.mxu0 }
 0x147   :  { %v615_v3 = vadd.f32 %v3832_v58, %v102_v44  ;;  %v5175_v44 = vpop.permute.xlu0 %2160 }
 0x148   :  { %v3834_v9 = vpop.f32.mrf.mxu0  ;;  %v681_v10 = vld [vmem:[#allocation2 + $0xb0] sm:$0xff] }
 0x149   :  { %648 = vst.msk [vmem:[#allocation2 + $0xc0] sm:$0xff] %vm45_vm1, %v615_v3  ;;  %v3835_v11 = vadd.f32 %v3834_v9, %v3833_v60  ;;  %4115 = vmatprep.mubr.msk.f32.mxu1 %vm45_vm1, %v681_v10  ;;  %v5177_v60 = vpop.permute.xlu1 %2155  ;;  %v106_v10 = vld [vmem:[#allocation2 + $0xe0] sm:$0xff] }
 0x14a   :  { %v3836_v15 = vpop.f32.mrf.mxu0 }
 0x14b   :  { %v616_v25 = vadd.f32 %v3835_v11, %v103_v5 }
 0x14c   :  { %v3837_v29 = vpop.f32.mrf.mxu0  ;;  %v682_v34 = vld [vmem:[#allocation2 + $0xb8] sm:$0xff] }
 0x14d   :  { %649 = vst.msk [vmem:[#allocation2 + $0xc8] sm:$0xff] %vm45_vm1, %v616_v25  ;;  %v3838_v38 = vadd.f32 %v3837_v29, %v3836_v15  ;;  %4116 = vmatmul.mubr.msk.f32.gmra.mxu1 %vm45_vm1, %v682_v34  ;;  %v5185_v34 = vpop.permute.xlu1 %2165 }
 0x14e   :  { %v3839_v32 = vpop.f32.mrf.mxu0 }
 0x14f   :  { %v617_v39 = vadd.f32 %v3838_v38, %v104_v27  ;;  %v5183_v27 = vpop.permute.xlu0 %2170 }
 0x150   :  { %v3840_v52 = vpop.f32.mrf.mxu0  ;;  %v683_v58 = vld [vmem:[#allocation2 + $0xc0] sm:$0xff] }
 0x151   :  { %650 = vst.msk [vmem:[#allocation2 + $0xd0] sm:$0xff] %vm45_vm1, %v617_v39  ;;  %v3841_v3 = vadd.f32 %v3840_v52, %v3839_v32  ;;  %4118 = vmatprep.mubr.msk.f32.mxu1 %vm45_vm1, %v683_v58  ;;  %v107_v39 = vld [vmem:[#allocation2 + $0xe8] sm:$0xff]  ;;  %v5191_v43 = vpop.permute.xlu1 %2175 }
 0x152   :  { %v3842_v5 = vpop.f32.mrf.mxu0 }
 0x153   :  { %v618_v9 = vadd.f32 %v3841_v3, %v105_v47 }
 0x154   :  { %v3843_v11 = vpop.f32.mrf.mxu0  ;;  %v684_v15 = vld [vmem:[#allocation2 + $0xc8] sm:$0xff] }
 0x155   :  { %651 = vst.msk [vmem:[#allocation2 + $0xd8] sm:$0xff] %vm45_vm1, %v618_v9  ;;  %v3844_v25 = vadd.f32 %v3843_v11, %v3842_v5  ;;  %4119 = vmatmul.mubr.msk.f32.gmra.mxu1 %vm45_vm1, %v684_v15  ;;  %v5189_v9 = vpop.permute.xlu0 %2180  ;;  %v108_v5 = vld [vmem:[#allocation2 + $0xf0] sm:$0xff] }
 0x156   :  { %v3845_v29 = vpop.f32.mrf.mxu0 }
 0x157   :  { %v619_v38 = vadd.f32 %v3844_v25, %v106_v10 }
 0x158   :  { %v3846_v32 = vpop.f32.mrf.mxu0  ;;  %v685_v52 = vld [vmem:[#allocation2 + $0xd0] sm:$0xff] }
 0x159   :  { %652 = vst.msk [vmem:[#allocation2 + $0xe0] sm:$0xff] %vm45_vm1, %v619_v38  ;;  %v3847_v47 = vadd.f32 %v3846_v32, %v3845_v29  ;;  %4121 = vmatprep.mubr.msk.f32.mxu1 %vm45_vm1, %v685_v52  ;;  %v109_v38 = vld [vmem:[#allocation2 + $0xf8] sm:$0xff]  ;;  %v5197_v52 = vpop.permute.xlu0 %2190 }
 0x15a   :  { %v3848_v58 = vpop.f32.mrf.mxu0  ;;  %6756 = vst [vmem:[#allocation37_spill] sm:$0xff] %v5197_v52 }
 0x15b   :  { %v620_v3 = vadd.f32 %v3847_v47, %v107_v39  ;;  %v5199_v47 = vpop.permute.xlu1 %2185 }
 0x15c   :  { %v3849_v11 = vpop.f32.mrf.mxu0  ;;  %v686_v15 = vld [vmem:[#allocation2 + $0xd8] sm:$0xff]  ;;  %6757 = vst [vmem:[#allocation38_spill] sm:$0xff] %v5199_v47 }
 0x15d   :  { %653 = vst.msk [vmem:[#allocation2 + $0xe8] sm:$0xff] %vm45_vm1, %v620_v3  ;;  %v3850_v10 = vadd.f32 %v3849_v11, %v3848_v58  ;;  %4122 = vmatmul.mubr.msk.f32.gmra.mxu1 %vm45_vm1, %v686_v15  ;;  %v5203_v58 = vpop.permute.xlu0 %2200 }
 0x15e   :  { %v3851_v25 = vpop.f32.mrf.mxu0  ;;  %6758 = vst [vmem:[#allocation39_spill] sm:$0xff] %v5203_v58 }
 0x15f   :  { %v621_v59 = vadd.f32 %v3850_v10, %v108_v5  ;;  %v5205_v3 = vpop.permute.xlu1 %2195 }
 0x160   :  { %v3852_v29 = vpop.f32.mrf.mxu0  ;;  %v687_v32 = vld [vmem:[#allocation2 + $0xe0] sm:$0xff]  ;;  %6759 = vst [vmem:[#allocation40_spill] sm:$0xff] %v5205_v3 }
 0x161   :  { %654 = vst.msk [vmem:[#allocation2 + $0xf0] sm:$0xff] %vm45_vm1, %v621_v59  ;;  %v3853_v39 = vadd.f32 %v3852_v29, %v3851_v25  ;;  %4124 = vmatprep.mubr.msk.f32.mxu1 %vm45_vm1, %v687_v32  ;;  %v5209_v11 = vpop.permute.xlu0 %2210 }
 0x162   :  { %6760 = vst [vmem:[#allocation41_spill] sm:$0xff] %v5209_v11  ;;  %v5370_v11 = vadd.f32 1.0, %v4959_v7 }
 0x163   :  { %v622_v42 = vadd.f32 %v3853_v39, %v109_v38  ;;  %v5211_v15 = vpop.permute.xlu1 %2205 }
 0x164   :  { %v688_v23 = vld [vmem:[#allocation2 + $0xe8] sm:$0xff]  ;;  %6761 = vst [vmem:[#allocation42_spill] sm:$0xff] %v5211_v15 }
 0x165   :  { %655 = vst.msk [vmem:[#allocation2 + $0xf8] sm:$0xff] %vm45_vm1, %v622_v42  ;;  %4125 = vmatmul.mubr.msk.f32.gmra.mxu1 %vm45_vm1, %v688_v23  ;;  %v5213_v10 = vpop.permute.xlu0 %2220 }
 0x166   :  { %6762 = vst [vmem:[#allocation43_spill] sm:$0xff] %v5213_v10 }
 0x167   :  { %v5215_v25 = vpop.permute.xlu1 %2215 }
 0x168   :  { %v689_v5 = vld [vmem:[#allocation2 + $0xf0] sm:$0xff]  ;;  %6763 = vst [vmem:[#allocation44_spill] sm:$0xff] %v5215_v25  ;;  %v5335_v25 = vld [vmem:[%s6636_s8] sm:$0xff] }
 0x169   :  { %4127 = vmatprep.mubr.msk.f32.mxu1 %vm45_vm1, %v689_v5  ;;  %v5217_v42 = vpop.permute.xlu0 %2225  ;;  %6784 = vst [vmem:[#allocation65_spill] sm:$0xff] %v5335_v25 }
 0x16a   :  { %6764 = vst [vmem:[#allocation45_spill] sm:$0xff] %v5217_v42  ;;  %v5240_v42 = vld [vmem:[%s6636_s8 + $0x38] sm:$0xff] }
 0x16b   :  { %v5219_v23 = vpop.permute.xlu1 %2001  ;;  %4194 = vmatprep.subr.mxu0 %v5240_v42 }
 0x16c   :  { %v690_v59 = vld [vmem:[#allocation2 + $0xf8] sm:$0xff]  ;;  %6765 = vst [vmem:[#allocation46_spill] sm:$0xff] %v5219_v23  ;;  %4195 = vmatpush3.msra.mxu0 %v5240_v42  ;;  %v5259_v23 = vld [vmem:[%s6636_s8 + $0x30] sm:$0xff] }
 0x16d   :  { %4128 = vmatmul.mubr.msk.f32.gmra.mxu1 %vm45_vm1, %v690_v59  ;;  %v5221_v38 = vpop.permute.xlu0 %2230  ;;  %4196 = vmatprep.subr.mxu0 %v5259_v23 }
 0x16e   :  { %6766 = vst [vmem:[#allocation47_spill] sm:$0xff] %v5221_v38  ;;  %4197 = vmatpush3.msra.mxu0 %v5259_v23 }
 0x16f   :  { %v5223_v29 = vpop.permute.xlu1 %2006 }
 0x170   :  { %6767 = vst [vmem:[#allocation48_spill] sm:$0xff] %v5223_v29  ;;  %v5313_v29 = vld [vmem:[%s6636_s8 + $0x10] sm:$0xff] }
 0x171   :  { %v5225_v32 = vpop.permute.xlu0 %2235 }
 0x172   :  { %6768 = vst [vmem:[#allocation49_spill] sm:$0xff] %v5225_v32 }
 0x173   :  { %v5227_v39 = vpop.permute.xlu1 %2011 }
 0x174   :  { %6769 = vst [vmem:[#allocation50_spill] sm:$0xff] %v5227_v39 }
 0x175   :  { %v5229_v5 = vpop.permute.xlu0 %2240 }
 0x176   :  { %6770 = vst [vmem:[#allocation51_spill] sm:$0xff] %v5229_v5 }
 0x177   :  { %v5231_v59 = vpop.permute.xlu1 %2016 }
 0x178   :  { %6771 = vst [vmem:[#allocation52_spill] sm:$0xff] %v5231_v59 }
 0x179   :  { %v5233_v4 = vpop.permute.xlu0 %2245 }
 0x17a   :  { %6772 = vst [vmem:[#allocation53_spill] sm:$0xff] %v5233_v4 }
 0x17b   :  { %v5235_v48 = vpop.permute.xlu1 %2021 }
 0x17c   :  { %6773 = vst [vmem:[#allocation54_spill] sm:$0xff] %v5235_v48 }
 0x17d   :  { %v5244_v32 = vpop.permute.xlu0 %2250 }
 0x17e   :  { %6774 = vst [vmem:[#allocation55_spill] sm:$0xff] %v5244_v32  ;;  %v2488_v32 = vld [vmem:[%s6637_s9 + $0x38] sm:$0xff] }
 0x17f   :  { %v5246_v39 = vpop.permute.xlu1 %2026  ;;  %4130 = vmatprep.subr.mxu1 %v2488_v32 }
 0x180   :  { %6775 = vst [vmem:[#allocation56_spill] sm:$0xff] %v5246_v39  ;;  %4131 = vmatpush3.msra.mxu1 %v2488_v32  ;;  %v5279_v39 = vld [vmem:[%s6636_s8 + $0x28] sm:$0xff]  ;;  %v2485_v32 = vld [vmem:[%s6637_s9 + $0x20] sm:$0xff] }
 0x181   :  { %v5248_v5 = vpop.permute.xlu0 %2255  ;;  %4198 = vmatprep.subr.mxu0 %v5279_v39 }
 0x182   :  { %6776 = vst [vmem:[#allocation57_spill] sm:$0xff] %v5248_v5  ;;  %v2487_v5 = vld [vmem:[%s6637_s9 + $0x30] sm:$0xff]  ;;  %4199 = vmatpush3.msra.mxu0 %v5279_v39 }
 0x183   :  { %v5250_v59 = vpop.permute.xlu1 %2031  ;;  %4132 = vmatprep.subr.mxu1 %v2487_v5 }
 0x184   :  { %6777 = vst [vmem:[#allocation58_spill] sm:$0xff] %v5250_v59  ;;  %4133 = vmatpush3.msra.mxu1 %v2487_v5  ;;  %v5289_v5 = vld [vmem:[%s6636_s8 + $0x20] sm:$0xff] }
 0x185   :  { %v5252_v4 = vpop.permute.xlu0 %2260  ;;  %4200 = vmatprep.subr.mxu0 %v5289_v5 }
 0x186   :  { %6778 = vst [vmem:[#allocation59_spill] sm:$0xff] %v5252_v4  ;;  %4201 = vmatpush3.msra.mxu0 %v5289_v5 }
 0x187   :  { %v5254_v48 = vpop.permute.xlu1 %2036 }
 0x188   :  { %6779 = vst [vmem:[#allocation60_spill] sm:$0xff] %v5254_v48  ;;  %v2486_v48 = vld [vmem:[%s6637_s9 + $0x28] sm:$0xff] }
 0x189   :  { %v5269_v59 = vpop.permute.xlu0 %2265  ;;  %4134 = vmatprep.subr.mxu1 %v2486_v48 }
 0x18a   :  { %6780 = vst [vmem:[#allocation61_spill] sm:$0xff] %v5269_v59  ;;  %4135 = vmatpush3.msra.mxu1 %v2486_v48  ;;  %v2484_v48 = vld [vmem:[%s6637_s9 + $0x18] sm:$0xff] }
 0x18b   :  { %v5271_v4 = vpop.permute.xlu1 %2041  ;;  %4136 = vmatprep.subr.mxu1 %v2485_v32  ;;  %v5299_v59 = vld [vmem:[%s6636_s8 + $0x18] sm:$0xff] }
 0x18c   :  { %6781 = vst [vmem:[#allocation62_spill] sm:$0xff] %v5271_v4  ;;  %4137 = vmatpush3.msra.mxu1 %v2485_v32  ;;  %4202 = vmatprep.subr.mxu0 %v5299_v59  ;;  %v2483_v32 = vld [vmem:[%s6637_s9 + $0x10] sm:$0xff] }
 0x18d   :  { %v5301_v4 = vpop.permute.xlu0 %2270  ;;  %4138 = vmatprep.subr.mxu1 %v2484_v48  ;;  %4203 = vmatpush3.msra.mxu0 %v5299_v59 }
 0x18e   :  { %6782 = vst [vmem:[#allocation63_spill] sm:$0xff] %v5301_v4  ;;  %4139 = vmatpush3.msra.mxu1 %v2484_v48  ;;  %4204 = vmatprep.subr.mxu0 %v5313_v29  ;;  %v2482_v48 = vld [vmem:[%s6637_s9 + $0x8] sm:$0xff] }
 0x18f   :  { %v5303_v38 = vpop.permute.xlu1 %2046  ;;  %4140 = vmatprep.subr.mxu1 %v2483_v32  ;;  %4205 = vmatpush3.msra.mxu0 %v5313_v29  ;;  %v5323_v4 = vld [vmem:[%s6636_s8 + $0x8] sm:$0xff] }
 0x190   :  { %6783 = vst [vmem:[#allocation64_spill] sm:$0xff] %v5303_v38  ;;  %4141 = vmatpush3.msra.mxu1 %v2483_v32  ;;  %4206 = vmatprep.subr.mxu0 %v5323_v4  ;;  %v2481_v32 = vld [vmem:[%s6637_s9] sm:$0xff] }
 0x191   :  { %4142 = vmatprep.subr.mxu1 %v2482_v48  ;;  %4207 = vmatpush3.msra.mxu0 %v5323_v4  ;;  %v5337_v22 = vpop.permute.xlu0 %2275 }
 0x192   :  { %4143 = vmatpush3.msra.mxu1 %v2482_v48  ;;  %6785 = vst [vmem:[#allocation66_spill] sm:$0xff] %v5337_v22  ;;  %v5344_v48 = vadd.f32 1.0, %v4946_v55  ;;  %4208 = vmatprep.subr.mxu0 %v5335_v25  ;;  %v2442_v22 = vld [vmem:[%s6638_s2 + $0x8] sm:$0xff]  ;;  %v2445_v55 = vld [vmem:[%s6638_s2 + $0x20] sm:$0xff] }
 0x193   :  { %v5339_v10 = vpop.permute.xlu1 %2051  ;;  %4144 = vmatprep.subr.mxu1 %v2481_v32  ;;  %4209 = vmatpush3.msra.mxu0 %v5335_v25 }
 0x194   :  { %6786 = vst [vmem:[#allocation67_spill] sm:$0xff] %v5339_v10  ;;  %4145 = vmatpush3.msra.mxu1 %v2481_v32  ;;  %4211 = vmatmul.mubr.msk.f32.vlgmr.msra.gmra.mxu0 %vm45_vm1, %v2442_v22  ;;  %v2444_v22 = vld [vmem:[%s6638_s2 + $0x18] sm:$0xff] }
 0x195   :  { %4258 = vmatprep.subr.mxu1 %v5240_v42  ;;  %v5361_v15 = vpop.permute.xlu0 %2280  ;;  %4213 = vmatprep.mubr.msk.f32.mxu0 %vm45_vm1, %v2443_v30 }
 0x196   :  { %6787 = vst [vmem:[#allocation68_spill] sm:$0xff] %v5361_v15 }
 0x197   :  { %v5363_v32 = vpop.permute.xlu1 %2056 }
 0x198   :  { %6788 = vst [vmem:[#allocation69_spill] sm:$0xff] %v5363_v32  ;;  %4214 = vmatmul.mubr.msk.f32.gmra.mxu0 %vm45_vm1, %v2444_v22  ;;  %v2446_v22 = vld [vmem:[%s6638_s2 + $0x28] sm:$0xff] }
 0x199   :  { %v5384_v32 = vpop.permute.xlu0 %2285  ;;  %4216 = vmatprep.mubr.msk.f32.mxu0 %vm45_vm1, %v2445_v55 }
 0x19a   :  { %6789 = vst [vmem:[#allocation70_spill] sm:$0xff] %v5384_v32 }
 0x19b   :  { %v5386_v7 = vpop.permute.xlu1 %2061 }
 0x19c   :  { %6790 = vst [vmem:[#allocation71_spill] sm:$0xff] %v5386_v7  ;;  %4217 = vmatmul.mubr.msk.f32.gmra.mxu0 %vm45_vm1, %v2446_v22  ;;  %v2448_v22 = vld [vmem:[%s6638_s2 + $0x38] sm:$0xff] }
 0x19d   :  { %v5404_v32 = vpop.permute.xlu0 %2290 }
 0x19e   :  { %6791 = vst [vmem:[#allocation72_spill] sm:$0xff] %v5404_v32  ;;  %v2447_v32 = vld [vmem:[%s6638_s2 + $0x30] sm:$0xff] }
 0x19f   :  { %v5406_v7 = vpop.permute.xlu1 %2066  ;;  %4219 = vmatprep.mubr.msk.f32.mxu0 %vm45_vm1, %v2447_v32  ;;  %v2449_v32 = vld [vmem:[%s6638_s2 + $0x40] sm:$0xff] }
 0x1a0   :  { %6792 = vst [vmem:[#allocation73_spill] sm:$0xff] %v5406_v7  ;;  %4220 = vmatmul.mubr.msk.f32.gmra.mxu0 %vm45_vm1, %v2448_v22  ;;  %v2450_v22 = vld [vmem:[%s6638_s2 + $0x48] sm:$0xff] }
 0x1a1   :  { %v5414_v3 = vpop.permute.xlu0 %2295  ;;  %4222 = vmatprep.mubr.msk.f32.mxu0 %vm45_vm1, %v2449_v32 }
 0x1a2   :  { %6793 = vst [vmem:[#allocation74_spill] sm:$0xff] %v5414_v3 }
 0x1a3   :  { %v5416_v55 = vpop.permute.xlu1 %2071 }
 0x1a4   :  { %6794 = vst [vmem:[#allocation75_spill] sm:$0xff] %v5416_v55  ;;  %v5439_v55 = vadd.f32 1.0, %v4993_v50  ;;  %4223 = vmatmul.mubr.msk.f32.gmra.mxu0 %vm45_vm1, %v2450_v22 }
 0x1a5   :  { %v5434_v3 = vpop.permute.xlu0 %2300 }
 0x1a6   :  { %6795 = vst [vmem:[#allocation76_spill] sm:$0xff] %v5434_v3  ;;  %6797 = vst [vmem:[#allocation78_spill] sm:$0xff] %v5439_v55 }
 0x1a9   :  { %v5457_v3 = vpop.permute.xlu0 %2305 }
 0x1aa   :  { %6800 = vst [vmem:[#allocation81_spill] sm:$0xff] %v5457_v3  ;;  %v2452_v3 = vld [vmem:[%s6638_s2 + $0x58] sm:$0xff] }
 0x1b5   :  { %v5326_v38 = vpop.f32.mrf.mxu1 }
 0x1b6   :  { %1739 = vrot.lane.b32.xlu1 %v5326_v38, %s4377_s6 }
 0x1b7   :  { %v1322_v12 = vpop.f32.mrf.mxu1 }
 0x1b8   :  { %v5354_v10 = vmul.f32 %v5344_v48, %v1322_v12  ;;  %1737 = vrot.lane.b32.xlu0 %v1322_v12, %s4377_s6 }
 0x1bd   :  { %v5365_v57 = vpop.f32.mrf.mxu1 }
 0x1be   :  { %1743 = vrot.lane.b32.xlu1 %v5365_v57, %s4377_s6 }
 0x1bf   :  { %v1332_v12 = vpop.f32.mrf.mxu1 }
 0x1c0   :  { %v5380_v15 = vmul.f32 %v5370_v11, %v1332_v12  ;;  %1741 = vrot.lane.b32.xlu0 %v1332_v12, %s4377_s6 }
 0x1c5   :  { %v4090_v40 = vpop.f32.mrf.mxu1 }
 0x1c6   :  { %v5392_v30 = vmul.f32 %v4090_v40, %v5389_v14  ;;  %1747 = vrot.lane.b32.xlu1 %v4090_v40, %s4377_s6  ;;  %v5412_v40 = vadd.f32 1.0, %v4981_v35 }
 0x1c7   :  { %v5398_v12 = vpop.f32.mrf.mxu1 }
 0x1c8   :  { %1745 = vrot.lane.b32.xlu0 %v5398_v12, %s4377_s6 }
 0x1cd   :  { %v4093_v20 = vpop.f32.mrf.mxu1 }
 0x1ce   :  { %v5419_v24 = vmul.f32 %v4093_v20, %v5412_v40  ;;  %1751 = vrot.lane.b32.xlu1 %v4093_v20, %s4377_s6  ;;  %v5436_v20 = vpop.permute.xlu1 %2076 }
 0x1cf   :  { %v5425_v7 = vpop.f32.mrf.mxu1  ;;  %6796 = vst [vmem:[#allocation77_spill] sm:$0xff] %v5436_v20  ;;  %v5462_v20 = vadd.f32 1.0, %v5005_v2  ;;  %v5487_v2 = vadd.f32 1.0, %v5017_v18 }
 0x1d0   :  { %1749 = vrot.lane.b32.xlu0 %v5425_v7, %s4377_s6 }
 0x1d1   :  { %6802 = vst [vmem:[#allocation83_spill] sm:$0xff] %v5462_v20  ;;  %6805 = vst [vmem:[#allocation86_spill] sm:$0xff] %v5487_v2 }
 0x1d5   :  { %v4096_v35 = vpop.f32.mrf.mxu1 }
 0x1d6   :  { %v5442_v58 = vmul.f32 %v4096_v35, %v5439_v55  ;;  %1755 = vrot.lane.b32.xlu1 %v4096_v35, %s4377_s6  ;;  %v5459_v35 = vpop.permute.xlu1 %2081  ;;  %v2451_v55 = vld [vmem:[%s6638_s2 + $0x50] sm:$0xff] }
 0x1d7   :  { %v5448_v62 = vpop.f32.mrf.mxu1  ;;  %6801 = vst [vmem:[#allocation82_spill] sm:$0xff] %v5459_v35  ;;  %4225 = vmatprep.mubr.msk.f32.mxu0 %vm45_vm1, %v2451_v55  ;;  %v5479_v35 = vpop.permute.xlu0 %1579 }
 0x1d8   :  { %6798 = vst [vmem:[#allocation79_spill] sm:$0xff] %v5442_v58  ;;  %6799 = vst [vmem:[#allocation80_spill] sm:$0xff] %v5448_v62  ;;  %1753 = vrot.lane.b32.xlu0 %v5448_v62, %s4377_s6  ;;  %4226 = vmatmul.mubr.msk.f32.gmra.mxu0 %vm45_vm1, %v2452_v3  ;;  %v2453_v58 = vld [vmem:[%s6638_s2 + $0x60] sm:$0xff]  ;;  %v2454_v3 = vld [vmem:[%s6638_s2 + $0x68] sm:$0xff] }
 0x1d9   :  { %4228 = vmatprep.mubr.msk.f32.mxu0 %vm45_vm1, %v2453_v58 }
 0x1da   :  { %v5464_v21 = vpop.permute.xlu1 %1583 }
 0x1dc   :  { %4229 = vmatmul.mubr.msk.f32.gmra.mxu0 %vm45_vm1, %v2454_v3 }
 0x1dd   :  { %v4099_v50 = vpop.f32.mrf.mxu1 }
 0x1de   :  { %v5467_v32 = vmul.f32 %v4099_v50, %v5462_v20  ;;  %1759 = vrot.lane.b32.xlu1 %v4099_v50, %s4377_s6  ;;  %v5484_v50 = vpop.permute.xlu1 %1581 }
 0x1df   :  { %v5473_v22 = vpop.f32.mrf.mxu1 }
 0x1e0   :  { %6803 = vst [vmem:[#allocation84_spill] sm:$0xff] %v5467_v32  ;;  %6804 = vst [vmem:[#allocation85_spill] sm:$0xff] %v5473_v22  ;;  %1757 = vrot.lane.b32.xlu0 %v5473_v22, %s4377_s6  ;;  %v5489_v32 = vpop.permute.xlu0 %1577 }
 0x1e2   :  { %v5504_v18 = vpop.permute.xlu1 %1587 }
 0x1e5   :  { %v4102_v20 = vpop.f32.mrf.mxu1 }
 0x1e6   :  { %v5492_v55 = vmul.f32 %v4102_v20, %v5487_v2  ;;  %1763 = vrot.lane.b32.xlu1 %v4102_v20, %s4377_s6  ;;  %v5509_v20 = vpop.permute.xlu0 %1585  ;;  %v5511_v2 = vpop.permute.xlu1 %1591 }
 0x1e7   :  { %v5498_v22 = vpop.f32.mrf.mxu1 }
 0x1e8   :  { %6806 = vst [vmem:[#allocation87_spill] sm:$0xff] %v5492_v55  ;;  %6807 = vst [vmem:[#allocation88_spill] sm:$0xff] %v5498_v22  ;;  %1761 = vrot.lane.b32.xlu0 %v5498_v22, %s4377_s6  ;;  %v5514_v55 = vadd.f32 1.0, %v5029_v36  ;;  %v2455_v22 = vld [vmem:[%s6638_s2 + $0x70] sm:$0xff]  ;;  %v2456_v36 = vld [vmem:[%s6638_s2 + $0x78] sm:$0xff] }
 0x1e9   :  { %4231 = vmatprep.mubr.msk.f32.mxu0 %vm45_vm1, %v2455_v22 }
 0x1ea   :  { %6808 = vst [vmem:[#allocation89_spill] sm:$0xff] %v5514_v55  ;;  %v5516_v58 = vpop.permute.xlu0 %1589  ;;  %v5531_v62 = vpop.permute.xlu1 %1595  ;;  %4232 = vmatmul.mubr.msk.f32.gmra.mxu0 %vm45_vm1, %v2456_v36 }
 0x1ed   :  { %v4105_v47 = vpop.f32.mrf.mxu1 }
 0x1ee   :  { %v5519_v25 = vmul.f32 %v4105_v47, %v5514_v55  ;;  %1767 = vrot.lane.b32.xlu1 %v4105_v47, %s4377_s6  ;;  %v5536_v47 = vpop.permute.xlu0 %1593  ;;  %v5538_v55 = vpop.permute.xlu1 %1599 }
 0x1ef   :  { %v5525_v3 = vpop.f32.mrf.mxu1  ;;  %6811 = vst [vmem:[#allocation92_spill] sm:$0xff] %v5536_v47  ;;  %6812 = vst [vmem:[#allocation93_spill] sm:$0xff] %v5538_v55 }
 0x1f0   :  { %6809 = vst [vmem:[#allocation90_spill] sm:$0xff] %v5519_v25  ;;  %6810 = vst [vmem:[#allocation91_spill] sm:$0xff] %v5525_v3  ;;  %1765 = vrot.lane.b32.xlu0 %v5525_v3, %s4377_s6  ;;  %v5541_v25 = vadd.f32 1.0, %v5041_v53  ;;  %v2457_v3 = vld [vmem:[%s6638_s2 + $0x80] sm:$0xff]  ;;  %v2458_v53 = vld [vmem:[%s6638_s2 + $0x88] sm:$0xff] }
 0x1f1   :  { %4234 = vmatprep.mubr.msk.f32.mxu0 %vm45_vm1, %v2457_v3 }
 0x1f2   :  { %6813 = vst [vmem:[#allocation94_spill] sm:$0xff] %v5541_v25  ;;  %v5543_v22 = vpop.permute.xlu0 %1597  ;;  %v5558_v55 = vpop.permute.xlu1 %1603  ;;  %4235 = vmatmul.mubr.msk.f32.gmra.mxu0 %vm45_vm1, %v2458_v53 }
 0x1f3   :  { %6814 = vst [vmem:[#allocation95_spill] sm:$0xff] %v5543_v22 }
 0x1f5   :  { %v4108_v1 = vpop.f32.mrf.mxu1 }
 0x1f6   :  { %v5546_v52 = vmul.f32 %v4108_v1, %v5541_v25  ;;  %1771 = vrot.lane.b32.xlu1 %v4108_v1, %s4377_s6  ;;  %v5563_v1 = vpop.permute.xlu0 %1601  ;;  %v5565_v25 = vpop.permute.xlu1 %1607 }
 0x1f7   :  { %v5552_v36 = vpop.f32.mrf.mxu1  ;;  %6817 = vst [vmem:[#allocation98_spill] sm:$0xff] %v5563_v1  ;;  %6818 = vst [vmem:[#allocation99_spill] sm:$0xff] %v5565_v25 }
 0x1f8   :  { %6815 = vst [vmem:[#allocation96_spill] sm:$0xff] %v5546_v52  ;;  %6816 = vst [vmem:[#allocation97_spill] sm:$0xff] %v5552_v36  ;;  %1769 = vrot.lane.b32.xlu0 %v5552_v36, %s4377_s6  ;;  %v5568_v52 = vadd.f32 1.0, %v5053_v8  ;;  %v2459_v36 = vld [vmem:[%s6638_s2 + $0x90] sm:$0xff]  ;;  %v2460_v8 = vld [vmem:[%s6638_s2 + $0x98] sm:$0xff] }
 0x1f9   :  { %4237 = vmatprep.mubr.msk.f32.mxu0 %vm45_vm1, %v2459_v36 }
 0x1fa   :  { %6819 = vst [vmem:[#allocation100_spill] sm:$0xff] %v5568_v52  ;;  %v5570_v3 = vpop.permute.xlu0 %1605  ;;  %v5585_v25 = vpop.permute.xlu1 %1611  ;;  %4238 = vmatmul.mubr.msk.f32.gmra.mxu0 %vm45_vm1, %v2460_v8 }
 0x1fb   :  { %6820 = vst [vmem:[#allocation101_spill] sm:$0xff] %v5570_v3 }
 0x1fd   :  { %v4111_v22 = vpop.f32.mrf.mxu1 }
 0x1fe   :  { %v5573_v47 = vmul.f32 %v4111_v22, %v5568_v52  ;;  %1775 = vrot.lane.b32.xlu1 %v4111_v22, %s4377_s6  ;;  %v5590_v22 = vpop.permute.xlu0 %1609  ;;  %v5592_v52 = vpop.permute.xlu1 %1615 }
 0x1ff   :  { %v5579_v53 = vpop.f32.mrf.mxu1  ;;  %6823 = vst [vmem:[#allocation104_spill] sm:$0xff] %v5590_v22  ;;  %6824 = vst [vmem:[#allocation105_spill] sm:$0xff] %v5592_v52 }
 0x200   :  { %6821 = vst [vmem:[#allocation102_spill] sm:$0xff] %v5573_v47  ;;  %6822 = vst [vmem:[#allocation103_spill] sm:$0xff] %v5579_v53  ;;  %1773 = vrot.lane.b32.xlu0 %v5579_v53, %s4377_s6  ;;  %v5595_v47 = vadd.f32 1.0, %v5065_v26  ;;  %v2461_v53 = vld [vmem:[%s6638_s2 + $0xa0] sm:$0xff]  ;;  %v2462_v26 = vld [vmem:[%s6638_s2 + $0xa8] sm:$0xff] }
 0x201   :  { %4240 = vmatprep.mubr.msk.f32.mxu0 %vm45_vm1, %v2461_v53 }
 0x202   :  { %6825 = vst [vmem:[#allocation106_spill] sm:$0xff] %v5595_v47  ;;  %v5597_v36 = vpop.permute.xlu0 %1613  ;;  %v5612_v52 = vpop.permute.xlu1 %1619  ;;  %4241 = vmatmul.mubr.msk.f32.gmra.mxu0 %vm45_vm1, %v2462_v26 }
 0x203   :  { %6826 = vst [vmem:[#allocation107_spill] sm:$0xff] %v5597_v36  ;;  %6828 = vst [vmem:[#allocation109_spill] sm:$0xff] %v5612_v52  ;;  %v2463_v52 = vld [vmem:[%s6638_s2 + $0xb0] sm:$0xff] }
 0x204   :  { %4243 = vmatprep.mubr.msk.f32.mxu0 %vm45_vm1, %v2463_v52 }
 0x205   :  { %v4114_v3 = vpop.f32.mrf.mxu1 }
 0x206   :  { %v5600_v1 = vmul.f32 %v4114_v3, %v5595_v47  ;;  %1779 = vrot.lane.b32.xlu1 %v4114_v3, %s4377_s6  ;;  %v5617_v3 = vpop.permute.xlu0 %1617  ;;  %v5620_v47 = vadd.f32 1.0, %v5077_v45  ;;  %v2464_v45 = vld [vmem:[%s6638_s2 + $0xb8] sm:$0xff] }
 0x207   :  { %v5606_v8 = vpop.f32.mrf.mxu1  ;;  %6829 = vst [vmem:[#allocation110_spill] sm:$0xff] %v5617_v3  ;;  %4244 = vmatmul.mubr.msk.f32.gmra.mxu0 %vm45_vm1, %v2464_v45 }
 0x208   :  { %6827 = vst [vmem:[#allocation108_spill] sm:$0xff] %v5600_v1  ;;  %1777 = vrot.lane.b32.xlu0 %v5606_v8, %s4377_s6  ;;  %6830 = vst [vmem:[#allocation111_spill] sm:$0xff] %v5620_v47  ;;  %v5622_v1 = vpop.permute.xlu1 %1623 }
 0x209   :  { %6831 = vst [vmem:[#allocation112_spill] sm:$0xff] %v5622_v1 }
 0x20a   :  { %v5628_v22 = vpop.permute.xlu0 %1621 }
 0x20b   :  { %6833 = vst [vmem:[#allocation114_spill] sm:$0xff] %v5628_v22  ;;  %v5647_v22 = vadd.f32 1.0, %v5087_v61 }
 0x20d   :  { %v4117_v36 = vpop.f32.mrf.mxu1  ;;  %6836 = vst [vmem:[#allocation117_spill] sm:$0xff] %v5647_v22 }
 0x20e   :  { %v5625_v53 = vmul.f32 %v4117_v36, %v5620_v47  ;;  %1783 = vrot.lane.b32.xlu1 %v4117_v36, %s4377_s6  ;;  %v5641_v47 = vpop.permute.xlu1 %1627  ;;  %v5644_v36 = vpop.permute.xlu0 %1625 }
 0x20f   :  { %v5633_v26 = vpop.f32.mrf.mxu1  ;;  %6834 = vst [vmem:[#allocation115_spill] sm:$0xff] %v5641_v47  ;;  %6835 = vst [vmem:[#allocation116_spill] sm:$0xff] %v5644_v36  ;;  %v2465_v47 = vld [vmem:[%s6638_s2 + $0xc0] sm:$0xff]  ;;  %v2466_v36 = vld [vmem:[%s6638_s2 + $0xc8] sm:$0xff] }
 0x210   :  { %6832 = vst [vmem:[#allocation113_spill] sm:$0xff] %v5625_v53  ;;  %1781 = vrot.lane.b32.xlu0 %v5633_v26, %s4377_s6  ;;  %4246 = vmatprep.mubr.msk.f32.mxu0 %vm45_vm1, %v2465_v47 }
 0x211   :  { %4247 = vmatmul.mubr.msk.f32.gmra.mxu0 %vm45_vm1, %v2466_v36  ;;  %v1482_v36 = vadd.f32 1.0, %v4940_v49 }
 0x212   :  { %v5653_v52 = vpop.permute.xlu1 %1631  ;;  %v5662_v45 = vpop.permute.xlu0 %1629 }
 0x213   :  { %6838 = vst [vmem:[#allocation119_spill] sm:$0xff] %v5653_v52  ;;  %6840 = vst [vmem:[#allocation121_spill] sm:$0xff] %v5662_v45  ;;  %v5679_v45 = vadd.f32 1.0, %v5113_v56 }
 0x215   :  { %v4120_v1 = vpop.f32.mrf.mxu1  ;;  %6844 = vst [vmem:[#allocation125_spill] sm:$0xff] %v5679_v45 }
 0x216   :  { %v5650_v53 = vmul.f32 %v4120_v1, %v5647_v22  ;;  %1787 = vrot.lane.b32.xlu1 %v4120_v1, %s4377_s6  ;;  %v5670_v1 = vadd.f32 1.0, %v5106_v41  ;;  %v5672_v52 = vpop.permute.xlu1 %1635  ;;  %v5681_v47 = vpop.permute.xlu0 %1633 }
 0x217   :  { %v5655_v3 = vpop.f32.mrf.mxu1  ;;  %6842 = vst [vmem:[#allocation123_spill] sm:$0xff] %v5672_v52  ;;  %6845 = vst [vmem:[#allocation126_spill] sm:$0xff] %v5681_v47 }
 0x218   :  { %6837 = vst [vmem:[#allocation118_spill] sm:$0xff] %v5650_v53  ;;  %6839 = vst [vmem:[#allocation120_spill] sm:$0xff] %v5655_v3  ;;  %1785 = vrot.lane.b32.xlu0 %v5655_v3, %s4377_s6 }
 0x219   :  { %6841 = vst [vmem:[#allocation122_spill] sm:$0xff] %v5670_v1 }
 0x21a   :  { %v5688_v52 = vpop.permute.xlu1 %1639 }
 0x21b   :  { %6847 = vst [vmem:[#allocation128_spill] sm:$0xff] %v5688_v52 }
 0x21d   :  { %v4123_v22 = vpop.f32.mrf.mxu1 }
 0x21e   :  { %v5675_v53 = vmul.f32 %v4123_v22, %v5670_v1  ;;  %1791 = vrot.lane.b32.xlu1 %v4123_v22, %s4377_s6  ;;  %v1514_v1 = vmul.f32 %v5326_v38, %v1482_v36  ;;  %v5694_v22 = vpop.permute.xlu0 %1637 }
 0x21f   :  { %v1452_v3 = vpop.f32.mrf.mxu1  ;;  %6849 = vst [vmem:[#allocation130_spill] sm:$0xff] %v5694_v22  ;;  %v1673_v22 = vadd.f32 %v5489_v32, %v5354_v10 }
 0x220   :  { %6843 = vst [vmem:[#allocation124_spill] sm:$0xff] %v5675_v53  ;;  %v5684_v61 = vmul.f32 %v5679_v45, %v1452_v3  ;;  %1789 = vrot.lane.b32.xlu0 %v1452_v3, %s4377_s6  ;;  %v5692_v53 = vadd.f32 1.0, %v5121_v6  ;;  %v5701_v45 = vadd.f32 1.0, %v5126_v13 }
 0x222   :  { %6846 = vst [vmem:[#allocation127_spill] sm:$0xff] %v5684_v61  ;;  %6848 = vst [vmem:[#allocation129_spill] sm:$0xff] %v5692_v53  ;;  %v1674_v61 = vadd.f32 %v5479_v35, %v1514_v1 }
 0x223   :  { %6851 = vst [vmem:[#allocation132_spill] sm:$0xff] %v5701_v45 }
 0x224   :  { %v2090_v56 = vmul.f32 %v5099_v19, %v1674_v61 }
 0x225   :  { %v4126_v41 = vpop.f32.mrf.mxu1 }
 0x226   :  { %v5697_v47 = vmul.f32 %v4126_v41, %v5692_v53  ;;  %1795 = vrot.lane.b32.xlu1 %v4126_v41, %s4377_s6  ;;  %v1484_v53 = vadd.f32 1.0, %v4949_v63 }
 0x227   :  { %v1462_v3 = vpop.f32.mrf.mxu1 }
 0x228   :  { %6850 = vst [vmem:[#allocation131_spill] sm:$0xff] %v5697_v47  ;;  %v5705_v52 = vmul.f32 %v5701_v45, %v1462_v3  ;;  %v1740_v38 = vpop.permute.xlu1 %1739  ;;  %1793 = vrot.lane.b32.xlu0 %v1462_v3, %s4377_s6  ;;  %v1516_v1 = vmul.f32 %v5365_v57, %v1484_v53  ;;  %v5716_v45 = vadd.f32 1.0, %v5137_v37 }
 0x229   :  { %v1834_v6 = vmul.f32 %v1740_v38, %v1482_v36 }
 0x22a   :  { %6852 = vst [vmem:[#allocation133_spill] sm:$0xff] %v5705_v52  ;;  %v1738_v47 = vpop.permute.xlu0 %1737  ;;  %6853 = vst [vmem:[#allocation134_spill] sm:$0xff] %v5716_v45  ;;  %v1928_v52 = vld [vmem:[%s6633_s4 + $0xf8] sm:$0xff] }
 0x22b   :  { %v1866_v41 = vadd.f32 %v1834_v6, %v5479_v35  ;;  %v1833_v13 = vmul.f32 %v1738_v47, %v5344_v48  ;;  %v3203_v6 = vmul.f32 %v1674_v61, %v1674_v61  ;;  %v2089_v48 = vmul.f32 %v5097_v16, %v1673_v22 }
 0x22c   :  { %v2152_v61 = vsub.f32 1.0, %v1928_v52 }
 0x22d   :  { %v2314_v3 = vmul.f32 %v5175_v44, %v1866_v41  ;;  %v3235_v36 = vmul.f32 %v1866_v41, %v1866_v41  ;;  %v1865_v38 = vadd.f32 %v1833_v13, %v5489_v32  ;;  %v4129_v10 = vpop.f32.mrf.mxu1  ;;  %v3202_v32 = vmul.f32 %v1673_v22, %v1673_v22 }
 0x22e   :  { %v5725_v19 = vmul.f32 %v4129_v10, %v5716_v45  ;;  %1799 = vrot.lane.b32.xlu1 %v4129_v10, %s4377_s6  ;;  %v1676_v41 = vadd.f32 %v5464_v21, %v1516_v1 }
 0x22f   :  { %v2346_v57 = vsub.f32 %v2090_v56, %v2314_v3  ;;  %v2313_v35 = vmul.f32 %v5177_v60, %v1865_v38  ;;  %v3234_v44 = vmul.f32 %v1865_v38, %v1865_v38  ;;  %v5729_v47 = vpop.f32.mrf.mxu1  ;;  %v5731_v13 = vadd.f32 %v3235_v36, %v3203_v6 }
 0x230   :  { %v1744_v37 = vpop.permute.xlu1 %1743  ;;  %1797 = vrot.lane.b32.xlu0 %v5729_v47, %s4377_s6  ;;  %v1675_v56 = vadd.f32 %v5484_v50, %v5380_v15  ;;  %v2092_v10 = vmul.f32 %v5110_v51, %v1676_v41  ;;  %v1485_v6 = vadd.f32 1.0, %v4966_v17 }
 0x231   :  { %v2345_v16 = vsub.f32 %v2089_v48, %v2313_v35  ;;  %v1836_v45 = vmul.f32 %v1744_v37, %v1484_v53  ;;  %v2378_v3 = vmul.f32 0.1, %v2346_v57  ;;  %v5738_v38 = vadd.f32 %v3234_v44, %v3202_v32  ;;  %v4343_v57 = vld [vmem:[#allocation2] sm:$0xff] }
 0x232   :  { %v1742_v60 = vpop.permute.xlu0 %1741  ;;  %2086 = vperm.xlu1 %4278, %v1928_v52   ;;  %v3205_v48 = vmul.f32 %v1676_v41, %v1676_v41  ;;  %v2091_v35 = vmul.f32 %v5115_v0, %v1675_v56  ;;  %v3204_v44 = vmul.f32 %v1675_v56, %v1675_v56 }
 0x233   :  { %v2377_v36 = vmul.f32 0.1, %v2345_v16  ;;  %v1868_v22 = vadd.f32 %v1836_v45, %v5464_v21  ;;  %v1835_v1 = vmul.f32 %v1742_v60, %v5370_v11  ;;  %v1517_v21 = vmul.f32 %v1485_v6, %v5398_v12  ;;  %v4344_v45 = vld [vmem:[#allocation2 + $0x8] sm:$0xff] }
 0x234   :  { %2310 = vperm.xlu0 %4277, %v2152_v61   ;;  %v2410_v11 = vadd.f32 %v4344_v45, %v2378_v3 }
 0x235   :  { %v2316_v37 = vmul.f32 %v5183_v27, %v1868_v22  ;;  %v3237_v53 = vmul.f32 %v1868_v22, %v1868_v22  ;;  %v1867_v15 = vadd.f32 %v1835_v1, %v5484_v50  ;;  %v2409_v52 = vadd.f32 %v4343_v57, %v2377_v36 }
 0x236   :  { %v1678_v27 = vadd.f32 %v5504_v18, %v5392_v30 }
 0x237   :  { %v2348_v32 = vsub.f32 %v2092_v10, %v2316_v37  ;;  %v2315_v51 = vmul.f32 %v5185_v34, %v1867_v15  ;;  %v3236_v16 = vmul.f32 %v1867_v15, %v1867_v15  ;;  %4146 = vmatprep.mubr.msk.f32.mxu1 %vm45_vm1, %v2409_v52  ;;  %v5750_v41 = vadd.f32 %v3237_v53, %v3205_v48  ;;  %v4345_v37 = vld [vmem:[#allocation2 + $0x10] sm:$0xff] }
 0x238   :  { %4147 = vmatmul.mubr.msk.f32.vlgmr.msra.gmra.mxu1 %vm45_vm1, %v2410_v11  ;;  %v1748_v50 = vpop.permute.xlu1 %1747  ;;  %v1677_v34 = vadd.f32 %v5509_v20, %v1517_v21  ;;  %v2094_v22 = vmul.f32 %v5133_v28, %v1678_v27  ;;  %v3207_v1 = vmul.f32 %v1678_v27, %v1678_v27  ;;  %v4346_v28 = vld [vmem:[#allocation2 + $0x18] sm:$0xff] }
 0x239   :  { %v2347_v0 = vsub.f32 %v2091_v35, %v2315_v51  ;;  %v1838_v61 = vmul.f32 %v1748_v50, %v5389_v14  ;;  %4266 = vmatpush3.msra.mxu1 %v5240_v42  ;;  %v5757_v12 = vadd.f32 %v3236_v16, %v3204_v44  ;;  %v2380_v56 = vmul.f32 0.1, %v2348_v32 }
 0x23a   :  { %v1746_v3 = vpop.permute.xlu0 %1745  ;;  %4259 = vmatprep.subr.mxu1 %v5259_v23  ;;  %v1487_v14 = vadd.f32 1.0, %v4978_v31 }
 0x23b   :  { %v2379_v60 = vmul.f32 0.1, %v2347_v0  ;;  %v1870_v36 = vadd.f32 %v1838_v61, %v5504_v18  ;;  %v1837_v30 = vmul.f32 %v1746_v3, %v1485_v6  ;;  %4267 = vmatpush3.msra.mxu1 %v5259_v23  ;;  %v2093_v18 = vmul.f32 %v5135_v33, %v1677_v34  ;;  %v4347_v0 = vld [vmem:[#allocation2 + $0x20] sm:$0xff] }
 0x23c   :  { %4260 = vmatprep.subr.mxu1 %v5279_v39  ;;  %v3206_v6 = vmul.f32 %v1677_v34, %v1677_v34  ;;  %v1519_v23 = vmul.f32 %v1487_v14, %v5425_v7  ;;  %v2412_v15 = vadd.f32 %v4346_v28, %v2380_v56 }
 0x23d   :  { %v2318_v42 = vmul.f32 %v5189_v9, %v1870_v36  ;;  %v3239_v10 = vmul.f32 %v1870_v36, %v1870_v36  ;;  %v1869_v48 = vadd.f32 %v1837_v30, %v5509_v20  ;;  %v2411_v53 = vadd.f32 %v4345_v37, %v2379_v60  ;;  %4268 = vmatpush3.msra.mxu1 %v5279_v39  ;;  %v6857_v36 = vld [vmem:[#allocation65_spill] sm:$0xff]  ;;  %v6860_v37 = vld [vmem:[#allocation78_spill] sm:$0xff] }
 0x23e   :  { %4261 = vmatprep.subr.mxu1 %v5289_v5  ;;  %v1680_v39 = vadd.f32 %v5511_v2, %v5419_v24 }
 0x23f   :  { %v2350_v57 = vsub.f32 %v2094_v22, %v2318_v42  ;;  %v2317_v52 = vmul.f32 %v5191_v43, %v1869_v48  ;;  %v3238_v9 = vmul.f32 %v1869_v48, %v1869_v48  ;;  %4149 = vmatprep.mubr.msk.f32.mxu1 %vm45_vm1, %v2411_v53  ;;  %4269 = vmatpush3.msra.mxu1 %v5289_v5  ;;  %v6858_v22 = vld [vmem:[#allocation38_spill] sm:$0xff]  ;;  %v6859_v42 = vld [vmem:[#allocation79_spill] sm:$0xff] }
 0x240   :  { %4150 = vmatmul.mubr.msk.f32.gmra.mxu1 %vm45_vm1, %v2412_v15  ;;  %v1752_v33 = vpop.permute.xlu1 %1751  ;;  %v5778_v20 = vadd.f32 %v3239_v10, %v3207_v1  ;;  %4262 = vmatprep.subr.mxu1 %v5299_v59  ;;  %v1679_v43 = vadd.f32 %v5516_v58, %v1519_v23  ;;  %v2096_v32 = vmul.f32 %v5147_v54, %v1680_v39  ;;  %v4348_v54 = vld [vmem:[#allocation2 + $0x28] sm:$0xff] }
 0x241   :  { %v2349_v7 = vsub.f32 %v2093_v18, %v2317_v52  ;;  %v1840_v35 = vmul.f32 %v1752_v33, %v5412_v40  ;;  %v5782_v44 = vadd.f32 %v3238_v9, %v3206_v6  ;;  %4270 = vmatpush3.msra.mxu1 %v5299_v59  ;;  %v2382_v5 = vmul.f32 0.1, %v2350_v57  ;;  %v6854_v59 = vld [vmem:[#allocation37_spill] sm:$0xff]  ;;  %v6861_v6 = vld [vmem:[#allocation92_spill] sm:$0xff] }
 0x242   :  { %v1750_v21 = vpop.permute.xlu0 %1749  ;;  %4263 = vmatprep.subr.mxu1 %v5313_v29  ;;  %v3209_v51 = vmul.f32 %v1680_v39, %v1680_v39  ;;  %v1489_v40 = vadd.f32 1.0, %v4990_v46  ;;  %v3208_v56 = vmul.f32 %v1679_v43, %v1679_v43  ;;  %v6862_v39 = vld [vmem:[#allocation31_spill] sm:$0xff] }
 0x243   :  { %v2381_v24 = vmul.f32 0.1, %v2349_v7  ;;  %v1872_v45 = vadd.f32 %v1840_v35, %v5511_v2  ;;  %v1839_v11 = vmul.f32 %v1750_v21, %v1487_v14  ;;  %4271 = vmatpush3.msra.mxu1 %v5313_v29  ;;  %v6855_v2 = vld [vmem:[#allocation30_spill] sm:$0xff]  ;;  %v6856_v29 = vld [vmem:[#allocation80_spill] sm:$0xff]  ;;  %v2414_v60 = vadd.f32 %v4348_v54, %v2382_v5  ;;  %v6864_v5 = vld [vmem:[#allocation39_spill] sm:$0xff] }
 0x244   :  { %4264 = vmatprep.subr.mxu1 %v5323_v4  ;;  %v2095_v34 = vmul.f32 %v6855_v2, %v1679_v43  ;;  %v1521_v3 = vmul.f32 %v1489_v40, %v6856_v29  ;;  %v6863_v35 = vld [vmem:[#allocation8_spill] sm:$0xff] }
 0x245   :  { %v2320_v16 = vmul.f32 %v6854_v59, %v1872_v45  ;;  %v3241_v27 = vmul.f32 %v1872_v45, %v1872_v45  ;;  %v1871_v50 = vadd.f32 %v1839_v11, %v5516_v58  ;;  %v2413_v61 = vadd.f32 %v4347_v0, %v2381_v24  ;;  %4272 = vmatpush3.msra.mxu1 %v5323_v4  ;;  %v4349_v11 = vld [vmem:[#allocation2 + $0x30] sm:$0xff]  ;;  %v4350_v0 = vld [vmem:[#allocation2 + $0x38] sm:$0xff]  ;;  %v6868_v29 = vld [vmem:[#allocation84_spill] sm:$0xff] }
 0x246   :  { %4265 = vmatprep.subr.mxu1 %v6857_v36  ;;  %v1682_v4 = vadd.f32 %v5531_v62, %v6859_v42  ;;  %v1681_v23 = vadd.f32 %v6861_v6, %v1521_v3  ;;  %v1491_v43 = vadd.f32 1.0, %v6863_v35  ;;  %v6869_v3 = vld [vmem:[#allocation93_spill] sm:$0xff] }
 0x247   :  { %v2352_v30 = vsub.f32 %v2096_v32, %v2320_v16  ;;  %v2319_v1 = vmul.f32 %v6858_v22, %v1871_v50  ;;  %v3240_v14 = vmul.f32 %v1871_v50, %v1871_v50  ;;  %4152 = vmatprep.mubr.msk.f32.mxu1 %vm45_vm1, %v2413_v61  ;;  %v5800_v58 = vadd.f32 %v3241_v27, %v3209_v51  ;;  %v6865_v51 = vld [vmem:[#allocation32_spill] sm:$0xff]  ;;  %v6866_v27 = vld [vmem:[#allocation85_spill] sm:$0xff] }
 0x248   :  { %4153 = vmatmul.mubr.msk.f32.gmra.mxu1 %vm45_vm1, %v2414_v60  ;;  %v1756_v10 = vpop.permute.xlu1 %1755  ;;  %v2098_v33 = vmul.f32 %v6862_v39, %v1682_v4  ;;  %v3211_v7 = vmul.f32 %v1682_v4, %v1682_v4  ;;  %v2097_v59 = vmul.f32 %v6865_v51, %v1681_v23  ;;  %v3210_v16 = vmul.f32 %v1681_v23, %v1681_v23  ;;  %v6867_v61 = vld [vmem:[#allocation40_spill] sm:$0xff]  ;;  %v6872_v4 = vld [vmem:[#allocation95_spill] sm:$0xff] }
 0x249   :  { %v2351_v48 = vsub.f32 %v2095_v34, %v2319_v1  ;;  %v1842_v53 = vmul.f32 %v1756_v10, %v6860_v37  ;;  %v5806_v18 = vadd.f32 %v3240_v14, %v3208_v56  ;;  %4273 = vmatpush3.msra.mxu1 %v6857_v36  ;;  %v2384_v28 = vmul.f32 0.1, %v2352_v30  ;;  %v6870_v30 = vld [vmem:[#allocation83_spill] sm:$0xff] }
 0x24a   :  { %v1754_v15 = vpop.permute.xlu0 %1753  ;;  %v1523_v50 = vmul.f32 %v1491_v43, %v6866_v27  ;;  %v1684_v54 = vadd.f32 %v6869_v3, %v6868_v29  ;;  %v6871_v1 = vld [vmem:[#allocation3_spill] sm:$0xff]  ;;  %v4352_v27 = vld [vmem:[#allocation2 + $0x48] sm:$0xff] }
 0x24b   :  { %v2383_v57 = vmul.f32 0.1, %v2351_v48  ;;  %v1874_v52 = vadd.f32 %v1842_v53, %v5531_v62  ;;  %v1841_v9 = vmul.f32 %v1754_v15, %v1489_v40  ;;  %v2416_v62 = vadd.f32 %v4350_v0, %v2384_v28  ;;  %v6873_v15 = vld [vmem:[#allocation33_spill] sm:$0xff] }
 0x24c   :  { %v3394_v14 = vmul.f32 %v6871_v1, %v6871_v1  ;;  %v1683_v10 = vadd.f32 %v6872_v4, %v1523_v50  ;;  %v3395_v28 = vmul.f32 %v4940_v49, %v4940_v49 }
 0x24d   :  { %v2322_v21 = vmul.f32 %v6864_v5, %v1874_v52  ;;  %v3243_v24 = vmul.f32 %v1874_v52, %v1874_v52  ;;  %v1873_v45 = vadd.f32 %v1841_v9, %v6861_v6  ;;  %v2415_v32 = vadd.f32 %v4349_v11, %v2383_v57  ;;  %v6874_v9 = vld [vmem:[#allocation10_spill] sm:$0xff]  ;;  %v6876_v5 = vld [vmem:[#allocation41_spill] sm:$0xff]  ;;  %v4351_v11 = vld [vmem:[#allocation2 + $0x40] sm:$0xff] }
 0x24e   :  { %v2100_v57 = vmul.f32 %v6873_v15, %v1684_v54  ;;  %v3213_v52 = vmul.f32 %v1684_v54, %v1684_v54  ;;  %v1493_v39 = vadd.f32 1.0, %v6874_v9 }
 0x24f   :  { %v2354_v40 = vsub.f32 %v2098_v33, %v2322_v21  ;;  %v2321_v2 = vmul.f32 %v6867_v61, %v1873_v45  ;;  %v3242_v34 = vmul.f32 %v1873_v45, %v1873_v45  ;;  %4155 = vmatprep.mubr.msk.f32.mxu1 %vm45_vm1, %v2415_v32  ;;  %v5819_v56 = vadd.f32 %v3243_v24, %v3211_v7  ;;  %v6875_v33 = vld [vmem:[#allocation4_spill] sm:$0xff] }
 0x250   :  { %4156 = vmatmul.mubr.msk.f32.gmra.mxu1 %vm45_vm1, %v2416_v62  ;;  %v1760_v60 = vpop.permute.xlu1 %1759  ;;  %v3396_v7 = vmul.f32 %v6875_v33, %v6875_v33  ;;  %v6879_v62 = vld [vmem:[#allocation42_spill] sm:$0xff]  ;;  %v3400_v33 = vmul.f32 %v4978_v31, %v4978_v31 }
 0x251   :  { %v2353_v36 = vsub.f32 %v2097_v59, %v2321_v2  ;;  %v1844_v22 = vmul.f32 %v1760_v60, %v6870_v30  ;;  %v5827_v42 = vadd.f32 %v3242_v34, %v3210_v16  ;;  %v2386_v48 = vmul.f32 0.1, %v2354_v40  ;;  %v6878_v16 = vld [vmem:[#allocation88_spill] sm:$0xff]  ;;  %v6880_v2 = vld [vmem:[#allocation87_spill] sm:$0xff]  ;;  %v6890_v31 = vld [vmem:[#allocation90_spill] sm:$0xff] }
 0x252   :  { %v1758_v37 = vpop.permute.xlu0 %1757  ;;  %v3212_v59 = vmul.f32 %v1683_v10, %v1683_v10  ;;  %v1525_v49 = vmul.f32 %v1493_v39, %v6878_v16  ;;  %v1686_v34 = vadd.f32 %v5558_v55, %v6880_v2  ;;  %v6892_v2 = vld [vmem:[#allocation6_spill] sm:$0xff] }
 0x253   :  { %v2385_v53 = vmul.f32 0.1, %v2353_v36  ;;  %v1876_v6 = vadd.f32 %v1844_v22, %v6869_v3  ;;  %v1843_v23 = vmul.f32 %v1758_v37, %v1491_v43  ;;  %3426 = vadd.xlane.f32.xlu0 %v3394_v14  ;;  %v6877_v43 = vld [vmem:[#allocation34_spill] sm:$0xff]  ;;  %v2418_v50 = vadd.f32 %v4352_v27, %v2386_v48  ;;  %v6889_v27 = vld [vmem:[#allocation44_spill] sm:$0xff] }
 0x254   :  { %v2099_v51 = vmul.f32 %v6877_v43, %v1683_v10  ;;  %v3397_v3 = vmul.f32 %v4949_v63, %v4949_v63  ;;  %v6881_v36 = vld [vmem:[#allocation86_spill] sm:$0xff]  ;;  %v3398_v22 = vmul.f32 %v4966_v17, %v4966_v17  ;;  %v6883_v63 = vld [vmem:[#allocation5_spill] sm:$0xff]  ;;  %v6888_v43 = vld [vmem:[#allocation91_spill] sm:$0xff] }
 0x255   :  { %v2324_v21 = vmul.f32 %v6876_v5, %v1876_v6  ;;  %v3245_v24 = vmul.f32 %v1876_v6, %v1876_v6  ;;  %v1875_v45 = vadd.f32 %v1843_v23, %v6872_v4  ;;  %v2417_v32 = vadd.f32 %v4351_v11, %v2385_v53  ;;  %v6882_v14 = vld [vmem:[#allocation98_spill] sm:$0xff] }
 0x256   :  { %3428 = vadd.xlane.f32.xlu1 %v3395_v28  ;;  %v1685_v4 = vadd.f32 %v6882_v14, %v1525_v49  ;;  %v3399_v23 = vmul.f32 %v6883_v63, %v6883_v63  ;;  %v6884_v28 = vld [vmem:[#allocation35_spill] sm:$0xff] }
 0x257   :  { %v2356_v0 = vsub.f32 %v2100_v57, %v2324_v21  ;;  %v2323_v40 = vmul.f32 %v6879_v62, %v1875_v45  ;;  %v3244_v61 = vmul.f32 %v1875_v45, %v1875_v45  ;;  %4158 = vmatprep.mubr.msk.f32.mxu1 %vm45_vm1, %v2417_v32  ;;  %3430 = vadd.xlane.f32.xlu0 %v3396_v7  ;;  %v6886_v7 = vld [vmem:[#allocation43_spill] sm:$0xff]  ;;  %v4353_v45 = vld [vmem:[#allocation2 + $0x50] sm:$0xff] }
 0x258   :  { %4159 = vmatmul.mubr.msk.f32.gmra.mxu1 %vm45_vm1, %v2418_v50  ;;  %v1764_v29 = vpop.permute.xlu1 %1763  ;;  %v5848_v54 = vadd.f32 %v3245_v24, %v3213_v52  ;;  %v2102_v15 = vmul.f32 %v6884_v28, %v1686_v34  ;;  %v3215_v57 = vmul.f32 %v1686_v34, %v1686_v34  ;;  %v6885_v52 = vld [vmem:[#allocation12_spill] sm:$0xff]  ;;  %v3214_v32 = vmul.f32 %v1685_v4, %v1685_v4  ;;  %v6891_v62 = vld [vmem:[#allocation99_spill] sm:$0xff] }
 0x259   :  { %v2355_v60 = vsub.f32 %v2099_v51, %v2323_v40  ;;  %v1846_v30 = vmul.f32 %v1764_v29, %v6881_v36  ;;  %v5853_v1 = vadd.f32 %v3244_v61, %v3212_v59  ;;  %v2388_v10 = vmul.f32 0.1, %v2356_v0  ;;  %v4354_v59 = vld [vmem:[#allocation2 + $0x58] sm:$0xff]  ;;  %v6895_v63 = vld [vmem:[#allocation7_spill] sm:$0xff]  ;;  %v6896_v28 = vld [vmem:[#allocation48_spill] sm:$0xff] }
 0x25a   :  { %v1762_v48 = vpop.permute.xlu0 %1761  ;;  %3432 = vadd.xlane.f32.xlu1 %v3397_v3  ;;  %v1495_v17 = vadd.f32 1.0, %v6885_v52  ;;  %v1688_v40 = vadd.f32 %v6891_v62, %v6890_v31  ;;  %v3401_v34 = vmul.f32 %v6892_v2, %v6892_v2 }
 0x25b   :  { %v2387_v37 = vmul.f32 0.1, %v2355_v60  ;;  %v1878_v53 = vadd.f32 %v1846_v30, %v5558_v55  ;;  %v1845_v6 = vmul.f32 %v1762_v48, %v1493_v39  ;;  %3434 = vadd.xlane.f32.xlu0 %v3398_v22  ;;  %v6887_v39 = vld [vmem:[#allocation36_spill] sm:$0xff]  ;;  %v2420_v16 = vadd.f32 %v4354_v59, %v2388_v10  ;;  %v6893_v60 = vld [vmem:[#allocation89_spill] sm:$0xff] }
 0x25c   :  { %v2101_v11 = vmul.f32 %v6887_v39, %v1685_v4  ;;  %v1527_v51 = vmul.f32 %v1495_v17, %v6888_v43  ;;  %v3402_v30 = vmul.f32 %v4990_v46, %v4990_v46  ;;  %v6900_v43 = vld [vmem:[#allocation97_spill] sm:$0xff]  ;;  %v4356_v59 = vld [vmem:[#allocation2 + $0x68] sm:$0xff] }
 0x25d   :  { %v2326_v5 = vmul.f32 %v6886_v7, %v1878_v53  ;;  %v3247_v21 = vmul.f32 %v1878_v53, %v1878_v53  ;;  %v1877_v24 = vadd.f32 %v1845_v6, %v6882_v14  ;;  %v2419_v55 = vadd.f32 %v4353_v45, %v2387_v37  ;;  %v6894_v14 = vld [vmem:[#allocation101_spill] sm:$0xff] }
 0x25e   :  { %3436 = vadd.xlane.f32.xlu1 %v3399_v23  ;;  %v1687_v4 = vadd.f32 %v6894_v14, %v1527_v51  ;;  %v3403_v23 = vmul.f32 %v6895_v63, %v6895_v63  ;;  %v3404_v7 = vmul.f32 %v6863_v35, %v6863_v35  ;;  %v6902_v35 = vld [vmem:[#allocation96_spill] sm:$0xff] }
 0x25f   :  { %v2358_v49 = vsub.f32 %v2102_v15, %v2326_v5  ;;  %v2325_v50 = vmul.f32 %v6889_v27, %v1877_v24  ;;  %v3246_v0 = vmul.f32 %v1877_v24, %v1877_v24  ;;  %4161 = vmatprep.mubr.msk.f32.mxu1 %vm45_vm1, %v2419_v55  ;;  %3438 = vadd.xlane.f32.xlu0 %v3400_v33  ;;  %v6897_v33 = vld [vmem:[#allocation14_spill] sm:$0xff]  ;;  %v6898_v5 = vld [vmem:[#allocation47_spill] sm:$0xff]  ;;  %v6901_v27 = vld [vmem:[#allocation45_spill] sm:$0xff] }
 0x260   :  { %4162 = vmatmul.mubr.msk.f32.gmra.mxu1 %vm45_vm1, %v2420_v16  ;;  %v1768_v61 = vpop.permute.xlu1 %1767  ;;  %v5874_v29 = vadd.f32 %v3247_v21, %v3215_v57  ;;  %v2104_v15 = vmul.f32 %v6896_v28, %v1688_v40  ;;  %v3217_v57 = vmul.f32 %v1688_v40, %v1688_v40  ;;  %v1497_v46 = vadd.f32 1.0, %v6897_v33  ;;  %v4355_v55 = vld [vmem:[#allocation2 + $0x60] sm:$0xff]  ;;  %v6903_v40 = vld [vmem:[#allocation9_spill] sm:$0xff]  ;;  %v6906_v63 = vld [vmem:[#allocation52_spill] sm:$0xff] }
 0x261   :  { %v2357_v3 = vsub.f32 %v2101_v11, %v2325_v50  ;;  %v1848_v36 = vmul.f32 %v1768_v61, %v6893_v60  ;;  %v5879_v22 = vadd.f32 %v3246_v0, %v3214_v32  ;;  %v2390_v10 = vmul.f32 0.1, %v2358_v49  ;;  %v6907_v28 = vld [vmem:[#allocation16_spill] sm:$0xff] }
 0x262   :  { %v1766_v48 = vpop.permute.xlu0 %1765  ;;  %3440 = vadd.xlane.f32.xlu1 %v3401_v34  ;;  %v3216_v32 = vmul.f32 %v1687_v4, %v1687_v4  ;;  %v1529_v51 = vmul.f32 %v1497_v46, %v6900_v43  ;;  %v1690_v31 = vadd.f32 %v5585_v25, %v6902_v35  ;;  %v3405_v61 = vmul.f32 %v6903_v40, %v6903_v40  ;;  %v6911_v43 = vld [vmem:[#allocation50_spill] sm:$0xff]  ;;  %v6915_v35 = vld [vmem:[#allocation13_spill] sm:$0xff] }
 0x263   :  { %v2389_v37 = vmul.f32 0.1, %v2357_v3  ;;  %v1880_v53 = vadd.f32 %v1848_v36, %v6891_v62  ;;  %v1847_v6 = vmul.f32 %v1766_v48, %v1495_v17  ;;  %3442 = vadd.xlane.f32.xlu0 %v3402_v30  ;;  %v6899_v17 = vld [vmem:[#allocation46_spill] sm:$0xff]  ;;  %v2422_v16 = vadd.f32 %v4356_v59, %v2390_v10  ;;  %v6905_v10 = vld [vmem:[#allocation104_spill] sm:$0xff] }
 0x264   :  { %v2103_v11 = vmul.f32 %v6899_v17, %v1687_v4  ;;  %v6904_v3 = vld [vmem:[#allocation94_spill] sm:$0xff]  ;;  %v3406_v36 = vmul.f32 %v6874_v9, %v6874_v9  ;;  %v5908_v48 = vadd.f32 %v6905_v10, %v1529_v51 }
 0x265   :  { %v2328_v21 = vmul.f32 %v6898_v5, %v1880_v53  ;;  %v3249_v24 = vmul.f32 %v1880_v53, %v1880_v53  ;;  %v1879_v45 = vadd.f32 %v1847_v6, %v6894_v14  ;;  %v2421_v39 = vadd.f32 %v4355_v55, %v2389_v37  ;;  %v6909_v5 = vld [vmem:[#allocation51_spill] sm:$0xff]  ;;  %v4357_v55 = vld [vmem:[#allocation2 + $0x70] sm:$0xff] }
 0x266   :  { %3444 = vadd.xlane.f32.xlu1 %v3403_v23  ;;  %v2106_v23 = vmul.f32 %v6906_v63, %v1690_v31  ;;  %v2105_v51 = vmul.f32 %v6911_v43, %v5908_v48 }
 0x267   :  { %v2360_v49 = vsub.f32 %v2104_v15, %v2328_v21  ;;  %v2327_v50 = vmul.f32 %v6901_v27, %v1879_v45  ;;  %v3248_v0 = vmul.f32 %v1879_v45, %v1879_v45  ;;  %4164 = vmatprep.mubr.msk.f32.mxu1 %vm45_vm1, %v2421_v39  ;;  %3446 = vadd.xlane.f32.xlu0 %v3404_v7  ;;  %v1499_v15 = vadd.f32 1.0, %v6907_v28  ;;  %v6910_v39 = vld [vmem:[#allocation103_spill] sm:$0xff]  ;;  %v6914_v27 = vld [vmem:[#allocation105_spill] sm:$0xff] }
 0x268   :  { %4165 = vmatmul.mubr.msk.f32.gmra.mxu1 %vm45_vm1, %v2422_v16  ;;  %v1772_v62 = vpop.permute.xlu1 %1771  ;;  %v5900_v2 = vadd.f32 %v3249_v24, %v3217_v57  ;;  %v6908_v57 = vld [vmem:[#allocation11_spill] sm:$0xff]  ;;  %v3408_v7 = vmul.f32 %v6885_v52, %v6885_v52  ;;  %v6912_v52 = vld [vmem:[#allocation49_spill] sm:$0xff] }
 0x269   :  { %v2359_v34 = vsub.f32 %v2103_v11, %v2327_v50  ;;  %v1850_v60 = vmul.f32 %v1772_v62, %v6904_v3  ;;  %v5905_v30 = vadd.f32 %v3248_v0, %v3216_v32  ;;  %v2392_v14 = vmul.f32 0.1, %v2360_v49  ;;  %v4358_v11 = vld [vmem:[#allocation2 + $0x78] sm:$0xff] }
 0x26a   :  { %v1770_v4 = vpop.permute.xlu0 %1769  ;;  %3448 = vadd.xlane.f32.xlu1 %v3405_v61  ;;  %v3407_v9 = vmul.f32 %v6908_v57, %v6908_v57  ;;  %v1531_v17 = vmul.f32 %v1499_v15, %v6910_v39  ;;  %v6913_v49 = vld [vmem:[#allocation102_spill] sm:$0xff]  ;;  %v6916_v61 = vld [vmem:[#allocation100_spill] sm:$0xff]  ;;  %v3410_v3 = vmul.f32 %v6897_v33, %v6897_v33  ;;  %v3412_v33 = vmul.f32 %v6907_v28, %v6907_v28  ;;  %v6923_v28 = vld [vmem:[#allocation53_spill] sm:$0xff] }
 0x26b   :  { %v2391_v37 = vmul.f32 0.1, %v2359_v34  ;;  %v1882_v53 = vadd.f32 %v1850_v60, %v5585_v25  ;;  %v1849_v6 = vmul.f32 %v1770_v4, %v1497_v46  ;;  %3450 = vadd.xlane.f32.xlu0 %v3406_v36  ;;  %v3219_v46 = vmul.f32 %v1690_v31, %v1690_v31  ;;  %v6917_v60 = vld [vmem:[#allocation107_spill] sm:$0xff]  ;;  %v6922_v39 = vld [vmem:[#allocation54_spill] sm:$0xff] }
 0x26c   :  { %v2424_v32 = vadd.f32 %v4358_v11, %v2392_v14  ;;  %v1692_v50 = vadd.f32 %v6914_v27, %v6913_v49  ;;  %v3409_v31 = vmul.f32 %v6915_v35, %v6915_v35  ;;  %v5938_v36 = vadd.f32 %v6917_v60, %v1531_v17  ;;  %v4360_v11 = vld [vmem:[#allocation2 + $0x88] sm:$0xff] }
 0x26d   :  { %v2330_v21 = vmul.f32 %v6909_v5, %v1882_v53  ;;  %v3251_v24 = vmul.f32 %v1882_v53, %v1882_v53  ;;  %v5919_v45 = vadd.f32 %v1849_v6, %v6905_v10  ;;  %v2423_v25 = vadd.f32 %v4357_v55, %v2391_v37  ;;  %v6918_v6 = vld [vmem:[#allocation56_spill] sm:$0xff]  ;;  %v6921_v5 = vld [vmem:[#allocation55_spill] sm:$0xff] }
 0x26e   :  { %3452 = vadd.xlane.f32.xlu1 %v3407_v9  ;;  %v2108_v63 = vmul.f32 %v6918_v6, %v1692_v50  ;;  %v6920_v9 = vld [vmem:[#allocation15_spill] sm:$0xff]  ;;  %v2107_v17 = vmul.f32 %v6922_v39, %v5938_v36 }
 0x26f   :  { %v2362_v59 = vsub.f32 %v2106_v23, %v2330_v21  ;;  %v2329_v16 = vmul.f32 %v6912_v52, %v5919_v45  ;;  %4167 = vmatprep.mubr.msk.f32.mxu1 %vm45_vm1, %v2423_v25  ;;  %3454 = vadd.xlane.f32.xlu0 %v3408_v7  ;;  %v5932_v62 = vadd.f32 %v3251_v24, %v3219_v46  ;;  %v6919_v23 = vld [vmem:[#allocation18_spill] sm:$0xff]  ;;  %v4359_v25 = vld [vmem:[#allocation2 + $0x80] sm:$0xff]  ;;  %v6924_v52 = vld [vmem:[#allocation108_spill] sm:$0xff] }
 0x270   :  { %4168 = vmatmul.mubr.msk.f32.gmra.mxu1 %vm45_vm1, %v2424_v32  ;;  %v1776_v0 = vpop.permute.xlu1 %1775  ;;  %v1501_v57 = vadd.f32 1.0, %v6919_v23  ;;  %v3411_v7 = vmul.f32 %v6920_v9, %v6920_v9 }
 0x271   :  { %v2361_v40 = vsub.f32 %v2105_v51, %v2329_v16  ;;  %v1852_v34 = vmul.f32 %v1776_v0, %v6916_v61  ;;  %v2394_v14 = vmul.f32 0.1, %v2362_v59  ;;  %v6925_v16 = vld [vmem:[#allocation109_spill] sm:$0xff]  ;;  %v3414_v61 = vmul.f32 %v6919_v23, %v6919_v23 }
 0x272   :  { %v1774_v4 = vpop.permute.xlu0 %1773  ;;  %3456 = vadd.xlane.f32.xlu1 %v3409_v31  ;;  %v1533_v43 = vmul.f32 %v1501_v57, %v5606_v8  ;;  %v1694_v49 = vadd.f32 %v6925_v16, %v6924_v52  ;;  %v6927_v8 = vld [vmem:[#allocation106_spill] sm:$0xff]  ;;  %v6935_v52 = vld [vmem:[#allocation113_spill] sm:$0xff] }
 0x273   :  { %v2393_v10 = vmul.f32 0.1, %v2361_v40  ;;  %v1884_v37 = vadd.f32 %v1852_v34, %v6914_v27  ;;  %v1851_v53 = vmul.f32 %v1774_v4, %v1499_v15  ;;  %3458 = vadd.xlane.f32.xlu0 %v3410_v3  ;;  %v3221_v15 = vmul.f32 %v1692_v50, %v1692_v50  ;;  %v6926_v50 = vld [vmem:[#allocation17_spill] sm:$0xff] }
 0x274   :  { %v2426_v32 = vadd.f32 %v4360_v11, %v2394_v14  ;;  %v3413_v0 = vmul.f32 %v6926_v50, %v6926_v50 }
 0x275   :  { %v2332_v21 = vmul.f32 %v6921_v5, %v1884_v37  ;;  %v3253_v24 = vmul.f32 %v1884_v37, %v1884_v37  ;;  %v5949_v55 = vadd.f32 %v1851_v53, %v6917_v60  ;;  %v2425_v46 = vadd.f32 %v4359_v25, %v2393_v10  ;;  %v6928_v60 = vld [vmem:[#allocation110_spill] sm:$0xff]  ;;  %v6929_v53 = vld [vmem:[#allocation60_spill] sm:$0xff]  ;;  %v6932_v5 = vld [vmem:[#allocation59_spill] sm:$0xff] }
 0x276   :  { %3460 = vadd.xlane.f32.xlu1 %v3411_v7  ;;  %v5968_v14 = vadd.f32 %v6928_v60, %v1533_v43  ;;  %v2110_v6 = vmul.f32 %v6929_v53, %v1694_v49  ;;  %v6931_v7 = vld [vmem:[#allocation19_spill] sm:$0xff] }
 0x277   :  { %v2364_v51 = vsub.f32 %v2108_v63, %v2332_v21  ;;  %v2331_v59 = vmul.f32 %v6923_v28, %v5949_v55  ;;  %4170 = vmatprep.mubr.msk.f32.mxu1 %vm45_vm1, %v2425_v46  ;;  %3462 = vadd.xlane.f32.xlu0 %v3412_v33  ;;  %v5962_v35 = vadd.f32 %v3253_v24, %v3221_v15  ;;  %v6930_v63 = vld [vmem:[#allocation20_spill] sm:$0xff]  ;;  %v4361_v46 = vld [vmem:[#allocation2 + $0x90] sm:$0xff] }
 0x278   :  { %4171 = vmatmul.mubr.msk.f32.gmra.mxu1 %vm45_vm1, %v2426_v32  ;;  %v1780_v27 = vpop.permute.xlu1 %1779  ;;  %v1503_v9 = vadd.f32 1.0, %v6930_v63  ;;  %v3415_v33 = vmul.f32 %v6931_v7, %v6931_v7  ;;  %v3416_v23 = vmul.f32 %v6930_v63, %v6930_v63  ;;  %v6933_v32 = vld [vmem:[#allocation58_spill] sm:$0xff]  ;;  %v6934_v28 = vld [vmem:[#allocation57_spill] sm:$0xff]  ;;  %v6941_v63 = vld [vmem:[#allocation64_spill] sm:$0xff] }
 0x279   :  { %v2363_v31 = vsub.f32 %v2107_v17, %v2331_v59  ;;  %v1854_v40 = vmul.f32 %v1780_v27, %v6927_v8  ;;  %v2396_v34 = vmul.f32 0.1, %v2364_v51  ;;  %v4362_v17 = vld [vmem:[#allocation2 + $0x98] sm:$0xff]  ;;  %v2109_v43 = vmul.f32 %v6933_v32, %v5968_v14  ;;  %v6938_v8 = vld [vmem:[#allocation111_spill] sm:$0xff] }
 0x27a   :  { %v1778_v3 = vpop.permute.xlu0 %1777  ;;  %3464 = vadd.xlane.f32.xlu1 %v3413_v0  ;;  %v1535_v39 = vmul.f32 %v1503_v9, %v5633_v26  ;;  %v6937_v26 = vld [vmem:[#allocation21_spill] sm:$0xff]  ;;  %v6945_v32 = vld [vmem:[#allocation62_spill] sm:$0xff] }
 0x27b   :  { %v2395_v4 = vmul.f32 0.1, %v2363_v31  ;;  %v1886_v10 = vadd.f32 %v1854_v40, %v6925_v16  ;;  %v1853_v37 = vmul.f32 %v1778_v3, %v1501_v57  ;;  %3466 = vadd.xlane.f32.xlu0 %v3414_v61  ;;  %v3223_v57 = vmul.f32 %v1694_v49, %v1694_v49  ;;  %v6936_v16 = vld [vmem:[#allocation112_spill] sm:$0xff]  ;;  %v6939_v61 = vld [vmem:[#allocation22_spill] sm:$0xff] }
 0x27c   :  { %v2428_v11 = vadd.f32 %v4362_v17, %v2396_v34  ;;  %v1696_v27 = vadd.f32 %v6936_v16, %v6935_v52  ;;  %v3417_v50 = vmul.f32 %v6937_v26, %v6937_v26  ;;  %v3418_v34 = vmul.f32 %v6939_v61, %v6939_v61  ;;  %v6940_v3 = vld [vmem:[#allocation114_spill] sm:$0xff]  ;;  %v4363_v17 = vld [vmem:[#allocation2 + $0xa0] sm:$0xff] }
 0x27d   :  { %v2334_v21 = vmul.f32 %v6932_v5, %v1886_v10  ;;  %v3255_v24 = vmul.f32 %v1886_v10, %v1886_v10  ;;  %v5979_v25 = vadd.f32 %v1853_v37, %v6928_v60  ;;  %v2427_v15 = vadd.f32 %v4361_v46, %v2395_v4  ;;  %v6944_v46 = vld [vmem:[#allocation63_spill] sm:$0xff] }
 0x27e   :  { %3468 = vadd.xlane.f32.xlu1 %v3415_v33  ;;  %v5998_v60 = vadd.f32 %v6940_v3, %v1535_v39  ;;  %v2112_v7 = vmul.f32 %v6941_v63, %v1696_v27  ;;  %v1505_v33 = vadd.f32 1.0, %v6939_v61 }
 0x27f   :  { %v2366_v51 = vsub.f32 %v2110_v6, %v2334_v21  ;;  %v2333_v59 = vmul.f32 %v6934_v28, %v5979_v25  ;;  %4173 = vmatprep.mubr.msk.f32.mxu1 %vm45_vm1, %v2427_v15  ;;  %3470 = vadd.xlane.f32.xlu0 %v3416_v23  ;;  %v5992_v0 = vadd.f32 %v3255_v24, %v3223_v57  ;;  %v6942_v23 = vld [vmem:[#allocation23_spill] sm:$0xff]  ;;  %v6943_v21 = vld [vmem:[#allocation25_spill] sm:$0xff] }
 0x280   :  { %4174 = vmatmul.mubr.msk.f32.gmra.mxu1 %vm45_vm1, %v2428_v11  ;;  %v1784_v49 = vpop.permute.xlu1 %1783  ;;  %v3419_v5 = vmul.f32 %v6942_v23, %v6942_v23  ;;  %v3420_v24 = vmul.f32 %v6943_v21, %v6943_v21 }
 0x281   :  { %v2365_v31 = vsub.f32 %v2109_v43, %v2333_v59  ;;  %v1856_v40 = vmul.f32 %v1784_v49, %v6938_v8  ;;  %v2398_v4 = vmul.f32 0.1, %v2366_v51  ;;  %v2111_v43 = vmul.f32 %v6945_v32, %v5998_v60  ;;  %v4364_v51 = vld [vmem:[#allocation2 + $0xa8] sm:$0xff]  ;;  %v6947_v49 = vld [vmem:[#allocation61_spill] sm:$0xff] }
 0x282   :  { %v1782_v10 = vpop.permute.xlu0 %1781  ;;  %3472 = vadd.xlane.f32.xlu1 %v3417_v50  ;;  %v6946_v59 = vld [vmem:[#allocation120_spill] sm:$0xff]  ;;  %v6948_v50 = vld [vmem:[#allocation118_spill] sm:$0xff] }
 0x283   :  { %v2397_v37 = vmul.f32 0.1, %v2365_v31  ;;  %v1888_v53 = vadd.f32 %v1856_v40, %v6936_v16  ;;  %v1855_v6 = vmul.f32 %v1782_v10, %v1503_v9  ;;  %3474 = vadd.xlane.f32.xlu0 %v3418_v34  ;;  %v3225_v9 = vmul.f32 %v1696_v27, %v1696_v27  ;;  %v6949_v31 = vld [vmem:[#allocation115_spill] sm:$0xff]  ;;  %v6950_v40 = vld [vmem:[#allocation24_spill] sm:$0xff] }
 0x284   :  { %v2430_v28 = vadd.f32 %v4364_v51, %v2398_v4  ;;  %v1537_v52 = vmul.f32 %v1505_v33, %v6946_v59  ;;  %v1698_v8 = vadd.f32 %v6949_v31, %v6948_v50  ;;  %v3421_v61 = vmul.f32 %v6950_v40, %v6950_v40  ;;  %v6951_v4 = vld [vmem:[#allocation117_spill] sm:$0xff]  ;;  %v6959_v40 = vld [vmem:[#allocation124_spill] sm:$0xff] }
 0x285   :  { %v2336_v15 = vmul.f32 %v6944_v46, %v1888_v53  ;;  %v3257_v57 = vmul.f32 %v1888_v53, %v1888_v53  ;;  %v6009_v39 = vadd.f32 %v1855_v6, %v6940_v3  ;;  %v2429_v11 = vadd.f32 %v4363_v17, %v2397_v37  ;;  %v6952_v37 = vld [vmem:[#allocation27_spill] sm:$0xff]  ;;  %v6954_v46 = vld [vmem:[#allocation69_spill] sm:$0xff] }
 0x286   :  { %3476 = vadd.xlane.f32.xlu1 %v3419_v5  ;;  %v3422_v53 = vmul.f32 %v6952_v37, %v6952_v37  ;;  %v4365_v51 = vld [vmem:[#allocation2 + $0xb0] sm:$0xff]  ;;  %v3227_v59 = vmul.f32 %v1698_v8, %v1698_v8 }
 0x287   :  { %v2368_v16 = vsub.f32 %v2112_v7, %v2336_v15  ;;  %v2335_v26 = vmul.f32 %v6947_v49, %v6009_v39  ;;  %4176 = vmatprep.mubr.msk.f32.mxu1 %vm45_vm1, %v2429_v11  ;;  %3478 = vadd.xlane.f32.xlu0 %v3420_v24  ;;  %v6022_v34 = vadd.f32 %v3257_v57, %v3225_v9  ;;  %v6953_v7 = vld [vmem:[#allocation116_spill] sm:$0xff]  ;;  %v6955_v57 = vld [vmem:[#allocation26_spill] sm:$0xff]  ;;  %v6957_v49 = vld [vmem:[#allocation67_spill] sm:$0xff] }
 0x288   :  { %4177 = vmatmul.mubr.msk.f32.gmra.mxu1 %vm45_vm1, %v2430_v28  ;;  %v1788_v27 = vpop.permute.xlu1 %1787  ;;  %v6028_v23 = vadd.f32 %v6953_v7, %v1537_v52  ;;  %v2114_v15 = vmul.f32 %v6954_v46, %v1698_v8  ;;  %v3423_v17 = vmul.f32 %v6955_v57, %v6955_v57  ;;  %v6956_v11 = vld [vmem:[#allocation68_spill] sm:$0xff]  ;;  %v3301_v52 = vsel %vm45_vm1, %v5731_v13, 0.0  ;;  %v6964_v57 = vld [vmem:[#allocation125_spill] sm:$0xff] }
 0x289   :  { %v2367_v3 = vsub.f32 %v2111_v43, %v2335_v26  ;;  %v1858_v10 = vmul.f32 %v1788_v27, %v6951_v4  ;;  %v2400_v6 = vmul.f32 0.1, %v2368_v16 }
 0x28a   :  { %v1786_v63 = vpop.permute.xlu0 %1785  ;;  %3480 = vadd.xlane.f32.xlu1 %v3421_v61  ;;  %v2113_v26 = vmul.f32 %v6957_v49, %v6028_v23  ;;  %v6960_v61 = vld [vmem:[#allocation119_spill] sm:$0xff] }
 0x28b   :  { %v2399_v5 = vmul.f32 0.1, %v2367_v3  ;;  %v1890_v21 = vadd.f32 %v1858_v10, %v6949_v31  ;;  %v1857_v24 = vmul.f32 %v1786_v63, %v1505_v33  ;;  %3482 = vadd.xlane.f32.xlu0 %v3422_v53  ;;  %v4366_v33 = vld [vmem:[#allocation2 + $0xb8] sm:$0xff]  ;;  %v1700_v3 = vadd.f32 %v6960_v61, %v6959_v40  ;;  %v6963_v63 = vld [vmem:[#allocation121_spill] sm:$0xff] }
 0x28c   :  { %v2432_v16 = vadd.f32 %v4366_v33, %v2400_v6  ;;  %v6958_v31 = vld [vmem:[#allocation66_spill] sm:$0xff]  ;;  %v3298_v53 = vsel %vm45_vm1, %v5738_v38, 0.0  ;;  %v6962_v6 = vld [vmem:[#allocation127_spill] sm:$0xff]  ;;  %v3307_v38 = vsel %vm45_vm1, %v5750_v41, 0.0 }
 0x28d   :  { %v2338_v9 = vmul.f32 %v6956_v11, %v1890_v21  ;;  %v3259_v32 = vmul.f32 %v1890_v21, %v1890_v21  ;;  %v6036_v43 = vadd.f32 %v1857_v24, %v6953_v7  ;;  %v2431_v28 = vadd.f32 %v4365_v51, %v2399_v5  ;;  %v6961_v10 = vld [vmem:[#allocation122_spill] sm:$0xff]  ;;  %v6965_v11 = vld [vmem:[#allocation73_spill] sm:$0xff]  ;;  %v6966_v51 = vld [vmem:[#allocation72_spill] sm:$0xff] }
 0x28e   :  { %3484 = vadd.xlane.f32.xlu1 %v3423_v17  ;;  %v1699_v7 = vadd.f32 %v6963_v63, %v6962_v6  ;;  %v3304_v24 = vsel %vm45_vm1, %v5757_v12, 0.0  ;;  %v4367_v33 = vld [vmem:[#allocation2 + $0xc0] sm:$0xff] }
 0x28f   :  { %v2370_v50 = vsub.f32 %v2114_v15, %v2338_v9  ;;  %v2337_v27 = vmul.f32 %v6958_v31, %v6036_v43  ;;  %4179 = vmatprep.mubr.msk.f32.mxu1 %vm45_vm1, %v2431_v28  ;;  %3302 = vadd.xlane.f32.xlu0 %v3301_v52  ;;  %v6048_v4 = vadd.f32 %v3259_v32, %v3227_v59  ;;  %v6967_v12 = vld [vmem:[#allocation71_spill] sm:$0xff] }
 0x290   :  { %4180 = vmatmul.mubr.msk.f32.gmra.mxu1 %vm45_vm1, %v2432_v16  ;;  %v1792_v8 = vpop.permute.xlu1 %1791  ;;  %v2116_v9 = vmul.f32 %v6965_v11, %v1700_v3  ;;  %v3229_v32 = vmul.f32 %v1700_v3, %v1700_v3  ;;  %v2115_v49 = vmul.f32 %v6967_v12, %v1699_v7  ;;  %v6974_v11 = vld [vmem:[#allocation29_spill] sm:$0xff] }
 0x291   :  { %v2369_v13 = vsub.f32 %v2113_v26, %v2337_v27  ;;  %v1860_v37 = vmul.f32 %v1792_v8, %v6961_v10  ;;  %v2402_v5 = vmul.f32 0.1, %v2370_v50  ;;  %v3310_v26 = vsel %vm45_vm1, %v5782_v44, 0.0  ;;  %v4368_v50 = vld [vmem:[#allocation2 + $0xc8] sm:$0xff]  ;;  %v6969_v8 = vld [vmem:[#allocation131_spill] sm:$0xff] }
 0x292   :  { %v1790_v21 = vpop.permute.xlu0 %1789  ;;  %3299 = vadd.xlane.f32.xlu1 %v3298_v53  ;;  %v3228_v27 = vmul.f32 %v1699_v7, %v1699_v7  ;;  %v6972_v53 = vld [vmem:[#allocation126_spill] sm:$0xff]  ;;  %v6973_v7 = vld [vmem:[#allocation129_spill] sm:$0xff] }
 0x293   :  { %v2401_v46 = vmul.f32 0.1, %v2369_v13  ;;  %v1892_v15 = vadd.f32 %v1860_v37, %v6960_v61  ;;  %v1859_v17 = vmul.f32 %v1790_v21, %v6964_v57  ;;  %3305 = vadd.xlane.f32.xlu0 %v3304_v24  ;;  %v2434_v31 = vadd.f32 %v4368_v50, %v2402_v5  ;;  %v6968_v61 = vld [vmem:[#allocation70_spill] sm:$0xff]  ;;  %v6970_v13 = vld [vmem:[#allocation123_spill] sm:$0xff]  ;;  %v6971_v37 = vld [vmem:[#allocation133_spill] sm:$0xff] }
 0x294   :  { %v1702_v10 = vadd.f32 %v6970_v13, %v6969_v8  ;;  %v1701_v6 = vadd.f32 %v6972_v53, %v6971_v37  ;;  %v3313_v24 = vsel %vm45_vm1, %v5778_v20, 0.0  ;;  %v6979_v37 = vld [vmem:[#allocation74_spill] sm:$0xff] }
 0x295   :  { %v2340_v28 = vmul.f32 %v6966_v51, %v1892_v15  ;;  %v3261_v59 = vmul.f32 %v1892_v15, %v1892_v15  ;;  %v1891_v52 = vadd.f32 %v1859_v17, %v6963_v63  ;;  %v2433_v16 = vadd.f32 %v4367_v33, %v2401_v46  ;;  %v6975_v51 = vld [vmem:[#allocation132_spill] sm:$0xff]  ;;  %v6977_v33 = vld [vmem:[#allocation75_spill] sm:$0xff] }
 0x296   :  { %3308 = vadd.xlane.f32.xlu1 %v3307_v38  ;;  %v3316_v17 = vsel %vm45_vm1, %v5806_v18, 0.0  ;;  %v2117_v20 = vmul.f32 %v6977_v33, %v1701_v6  ;;  %v3231_v12 = vmul.f32 %v1702_v10, %v1702_v10  ;;  %v3230_v8 = vmul.f32 %v1701_v6, %v1701_v6  ;;  %v4371_v33 = vld [vmem:[#allocation2 + $0xe0] sm:$0xff] }
 0x297   :  { %v2372_v40 = vsub.f32 %v2116_v9, %v2340_v28  ;;  %v2339_v41 = vmul.f32 %v6968_v61, %v1891_v52  ;;  %v3260_v3 = vmul.f32 %v1891_v52, %v1891_v52  ;;  %4182 = vmatprep.mubr.msk.f32.mxu1 %vm45_vm1, %v2433_v16  ;;  %3311 = vadd.xlane.f32.xlu0 %v3310_v26  ;;  %v1511_v9 = vadd.f32 1.0, %v6974_v11 }
 0x298   :  { %4183 = vmatmul.mubr.msk.f32.gmra.mxu1 %vm45_vm1, %v2434_v31  ;;  %v1796_v63 = vpop.permute.xlu1 %1795  ;;  %v6074_v44 = vadd.f32 %v3261_v59, %v3229_v32  ;;  %v6976_v59 = vld [vmem:[#allocation77_spill] sm:$0xff]  ;;  %v3319_v16 = vsel %vm45_vm1, %v5800_v58, 0.0  ;;  %v3322_v61 = vsel %vm45_vm1, %v5827_v42, 0.0  ;;  %v6981_v42 = vld [vmem:[#allocation134_spill] sm:$0xff]  ;;  %v3325_v6 = vsel %vm45_vm1, %v5819_v56, 0.0 }
 0x299   :  { %v2371_v5 = vsub.f32 %v2115_v49, %v2339_v41  ;;  %v1862_v21 = vmul.f32 %v1796_v63, %v6973_v7  ;;  %v6079_v46 = vadd.f32 %v3260_v3, %v3228_v27  ;;  %v2404_v15 = vmul.f32 0.1, %v2372_v40  ;;  %v6978_v49 = vld [vmem:[#allocation76_spill] sm:$0xff]  ;;  %v4369_v31 = vld [vmem:[#allocation2 + $0xd0] sm:$0xff]  ;;  %v4370_v41 = vld [vmem:[#allocation2 + $0xd8] sm:$0xff] }
 0x29a   :  { %v1794_v57 = vpop.permute.xlu0 %1793  ;;  %3314 = vadd.xlane.f32.xlu1 %v3313_v24  ;;  %v2118_v52 = vmul.f32 %v6976_v59, %v1702_v10  ;;  %v1543_v40 = vmul.f32 %v1511_v9, %v5729_v47  ;;  %v6980_v63 = vld [vmem:[#allocation128_spill] sm:$0xff]  ;;  %v3331_v56 = vsel %vm45_vm1, %v5848_v54, 0.0 }
 0x29b   :  { %v2403_v38 = vmul.f32 0.1, %v2371_v5  ;;  %v1894_v32 = vadd.f32 %v1862_v21, %v6970_v13  ;;  %v1861_v28 = vmul.f32 %v1794_v57, %v6975_v51  ;;  %3317 = vadd.xlane.f32.xlu0 %v3316_v17  ;;  %v2436_v3 = vadd.f32 %v4370_v41, %v2404_v15 }
 0x29c   :  { %v1704_v47 = vadd.f32 %v6980_v63, %v5725_v19  ;;  %v3328_v17 = vsel %vm45_vm1, %v5853_v1, 0.0  ;;  %v3250_v1 = vmul.f32 %v5919_v45, %v5919_v45  ;;  %v3218_v45 = vmul.f32 %v5908_v48, %v5908_v48 }
 0x29d   :  { %v2342_v26 = vmul.f32 %v6978_v49, %v1894_v32  ;;  %v3263_v50 = vmul.f32 %v1894_v32, %v1894_v32  ;;  %v1893_v18 = vadd.f32 %v1861_v28, %v6972_v53  ;;  %v2435_v27 = vadd.f32 %v4369_v31, %v2403_v38  ;;  %v6982_v38 = vld [vmem:[#allocation130_spill] sm:$0xff] }
 0x29e   :  { %3320 = vadd.xlane.f32.xlu1 %v3319_v16  ;;  %v6110_v32 = vadd.f32 %v6982_v38, %v1543_v40  ;;  %v3233_v59 = vmul.f32 %v1704_v47, %v1704_v47  ;;  %v3252_v40 = vmul.f32 %v5949_v55, %v5949_v55  ;;  %v3282_v41 = vadd.f32 %v3250_v1, %v3218_v45 }
 0x29f   :  { %v2374_v13 = vsub.f32 %v2118_v52, %v2342_v26  ;;  %v2341_v58 = vmul.f32 %v6979_v37, %v1893_v18  ;;  %v3262_v10 = vmul.f32 %v1893_v18, %v1893_v18  ;;  %4185 = vmatprep.mubr.msk.f32.mxu1 %vm45_vm1, %v2435_v27  ;;  %3323 = vadd.xlane.f32.xlu0 %v3322_v61  ;;  %v6983_v26 = vld [vmem:[#allocation82_spill] sm:$0xff]  ;;  %v6984_v18 = vld [vmem:[#allocation81_spill] sm:$0xff]  ;;  %v3340_v61 = vsel %vm45_vm1, %v5905_v30, 0.0 }
 0x2a0   :  { %4186 = vmatmul.mubr.msk.f32.gmra.mxu1 %vm45_vm1, %v2436_v3  ;;  %v1800_v53 = vpop.permute.xlu1 %1799  ;;  %v6100_v5 = vadd.f32 %v3263_v50, %v3231_v12  ;;  %v4372_v12 = vld [vmem:[#allocation2 + $0xe8] sm:$0xff]  ;;  %v2119_v50 = vmul.f32 %v6983_v26, %v6110_v32  ;;  %v4373_v37 = vld [vmem:[#allocation2 + $0xf0] sm:$0xff]  ;;  %v3346_v55 = vsel %vm45_vm1, %v3282_v41, 0.0  ;;  %v3232_v1 = vmul.f32 %v6110_v32, %v6110_v32  ;;  %v4212_v41 = vpop.f32.mrf.mxu0 }
 0x2a1   :  { %v2373_v7 = vsub.f32 %v2117_v20, %v2341_v58  ;;  %v1864_v21 = vmul.f32 %v1800_v53, %v6981_v42  ;;  %v6105_v24 = vadd.f32 %v3262_v10, %v3230_v8  ;;  %v2406_v15 = vmul.f32 0.1, %v2374_v13 }
 0x2a2   :  { %3326 = vadd.xlane.f32.xlu1 %v3325_v6  ;;  %v1798_v57 = vpop.permute.xlu0 %1797  ;;  %v3220_v8 = vmul.f32 %v5938_v36, %v5938_v36  ;;  %v3343_v13 = vsel %vm45_vm1, %v5900_v2, 0.0  ;;  %v3222_v36 = vmul.f32 %v5968_v14, %v5968_v14  ;;  %v3349_v2 = vsel %vm45_vm1, %v5932_v62, 0.0  ;;  %v4374_v62 = vld [vmem:[#allocation2 + $0xf8] sm:$0xff] }
 0x2a3   :  { %v2405_v19 = vmul.f32 0.1, %v2373_v7  ;;  %v1863_v51 = vmul.f32 %v1798_v57, %v1511_v9  ;;  %3329 = vadd.xlane.f32.xlu0 %v3328_v17  ;;  %v1896_v28 = vadd.f32 %v1864_v21, %v6980_v63  ;;  %v3334_v9 = vsel %vm45_vm1, %v5879_v22, 0.0 }
 0x2a4   :  { %v2438_v49 = vadd.f32 %v4372_v12, %v2406_v15  ;;  %v3337_v22 = vsel %vm45_vm1, %v5874_v29, 0.0  ;;  %v3254_v29 = vmul.f32 %v5979_v25, %v5979_v25  ;;  %v3284_v10 = vadd.f32 %v3252_v40, %v3220_v8 }
 0x2a5   :  { %v6114_v52 = vadd.f32 %v1863_v51, %v6982_v38  ;;  %v2437_v20 = vadd.f32 %v4371_v33, %v2405_v19  ;;  %v3265_v16 = vmul.f32 %v1896_v28, %v1896_v28  ;;  %v3256_v7 = vmul.f32 %v6009_v39, %v6009_v39  ;;  %v2467_v38 = vld [vmem:[%s6638_s2 + $0xd0] sm:$0xff] }
 0x2a6   :  { %3332 = vadd.xlane.f32.xlu1 %v3331_v56  ;;  %v3352_v42 = vsel %vm45_vm1, %v3284_v10, 0.0  ;;  %v3286_v21 = vadd.f32 %v3254_v29, %v3222_v36  ;;  %v3224_v6 = vmul.f32 %v5998_v60, %v5998_v60  ;;  %v3355_v14 = vsel %vm45_vm1, %v5962_v35, 0.0  ;;  %v2471_v56 = vld [vmem:[%s6638_s2 + $0xf0] sm:$0xff] }
 0x2a7   :  { %v2343_v31 = vmul.f32 %v6984_v18, %v6114_v52  ;;  %4188 = vmatprep.mubr.msk.f32.mxu1 %vm45_vm1, %v2437_v20  ;;  %3335 = vadd.xlane.f32.xlu0 %v3334_v9  ;;  %v6127_v54 = vadd.f32 %v3265_v16, %v3233_v59  ;;  %v3226_v60 = vmul.f32 %v6028_v23, %v6028_v23  ;;  %v3361_v35 = vsel %vm45_vm1, %v5992_v0, 0.0  ;;  %v2470_v23 = vld [vmem:[%s6638_s2 + $0xe8] sm:$0xff] }
 0x2a8   :  { %4189 = vmatmul.mubr.msk.f32.gmra.mxu1 %vm45_vm1, %v2438_v49  ;;  %v3358_v39 = vsel %vm45_vm1, %v3286_v21, 0.0  ;;  %v3288_v17 = vadd.f32 %v3256_v7, %v3224_v6  ;;  %v3367_v0 = vsel %vm45_vm1, %v6022_v34, 0.0  ;;  %v3373_v33 = vsel %vm45_vm1, %v6048_v4, 0.0  ;;  %v2472_v34 = vld [vmem:[%s6638_s2 + $0xf8] sm:$0xff] }
 0x2a9   :  { %v2375_v27 = vsub.f32 %v2119_v50, %v2343_v31  ;;  %v3264_v20 = vmul.f32 %v6114_v52, %v6114_v52  ;;  %v3376_v16 = vsel %vm45_vm1, %v6079_v46, 0.0  ;;  %v3379_v4 = vsel %vm45_vm1, %v6074_v44, 0.0  ;;  %v6985_v44 = vld [vmem:[#allocation28_spill] sm:$0xff] }
 0x2aa   :  { %3338 = vadd.xlane.f32.xlu1 %v3337_v22  ;;  %v3364_v19 = vsel %vm45_vm1, %v3288_v17, 0.0  ;;  %v3382_v9 = vsel %vm45_vm1, %v6105_v24, 0.0  ;;  %v3385_v52 = vsel %vm45_vm1, %v6100_v5, 0.0  ;;  %v3391_v49 = vsel %vm45_vm1, %v6127_v54, 0.0 }
 0x2ab   :  { %v2407_v3 = vmul.f32 0.1, %v2375_v27  ;;  %3341 = vadd.xlane.f32.xlu0 %v3340_v61  ;;  %v3296_v12 = vadd.f32 %v3264_v20, %v3232_v1  ;;  %v3424_v32 = vmul.f32 %v6974_v11, %v6974_v11  ;;  %v3425_v24 = vmul.f32 %v6985_v44, %v6985_v44 }
 0x2ad   :  { %v2087_v48 = vpop.permute.xlu1 %2086  ;;  %v2439_v58 = vadd.f32 %v4373_v37, %v2407_v3  ;;  %v3388_v46 = vsel %vm45_vm1, %v3296_v12, 0.0 }
 0x2ae   :  { %3344 = vadd.xlane.f32.xlu1 %v3343_v13  ;;  %v2120_v53 = vmul.f32 %v2087_v48, %v1704_v47  ;;  %v3258_v47 = vmul.f32 %v6036_v43, %v6036_v43  ;;  %v2468_v43 = vld [vmem:[%s6638_s2 + $0xd8] sm:$0xff]  ;;  %v2972_v48 = vpop.f32.mrf.mxu0 }
 0x2af   :  { %3347 = vadd.xlane.f32.xlu0 %v3346_v55  ;;  %v2311_v30 = vpop.permute.xlu0 %2310  ;;  %4191 = vmatprep.mubr.msk.f32.mxu1 %vm45_vm1, %v2439_v58  ;;  %v6247_v58 = vld [vmem:[%s6639_s10] ss:$0 sm:$0xff] }
 0x2b0   :  { %v2344_v63 = vmul.f32 %v2311_v30, %v1896_v28  ;;  %v3290_v51 = vadd.f32 %v3258_v47, %v3226_v60  ;;  %v2469_v28 = vld [vmem:[%s6638_s2 + $0xe0] sm:$0xff] }
 0x2b2   :  { %v2376_v25 = vsub.f32 %v2120_v53, %v2344_v63  ;;  %3350 = vadd.xlane.f32.xlu1 %v3349_v2  ;;  %v3370_v59 = vsel %vm45_vm1, %v3290_v51, 0.0  ;;  %v4215_v53 = vpop.f32.mrf.mxu0 }
 0x2b3   :  { %3353 = vadd.xlane.f32.xlu0 %v3352_v42 }
 0x2b4   :  { %v2408_v15 = vmul.f32 0.1, %v2376_v25  ;;  %v2982_v25 = vpop.f32.mrf.mxu0 }
 0x2b6   :  { %v2440_v57 = vadd.f32 %v4374_v62, %v2408_v15  ;;  %3356 = vadd.xlane.f32.xlu1 %v3355_v14 }
 0x2b7   :  { %3359 = vadd.xlane.f32.xlu0 %v3358_v39 }
 0x2b8   :  { %4192 = vmatmul.mubr.msk.f32.gmra.mxu1 %vm45_vm1, %v2440_v57  ;;  %v4218_v57 = vpop.f32.mrf.mxu0 }
 0x2b9   :  { %4249 = vmatprep.mubr.msk.f32.mxu1 %vm45_vm1, %v2467_v38 }
 0x2ba   :  { %3362 = vadd.xlane.f32.xlu1 %v3361_v35  ;;  %v2992_v60 = vpop.f32.mrf.mxu0 }
 0x2bb   :  { %3365 = vadd.xlane.f32.xlu0 %v3364_v19 }
 0x2bc   :  { %4250 = vmatmul.mubr.msk.f32.vlgmr.msra.gmra.mxu1 %vm45_vm1, %v2468_v43 }
 0x2bd   :  { %4252 = vmatprep.mubr.msk.f32.mxu1 %vm45_vm1, %v2469_v28 }
 0x2be   :  { %3368 = vadd.xlane.f32.xlu1 %v3367_v0 }
 0x2bf   :  { %3371 = vadd.xlane.f32.xlu0 %v3370_v59  ;;  %v4221_v59 = vpop.f32.mrf.mxu0 }
 0x2c0   :  { %4253 = vmatmul.mubr.msk.f32.gmra.mxu1 %vm45_vm1, %v2470_v23 }
 0x2c1   :  { %4255 = vmatprep.mubr.msk.f32.mxu1 %vm45_vm1, %v2471_v56  ;;  %v3002_v20 = vpop.f32.mrf.mxu0 }
 0x2c2   :  { %3374 = vadd.xlane.f32.xlu1 %v3373_v33 }
 0x2c3   :  { %3377 = vadd.xlane.f32.xlu0 %v3376_v16 }
 0x2c4   :  { %4256 = vmatmul.mubr.msk.f32.gmra.mxu1 %vm45_vm1, %v2472_v34 }
 0x2c6   :  { %3380 = vadd.xlane.f32.xlu1 %v3379_v4 }
 0x2c7   :  { %3383 = vadd.xlane.f32.xlu0 %v3382_v9 }
 0x2ca   :  { %3386 = vadd.xlane.f32.xlu1 %v3385_v52 }
 0x2cb   :  { %3389 = vadd.xlane.f32.xlu0 %v3388_v46 }
 0x2ce   :  { %3392 = vadd.xlane.f32.xlu1 %v3391_v49  ;;  %v4224_v49 = vpop.f32.mrf.mxu0 }
 0x2cf   :  { %3486 = vadd.xlane.f32.xlu0 %v3424_v32 }
 0x2d2   :  { %3488 = vadd.xlane.f32.xlu1 %v3425_v24 }
 0x2dc   :  { %v6214_v26 = vpop.xlane.xlu0 %3426 }
 0x2df   :  { %v6216_v50 = vpop.xlane.xlu1 %3428 }
 0x2e0   :  { %v6218_v5 = vpop.xlane.xlu0 %3430 }
 0x2e3   :  { %v6220_v18 = vpop.xlane.xlu1 %3432 }
 0x2e4   :  { %v6222_v31 = vpop.xlane.xlu0 %3434 }
 0x2e7   :  { %v6224_v54 = vpop.xlane.xlu1 %3436 }
 0x2e8   :  { %v6226_v45 = vpop.xlane.xlu0 %3438 }
 0x2eb   :  { %v6228_v11 = vpop.xlane.xlu1 %3440 }
 0x2ec   :  { %v6230_v27 = vpop.xlane.xlu0 %3442 }
 0x2ef   :  { %v6232_v22 = vpop.xlane.xlu1 %3444 }
 0x2f0   :  { %v6234_v40 = vpop.xlane.xlu0 %3446 }
 0x2f3   :  { %v6236_v61 = vpop.xlane.xlu1 %3448 }
 0x2f4   :  { %v6238_v3 = vpop.xlane.xlu0 %3450 }
 0x2f7   :  { %v6240_v8 = vpop.xlane.xlu1 %3452 }
 0x2f8   :  { %v6242_v13 = vpop.xlane.xlu0 %3454  ;;  %v4148_v37 = vpop.f32.mrf.mxu1 }
 0x2f9   :  { %v2978_v29 = vadd.f32 %v4212_v41, %v4148_v37  ;;  %v3012_v41 = vpop.f32.mrf.mxu0 }
 0x2fa   :  { %v2651_v55 = vpop.f32.mrf.mxu1 }
 0x2fb   :  { %v3139_v10 = vadd.f32 %v6247_v58, %v2978_v29  ;;  %v2973_v30 = vadd.f32 %v2972_v48, %v2651_v55  ;;  %v6250_v36 = vpop.xlane.xlu1 %3456 }
 0x2fc   :  { %v6252_v63 = vpop.xlane.xlu0 %3458 }
 0x2fd   :  { %3171 = vst.msk [vmem:[%s6640_s11 + $0x8] sm:$0xff] %vm45_vm1, %v3139_v10  ;;  %v3138_v2 = vadd.f32 %v6247_v58, %v2973_v30 }
 0x2ff   :  { %3170 = vst.msk [vmem:[%s6640_s11] sm:$0xff] %vm45_vm1, %v3138_v2  ;;  %v6263_v7 = vpop.xlane.xlu1 %3460 }
 0x300   :  { %v6265_v42 = vpop.xlane.xlu0 %3462  ;;  %v4151_v21 = vpop.f32.mrf.mxu1 }
 0x301   :  { %v2988_v6 = vadd.f32 %v4215_v53, %v4151_v21 }
 0x302   :  { %v2661_v15 = vpop.f32.mrf.mxu1 }
 0x303   :  { %v3141_v14 = vadd.f32 %v6247_v58, %v2988_v6  ;;  %v2983_v47 = vadd.f32 %v2982_v25, %v2661_v15  ;;  %v6268_v62 = vpop.xlane.xlu1 %3464  ;;  %v4227_v25 = vpop.f32.mrf.mxu0 }
 0x304   :  { %v6270_v39 = vpop.xlane.xlu0 %3466 }
 0x305   :  { %3173 = vst.msk [vmem:[%s6640_s11 + $0x18] sm:$0xff] %vm45_vm1, %v3141_v14  ;;  %v3140_v17 = vadd.f32 %v6247_v58, %v2983_v47  ;;  %v3022_v14 = vpop.f32.mrf.mxu0 }
 0x307   :  { %3172 = vst.msk [vmem:[%s6640_s11 + $0x10] sm:$0xff] %vm45_vm1, %v3140_v17  ;;  %v6281_v38 = vpop.xlane.xlu1 %3468 }
 0x308   :  { %v6283_v35 = vpop.xlane.xlu0 %3470  ;;  %v4154_v43 = vpop.f32.mrf.mxu1 }
 0x309   :  { %v2998_v19 = vadd.f32 %v4218_v57, %v4154_v43 }
 0x30a   :  { %v2671_v51 = vpop.f32.mrf.mxu1 }
 0x30b   :  { %v3143_v28 = vadd.f32 %v6247_v58, %v2998_v19  ;;  %v2993_v0 = vadd.f32 %v2992_v60, %v2671_v51  ;;  %v6286_v23 = vpop.xlane.xlu1 %3472 }
 0x30c   :  { %v6288_v56 = vpop.xlane.xlu0 %3474 }
 0x30d   :  { %3175 = vst.msk [vmem:[%s6640_s11 + $0x28] sm:$0xff] %vm45_vm1, %v3143_v28  ;;  %v3142_v33 = vadd.f32 %v6247_v58, %v2993_v0  ;;  %v4230_v28 = vpop.f32.mrf.mxu0 }
 0x30f   :  { %3174 = vst.msk [vmem:[%s6640_s11 + $0x20] sm:$0xff] %vm45_vm1, %v3142_v33  ;;  %v6299_v34 = vpop.xlane.xlu1 %3476 }
 0x310   :  { %v6301_v16 = vpop.xlane.xlu0 %3478  ;;  %v4157_v1 = vpop.f32.mrf.mxu1 }
 0x311   :  { %v3008_v4 = vadd.f32 %v4221_v59, %v4157_v1 }
 0x312   :  { %v2681_v9 = vpop.f32.mrf.mxu1 }
 0x313   :  { %v3145_v12 = vadd.f32 %v6247_v58, %v3008_v4  ;;  %v3003_v52 = vadd.f32 %v3002_v20, %v2681_v9  ;;  %v6304_v46 = vpop.xlane.xlu1 %3480  ;;  %v3032_v20 = vpop.f32.mrf.mxu0 }
 0x314   :  { %v6306_v32 = vpop.xlane.xlu0 %3482 }
 0x315   :  { %3177 = vst.msk [vmem:[%s6640_s11 + $0x38] sm:$0xff] %vm45_vm1, %v3145_v12  ;;  %v3144_v44 = vadd.f32 %v6247_v58, %v3003_v52 }
 0x317   :  { %3176 = vst.msk [vmem:[%s6640_s11 + $0x30] sm:$0xff] %vm45_vm1, %v3144_v44  ;;  %v6317_v24 = vpop.xlane.xlu1 %3484 }
 0x318   :  { %v3303_v48 = vpop.xlane.xlu0 %3302  ;;  %v4160_v37 = vpop.f32.mrf.mxu1 }
 0x319   :  { %v3492_v29 = vsel %vm3490_vm4, %v3303_v48, %v6216_v50  ;;  %v3018_v55 = vadd.f32 %v4224_v49, %v4160_v37 }
 0x31a   :  { %3525 = vst.msk [vmem:[%s6641_s12 + $0x8] sm:$0xff] %vm3523_vm5, %v3492_v29  ;;  %v2691_v10 = vpop.f32.mrf.mxu1 }
 0x31b   :  { %v3147_v30 = vadd.f32 %v6247_v58, %v3018_v55  ;;  %v3013_v53 = vadd.f32 %v3012_v41, %v2691_v10  ;;  %v3300_v2 = vpop.xlane.xlu1 %3299  ;;  %v4233_v41 = vpop.f32.mrf.mxu0 }
 0x31c   :  { %v3491_v21 = vsel %vm3490_vm4, %v3300_v2, %v6214_v26  ;;  %v3306_v6 = vpop.xlane.xlu0 %3305 }
 0x31d   :  { %3179 = vst.msk [vmem:[%s6640_s11 + $0x48] sm:$0xff] %vm45_vm1, %v3147_v30  ;;  %v3146_v50 = vadd.f32 %v6247_v58, %v3013_v53  ;;  %v3493_v15 = vsel %vm3490_vm4, %v3306_v6, %v6218_v5  ;;  %v3042_v55 = vpop.f32.mrf.mxu0 }
 0x31e   :  { %3524 = vst.msk [vmem:[%s6641_s12] sm:$0xff] %vm3523_vm5, %v3491_v21  ;;  %3526 = vst.msk [vmem:[%s6641_s12 + $0x10] sm:$0xff] %vm3523_vm5, %v3493_v15 }
 0x31f   :  { %3178 = vst.msk [vmem:[%s6640_s11 + $0x40] sm:$0xff] %vm45_vm1, %v3146_v50  ;;  %v3309_v26 = vpop.xlane.xlu1 %3308  ;;  %v4236_v50 = vpop.f32.mrf.mxu0 }
 0x320   :  { %v3494_v47 = vsel %vm3490_vm4, %v3309_v26, %v6220_v18  ;;  %v3312_v57 = vpop.xlane.xlu0 %3311  ;;  %v4163_v17 = vpop.f32.mrf.mxu1 }
 0x321   :  { %3527 = vst.msk [vmem:[%s6641_s12 + $0x18] sm:$0xff] %vm3523_vm5, %v3494_v47  ;;  %v3495_v5 = vsel %vm3490_vm4, %v3312_v57, %v6222_v31  ;;  %v3028_v60 = vadd.f32 %v4227_v25, %v4163_v17  ;;  %v3052_v47 = vpop.f32.mrf.mxu0 }
 0x322   :  { %3528 = vst.msk [vmem:[%s6641_s12 + $0x20] sm:$0xff] %vm3523_vm5, %v3495_v5  ;;  %v2701_v43 = vpop.f32.mrf.mxu1 }
 0x323   :  { %v3149_v19 = vadd.f32 %v6247_v58, %v3028_v60  ;;  %v3023_v18 = vadd.f32 %v3022_v14, %v2701_v43  ;;  %v3315_v51 = vpop.xlane.xlu1 %3314 }
 0x324   :  { %v3496_v0 = vsel %vm3490_vm4, %v3315_v51, %v6224_v54  ;;  %v3318_v59 = vpop.xlane.xlu0 %3317  ;;  %v4239_v51 = vpop.f32.mrf.mxu0 }
 0x325   :  { %3181 = vst.msk [vmem:[%s6640_s11 + $0x58] sm:$0xff] %vm45_vm1, %v3149_v19  ;;  %v3148_v31 = vadd.f32 %v6247_v58, %v3023_v18  ;;  %v3497_v33 = vsel %vm3490_vm4, %v3318_v59, %v6226_v45 }
 0x326   :  { %3529 = vst.msk [vmem:[%s6641_s12 + $0x28] sm:$0xff] %vm3523_vm5, %v3496_v0  ;;  %3530 = vst.msk [vmem:[%s6641_s12 + $0x30] sm:$0xff] %vm3523_vm5, %v3497_v33 }
 0x327   :  { %3180 = vst.msk [vmem:[%s6640_s11 + $0x50] sm:$0xff] %vm45_vm1, %v3148_v31  ;;  %v3321_v54 = vpop.xlane.xlu1 %3320  ;;  %v3062_v31 = vpop.f32.mrf.mxu0 }
 0x328   :  { %v3498_v1 = vsel %vm3490_vm4, %v3321_v54, %v6228_v11  ;;  %v3324_v4 = vpop.xlane.xlu0 %3323  ;;  %v4166_v9 = vpop.f32.mrf.mxu1 }
 0x329   :  { %3531 = vst.msk [vmem:[%s6641_s12 + $0x38] sm:$0xff] %vm3523_vm5, %v3498_v1  ;;  %v3499_v45 = vsel %vm3490_vm4, %v3324_v4, %v6230_v27  ;;  %v3038_v12 = vadd.f32 %v4230_v28, %v4166_v9 }
 0x32a   :  { %3532 = vst.msk [vmem:[%s6641_s12 + $0x40] sm:$0xff] %vm3523_vm5, %v3499_v45  ;;  %v2711_v52 = vpop.f32.mrf.mxu1 }
 0x32b   :  { %v3151_v49 = vadd.f32 %v6247_v58, %v3038_v12  ;;  %v3033_v11 = vadd.f32 %v3032_v20, %v2711_v52  ;;  %v3327_v44 = vpop.xlane.xlu1 %3326  ;;  %v4242_v12 = vpop.f32.mrf.mxu0 }
 0x32c   :  { %v3500_v48 = vsel %vm3490_vm4, %v3327_v44, %v6232_v22  ;;  %v3330_v37 = vpop.xlane.xlu0 %3329 }
 0x32d   :  { %3183 = vst.msk [vmem:[%s6640_s11 + $0x68] sm:$0xff] %vm45_vm1, %v3151_v49  ;;  %v3150_v27 = vadd.f32 %v6247_v58, %v3033_v11  ;;  %v3501_v29 = vsel %vm3490_vm4, %v3330_v37, %v6234_v40  ;;  %v3072_v44 = vpop.f32.mrf.mxu0 }
 0x32e   :  { %3533 = vst.msk [vmem:[%s6641_s12 + $0x48] sm:$0xff] %vm3523_vm5, %v3500_v48  ;;  %3534 = vst.msk [vmem:[%s6641_s12 + $0x50] sm:$0xff] %vm3523_vm5, %v3501_v29 }
 0x32f   :  { %3182 = vst.msk [vmem:[%s6640_s11 + $0x60] sm:$0xff] %vm45_vm1, %v3150_v27  ;;  %v3333_v22 = vpop.xlane.xlu1 %3332 }
 0x330   :  { %v3502_v10 = vsel %vm3490_vm4, %v3333_v22, %v6236_v61  ;;  %v3336_v30 = vpop.xlane.xlu0 %3335  ;;  %v4169_v53 = vpop.f32.mrf.mxu1 }
 0x331   :  { %3535 = vst.msk [vmem:[%s6641_s12 + $0x58] sm:$0xff] %vm3523_vm5, %v3502_v10  ;;  %v3503_v40 = vsel %vm3490_vm4, %v3336_v30, %v6238_v3  ;;  %v3048_v2 = vadd.f32 %v4233_v41, %v4169_v53  ;;  %v4245_v10 = vpop.f32.mrf.mxu0 }
 0x332   :  { %3536 = vst.msk [vmem:[%s6641_s12 + $0x60] sm:$0xff] %vm3523_vm5, %v3503_v40  ;;  %v2721_v25 = vpop.f32.mrf.mxu1 }
 0x333   :  { %v3153_v21 = vadd.f32 %v6247_v58, %v3048_v2  ;;  %v3043_v61 = vadd.f32 %v3042_v55, %v2721_v25  ;;  %v3339_v6 = vpop.xlane.xlu1 %3338  ;;  %v3082_v2 = vpop.f32.mrf.mxu0 }
 0x334   :  { %v3504_v15 = vsel %vm3490_vm4, %v3339_v6, %v6240_v8  ;;  %v3342_v26 = vpop.xlane.xlu0 %3341 }
 0x335   :  { %3185 = vst.msk [vmem:[%s6640_s11 + $0x78] sm:$0xff] %vm45_vm1, %v3153_v21  ;;  %v3152_v3 = vadd.f32 %v6247_v58, %v3043_v61  ;;  %v3505_v14 = vsel %vm3490_vm4, %v3342_v26, %v6242_v13 }
 0x336   :  { %3537 = vst.msk [vmem:[%s6641_s12 + $0x68] sm:$0xff] %vm3523_vm5, %v3504_v15  ;;  %3538 = vst.msk [vmem:[%s6641_s12 + $0x70] sm:$0xff] %vm3523_vm5, %v3505_v14 }
 0x337   :  { %3184 = vst.msk [vmem:[%s6640_s11 + $0x70] sm:$0xff] %vm45_vm1, %v3152_v3  ;;  %v3345_v8 = vpop.xlane.xlu1 %3344  ;;  %v4248_v3 = vpop.f32.mrf.mxu0 }
 0x338   :  { %v3506_v57 = vsel %vm3490_vm4, %v3345_v8, %v6250_v36  ;;  %v3348_v17 = vpop.xlane.xlu0 %3347  ;;  %v4172_v5 = vpop.f32.mrf.mxu1 }
 0x339   :  { %3539 = vst.msk [vmem:[%s6641_s12 + $0x78] sm:$0xff] %vm3523_vm5, %v3506_v57  ;;  %v3507_v13 = vsel %vm3490_vm4, %v3348_v17, %v6252_v63  ;;  %v3058_v60 = vadd.f32 %v4236_v50, %v4172_v5 }
 0x33a   :  { %3540 = vst.msk [vmem:[%s6641_s12 + $0x80] sm:$0xff] %vm3523_vm5, %v3507_v13  ;;  %v2731_v43 = vpop.f32.mrf.mxu1 }
 0x33b   :  { %v3155_v19 = vadd.f32 %v6247_v58, %v3058_v60  ;;  %v3053_v36 = vadd.f32 %v3052_v47, %v2731_v43  ;;  %v3351_v18 = vpop.xlane.xlu1 %3350 }
 0x33c   :  { %v3508_v28 = vsel %vm3490_vm4, %v3351_v18, %v6263_v7  ;;  %v3354_v0 = vpop.xlane.xlu0 %3353 }
 0x33d   :  { %3187 = vst.msk [vmem:[%s6640_s11 + $0x88] sm:$0xff] %vm45_vm1, %v3155_v19  ;;  %v3154_v63 = vadd.f32 %v6247_v58, %v3053_v36  ;;  %v3509_v59 = vsel %vm3490_vm4, %v3354_v0, %v6265_v42 }
 0x33e   :  { %3541 = vst.msk [vmem:[%s6641_s12 + $0x88] sm:$0xff] %vm3523_vm5, %v3508_v28  ;;  %3542 = vst.msk [vmem:[%s6641_s12 + $0x90] sm:$0xff] %vm3523_vm5, %v3509_v59 }
 0x33f   :  { %3186 = vst.msk [vmem:[%s6640_s11 + $0x80] sm:$0xff] %vm45_vm1, %v3154_v63  ;;  %v3357_v7 = vpop.xlane.xlu1 %3356 }
 0x340   :  { %v3510_v33 = vsel %vm3490_vm4, %v3357_v7, %v6268_v62  ;;  %v3360_v54 = vpop.xlane.xlu0 %3359  ;;  %v4175_v20 = vpop.f32.mrf.mxu1 }
 0x341   :  { %3543 = vst.msk [vmem:[%s6641_s12 + $0x98] sm:$0xff] %vm3523_vm5, %v3510_v33  ;;  %v3511_v42 = vsel %vm3490_vm4, %v3360_v54, %v6270_v39  ;;  %v3068_v1 = vadd.f32 %v4239_v51, %v4175_v20 }
 0x342   :  { %3544 = vst.msk [vmem:[%s6641_s12 + $0xa0] sm:$0xff] %vm3523_vm5, %v3511_v42  ;;  %v2741_v4 = vpop.f32.mrf.mxu1 }
 0x343   :  { %v3157_v9 = vadd.f32 %v6247_v58, %v3068_v1  ;;  %v3063_v62 = vadd.f32 %v3062_v31, %v2741_v4  ;;  %v3363_v45 = vpop.xlane.xlu1 %3362 }
 0x344   :  { %v3512_v52 = vsel %vm3490_vm4, %v3363_v45, %v6281_v38  ;;  %v3366_v49 = vpop.xlane.xlu0 %3365 }
 0x345   :  { %3189 = vst.msk [vmem:[%s6640_s11 + $0x98] sm:$0xff] %vm45_vm1, %v3157_v9  ;;  %v3156_v39 = vadd.f32 %v6247_v58, %v3063_v62  ;;  %v3513_v11 = vsel %vm3490_vm4, %v3366_v49, %v6283_v35 }
 0x346   :  { %3545 = vst.msk [vmem:[%s6641_s12 + $0xa8] sm:$0xff] %vm3523_vm5, %v3512_v52  ;;  %3546 = vst.msk [vmem:[%s6641_s12 + $0xb0] sm:$0xff] %vm3523_vm5, %v3513_v11 }
 0x347   :  { %3188 = vst.msk [vmem:[%s6640_s11 + $0x90] sm:$0xff] %vm45_vm1, %v3156_v39  ;;  %v3369_v38 = vpop.xlane.xlu1 %3368 }
 0x348   :  { %v3514_v41 = vsel %vm3490_vm4, %v3369_v38, %v6286_v23  ;;  %v3372_v48 = vpop.xlane.xlu0 %3371  ;;  %v4178_v37 = vpop.f32.mrf.mxu1 }
 0x349   :  { %3547 = vst.msk [vmem:[%s6641_s12 + $0xb8] sm:$0xff] %vm3523_vm5, %v3514_v41  ;;  %v3515_v35 = vsel %vm3490_vm4, %v3372_v48, %v6288_v56  ;;  %v3078_v27 = vadd.f32 %v4242_v12, %v4178_v37 }
 0x34a   :  { %3548 = vst.msk [vmem:[%s6641_s12 + $0xc0] sm:$0xff] %vm3523_vm5, %v3515_v35  ;;  %v2751_v29 = vpop.f32.mrf.mxu1 }
 0x34b   :  { %v3159_v22 = vadd.f32 %v6247_v58, %v3078_v27  ;;  %v3073_v23 = vadd.f32 %v3072_v44, %v2751_v29  ;;  %v3375_v55 = vpop.xlane.xlu1 %3374 }
 0x34c   :  { %v3516_v30 = vsel %vm3490_vm4, %v3375_v55, %v6299_v34  ;;  %v3378_v53 = vpop.xlane.xlu0 %3377 }
 0x34d   :  { %3191 = vst.msk [vmem:[%s6640_s11 + $0xa8] sm:$0xff] %vm45_vm1, %v3159_v22  ;;  %v3158_v56 = vadd.f32 %v6247_v58, %v3073_v23  ;;  %v3517_v40 = vsel %vm3490_vm4, %v3378_v53, %v6301_v16 }
 0x34e   :  { %3549 = vst.msk [vmem:[%s6641_s12 + $0xc8] sm:$0xff] %vm3523_vm5, %v3516_v30  ;;  %3550 = vst.msk [vmem:[%s6641_s12 + $0xd0] sm:$0xff] %vm3523_vm5, %v3517_v40 }
 0x34f   :  { %3190 = vst.msk [vmem:[%s6640_s11 + $0xa0] sm:$0xff] %vm45_vm1, %v3158_v56  ;;  %v3381_v34 = vpop.xlane.xlu1 %3380 }
 0x350   :  { %v3518_v25 = vsel %vm3490_vm4, %v3381_v34, %v6304_v46  ;;  %v3384_v21 = vpop.xlane.xlu0 %3383  ;;  %v4181_v61 = vpop.f32.mrf.mxu1 }
 0x351   :  { %3551 = vst.msk [vmem:[%s6641_s12 + $0xd8] sm:$0xff] %vm3523_vm5, %v3518_v25  ;;  %v3519_v16 = vsel %vm3490_vm4, %v3384_v21, %v6306_v32  ;;  %v3088_v6 = vadd.f32 %v4245_v10, %v4181_v61 }
 0x352   :  { %3552 = vst.msk [vmem:[%s6641_s12 + $0xe0] sm:$0xff] %vm3523_vm5, %v3519_v16  ;;  %v2761_v50 = vpop.f32.mrf.mxu1 }
 0x353   :  { %v3161_v15 = vadd.f32 %v6247_v58, %v3088_v6  ;;  %v3083_v46 = vadd.f32 %v3082_v2, %v2761_v50  ;;  %v3387_v26 = vpop.xlane.xlu1 %3386 }
 0x354   :  { %v3520_v14 = vsel %vm3490_vm4, %v3387_v26, %v6317_v24  ;;  %v3390_v8 = vpop.xlane.xlu0 %3389  ;;  %v3092_v24 = vpop.f32.mrf.mxu0 }
 0x355   :  { %3193 = vst.msk [vmem:[%s6640_s11 + $0xb8] sm:$0xff] %vm45_vm1, %v3161_v15  ;;  %v3160_v32 = vadd.f32 %v6247_v58, %v3083_v46 }
 0x356   :  { %3553 = vst.msk [vmem:[%s6641_s12 + $0xe8] sm:$0xff] %vm3523_vm5, %v3520_v14 }
 0x357   :  { %3192 = vst.msk [vmem:[%s6640_s11 + $0xb0] sm:$0xff] %vm45_vm1, %v3160_v32  ;;  %v3393_v47 = vpop.xlane.xlu1 %3392 }
 0x358   :  { %v4184_v57 = vpop.f32.mrf.mxu1  ;;  %v3487_v17 = vpop.xlane.xlu0 %3486 }
 0x359   :  { %v3098_v5 = vadd.f32 %v4248_v3, %v4184_v57  ;;  %v3521_v13 = vsel %vm3490_vm4, %v3390_v8, %v3487_v17 }
 0x35a   :  { %3554 = vst.msk [vmem:[%s6641_s12 + $0xf0] sm:$0xff] %vm3523_vm5, %v3521_v13  ;;  %v2771_v60 = vpop.f32.mrf.mxu1 }
 0x35b   :  { %v3163_v43 = vadd.f32 %v6247_v58, %v3098_v5  ;;  %v3093_v19 = vadd.f32 %v3092_v24, %v2771_v60  ;;  %v3489_v36 = vpop.xlane.xlu1 %3488 }
 0x35c   :  { %v3522_v18 = vsel %vm3490_vm4, %v3393_v47, %v3489_v36 }
 0x35d   :  { %3195 = vst.msk [vmem:[%s6640_s11 + $0xc8] sm:$0xff] %vm45_vm1, %v3163_v43  ;;  %v3162_v51 = vadd.f32 %v6247_v58, %v3093_v19 }
 0x35e   :  { %3555 = vst.msk [vmem:[%s6641_s12 + $0xf8] sm:$0xff] %vm3523_vm5, %v3522_v18 }
 0x35f   :  { %3194 = vst.msk [vmem:[%s6640_s11 + $0xc0] sm:$0xff] %vm45_vm1, %v3162_v51 }
 0x360   :  { %v4187_v28 = vpop.f32.mrf.mxu1 }
 0x362   :  { %v2781_v0 = vpop.f32.mrf.mxu1 }
 0x368   :  { %v4190_v63 = vpop.f32.mrf.mxu1 }
 0x36a   :  { %v2791_v59 = vpop.f32.mrf.mxu1 }
 0x378   :  { %v4193_v7 = vpop.f32.mrf.mxu1 }
 0x37a   :  { %v2801_v31 = vpop.f32.mrf.mxu1 }
 0x37c   :  { %v4251_v33 = vpop.f32.mrf.mxu1 }
 0x37d   :  { %v3108_v54 = vadd.f32 %v4251_v33, %v4187_v28 }
 0x37e   :  { %v3102_v20 = vpop.f32.mrf.mxu1 }
 0x37f   :  { %v3165_v42 = vadd.f32 %v6247_v58, %v3108_v54  ;;  %v3103_v1 = vadd.f32 %v3102_v20, %v2781_v0 }
 0x380   :  { %v4254_v4 = vpop.f32.mrf.mxu1 }
 0x381   :  { %3197 = vst.msk [vmem:[%s6640_s11 + $0xd8] sm:$0xff] %vm45_vm1, %v3165_v42  ;;  %v3164_v9 = vadd.f32 %v6247_v58, %v3103_v1  ;;  %v3118_v62 = vadd.f32 %v4254_v4, %v4190_v63 }
 0x382   :  { %v3112_v45 = vpop.f32.mrf.mxu1 }
 0x383   :  { %3196 = vst.msk [vmem:[%s6640_s11 + $0xd0] sm:$0xff] %vm45_vm1, %v3164_v9  ;;  %v3167_v12 = vadd.f32 %v6247_v58, %v3118_v62  ;;  %v3113_v52 = vadd.f32 %v3112_v45, %v2791_v59 }
 0x384   :  { %v4257_v49 = vpop.f32.mrf.mxu1 }
 0x385   :  { %3199 = vst.msk [vmem:[%s6640_s11 + $0xe8] sm:$0xff] %vm45_vm1, %v3167_v12  ;;  %v3166_v39 = vadd.f32 %v6247_v58, %v3113_v52  ;;  %v3128_v11 = vadd.f32 %v4257_v49, %v4193_v7 }
 0x386   :  { %v3122_v38 = vpop.f32.mrf.mxu1 }
 0x387   :  { %3198 = vst.msk [vmem:[%s6640_s11 + $0xe0] sm:$0xff] %vm45_vm1, %v3166_v39  ;;  %v3169_v44 = vadd.f32 %v6247_v58, %v3128_v11  ;;  %v3123_v41 = vadd.f32 %v3122_v38, %v2801_v31 }
 0x389   :  { %3201 = vst.msk [vmem:[%s6640_s11 + $0xf8] sm:$0xff] %vm45_vm1, %v3169_v44  ;;  %v3168_v48 = vadd.f32 %v6247_v58, %v3123_v41 }
 0x38b   :  { %3200 = vst.msk [vmem:[%s6640_s11 + $0xf0] sm:$0xff] %vm45_vm1, %v3168_v48 }

// kernel: dfair_forward.5
= control target key start
LH: loop header
LB: loop body
LE: loop exit
PB: predicated region body
PF: predicated region fallthrough
CT: control target
= control target key end

     0   :  { %v4920_v17 = vmov 0   ;;  %vm734_vm0 = vcmask 261120   ;;  %vm45_vm1 = vcmask 523264   ;;  %s7446_s1 = inlined_call_operand.vmem [shape: bf16[256,64], index: 1, kind: input, shape index: {}]   ;;  %s7447_s0 = inlined_call_operand.vmem [shape: bf16[256,256], index: 0, kind: input, shape index: {}]   ;;  %s7448_s5 = inlined_call_operand.vmem [shape: f32[32,128], index: 5, kind: input, shape index: {}]   ;;  %s7449_s3 = inlined_call_operand.vmem [shape: f32[256,32], index: 3, kind: input, shape index: {}]   ;;  %s7450_s4 = inlined_call_operand.vmem [shape: f32[256,1], index: 4, kind: input, shape index: {}]   ;;  %s7451_s7 = inlined_call_operand.vmem [shape: f32[64,128], index: 7, kind: input, shape index: {}]   ;;  %s7452_s6 = inlined_call_operand.vmem [shape: f32[1,128], index: 6, kind: input, shape index: {}]   ;;  %s7453_s8 = inlined_call_operand.vmem [shape: f32[64,5], index: 8, kind: input, shape index: {}]   ;;  %s7454_s9 = inlined_call_operand.vmem [shape: f32[64,5], index: 9, kind: input, shape index: {}]   ;;  %s7455_s2 = inlined_call_operand.vmem [shape: f32[256,64], index: 2, kind: input, shape index: {}]   ;;  %s7456_s12 = inlined_call_operand.vmem [shape: f32[256,2], index: 12, kind: output, shape index: {1}]   ;;  %s7457_s10 = inlined_call_operand.vmem [shape: f32[1,5], index: 10, kind: input, shape index: {}]   ;;  %s7458_s11 = inlined_call_operand.vmem [shape: f32[256,5], index: 11, kind: output, shape index: {0}]  }
   0x1   :  { %v4696_v0 = vld [vmem:[%s7446_s1 + $0x78] sm:$0xff]   ;;  %v4698_v2 = vld [vmem:[%s7446_s1 + $0x70] sm:$0xff]   ;;  %v4700_v4 = vld [vmem:[%s7446_s1 + $0x68] sm:$0xff]   ;;  %4694 = vset.pattern.permute.xlu0 %v4920_v17  ;;  %4695 = vset.pattern.permute.xlu1 %v4920_v17 }
   0x2   :  { %v4697_v1 = vld [vmem:[%s7446_s1 + $0x38] sm:$0xff]   ;;  %4159 = vmatprep.subr.bf16.mxu0 %v4696_v0  ;;  %v4699_v3 = vld [vmem:[%s7446_s1 + $0x30] sm:$0xff]   ;;  %v4701_v5 = vld [vmem:[%s7446_s1 + $0x28] sm:$0xff]  }
   0x3   :  { %4160 = vmatpush3.bf16.msra.mxu0 %v4697_v1  ;;  %v4702_v6 = vld [vmem:[%s7446_s1 + $0x60] sm:$0xff]   ;;  %v4704_v8 = vld [vmem:[%s7446_s1 + $0x58] sm:$0xff]   ;;  %v4706_v10 = vld [vmem:[%s7446_s1 + $0x50] sm:$0xff]  }
   0x4   :  { %4161 = vmatprep.subr.bf16.mxu0 %v4698_v2  ;;  %v4703_v7 = vld [vmem:[%s7446_s1 + $0x20] sm:$0xff]   ;;  %v4705_v9 = vld [vmem:[%s7446_s1 + $0x18] sm:$0xff]   ;;  %v4707_v12 = vld [vmem:[%s7446_s1 + $0x10] sm:$0xff]  }
   0x5   :  { %v4714_v11 = vld [vmem:[%s7447_s0 + $0x4] ss:$8 sps:$4 sm:$0xff]   ;;  %v4712_v18 = vld [vmem:[%s7447_s0] ss:$8 sps:$4 sm:$0xff]   ;;  %v4715_v19 = vld [vmem:[%s7447_s0 + $0x14] ss:$8 sps:$4 sm:$0xff]  }
   0x6   :  { %462 = vmatprep.mubr.bf16.mxu0 %v4714_v11  ;;  %v4708_v13 = vld [vmem:[%s7446_s1 + $0x48] sm:$0xff]   ;;  %v4710_v15 = vld [vmem:[%s7446_s1 + $0x40] sm:$0xff]   ;;  %v726_v20 = vld [vmem:[%s7448_s5 + $0x18] sm:$0xff] }
   0x7   :  { %4162 = vmatpush3.bf16.msra.mxu0 %v4699_v3  ;;  %v4709_v14 = vld [vmem:[%s7446_s1 + $0x8] sm:$0xff]   ;;  %v4711_v16 = vld [vmem:[%s7446_s1] sm:$0xff]   ;;  %4427 = vmatprep.subr.mxu1 %v726_v20  ;;  %v725_v21 = vld [vmem:[%s7448_s5 + $0x10] sm:$0xff] }
   0x8   :  { %4163 = vmatprep.subr.bf16.mxu0 %v4700_v4  ;;  %4428 = vmatpush3.msra.mxu1 %v726_v20  ;;  %v724_v22 = vld [vmem:[%s7448_s5 + $0x8] sm:$0xff]  ;;  %v691_v23 = vld [vmem:[%s7449_s3] sm:$0xff]  ;;  %v693_v26 = vld [vmem:[%s7449_s3 + $0x10] sm:$0xff] }
   0x9   :  { %4429 = vmatprep.subr.mxu1 %v725_v21  ;;  %v723_v24 = vld [vmem:[%s7448_s5] sm:$0xff]  ;;  %4435 = vmatprep.mubr.msk.f32.mxu1 %vm734_vm0, %v691_v23  ;;  %v692_v25 = vld [vmem:[%s7449_s3 + $0x8] sm:$0xff]  ;;  %v4717_v27 = vld [vmem:[%s7447_s0 + $0x10] ss:$8 sps:$4 sm:$0xff]  }
   0xa   :  { %4430 = vmatpush3.msra.mxu1 %v725_v21  ;;  %v4718_v28 = vld [vmem:[%s7447_s0 + $0x24] ss:$8 sps:$4 sm:$0xff]   ;;  %v694_v29 = vld [vmem:[%s7449_s3 + $0x18] sm:$0xff]  ;;  %v697_v33 = vld [vmem:[%s7449_s3 + $0x30] sm:$0xff] }
   0xb   :  { %4164 = vmatpush3.bf16.msra.mxu0 %v4701_v5  ;;  %4431 = vmatprep.subr.mxu1 %v724_v22  ;;  %v695_v30 = vld [vmem:[%s7449_s3 + $0x20] sm:$0xff]  ;;  %v696_v31 = vld [vmem:[%s7449_s3 + $0x28] sm:$0xff]  ;;  %v1899_v38 = vld [vmem:[%s7450_s4 + $0x10] sm:$0xff] }
   0xc   :  { %4165 = vmatprep.subr.bf16.mxu0 %v4702_v6  ;;  %4432 = vmatpush3.msra.mxu1 %v724_v22  ;;  %v1897_v32 = vld [vmem:[%s7450_s4] sm:$0xff]  ;;  %v1898_v35 = vld [vmem:[%s7450_s4 + $0x8] sm:$0xff]  ;;  %v4721_v39 = vld [vmem:[%s7447_s0 + $0x34] ss:$8 sps:$4 sm:$0xff]   ;;  %v2123_v42 = vsub.f32 1.0, %v1899_v38  ;;  %v4921_v22 = vmov 0.0  }
   0xd   :  { %4433 = vmatprep.subr.mxu1 %v723_v24  ;;  %1931 = vperm.xlu0 %4694, %v1897_v32   ;;  %v2121_v34 = vsub.f32 1.0, %v1897_v32  ;;  %v4720_v36 = vld [vmem:[%s7447_s0 + $0x20] ss:$8 sps:$4 sm:$0xff]   ;;  %v2122_v37 = vsub.f32 1.0, %v1898_v35  ;;  %v698_v40 = vld [vmem:[%s7449_s3 + $0x38] sm:$0xff]  ;;  %v701_v45 = vld [vmem:[%s7449_s3 + $0x50] sm:$0xff] }
   0xe   :  { %4434 = vmatpush3.msra.mxu1 %v723_v24  ;;  %v699_v41 = vld [vmem:[%s7449_s3 + $0x40] sm:$0xff]  ;;  %v1900_v43 = vld [vmem:[%s7450_s4 + $0x18] sm:$0xff]  ;;  %v700_v44 = vld [vmem:[%s7449_s3 + $0x48] sm:$0xff]  ;;  %46 = vst.msk [vmem:[#allocation2] sm:$0xff] %vm45_vm1, %v4921_v22 }
   0xf   :  { %4166 = vmatpush3.bf16.msra.mxu0 %v4703_v7  ;;  %4436 = vmatmul.mubr.msk.f32.vlgmr.msra.gmra.mxu1 %vm734_vm0, %v692_v25  ;;  %v2124_v46 = vsub.f32 1.0, %v1900_v43  ;;  %v4723_v47 = vld [vmem:[%s7447_s0 + $0x30] ss:$8 sps:$4 sm:$0xff]   ;;  %v1901_v48 = vld [vmem:[%s7450_s4 + $0x20] sm:$0xff]  ;;  %v1902_v53 = vld [vmem:[%s7450_s4 + $0x28] sm:$0xff]  ;;  %47 = vst.msk [vmem:[#allocation2 + $0x8] sm:$0xff] %vm45_vm1, %v4921_v22 }
  0x10   :  { %4167 = vmatprep.subr.bf16.mxu0 %v4704_v8  ;;  %4438 = vmatprep.mubr.msk.f32.mxu1 %vm734_vm0, %v693_v26  ;;  %v4724_v49 = vld [vmem:[%s7447_s0 + $0x44] ss:$8 sps:$4 sm:$0xff]   ;;  %v702_v50 = vld [vmem:[%s7449_s3 + $0x58] sm:$0xff]  ;;  %v2125_v52 = vsub.f32 1.0, %v1901_v48  ;;  %v705_v55 = vld [vmem:[%s7449_s3 + $0x70] sm:$0xff]  ;;  %v2126_v56 = vsub.f32 1.0, %v1902_v53 }
  0x11   :  { %2155 = vperm.xlu1 %4695, %v2121_v34   ;;  %2160 = vperm.xlu0 %4694, %v2122_v37   ;;  %v703_v51 = vld [vmem:[%s7449_s3 + $0x60] sm:$0xff]  ;;  %v704_v54 = vld [vmem:[%s7449_s3 + $0x68] sm:$0xff]  ;;  %v1903_v58 = vld [vmem:[%s7450_s4 + $0x30] sm:$0xff]  ;;  %48 = vst.msk [vmem:[#allocation2 + $0x10] sm:$0xff] %vm45_vm1, %v4921_v22 }
  0x12   :  { %v4726_v57 = vld [vmem:[%s7447_s0 + $0x40] ss:$8 sps:$4 sm:$0xff]   ;;  %v4727_v59 = vld [vmem:[%s7447_s0 + $0x54] ss:$8 sps:$4 sm:$0xff]   ;;  %v2127_v62 = vsub.f32 1.0, %v1903_v58  ;;  %49 = vst.msk [vmem:[#allocation2 + $0x18] sm:$0xff] %vm45_vm1, %v4921_v22 }
  0x13   :  { %4168 = vmatpush3.bf16.msra.mxu0 %v4705_v9  ;;  %4439 = vmatmul.mubr.msk.f32.gmra.mxu1 %vm734_vm0, %v694_v29  ;;  %v706_v60 = vld [vmem:[%s7449_s3 + $0x78] sm:$0xff]  ;;  %v707_v61 = vld [vmem:[%s7449_s3 + $0x80] sm:$0xff]  ;;  %v708_v0 = vld [vmem:[%s7449_s3 + $0x88] sm:$0xff]  ;;  %50 = vst.msk [vmem:[#allocation2 + $0x20] sm:$0xff] %vm45_vm1, %v4921_v22 }
  0x14   :  { %4169 = vmatprep.subr.bf16.mxu0 %v4706_v10  ;;  %4441 = vmatprep.mubr.msk.f32.mxu1 %vm734_vm0, %v695_v30  ;;  %v1904_v63 = vld [vmem:[%s7450_s4 + $0x38] sm:$0xff]  ;;  %v709_v1 = vld [vmem:[%s7449_s3 + $0x90] sm:$0xff]  ;;  %v1905_v4 = vld [vmem:[%s7450_s4 + $0x40] sm:$0xff]  ;;  %51 = vst.msk [vmem:[#allocation2 + $0x28] sm:$0xff] %vm45_vm1, %v4921_v22 }
  0x15   :  { %1936 = vperm.xlu1 %4695, %v1898_v35   ;;  %2165 = vperm.xlu0 %4694, %v2123_v42   ;;  %v2128_v2 = vsub.f32 1.0, %v1904_v63  ;;  %v4729_v3 = vld [vmem:[%s7447_s0 + $0x50] ss:$8 sps:$4 sm:$0xff]   ;;  %v4730_v5 = vld [vmem:[%s7447_s0 + $0x64] ss:$8 sps:$4 sm:$0xff]   ;;  %v2129_v8 = vsub.f32 1.0, %v1905_v4 }
  0x16   :  { %v710_v6 = vld [vmem:[%s7449_s3 + $0x98] sm:$0xff]  ;;  %v711_v7 = vld [vmem:[%s7449_s3 + $0xa0] sm:$0xff]  ;;  %v1906_v9 = vld [vmem:[%s7450_s4 + $0x48] sm:$0xff]  ;;  %52 = vst.msk [vmem:[#allocation2 + $0x30] sm:$0xff] %vm45_vm1, %v4921_v22 }
  0x17   :  { %4170 = vmatpush3.bf16.msra.mxu0 %v4707_v12  ;;  %4442 = vmatmul.mubr.msk.f32.gmra.mxu1 %vm734_vm0, %v696_v31  ;;  %v712_v10 = vld [vmem:[%s7449_s3 + $0xa8] sm:$0xff]  ;;  %v713_v11 = vld [vmem:[%s7449_s3 + $0xb0] sm:$0xff]  ;;  %v2130_v12 = vsub.f32 1.0, %v1906_v9  ;;  %53 = vst.msk [vmem:[#allocation2 + $0x38] sm:$0xff] %vm45_vm1, %v4921_v22  ;;  %54 = vst.msk [vmem:[#allocation2 + $0x40] sm:$0xff] %vm45_vm1, %v4921_v22 }
  0x18   :  { %4171 = vmatprep.subr.bf16.mxu0 %v4708_v13  ;;  %4444 = vmatprep.mubr.msk.f32.mxu1 %vm734_vm0, %v697_v33  ;;  %v4732_v13 = vld [vmem:[%s7447_s0 + $0x60] ss:$8 sps:$4 sm:$0xff]   ;;  %v4739_v21 = vld [vmem:[%s7447_s0 + $0x94] ss:$8 sps:$4 sm:$0xff]   ;;  %55 = vst.msk [vmem:[#allocation2 + $0x48] sm:$0xff] %vm45_vm1, %v4921_v22  ;;  %56 = vst.msk [vmem:[#allocation2 + $0x50] sm:$0xff] %vm45_vm1, %v4921_v22 }
  0x19   :  { %1941 = vperm.xlu1 %4695, %v1899_v38   ;;  %2170 = vperm.xlu0 %4694, %v2124_v46   ;;  %v716_v17 = vld [vmem:[%s7449_s3 + $0xc8] sm:$0xff]  ;;  %57 = vst.msk [vmem:[#allocation2 + $0x58] sm:$0xff] %vm45_vm1, %v4921_v22  ;;  %58 = vst.msk [vmem:[#allocation2 + $0x60] sm:$0xff] %vm45_vm1, %v4921_v22  ;;  %v717_v23 = vld [vmem:[%s7449_s3 + $0xd0] sm:$0xff] }
  0x1a   :  { %v4738_v20 = vld [vmem:[%s7447_s0 + $0x80] ss:$8 sps:$4 sm:$0xff]   ;;  %59 = vst.msk [vmem:[#allocation2 + $0x68] sm:$0xff] %vm45_vm1, %v4921_v22  ;;  %60 = vst.msk [vmem:[#allocation2 + $0x70] sm:$0xff] %vm45_vm1, %v4921_v22  ;;  %v718_v24 = vld [vmem:[%s7449_s3 + $0xd8] sm:$0xff] }
  0x1b   :  { %4172 = vmatpush3.bf16.msra.mxu0 %v4709_v14  ;;  %4445 = vmatmul.mubr.msk.f32.gmra.mxu1 %vm734_vm0, %v698_v40  ;;  %v4733_v14 = vld [vmem:[%s7447_s0 + $0x74] ss:$8 sps:$4 sm:$0xff]   ;;  %61 = vst.msk [vmem:[#allocation2 + $0x78] sm:$0xff] %vm45_vm1, %v4921_v22  ;;  %62 = vst.msk [vmem:[#allocation2 + $0x80] sm:$0xff] %vm45_vm1, %v4921_v22  ;;  %v719_v29 = vld [vmem:[%s7449_s3 + $0xe0] sm:$0xff] }
  0x1c   :  { %4173 = vmatprep.subr.bf16.mxu0 %v4710_v15  ;;  %4447 = vmatprep.mubr.msk.f32.mxu1 %vm734_vm0, %v699_v41  ;;  %v714_v15 = vld [vmem:[%s7449_s3 + $0xb8] sm:$0xff]  ;;  %63 = vst.msk [vmem:[#allocation2 + $0x88] sm:$0xff] %vm45_vm1, %v4921_v22  ;;  %64 = vst.msk [vmem:[#allocation2 + $0x90] sm:$0xff] %vm45_vm1, %v4921_v22  ;;  %v1907_v25 = vld [vmem:[%s7450_s4 + $0x50] sm:$0xff] }
  0x1d   :  { %1946 = vperm.xlu1 %4695, %v1900_v43   ;;  %2175 = vperm.xlu0 %4694, %v2125_v52   ;;  %65 = vst.msk [vmem:[#allocation2 + $0x98] sm:$0xff] %vm45_vm1, %v4921_v22  ;;  %66 = vst.msk [vmem:[#allocation2 + $0xa0] sm:$0xff] %vm45_vm1, %v4921_v22  ;;  %v1159_v26 = vld [vmem:[%s7451_s7 + $0x38] sm:$0xff]  ;;  %v1158_v30 = vld [vmem:[%s7451_s7 + $0x30] sm:$0xff] }
  0x1e   :  { %67 = vst.msk [vmem:[#allocation2 + $0xa8] sm:$0xff] %vm45_vm1, %v4921_v22  ;;  %68 = vst.msk [vmem:[#allocation2 + $0xb0] sm:$0xff] %vm45_vm1, %v4921_v22  ;;  %4483 = vmatprep.subr.mxu1 %v1159_v26  ;;  %v4742_v31 = vld [vmem:[%s7447_s0 + $0xa4] ss:$8 sps:$4 sm:$0xff]   ;;  %v1908_v33 = vld [vmem:[%s7450_s4 + $0x58] sm:$0xff] }
  0x1f   :  { %4174 = vmatpush3.bf16.msra.mxu0 %v4711_v16  ;;  %4448 = vmatmul.mubr.msk.f32.gmra.mxu1 %vm734_vm0, %v700_v44  ;;  %v715_v16 = vld [vmem:[%s7449_s3 + $0xc0] sm:$0xff]  ;;  %69 = vst.msk [vmem:[#allocation2 + $0xb8] sm:$0xff] %vm45_vm1, %v4921_v22  ;;  %70 = vst.msk [vmem:[#allocation2 + $0xc0] sm:$0xff] %vm45_vm1, %v4921_v22  ;;  %v720_v32 = vld [vmem:[%s7449_s3 + $0xe8] sm:$0xff]  ;;  %v2132_v35 = vsub.f32 1.0, %v1908_v33 }
  0x20   :  { %4450 = vmatprep.mubr.msk.f32.mxu1 %vm734_vm0, %v701_v45  ;;  %71 = vst.msk [vmem:[#allocation2 + $0xc8] sm:$0xff] %vm45_vm1, %v4921_v22  ;;  %72 = vst.msk [vmem:[#allocation2 + $0xd0] sm:$0xff] %vm45_vm1, %v4921_v22  ;;  %4484 = vmatpush3.msra.mxu1 %v1159_v26  ;;  %v1157_v34 = vld [vmem:[%s7451_s7 + $0x28] sm:$0xff]  ;;  %v1156_v37 = vld [vmem:[%s7451_s7 + $0x20] sm:$0xff] }
  0x21   :  { %1951 = vperm.xlu1 %4695, %v1901_v48   ;;  %2180 = vperm.xlu0 %4694, %v2126_v56   ;;  %73 = vst.msk [vmem:[#allocation2 + $0xd8] sm:$0xff] %vm45_vm1, %v4921_v22  ;;  %74 = vst.msk [vmem:[#allocation2 + $0xe0] sm:$0xff] %vm45_vm1, %v4921_v22  ;;  %v722_v38 = vld [vmem:[%s7449_s3 + $0xf8] sm:$0xff]  ;;  %v4744_v42 = vld [vmem:[%s7447_s0 + $0xa0] ss:$8 sps:$4 sm:$0xff]  }
  0x22   :  { %463 = vmatmul.mubr.bf16.vlgmr.msra.gmra.mxu0 %v4712_v18  ;;  %v4735_v18 = vld [vmem:[%s7447_s0 + $0x70] ss:$8 sps:$4 sm:$0xff]   ;;  %75 = vst.msk [vmem:[#allocation2 + $0xe8] sm:$0xff] %vm45_vm1, %v4921_v22  ;;  %76 = vst.msk [vmem:[#allocation2 + $0xf0] sm:$0xff] %vm45_vm1, %v4921_v22  ;;  %4485 = vmatprep.subr.mxu1 %v1158_v30  ;;  %v4745_v44 = vld [vmem:[%s7447_s0 + $0xb4] ss:$8 sps:$4 sm:$0xff]  }
  0x23   :  { %470 = vmatprep.mubr.bf16.mxu0 %v4715_v19  ;;  %4451 = vmatmul.mubr.msk.f32.gmra.mxu1 %vm734_vm0, %v702_v50  ;;  %v4736_v19 = vld [vmem:[%s7447_s0 + $0x84] ss:$8 sps:$4 sm:$0xff]   ;;  %77 = vst.msk [vmem:[#allocation2 + $0xf8] sm:$0xff] %vm45_vm1, %v4921_v22  ;;  %v1155_v40 = vld [vmem:[%s7451_s7 + $0x18] sm:$0xff]  ;;  %v1154_v43 = vld [vmem:[%s7451_s7 + $0x10] sm:$0xff] }
  0x24   :  { %4453 = vmatprep.mubr.msk.f32.mxu1 %vm734_vm0, %v703_v51  ;;  %4486 = vmatpush3.msra.mxu1 %v1158_v30  ;;  %v1910_v45 = vld [vmem:[%s7450_s4 + $0x68] sm:$0xff]  ;;  %v1152_v48 = vld [vmem:[%s7451_s7] sm:$0xff]  ;;  %v4747_v51 = vld [vmem:[%s7447_s0 + $0xb0] ss:$8 sps:$4 sm:$0xff]  }
  0x25   :  { %1956 = vperm.xlu1 %4695, %v1902_v53   ;;  %2185 = vperm.xlu0 %4694, %v2127_v62   ;;  %v1153_v46 = vld [vmem:[%s7451_s7 + $0x8] sm:$0xff]  ;;  %v1912_v53 = vld [vmem:[%s7450_s4 + $0x78] sm:$0xff]  ;;  %v1925_v22 = vld [vmem:[%s7450_s4 + $0xe0] sm:$0xff] }
  0x26   :  { %4487 = vmatprep.subr.mxu1 %v1157_v34  ;;  %v4748_v52 = vld [vmem:[%s7447_s0 + $0xc4] ss:$8 sps:$4 sm:$0xff]   ;;  %v1927_v26 = vld [vmem:[%s7450_s4 + $0xf0] sm:$0xff] }
  0x27   :  { %4454 = vmatmul.mubr.msk.f32.gmra.mxu1 %vm734_vm0, %v704_v54  ;;  %v2136_v54 = vsub.f32 1.0, %v1912_v53 }
  0x28   :  { %4456 = vmatprep.mubr.msk.f32.mxu1 %vm734_vm0, %v705_v55  ;;  %4488 = vmatpush3.msra.mxu1 %v1157_v34  ;;  %v1913_v55 = vld [vmem:[%s7450_s4 + $0x80] sm:$0xff] }
  0x29   :  { %1961 = vperm.xlu1 %4695, %v1903_v58   ;;  %2190 = vperm.xlu0 %4694, %v2128_v2   ;;  %v2137_v56 = vsub.f32 1.0, %v1913_v55  ;;  %v4751_v58 = vld [vmem:[%s7447_s0 + $0xd4] ss:$8 sps:$4 sm:$0xff]  }
  0x2a   :  { %471 = vmatmul.mubr.bf16.gmra.mxu0 %v4717_v27  ;;  %v2131_v27 = vsub.f32 1.0, %v1907_v25  ;;  %4489 = vmatprep.subr.mxu1 %v1156_v37 }
  0x2b   :  { %478 = vmatprep.mubr.bf16.mxu0 %v4718_v28  ;;  %4457 = vmatmul.mubr.msk.f32.gmra.mxu1 %vm734_vm0, %v706_v60  ;;  %v4741_v28 = vld [vmem:[%s7447_s0 + $0x90] ss:$8 sps:$4 sm:$0xff]  }
  0x2c   :  { %4459 = vmatprep.mubr.msk.f32.mxu1 %vm734_vm0, %v707_v61  ;;  %4490 = vmatpush3.msra.mxu1 %v1156_v37  ;;  %v1915_v61 = vld [vmem:[%s7450_s4 + $0x90] sm:$0xff] }
  0x2d   :  { %1966 = vperm.xlu1 %4695, %v1904_v63   ;;  %2195 = vperm.xlu0 %4694, %v2129_v8   ;;  %v2139_v62 = vsub.f32 1.0, %v1915_v61  ;;  %v4753_v63 = vld [vmem:[%s7447_s0 + $0xd0] ss:$8 sps:$4 sm:$0xff]  }
  0x2e   :  { %4491 = vmatprep.subr.mxu1 %v1155_v40 }
  0x2f   :  { %4460 = vmatmul.mubr.msk.f32.gmra.mxu1 %vm734_vm0, %v708_v0  ;;  %v4754_v0 = vld [vmem:[%s7447_s0 + $0xe4] ss:$8 sps:$4 sm:$0xff]  }
  0x30   :  { %4462 = vmatprep.mubr.msk.f32.mxu1 %vm734_vm0, %v709_v1  ;;  %4492 = vmatpush3.msra.mxu1 %v1155_v40  ;;  %v1916_v1 = vld [vmem:[%s7450_s4 + $0x98] sm:$0xff] }
  0x31   :  { %1971 = vperm.xlu1 %4695, %v1905_v4   ;;  %2200 = vperm.xlu0 %4694, %v2130_v12   ;;  %v2140_v2 = vsub.f32 1.0, %v1916_v1  ;;  %v1920_v12 = vld [vmem:[%s7450_s4 + $0xb8] sm:$0xff] }
  0x32   :  { %479 = vmatmul.mubr.bf16.gmra.mxu0 %v4720_v36  ;;  %v721_v36 = vld [vmem:[%s7449_s3 + $0xf0] sm:$0xff]  ;;  %4493 = vmatprep.subr.mxu1 %v1154_v43 }
  0x33   :  { %486 = vmatprep.mubr.bf16.mxu0 %v4721_v39  ;;  %4463 = vmatmul.mubr.msk.f32.gmra.mxu1 %vm734_vm0, %v710_v6  ;;  %v1909_v39 = vld [vmem:[%s7450_s4 + $0x60] sm:$0xff]  ;;  %v4757_v6 = vld [vmem:[%s7447_s0 + $0xf4] ss:$8 sps:$4 sm:$0xff]  }
  0x34   :  { %4465 = vmatprep.mubr.msk.f32.mxu1 %vm734_vm0, %v711_v7  ;;  %v2133_v41 = vsub.f32 1.0, %v1909_v39  ;;  %4494 = vmatpush3.msra.mxu1 %v1154_v43  ;;  %v1918_v7 = vld [vmem:[%s7450_s4 + $0xa8] sm:$0xff] }
  0x35   :  { %1976 = vperm.xlu1 %4695, %v1906_v9   ;;  %2205 = vperm.xlu0 %4694, %v2131_v27   ;;  %v2142_v8 = vsub.f32 1.0, %v1918_v7  ;;  %v1919_v9 = vld [vmem:[%s7450_s4 + $0xb0] sm:$0xff]  ;;  %v2151_v27 = vsub.f32 1.0, %v1927_v26 }
  0x36   :  { %4495 = vmatprep.subr.mxu1 %v1153_v46 }
  0x37   :  { %4466 = vmatmul.mubr.msk.f32.gmra.mxu1 %vm734_vm0, %v712_v10  ;;  %v2143_v10 = vsub.f32 1.0, %v1919_v9 }
  0x38   :  { %4468 = vmatprep.mubr.msk.f32.mxu1 %vm734_vm0, %v713_v11  ;;  %4496 = vmatpush3.msra.mxu1 %v1153_v46  ;;  %v4759_v11 = vld [vmem:[%s7447_s0 + $0xf0] ss:$8 sps:$4 sm:$0xff]  }
  0x39   :  { %1981 = vperm.xlu1 %4695, %v1907_v25   ;;  %2210 = vperm.xlu0 %4694, %v2132_v35   ;;  %v80_v46 = vld [vmem:[#allocation2 + $0x10] sm:$0xff] }
  0x3a   :  { %487 = vmatmul.mubr.bf16.gmra.mxu0 %v4723_v47  ;;  %v2134_v47 = vsub.f32 1.0, %v1910_v45  ;;  %4497 = vmatprep.subr.mxu1 %v1152_v48 }
  0x3b   :  { %494 = vmatprep.mubr.bf16.mxu0 %v4724_v49  ;;  %4469 = vmatmul.mubr.msk.f32.gmra.mxu1 %vm734_vm0, %v714_v15  ;;  %v1911_v49 = vld [vmem:[%s7450_s4 + $0x70] sm:$0xff] }
  0x3c   :  { %4471 = vmatprep.mubr.msk.f32.mxu1 %vm734_vm0, %v715_v16  ;;  %v2135_v50 = vsub.f32 1.0, %v1911_v49  ;;  %4498 = vmatpush3.msra.mxu1 %v1152_v48  ;;  %v1922_v16 = vld [vmem:[%s7450_s4 + $0xc8] sm:$0xff] }
  0x3d   :  { %1986 = vperm.xlu1 %4695, %v1908_v33   ;;  %2215 = vperm.xlu0 %4694, %v2133_v41  }
  0x3f   :  { %4472 = vmatmul.mubr.msk.f32.gmra.mxu1 %vm734_vm0, %v716_v17  ;;  %v2146_v17 = vsub.f32 1.0, %v1922_v16 }
  0x40   :  { %4474 = vmatprep.mubr.msk.f32.mxu1 %vm734_vm0, %v717_v23  ;;  %v2149_v23 = vsub.f32 1.0, %v1925_v22 }
  0x41   :  { %1991 = vperm.xlu1 %4695, %v1909_v39   ;;  %2220 = vperm.xlu0 %4694, %v2134_v47  }
  0x42   :  { %495 = vmatmul.mubr.bf16.gmra.mxu0 %v4726_v57  ;;  %v4750_v57 = vld [vmem:[%s7447_s0 + $0xc0] ss:$8 sps:$4 sm:$0xff]  }
  0x43   :  { %502 = vmatprep.mubr.bf16.mxu0 %v4727_v59  ;;  %4475 = vmatmul.mubr.msk.f32.gmra.mxu1 %vm734_vm0, %v718_v24  ;;  %v1914_v59 = vld [vmem:[%s7450_s4 + $0x88] sm:$0xff] }
  0x44   :  { %4477 = vmatprep.mubr.msk.f32.mxu1 %vm734_vm0, %v719_v29  ;;  %v2138_v60 = vsub.f32 1.0, %v1914_v59  ;;  %v1926_v24 = vld [vmem:[%s7450_s4 + $0xe8] sm:$0xff]  ;;  %v78_v29 = vld [vmem:[#allocation2] sm:$0xff] }
  0x45   :  { %1996 = vperm.xlu1 %4695, %v1910_v45   ;;  %2225 = vperm.xlu0 %4694, %v2135_v50   ;;  %v2150_v25 = vsub.f32 1.0, %v1926_v24 }
  0x47   :  { %4478 = vmatmul.mubr.msk.f32.gmra.mxu1 %vm734_vm0, %v720_v32  ;;  %v5424_v32 = vld [vmem:[%s7452_s6] ss:$0 sm:$0xff]  ;;  %s4922_s6 = smov 64  }
  0x48   :  { %4480 = vmatprep.mubr.msk.f32.mxu1 %vm734_vm0, %v721_v36  ;;  %v79_v36 = vld [vmem:[#allocation2 + $0x8] sm:$0xff] }
  0x49   :  { %2001 = vperm.xlu1 %4695, %v1911_v49   ;;  %2230 = vperm.xlu0 %4694, %v2136_v54  }
  0x4a   :  { %503 = vmatmul.mubr.bf16.gmra.mxu0 %v4729_v3  ;;  %v1917_v3 = vld [vmem:[%s7450_s4 + $0xa0] sm:$0xff] }
  0x4b   :  { %510 = vmatprep.mubr.bf16.mxu0 %v4730_v5  ;;  %4481 = vmatmul.mubr.msk.f32.gmra.mxu1 %vm734_vm0, %v722_v38  ;;  %v2141_v4 = vsub.f32 1.0, %v1917_v3  ;;  %v4756_v5 = vld [vmem:[%s7447_s0 + $0xe0] ss:$8 sps:$4 sm:$0xff]  }
  0x4d   :  { %2006 = vperm.xlu1 %4695, %v1912_v53   ;;  %2235 = vperm.xlu0 %4694, %v2137_v56  }
  0x51   :  { %2011 = vperm.xlu1 %4695, %v1913_v55   ;;  %2240 = vperm.xlu0 %4694, %v2138_v60  }
  0x52   :  { %511 = vmatmul.mubr.bf16.gmra.mxu0 %v4732_v13  ;;  %v2144_v13 = vsub.f32 1.0, %v1920_v12 }
  0x53   :  { %518 = vmatprep.mubr.bf16.mxu0 %v4733_v14  ;;  %v1921_v14 = vld [vmem:[%s7450_s4 + $0xc0] sm:$0xff] }
  0x54   :  { %v2145_v15 = vsub.f32 1.0, %v1921_v14 }
  0x55   :  { %2016 = vperm.xlu1 %4695, %v1914_v59   ;;  %2245 = vperm.xlu0 %4694, %v2139_v62   ;;  %v81_v59 = vld [vmem:[#allocation2 + $0x18] sm:$0xff] }
  0x59   :  { %2021 = vperm.xlu1 %4695, %v1915_v61   ;;  %2250 = vperm.xlu0 %4694, %v2140_v2  }
  0x5a   :  { %519 = vmatmul.mubr.bf16.gmra.mxu0 %v4735_v18  ;;  %v1923_v18 = vld [vmem:[%s7450_s4 + $0xd0] sm:$0xff] }
  0x5b   :  { %526 = vmatprep.mubr.bf16.mxu0 %v4736_v19  ;;  %v2147_v19 = vsub.f32 1.0, %v1923_v18 }
  0x5d   :  { %2026 = vperm.xlu1 %4695, %v1916_v1   ;;  %2255 = vperm.xlu0 %4694, %v2141_v4  }
  0x61   :  { %2031 = vperm.xlu1 %4695, %v1917_v3   ;;  %2260 = vperm.xlu0 %4694, %v2142_v8  }
  0x62   :  { %527 = vmatmul.mubr.bf16.gmra.mxu0 %v4738_v20  ;;  %v1924_v20 = vld [vmem:[%s7450_s4 + $0xd8] sm:$0xff] }
  0x63   :  { %534 = vmatprep.mubr.bf16.mxu0 %v4739_v21  ;;  %v2148_v21 = vsub.f32 1.0, %v1924_v20 }
  0x65   :  { %2036 = vperm.xlu1 %4695, %v1918_v7   ;;  %2265 = vperm.xlu0 %4694, %v2143_v10  }
  0x69   :  { %2041 = vperm.xlu1 %4695, %v1919_v9   ;;  %2270 = vperm.xlu0 %4694, %v2144_v13   ;;  %v82_v9 = vld [vmem:[#allocation2 + $0x20] sm:$0xff] }
  0x6a   :  { %535 = vmatmul.mubr.bf16.gmra.mxu0 %v4741_v28 }
  0x6b   :  { %542 = vmatprep.mubr.bf16.mxu0 %v4742_v31 }
  0x6d   :  { %2046 = vperm.xlu1 %4695, %v1920_v12   ;;  %2275 = vperm.xlu0 %4694, %v2145_v15  }
  0x71   :  { %2051 = vperm.xlu1 %4695, %v1921_v14   ;;  %2280 = vperm.xlu0 %4694, %v2146_v17  }
  0x72   :  { %543 = vmatmul.mubr.bf16.gmra.mxu0 %v4744_v42 }
  0x73   :  { %550 = vmatprep.mubr.bf16.mxu0 %v4745_v44 }
  0x75   :  { %2056 = vperm.xlu1 %4695, %v1922_v16   ;;  %2285 = vperm.xlu0 %4694, %v2147_v19  }
  0x79   :  { %2061 = vperm.xlu1 %4695, %v1923_v18   ;;  %2290 = vperm.xlu0 %4694, %v2148_v21  }
  0x7a   :  { %551 = vmatmul.mubr.bf16.gmra.mxu0 %v4747_v51 }
  0x7b   :  { %558 = vmatprep.mubr.bf16.mxu0 %v4748_v52 }
  0x7d   :  { %2066 = vperm.xlu1 %4695, %v1924_v20   ;;  %2295 = vperm.xlu0 %4694, %v2149_v23   ;;  %v83_v23 = vld [vmem:[#allocation2 + $0x28] sm:$0xff] }
  0x81   :  { %2071 = vperm.xlu1 %4695, %v1925_v22   ;;  %2300 = vperm.xlu0 %4694, %v2150_v25  }
  0x82   :  { %559 = vmatmul.mubr.bf16.gmra.mxu0 %v4750_v57 }
  0x83   :  { %566 = vmatprep.mubr.bf16.mxu0 %v4751_v58 }
  0x85   :  { %2076 = vperm.xlu1 %4695, %v1926_v24   ;;  %2305 = vperm.xlu0 %4694, %v2151_v27  }
  0x89   :  { %2081 = vperm.xlu1 %4695, %v1927_v26  }
  0x8a   :  { %567 = vmatmul.mubr.bf16.gmra.mxu0 %v4753_v63 }
  0x8b   :  { %574 = vmatprep.mubr.bf16.mxu0 %v4754_v0 }
  0x92   :  { %575 = vmatmul.mubr.bf16.gmra.mxu0 %v4756_v5 }
  0x93   :  { %582 = vmatprep.mubr.bf16.mxu0 %v4757_v6 }
  0x9a   :  { %583 = vmatmul.mubr.bf16.gmra.mxu0 %v4759_v11 }
  0xcf   :  { %v4437_v35 = vpop.f32.mrf.mxu1 }
  0xd0   :  { %v903_v38 = vadd.f32 %v4437_v35, %v5424_v32 }
  0xd1   :  { %v897_v40 = vpop.f32.mrf.mxu1 }
  0xd2   :  { %v1089_v42 = vmul.f32 0.01, %v903_v38  ;;  %v898_v43 = vadd.f32 %v5424_v32, %v897_v40  ;;  %vm1057_vm2 = vcmp.gt.f32.partialorder %v903_v38, 0.0 }
  0xd3   :  { %v4440_v45 = vpop.f32.mrf.mxu1 }
  0xd4   :  { %v1088_v48 = vmul.f32 0.01, %v898_v43  ;;  %v5429_v49 = vsel %vm1057_vm2, %v903_v38, %v1089_v42  ;;  %v913_v50 = vadd.f32 %v4440_v45, %v5424_v32  ;;  %vm1056_vm3 = vcmp.gt.f32.partialorder %v898_v43, 0.0  ;;  %v84_v38 = vld [vmem:[#allocation2 + $0x30] sm:$0xff] }
  0xd5   :  { %1579 = vrot.lane.b32.xlu0 %v5429_v49, %s4922_s6  ;;  %v907_v52 = vpop.f32.mrf.mxu1 }
  0xd6   :  { %v1091_v54 = vmul.f32 0.01, %v913_v50  ;;  %v5435_v55 = vsel %vm1056_vm3, %v898_v43, %v1088_v48  ;;  %v908_v56 = vadd.f32 %v5424_v32, %v907_v52  ;;  %vm1059_vm4 = vcmp.gt.f32.partialorder %v913_v50, 0.0 }
  0xd7   :  { %7564 = vst [vmem:[#allocation3_spill] sm:$0xff] %v5435_v55  ;;  %v4443_v58 = vpop.f32.mrf.mxu1 }
  0xd8   :  { %v1090_v62 = vmul.f32 0.01, %v908_v56  ;;  %v5438_v63 = vsel %vm1059_vm4, %v913_v50, %v1091_v54  ;;  %v923_v0 = vadd.f32 %v4443_v58, %v5424_v32  ;;  %vm1058_vm5 = vcmp.gt.f32.partialorder %v908_v56, 0.0 }
  0xd9   :  { %1577 = vrot.lane.b32.xlu0 %v5435_v55, %s4922_s6  ;;  %v917_v2 = vpop.f32.mrf.mxu1  ;;  %1583 = vrot.lane.b32.xlu1 %v5438_v63, %s4922_s6 }
  0xda   :  { %v918_v4 = vadd.f32 %v5424_v32, %v917_v2  ;;  %v1093_v6 = vmul.f32 0.01, %v923_v0  ;;  %v5448_v7 = vsel %vm1058_vm5, %v908_v56, %v1090_v62  ;;  %vm1061_vm6 = vcmp.gt.f32.partialorder %v923_v0, 0.0 }
  0xdb   :  { %7565 = vst [vmem:[#allocation4_spill] sm:$0xff] %v5448_v7  ;;  %v4446_v8 = vpop.f32.mrf.mxu1 }
  0xdc   :  { %v1092_v12 = vmul.f32 0.01, %v918_v4  ;;  %v933_v13 = vadd.f32 %v4446_v8, %v5424_v32  ;;  %vm1060_vm7 = vcmp.gt.f32.partialorder %v918_v4, 0.0  ;;  %v5458_v20 = vsel %vm1061_vm6, %v923_v0, %v1093_v6 }
  0xdd   :  { %v927_v15 = vpop.f32.mrf.mxu1  ;;  %1581 = vrot.lane.b32.xlu1 %v5448_v7, %s4922_s6  ;;  %7566 = vst [vmem:[#allocation5_spill] sm:$0xff] %v5458_v20 }
  0xde   :  { %v5455_v17 = vsel %vm1060_vm7, %v918_v4, %v1092_v12  ;;  %v928_v18 = vadd.f32 %v5424_v32, %v927_v15  ;;  %v1095_v21 = vmul.f32 0.01, %v933_v13  ;;  %vm1063_vm8 = vcmp.gt.f32.partialorder %v933_v13, 0.0 }
  0xdf   :  { %1585 = vrot.lane.b32.xlu0 %v5455_v17, %s4922_s6  ;;  %v4449_v22 = vpop.f32.mrf.mxu1 }
  0xe0   :  { %v1094_v26 = vmul.f32 0.01, %v928_v18  ;;  %v943_v27 = vadd.f32 %v4449_v22, %v5424_v32  ;;  %vm1062_vm9 = vcmp.gt.f32.partialorder %v928_v18, 0.0  ;;  %v5470_v35 = vsel %vm1063_vm8, %v933_v13, %v1095_v21  ;;  %v87_v22 = vld [vmem:[#allocation2 + $0x48] sm:$0xff] }
  0xe1   :  { %1587 = vrot.lane.b32.xlu1 %v5458_v20, %s4922_s6  ;;  %7567 = vst [vmem:[#allocation6_spill] sm:$0xff] %v5470_v35 }
  0xe2   :  { %v4175_v28 = vpop.f32.mrf.mxu0  ;;  %vm1065_vm10 = vcmp.gt.f32.partialorder %v943_v27, 0.0 }
  0xe4   :  { %v4176_v30 = vpop.f32.mrf.mxu0 }
  0xe5   :  { %v4177_v31 = vadd.f32 %v4176_v30, %v4175_v28  ;;  %1591 = vrot.lane.b32.xlu1 %v5470_v35, %s4922_s6 }
  0xe6   :  { %v4178_v33 = vpop.f32.mrf.mxu0 }
  0xe7   :  { %v591_v34 = vadd.f32 %v4177_v31, %v78_v29  ;;  %v937_v29 = vpop.f32.mrf.mxu1  ;;  %v5467_v31 = vsel %vm1062_vm9, %v928_v18, %v1094_v26 }
  0xe8   :  { %v4179_v37 = vpop.f32.mrf.mxu0  ;;  %1589 = vrot.lane.b32.xlu0 %v5467_v31, %s4922_s6 }
  0xe9   :  { %624 = vst.msk [vmem:[#allocation2] sm:$0xff] %vm45_vm1, %v591_v34  ;;  %v4180_v39 = vadd.f32 %v4179_v37, %v4178_v33  ;;  %v938_v33 = vadd.f32 %v5424_v32, %v937_v29  ;;  %v4452_v37 = vpop.f32.mrf.mxu1 }
  0xea   :  { %v4181_v41 = vpop.f32.mrf.mxu0  ;;  %v953_v42 = vadd.f32 %v4452_v37, %v5424_v32 }
  0xeb   :  { %v592_v44 = vadd.f32 %v4180_v39, %v79_v36  ;;  %v1097_v36 = vmul.f32 0.01, %v943_v27  ;;  %vm1064_vm11 = vcmp.gt.f32.partialorder %v938_v33, 0.0 }
  0xec   :  { %v4182_v47 = vpop.f32.mrf.mxu0  ;;  %vm1067_vm12 = vcmp.gt.f32.partialorder %v953_v42, 0.0 }
  0xed   :  { %625 = vst.msk [vmem:[#allocation2 + $0x8] sm:$0xff] %vm45_vm1, %v592_v44  ;;  %v4183_v51 = vadd.f32 %v4182_v47, %v4181_v41  ;;  %v1096_v41 = vmul.f32 0.01, %v938_v33  ;;  %v947_v44 = vpop.f32.mrf.mxu1  ;;  %v5482_v50 = vsel %vm1065_vm10, %v943_v27, %v1097_v36 }
  0xee   :  { %v4184_v53 = vpop.f32.mrf.mxu0  ;;  %v948_v47 = vadd.f32 %v5424_v32, %v947_v44  ;;  %7568 = vst [vmem:[#allocation7_spill] sm:$0xff] %v5482_v50  ;;  %1595 = vrot.lane.b32.xlu1 %v5482_v50, %s4922_s6 }
  0xef   :  { %v593_v57 = vadd.f32 %v4183_v51, %v80_v46  ;;  %v5479_v46 = vsel %vm1064_vm11, %v938_v33, %v1096_v41  ;;  %v1099_v51 = vmul.f32 0.01, %v953_v42  ;;  %v4455_v52 = vpop.f32.mrf.mxu1 }
  0xf0   :  { %v4185_v60 = vpop.f32.mrf.mxu0  ;;  %v659_v61 = vld [vmem:[#allocation2] sm:$0xff]  ;;  %1593 = vrot.lane.b32.xlu0 %v5479_v46, %s4922_s6  ;;  %v963_v58 = vadd.f32 %v4455_v52, %v5424_v32  ;;  %vm1066_vm13 = vcmp.gt.f32.partialorder %v948_v47, 0.0 }
  0xf1   :  { %626 = vst.msk [vmem:[#allocation2 + $0x10] sm:$0xff] %vm45_vm1, %v593_v57  ;;  %v4186_v1 = vadd.f32 %v4185_v60, %v4184_v53  ;;  %4499 = vmatprep.mubr.msk.f32.mxu1 %vm45_vm1, %v659_v61  ;;  %v85_v53 = vld [vmem:[#allocation2 + $0x38] sm:$0xff]  ;;  %v1098_v57 = vmul.f32 0.01, %v948_v47  ;;  %v957_v60 = vpop.f32.mrf.mxu1  ;;  %v5494_v2 = vsel %vm1067_vm12, %v953_v42, %v1099_v51 }
  0xf2   :  { %v4187_v3 = vpop.f32.mrf.mxu0  ;;  %v958_v0 = vadd.f32 %v5424_v32, %v957_v60  ;;  %7570 = vst [vmem:[#allocation9_spill] sm:$0xff] %v5494_v2  ;;  %vm1069_vm14 = vcmp.gt.f32.partialorder %v963_v58, 0.0  ;;  %1599 = vrot.lane.b32.xlu1 %v5494_v2, %s4922_s6 }
  0xf3   :  { %v594_v5 = vadd.f32 %v4186_v1, %v81_v59  ;;  %v5491_v62 = vsel %vm1066_vm13, %v948_v47, %v1098_v57  ;;  %v4458_v4 = vpop.f32.mrf.mxu1  ;;  %v89_v57 = vld [vmem:[#allocation2 + $0x58] sm:$0xff] }
  0xf4   :  { %v4188_v10 = vpop.f32.mrf.mxu0  ;;  %v660_v11 = vld [vmem:[#allocation2 + $0x8] sm:$0xff]  ;;  %7569 = vst [vmem:[#allocation8_spill] sm:$0xff] %v5491_v62  ;;  %1597 = vrot.lane.b32.xlu0 %v5491_v62, %s4922_s6  ;;  %vm1068_vm15 = vcmp.gt.f32.partialorder %v958_v0, 0.0 }
  0xf5   :  { %627 = vst.msk [vmem:[#allocation2 + $0x18] sm:$0xff] %vm45_vm1, %v594_v5  ;;  %v4189_v14 = vadd.f32 %v4188_v10, %v4187_v3  ;;  %4500 = vmatmul.mubr.msk.f32.vlgmr.msra.gmra.mxu1 %vm45_vm1, %v660_v11  ;;  %v1101_v3 = vmul.f32 0.01, %v963_v58  ;;  %v86_v5 = vld [vmem:[#allocation2 + $0x40] sm:$0xff]  ;;  %v973_v10 = vadd.f32 %v4458_v4, %v5424_v32  ;;  %v967_v12 = vpop.f32.mrf.mxu1 }
  0xf6   :  { %v4190_v16 = vpop.f32.mrf.mxu0  ;;  %v968_v15 = vadd.f32 %v5424_v32, %v967_v12 }
  0xf7   :  { %v595_v19 = vadd.f32 %v4189_v14, %v82_v9  ;;  %v1100_v9 = vmul.f32 0.01, %v958_v0  ;;  %v5506_v18 = vsel %vm1069_vm14, %v963_v58, %v1101_v3  ;;  %v4461_v21 = vpop.f32.mrf.mxu1  ;;  %vm1071_vm0 = vcmp.gt.f32.partialorder %v973_v10, 0.0 }
  0xf8   :  { %v4191_v24 = vpop.f32.mrf.mxu0  ;;  %v661_v25 = vld [vmem:[#allocation2 + $0x10] sm:$0xff]  ;;  %7572 = vst [vmem:[#allocation11_spill] sm:$0xff] %v5506_v18  ;;  %v983_v26 = vadd.f32 %v4461_v21, %v5424_v32  ;;  %vm1070_vm2 = vcmp.gt.f32.partialorder %v968_v15, 0.0  ;;  %1603 = vrot.lane.b32.xlu1 %v5506_v18, %s4922_s6 }
  0xf9   :  { %628 = vst.msk [vmem:[#allocation2 + $0x20] sm:$0xff] %vm45_vm1, %v595_v19  ;;  %v4192_v28 = vadd.f32 %v4191_v24, %v4190_v16  ;;  %4502 = vmatprep.mubr.msk.f32.mxu1 %vm45_vm1, %v661_v25  ;;  %v5503_v14 = vsel %vm1068_vm15, %v958_v0, %v1100_v9  ;;  %v1103_v19 = vmul.f32 0.01, %v973_v10  ;;  %v1102_v25 = vmul.f32 0.01, %v968_v15 }
  0xfa   :  { %v4193_v30 = vpop.f32.mrf.mxu0  ;;  %7571 = vst [vmem:[#allocation10_spill] sm:$0xff] %v5503_v14  ;;  %1601 = vrot.lane.b32.xlu0 %v5503_v14, %s4922_s6  ;;  %v1105_v37 = vmul.f32 0.01, %v983_v26  ;;  %vm1073_vm3 = vcmp.gt.f32.partialorder %v983_v26, 0.0  ;;  %v5878_v14 = vadd.f32 1.0, %v5458_v20 }
  0xfb   :  { %v596_v34 = vadd.f32 %v4192_v28, %v83_v23  ;;  %v977_v28 = vpop.f32.mrf.mxu1  ;;  %v5518_v36 = vsel %vm1071_vm0, %v973_v10, %v1103_v19 }
  0xfc   :  { %v4194_v39 = vpop.f32.mrf.mxu0  ;;  %v662_v40 = vld [vmem:[#allocation2 + $0x18] sm:$0xff]  ;;  %v978_v33 = vadd.f32 %v5424_v32, %v977_v28  ;;  %7574 = vst [vmem:[#allocation13_spill] sm:$0xff] %v5518_v36  ;;  %1607 = vrot.lane.b32.xlu1 %v5518_v36, %s4922_s6 }
  0xfd   :  { %629 = vst.msk [vmem:[#allocation2 + $0x28] sm:$0xff] %vm45_vm1, %v596_v34  ;;  %v4195_v43 = vadd.f32 %v4194_v39, %v4193_v30  ;;  %4503 = vmatmul.mubr.msk.f32.gmra.mxu1 %vm45_vm1, %v662_v40  ;;  %v5515_v30 = vsel %vm1070_vm2, %v968_v15, %v1102_v25  ;;  %v88_v39 = vld [vmem:[#allocation2 + $0x50] sm:$0xff] }
  0xfe   :  { %v4196_v45 = vpop.f32.mrf.mxu0  ;;  %7573 = vst [vmem:[#allocation12_spill] sm:$0xff] %v5515_v30  ;;  %1605 = vrot.lane.b32.xlu0 %v5515_v30, %s4922_s6  ;;  %v1104_v42 = vmul.f32 0.01, %v978_v33  ;;  %vm1072_vm4 = vcmp.gt.f32.partialorder %v978_v33, 0.0  ;;  %v2441_v30 = vld [vmem:[%s7455_s2] sm:$0xff] }
  0xff   :  { %v597_v48 = vadd.f32 %v4195_v43, %v84_v38  ;;  %v4464_v38 = vpop.f32.mrf.mxu1  ;;  %4627 = vmatprep.mubr.msk.f32.mxu0 %vm45_vm1, %v2441_v30  ;;  %v2443_v30 = vld [vmem:[%s7455_s2 + $0x10] sm:$0xff] }
 0x100   :  { %v4197_v54 = vpop.f32.mrf.mxu0  ;;  %v663_v56 = vld [vmem:[#allocation2 + $0x20] sm:$0xff]  ;;  %v993_v43 = vadd.f32 %v4464_v38, %v5424_v32 }
 0x101   :  { %630 = vst.msk [vmem:[#allocation2 + $0x30] sm:$0xff] %vm45_vm1, %v597_v48  ;;  %v4198_v59 = vadd.f32 %v4197_v54, %v4196_v45  ;;  %4505 = vmatprep.mubr.msk.f32.mxu1 %vm45_vm1, %v663_v56  ;;  %v987_v45 = vpop.f32.mrf.mxu1  ;;  %v5527_v48 = vsel %vm1072_vm4, %v978_v33, %v1104_v42  ;;  %vm3907_vm4 = vcmask 7168  }
 0x102   :  { %v4199_v61 = vpop.f32.mrf.mxu0  ;;  %7575 = vst [vmem:[#allocation14_spill] sm:$0xff] %v5527_v48  ;;  %v988_v51 = vadd.f32 %v5424_v32, %v987_v45  ;;  %v1107_v54 = vmul.f32 0.01, %v993_v43  ;;  %1609 = vrot.lane.b32.xlu0 %v5527_v48, %s4922_s6  ;;  %vm1075_vm5 = vcmp.gt.f32.partialorder %v993_v43, 0.0 }
 0x103   :  { %v598_v1 = vadd.f32 %v4198_v59, %v85_v53  ;;  %v5530_v53 = vsel %vm1073_vm3, %v983_v26, %v1105_v37  ;;  %v4467_v56 = vpop.f32.mrf.mxu1 }
 0x104   :  { %v4200_v6 = vpop.f32.mrf.mxu0  ;;  %v664_v8 = vld [vmem:[#allocation2 + $0x28] sm:$0xff]  ;;  %7576 = vst [vmem:[#allocation15_spill] sm:$0xff] %v5530_v53  ;;  %v1106_v60 = vmul.f32 0.01, %v988_v51  ;;  %vm1074_vm6 = vcmp.gt.f32.partialorder %v988_v51, 0.0  ;;  %1611 = vrot.lane.b32.xlu1 %v5530_v53, %s4922_s6 }
 0x105   :  { %631 = vst.msk [vmem:[#allocation2 + $0x38] sm:$0xff] %vm45_vm1, %v598_v1  ;;  %v4201_v11 = vadd.f32 %v4200_v6, %v4199_v61  ;;  %4506 = vmatmul.mubr.msk.f32.gmra.mxu1 %vm45_vm1, %v664_v8  ;;  %v1003_v61 = vadd.f32 %v4467_v56, %v5424_v32  ;;  %v997_v1 = vpop.f32.mrf.mxu1  ;;  %v5542_v8 = vsel %vm1075_vm5, %v993_v43, %v1107_v54  ;;  %vm3940_vm5 = vcmask 15360  }
 0x106   :  { %v4202_v13 = vpop.f32.mrf.mxu0  ;;  %v5539_v4 = vsel %vm1074_vm6, %v988_v51, %v1106_v60  ;;  %7578 = vst [vmem:[#allocation17_spill] sm:$0xff] %v5542_v8  ;;  %v92_v51 = vld [vmem:[#allocation2 + $0x70] sm:$0xff] }
 0x107   :  { %v599_v16 = vadd.f32 %v4201_v11, %v86_v5  ;;  %7577 = vst [vmem:[#allocation16_spill] sm:$0xff] %v5539_v4  ;;  %v998_v5 = vadd.f32 %v5424_v32, %v997_v1  ;;  %v1109_v9 = vmul.f32 0.01, %v1003_v61  ;;  %1613 = vrot.lane.b32.xlu0 %v5539_v4, %s4922_s6  ;;  %v4470_v10 = vpop.f32.mrf.mxu1  ;;  %v90_v11 = vld [vmem:[#allocation2 + $0x60] sm:$0xff]  ;;  %vm1077_vm7 = vcmp.gt.f32.partialorder %v1003_v61, 0.0 }
 0x108   :  { %v4203_v23 = vpop.f32.mrf.mxu0  ;;  %v665_v24 = vld [vmem:[#allocation2 + $0x30] sm:$0xff]  ;;  %1615 = vrot.lane.b32.xlu1 %v5542_v8, %s4922_s6 }
 0x109   :  { %632 = vst.msk [vmem:[#allocation2 + $0x40] sm:$0xff] %vm45_vm1, %v599_v16  ;;  %v4204_v27 = vadd.f32 %v4203_v23, %v4202_v13  ;;  %4508 = vmatprep.mubr.msk.f32.mxu1 %vm45_vm1, %v665_v24  ;;  %v1108_v15 = vmul.f32 0.01, %v998_v5  ;;  %v1013_v16 = vadd.f32 %v4470_v10, %v5424_v32  ;;  %vm1076_vm8 = vcmp.gt.f32.partialorder %v998_v5, 0.0  ;;  %v1007_v21 = vpop.f32.mrf.mxu1  ;;  %v94_v10 = vld [vmem:[#allocation2 + $0x80] sm:$0xff] }
 0x10a   :  { %v4205_v29 = vpop.f32.mrf.mxu0  ;;  %v1008_v24 = vadd.f32 %v5424_v32, %v1007_v21  ;;  %v5554_v26 = vsel %vm1077_vm7, %v1003_v61, %v1109_v9  ;;  %v5588_v21 = vpop.permute.xlu1 %2155 }
 0x10b   :  { %v600_v34 = vadd.f32 %v4204_v27, %v87_v22  ;;  %v5551_v23 = vsel %vm1076_vm8, %v998_v5, %v1108_v15  ;;  %7580 = vst [vmem:[#allocation19_spill] sm:$0xff] %v5554_v26  ;;  %v1111_v27 = vmul.f32 0.01, %v1013_v16  ;;  %v4473_v28 = vpop.f32.mrf.mxu1  ;;  %vm1079_vm9 = vcmp.gt.f32.partialorder %v1013_v16, 0.0  ;;  %v5586_v15 = vpop.permute.xlu0 %1931 }
 0x10c   :  { %v4206_v40 = vpop.f32.mrf.mxu0  ;;  %v666_v41 = vld [vmem:[#allocation2 + $0x38] sm:$0xff]  ;;  %7579 = vst [vmem:[#allocation18_spill] sm:$0xff] %v5551_v23  ;;  %1617 = vrot.lane.b32.xlu0 %v5551_v23, %s4922_s6  ;;  %v1110_v37 = vmul.f32 0.01, %v1008_v24  ;;  %v1023_v38 = vadd.f32 %v4473_v28, %v5424_v32  ;;  %vm1078_vm10 = vcmp.gt.f32.partialorder %v1008_v24, 0.0  ;;  %1619 = vrot.lane.b32.xlu1 %v5554_v26, %s4922_s6 }
 0x10d   :  { %633 = vst.msk [vmem:[#allocation2 + $0x48] sm:$0xff] %vm45_vm1, %v600_v34  ;;  %v4207_v44 = vadd.f32 %v4206_v40, %v4205_v29  ;;  %4509 = vmatmul.mubr.msk.f32.gmra.mxu1 %vm45_vm1, %v666_v41  ;;  %v91_v29 = vld [vmem:[#allocation2 + $0x68] sm:$0xff]  ;;  %v1017_v40 = vpop.f32.mrf.mxu1  ;;  %v5566_v45 = vsel %vm1079_vm9, %v1013_v16, %v1111_v27 }
 0x10e   :  { %v4208_v47 = vpop.f32.mrf.mxu0  ;;  %v5563_v42 = vsel %vm1078_vm10, %v1008_v24, %v1110_v37  ;;  %v1018_v43 = vadd.f32 %v5424_v32, %v1017_v40  ;;  %7582 = vst [vmem:[#allocation21_spill] sm:$0xff] %v5566_v45  ;;  %vm1081_vm11 = vcmp.gt.f32.partialorder %v1023_v38, 0.0  ;;  %v95_v27 = vld [vmem:[#allocation2 + $0x88] sm:$0xff] }
 0x10f   :  { %v601_v52 = vadd.f32 %v4207_v44, %v88_v39  ;;  %7581 = vst [vmem:[#allocation20_spill] sm:$0xff] %v5563_v42  ;;  %v4476_v16 = vpop.f32.mrf.mxu1 }
 0x110   :  { %v4209_v58 = vpop.f32.mrf.mxu0  ;;  %v667_v59 = vld [vmem:[#allocation2 + $0x40] sm:$0xff]  ;;  %1621 = vrot.lane.b32.xlu0 %v5563_v42, %s4922_s6  ;;  %v1112_v56 = vmul.f32 0.01, %v1018_v43  ;;  %vm1080_vm12 = vcmp.gt.f32.partialorder %v1018_v43, 0.0  ;;  %1623 = vrot.lane.b32.xlu1 %v5566_v45, %s4922_s6 }
 0x111   :  { %634 = vst.msk [vmem:[#allocation2 + $0x50] sm:$0xff] %vm45_vm1, %v601_v52  ;;  %v4210_v0 = vadd.f32 %v4209_v58, %v4208_v47  ;;  %4511 = vmatprep.mubr.msk.f32.mxu1 %vm45_vm1, %v667_v59  ;;  %v1113_v47 = vmul.f32 0.01, %v1023_v38 }
 0x112   :  { %v4211_v3 = vpop.f32.mrf.mxu0  ;;  %v5574_v59 = vsel %vm1080_vm12, %v1018_v43, %v1112_v56 }
 0x113   :  { %v602_v6 = vadd.f32 %v4210_v0, %v89_v57  ;;  %7583 = vst [vmem:[#allocation22_spill] sm:$0xff] %v5574_v59  ;;  %v5576_v61 = vsel %vm1081_vm11, %v1023_v38, %v1113_v47  ;;  %v93_v0 = vld [vmem:[#allocation2 + $0x78] sm:$0xff]  ;;  %v5597_v47 = vpop.permute.xlu0 %2160 }
 0x114   :  { %v4212_v12 = vpop.f32.mrf.mxu0  ;;  %v668_v13 = vld [vmem:[#allocation2 + $0x48] sm:$0xff]  ;;  %7584 = vst [vmem:[#allocation23_spill] sm:$0xff] %v5576_v61  ;;  %1625 = vrot.lane.b32.xlu0 %v5574_v59, %s4922_s6  ;;  %1627 = vrot.lane.b32.xlu1 %v5576_v61, %s4922_s6 }
 0x115   :  { %635 = vst.msk [vmem:[#allocation2 + $0x58] sm:$0xff] %vm45_vm1, %v602_v6  ;;  %v4213_v19 = vadd.f32 %v4212_v12, %v4211_v3  ;;  %4512 = vmatmul.mubr.msk.f32.gmra.mxu1 %vm45_vm1, %v668_v13 }
 0x116   :  { %v4214_v22 = vpop.f32.mrf.mxu0 }
 0x117   :  { %v603_v25 = vadd.f32 %v4213_v19, %v90_v11 }
 0x118   :  { %v4215_v33 = vpop.f32.mrf.mxu0  ;;  %v669_v34 = vld [vmem:[#allocation2 + $0x50] sm:$0xff] }
 0x119   :  { %636 = vst.msk [vmem:[#allocation2 + $0x60] sm:$0xff] %vm45_vm1, %v603_v25  ;;  %v4216_v39 = vadd.f32 %v4215_v33, %v4214_v22  ;;  %4514 = vmatprep.mubr.msk.f32.mxu1 %vm45_vm1, %v669_v34  ;;  %v1033_v22 = vadd.f32 %v4476_v16, %v5424_v32  ;;  %v1027_v25 = vpop.f32.mrf.mxu1 }
 0x11a   :  { %v4217_v41 = vpop.f32.mrf.mxu0  ;;  %v1028_v34 = vadd.f32 %v5424_v32, %v1027_v25 }
 0x11b   :  { %v604_v44 = vadd.f32 %v4216_v39, %v91_v29  ;;  %v1115_v33 = vmul.f32 0.01, %v1033_v22  ;;  %vm1083_vm13 = vcmp.gt.f32.partialorder %v1033_v22, 0.0  ;;  %v4479_v38 = vpop.f32.mrf.mxu1 }
 0x11c   :  { %v4218_v52 = vpop.f32.mrf.mxu0  ;;  %v670_v54 = vld [vmem:[#allocation2 + $0x58] sm:$0xff]  ;;  %v1114_v40 = vmul.f32 0.01, %v1028_v34  ;;  %vm1082_vm14 = vcmp.gt.f32.partialorder %v1028_v34, 0.0 }
 0x11d   :  { %637 = vst.msk [vmem:[#allocation2 + $0x68] sm:$0xff] %vm45_vm1, %v604_v44  ;;  %v4219_v57 = vadd.f32 %v4218_v52, %v4217_v41  ;;  %4515 = vmatmul.mubr.msk.f32.gmra.mxu1 %vm45_vm1, %v670_v54  ;;  %v1043_v41 = vadd.f32 %v4479_v38, %v5424_v32  ;;  %v5595_v43 = vsel %vm1083_vm13, %v1033_v22, %v1115_v33  ;;  %v96_v52 = vld [vmem:[#allocation2 + $0x90] sm:$0xff]  ;;  %v98_v38 = vld [vmem:[#allocation2 + $0xa0] sm:$0xff] }
 0x11e   :  { %v4220_v58 = vpop.f32.mrf.mxu0  ;;  %7585 = vst [vmem:[#allocation24_spill] sm:$0xff] %v5595_v43  ;;  %1631 = vrot.lane.b32.xlu1 %v5595_v43, %s4922_s6 }
 0x11f   :  { %v605_v60 = vadd.f32 %v4219_v57, %v92_v51  ;;  %v1037_v51 = vpop.f32.mrf.mxu1  ;;  %v5601_v57 = vpop.permute.xlu1 %1936  ;;  %vm1085_vm15 = vcmp.gt.f32.partialorder %v1043_v41, 0.0 }
 0x120   :  { %v4221_v1 = vpop.f32.mrf.mxu0  ;;  %v671_v3 = vld [vmem:[#allocation2 + $0x60] sm:$0xff] }
 0x121   :  { %638 = vst.msk [vmem:[#allocation2 + $0x70] sm:$0xff] %vm45_vm1, %v605_v60  ;;  %v4222_v5 = vadd.f32 %v4221_v1, %v4220_v58  ;;  %4517 = vmatprep.mubr.msk.f32.mxu1 %vm45_vm1, %v671_v3  ;;  %v1117_v58 = vmul.f32 0.01, %v1043_v41  ;;  %v1038_v60 = vadd.f32 %v5424_v32, %v1037_v51  ;;  %v4482_v3 = vpop.f32.mrf.mxu1 }
 0x122   :  { %v4223_v6 = vpop.f32.mrf.mxu0 }
 0x123   :  { %v606_v9 = vadd.f32 %v4222_v5, %v93_v0  ;;  %v5604_v0 = vsel %vm1082_vm14, %v1028_v34, %v1114_v40  ;;  %vm1084_vm0 = vcmp.gt.f32.partialorder %v1038_v60, 0.0  ;;  %v5624_v33 = vpop.permute.xlu1 %1941 }
 0x124   :  { %v4224_v11 = vpop.f32.mrf.mxu0  ;;  %v672_v12 = vld [vmem:[#allocation2 + $0x68] sm:$0xff]  ;;  %7586 = vst [vmem:[#allocation25_spill] sm:$0xff] %v5604_v0  ;;  %1629 = vrot.lane.b32.xlu0 %v5604_v0, %s4922_s6 }
 0x125   :  { %639 = vst.msk [vmem:[#allocation2 + $0x78] sm:$0xff] %vm45_vm1, %v606_v9  ;;  %v4225_v13 = vadd.f32 %v4224_v11, %v4223_v6  ;;  %4518 = vmatmul.mubr.msk.f32.gmra.mxu1 %vm45_vm1, %v672_v12  ;;  %v1116_v6 = vmul.f32 0.01, %v1038_v60  ;;  %v1053_v9 = vadd.f32 %v4482_v3, %v5424_v32  ;;  %v1047_v12 = vpop.f32.mrf.mxu1 }
 0x126   :  { %v4226_v19 = vpop.f32.mrf.mxu0 }
 0x127   :  { %v607_v24 = vadd.f32 %v4225_v13, %v94_v10  ;;  %v5611_v10 = vsel %vm1085_vm15, %v1043_v41, %v1117_v58  ;;  %v97_v13 = vld [vmem:[#allocation2 + $0x98] sm:$0xff]  ;;  %v1119_v22 = vmul.f32 0.01, %v1053_v9  ;;  %v5616_v25 = vsel %vm1084_vm0, %v1038_v60, %v1116_v6 }
 0x128   :  { %v4227_v28 = vpop.f32.mrf.mxu0  ;;  %v673_v29 = vld [vmem:[#allocation2 + $0x70] sm:$0xff]  ;;  %7587 = vst [vmem:[#allocation26_spill] sm:$0xff] %v5611_v10  ;;  %1635 = vrot.lane.b32.xlu1 %v5611_v10, %s4922_s6  ;;  %7588 = vst [vmem:[#allocation27_spill] sm:$0xff] %v5616_v25  ;;  %vm1087_vm2 = vcmp.gt.f32.partialorder %v1053_v9, 0.0  ;;  %1633 = vrot.lane.b32.xlu0 %v5616_v25, %s4922_s6 }
 0x129   :  { %640 = vst.msk [vmem:[#allocation2 + $0x80] sm:$0xff] %vm45_vm1, %v607_v24  ;;  %v4228_v37 = vadd.f32 %v4227_v28, %v4226_v19  ;;  %4520 = vmatprep.mubr.msk.f32.mxu1 %vm45_vm1, %v673_v29  ;;  %v1048_v24 = vadd.f32 %v5424_v32, %v1047_v12  ;;  %v5620_v28 = vpop.permute.xlu0 %2165 }
 0x12a   :  { %v4229_v39 = vpop.f32.mrf.mxu0 }
 0x12b   :  { %v608_v44 = vadd.f32 %v4228_v37, %v95_v27  ;;  %v1118_v34 = vmul.f32 0.01, %v1048_v24  ;;  %v5626_v37 = vsel %vm1087_vm2, %v1053_v9, %v1119_v22  ;;  %vm1086_vm3 = vcmp.gt.f32.partialorder %v1048_v24, 0.0  ;;  %v100_v9 = vld [vmem:[#allocation2 + $0xb0] sm:$0xff] }
 0x12c   :  { %v4230_v54 = vpop.f32.mrf.mxu0  ;;  %v674_v56 = vld [vmem:[#allocation2 + $0x78] sm:$0xff]  ;;  %7589 = vst [vmem:[#allocation28_spill] sm:$0xff] %v5626_v37  ;;  %1639 = vrot.lane.b32.xlu1 %v5626_v37, %s4922_s6 }
 0x12d   :  { %641 = vst.msk [vmem:[#allocation2 + $0x88] sm:$0xff] %vm45_vm1, %v608_v44  ;;  %v4231_v1 = vadd.f32 %v4230_v54, %v4229_v39  ;;  %4521 = vmatmul.mubr.msk.f32.gmra.mxu1 %vm45_vm1, %v674_v56  ;;  %v5630_v41 = vsel %vm1086_vm3, %v1048_v24, %v1118_v34  ;;  %v5636_v54 = vpop.permute.xlu0 %2170  ;;  %v99_v56 = vld [vmem:[#allocation2 + $0xa8] sm:$0xff] }
 0x12e   :  { %v4232_v5 = vpop.f32.mrf.mxu0  ;;  %7590 = vst [vmem:[#allocation29_spill] sm:$0xff] %v5630_v41  ;;  %1637 = vrot.lane.b32.xlu0 %v5630_v41, %s4922_s6 }
 0x12f   :  { %v609_v11 = vadd.f32 %v4231_v1, %v96_v52  ;;  %v5638_v1 = vpop.permute.xlu1 %1946 }
 0x130   :  { %v4233_v16 = vpop.f32.mrf.mxu0  ;;  %v675_v19 = vld [vmem:[#allocation2 + $0x80] sm:$0xff] }
 0x131   :  { %642 = vst.msk [vmem:[#allocation2 + $0x90] sm:$0xff] %vm45_vm1, %v609_v11  ;;  %v4234_v27 = vadd.f32 %v4233_v16, %v4232_v5  ;;  %4523 = vmatprep.mubr.msk.f32.mxu1 %vm45_vm1, %v675_v19  ;;  %v5644_v16 = vpop.permute.xlu0 %2175 }
 0x132   :  { %v4235_v29 = vpop.f32.mrf.mxu0 }
 0x133   :  { %v610_v32 = vadd.f32 %v4234_v27, %v97_v13  ;;  %v5646_v22 = vpop.permute.xlu1 %1951  ;;  %v101_v27 = vld [vmem:[#allocation2 + $0xb8] sm:$0xff] }
 0x134   :  { %v4236_v39 = vpop.f32.mrf.mxu0  ;;  %v676_v40 = vld [vmem:[#allocation2 + $0x88] sm:$0xff] }
 0x135   :  { %643 = vst.msk [vmem:[#allocation2 + $0x98] sm:$0xff] %vm45_vm1, %v610_v32  ;;  %v4237_v44 = vadd.f32 %v4236_v39, %v4235_v29  ;;  %4524 = vmatmul.mubr.msk.f32.gmra.mxu1 %vm45_vm1, %v676_v40  ;;  %v5650_v40 = vpop.permute.xlu0 %2180 }
 0x136   :  { %v4238_v51 = vpop.f32.mrf.mxu0 }
 0x137   :  { %v611_v52 = vadd.f32 %v4237_v44, %v98_v38  ;;  %v102_v44 = vld [vmem:[#allocation2 + $0xc0] sm:$0xff] }
 0x138   :  { %v4239_v58 = vpop.f32.mrf.mxu0  ;;  %v677_v60 = vld [vmem:[#allocation2 + $0x90] sm:$0xff] }
 0x139   :  { %644 = vst.msk [vmem:[#allocation2 + $0xa0] sm:$0xff] %vm45_vm1, %v611_v52  ;;  %v4240_v3 = vadd.f32 %v4239_v58, %v4238_v51  ;;  %4526 = vmatprep.mubr.msk.f32.mxu1 %vm45_vm1, %v677_v60 }
 0x13a   :  { %v4241_v5 = vpop.f32.mrf.mxu0 }
 0x13b   :  { %v612_v6 = vadd.f32 %v4240_v3, %v99_v56  ;;  %v5652_v56 = vpop.permute.xlu1 %1956 }
 0x13c   :  { %v4242_v11 = vpop.f32.mrf.mxu0  ;;  %v678_v12 = vld [vmem:[#allocation2 + $0x98] sm:$0xff] }
 0x13d   :  { %645 = vst.msk [vmem:[#allocation2 + $0xa8] sm:$0xff] %vm45_vm1, %v612_v6  ;;  %v4243_v13 = vadd.f32 %v4242_v11, %v4241_v5  ;;  %4527 = vmatmul.mubr.msk.f32.gmra.mxu1 %vm45_vm1, %v678_v12  ;;  %v103_v5 = vld [vmem:[#allocation2 + $0xc8] sm:$0xff]  ;;  %v5658_v12 = vpop.permute.xlu0 %2185 }
 0x13e   :  { %v4244_v19 = vpop.f32.mrf.mxu0  ;;  %7591 = vst [vmem:[#allocation30_spill] sm:$0xff] %v5658_v12 }
 0x13f   :  { %v613_v24 = vadd.f32 %v4243_v13, %v100_v9 }
 0x140   :  { %v4245_v29 = vpop.f32.mrf.mxu0  ;;  %v679_v34 = vld [vmem:[#allocation2 + $0xa0] sm:$0xff] }
 0x141   :  { %646 = vst.msk [vmem:[#allocation2 + $0xb0] sm:$0xff] %vm45_vm1, %v613_v24  ;;  %v4246_v32 = vadd.f32 %v4245_v29, %v4244_v19  ;;  %4529 = vmatprep.mubr.msk.f32.mxu1 %vm45_vm1, %v679_v34  ;;  %v5660_v19 = vpop.permute.xlu1 %1961 }
 0x142   :  { %v4247_v38 = vpop.f32.mrf.mxu0  ;;  %7592 = vst [vmem:[#allocation31_spill] sm:$0xff] %v5660_v19 }
 0x143   :  { %v614_v39 = vadd.f32 %v4246_v32, %v101_v27  ;;  %v104_v27 = vld [vmem:[#allocation2 + $0xd0] sm:$0xff] }
 0x144   :  { %v4248_v51 = vpop.f32.mrf.mxu0  ;;  %v680_v52 = vld [vmem:[#allocation2 + $0xa8] sm:$0xff] }
 0x145   :  { %647 = vst.msk [vmem:[#allocation2 + $0xb8] sm:$0xff] %vm45_vm1, %v614_v39  ;;  %v4249_v58 = vadd.f32 %v4248_v51, %v4247_v38  ;;  %4530 = vmatmul.mubr.msk.f32.gmra.mxu1 %vm45_vm1, %v680_v52  ;;  %v105_v51 = vld [vmem:[#allocation2 + $0xd8] sm:$0xff] }
 0x146   :  { %v4250_v60 = vpop.f32.mrf.mxu0 }
 0x147   :  { %v615_v3 = vadd.f32 %v4249_v58, %v102_v44  ;;  %v5664_v44 = vpop.permute.xlu0 %2190 }
 0x148   :  { %v4251_v6 = vpop.f32.mrf.mxu0  ;;  %v681_v9 = vld [vmem:[#allocation2 + $0xb0] sm:$0xff] }
 0x149   :  { %648 = vst.msk [vmem:[#allocation2 + $0xc0] sm:$0xff] %vm45_vm1, %v615_v3  ;;  %v4252_v11 = vadd.f32 %v4251_v6, %v4250_v60  ;;  %4532 = vmatprep.mubr.msk.f32.mxu1 %vm45_vm1, %v681_v9  ;;  %v5666_v60 = vpop.permute.xlu1 %1966  ;;  %v106_v9 = vld [vmem:[#allocation2 + $0xe0] sm:$0xff] }
 0x14a   :  { %v4253_v13 = vpop.f32.mrf.mxu0 }
 0x14b   :  { %v616_v24 = vadd.f32 %v4252_v11, %v103_v5 }
 0x14c   :  { %v4254_v29 = vpop.f32.mrf.mxu0  ;;  %v682_v34 = vld [vmem:[#allocation2 + $0xb8] sm:$0xff] }
 0x14d   :  { %649 = vst.msk [vmem:[#allocation2 + $0xc8] sm:$0xff] %vm45_vm1, %v616_v24  ;;  %v4255_v32 = vadd.f32 %v4254_v29, %v4253_v13  ;;  %4533 = vmatmul.mubr.msk.f32.gmra.mxu1 %vm45_vm1, %v682_v34  ;;  %v5674_v34 = vpop.permute.xlu1 %1971 }
 0x14e   :  { %v4256_v38 = vpop.f32.mrf.mxu0  ;;  %7594 = vst [vmem:[#allocation33_spill] sm:$0xff] %v5674_v34 }
 0x14f   :  { %v617_v39 = vadd.f32 %v4255_v32, %v104_v27  ;;  %v5672_v27 = vpop.permute.xlu0 %2195 }
 0x150   :  { %v4257_v52 = vpop.f32.mrf.mxu0  ;;  %v683_v58 = vld [vmem:[#allocation2 + $0xc0] sm:$0xff]  ;;  %7593 = vst [vmem:[#allocation32_spill] sm:$0xff] %v5672_v27 }
 0x151   :  { %650 = vst.msk [vmem:[#allocation2 + $0xd0] sm:$0xff] %vm45_vm1, %v617_v39  ;;  %v4258_v3 = vadd.f32 %v4257_v52, %v4256_v38  ;;  %4535 = vmatprep.mubr.msk.f32.mxu1 %vm45_vm1, %v683_v58  ;;  %v107_v39 = vld [vmem:[#allocation2 + $0xe8] sm:$0xff]  ;;  %v5680_v41 = vpop.permute.xlu1 %1976 }
 0x152   :  { %v4259_v5 = vpop.f32.mrf.mxu0  ;;  %7596 = vst [vmem:[#allocation35_spill] sm:$0xff] %v5680_v41 }
 0x153   :  { %v618_v6 = vadd.f32 %v4258_v3, %v105_v51 }
 0x154   :  { %v4260_v11 = vpop.f32.mrf.mxu0  ;;  %v684_v13 = vld [vmem:[#allocation2 + $0xc8] sm:$0xff] }
 0x155   :  { %651 = vst.msk [vmem:[#allocation2 + $0xd8] sm:$0xff] %vm45_vm1, %v618_v6  ;;  %v4261_v24 = vadd.f32 %v4260_v11, %v4259_v5  ;;  %4536 = vmatmul.mubr.msk.f32.gmra.mxu1 %vm45_vm1, %v684_v13  ;;  %v5678_v6 = vpop.permute.xlu0 %2200  ;;  %v108_v5 = vld [vmem:[#allocation2 + $0xf0] sm:$0xff] }
 0x156   :  { %v4262_v29 = vpop.f32.mrf.mxu0  ;;  %7595 = vst [vmem:[#allocation34_spill] sm:$0xff] %v5678_v6 }
 0x157   :  { %v619_v32 = vadd.f32 %v4261_v24, %v106_v9 }
 0x158   :  { %v4263_v38 = vpop.f32.mrf.mxu0  ;;  %v685_v52 = vld [vmem:[#allocation2 + $0xd0] sm:$0xff] }
 0x159   :  { %652 = vst.msk [vmem:[#allocation2 + $0xe0] sm:$0xff] %vm45_vm1, %v619_v32  ;;  %v4264_v51 = vadd.f32 %v4263_v38, %v4262_v29  ;;  %4538 = vmatprep.mubr.msk.f32.mxu1 %vm45_vm1, %v685_v52  ;;  %v109_v32 = vld [vmem:[#allocation2 + $0xf8] sm:$0xff]  ;;  %v5686_v52 = vpop.permute.xlu0 %2205 }
 0x15a   :  { %v4265_v58 = vpop.f32.mrf.mxu0  ;;  %7597 = vst [vmem:[#allocation36_spill] sm:$0xff] %v5686_v52 }
 0x15b   :  { %v620_v3 = vadd.f32 %v4264_v51, %v107_v39  ;;  %v5688_v51 = vpop.permute.xlu1 %1981 }
 0x15c   :  { %v4266_v11 = vpop.f32.mrf.mxu0  ;;  %v686_v13 = vld [vmem:[#allocation2 + $0xd8] sm:$0xff]  ;;  %7598 = vst [vmem:[#allocation37_spill] sm:$0xff] %v5688_v51 }
 0x15d   :  { %653 = vst.msk [vmem:[#allocation2 + $0xe8] sm:$0xff] %vm45_vm1, %v620_v3  ;;  %v4267_v9 = vadd.f32 %v4266_v11, %v4265_v58  ;;  %4539 = vmatmul.mubr.msk.f32.gmra.mxu1 %vm45_vm1, %v686_v13  ;;  %v5692_v58 = vpop.permute.xlu0 %2210 }
 0x15e   :  { %v4268_v24 = vpop.f32.mrf.mxu0  ;;  %7599 = vst [vmem:[#allocation38_spill] sm:$0xff] %v5692_v58  ;;  %v5859_v58 = vadd.f32 1.0, %v5448_v7 }
 0x15f   :  { %v621_v59 = vadd.f32 %v4267_v9, %v108_v5  ;;  %v5694_v3 = vpop.permute.xlu1 %1986 }
 0x160   :  { %v4269_v29 = vpop.f32.mrf.mxu0  ;;  %v687_v38 = vld [vmem:[#allocation2 + $0xe0] sm:$0xff]  ;;  %7600 = vst [vmem:[#allocation39_spill] sm:$0xff] %v5694_v3 }
 0x161   :  { %654 = vst.msk [vmem:[#allocation2 + $0xf0] sm:$0xff] %vm45_vm1, %v621_v59  ;;  %v4270_v39 = vadd.f32 %v4269_v29, %v4268_v24  ;;  %4541 = vmatprep.mubr.msk.f32.mxu1 %vm45_vm1, %v687_v38  ;;  %v5698_v11 = vpop.permute.xlu0 %2215 }
 0x162   :  { %7601 = vst [vmem:[#allocation40_spill] sm:$0xff] %v5698_v11  ;;  %v5824_v11 = vld [vmem:[%s7453_s8] sm:$0xff] }
 0x163   :  { %v622_v42 = vadd.f32 %v4270_v39, %v109_v32  ;;  %v5700_v13 = vpop.permute.xlu1 %1991  ;;  %7626 = vst [vmem:[#allocation65_spill] sm:$0xff] %v5824_v11 }
 0x164   :  { %v688_v23 = vld [vmem:[#allocation2 + $0xe8] sm:$0xff]  ;;  %7602 = vst [vmem:[#allocation41_spill] sm:$0xff] %v5700_v13 }
 0x165   :  { %655 = vst.msk [vmem:[#allocation2 + $0xf8] sm:$0xff] %vm45_vm1, %v622_v42  ;;  %4542 = vmatmul.mubr.msk.f32.gmra.mxu1 %vm45_vm1, %v688_v23  ;;  %v5702_v9 = vpop.permute.xlu0 %2220 }
 0x166   :  { %7603 = vst [vmem:[#allocation42_spill] sm:$0xff] %v5702_v9 }
 0x167   :  { %v5704_v24 = vpop.permute.xlu1 %1996 }
 0x168   :  { %v689_v5 = vld [vmem:[#allocation2 + $0xf0] sm:$0xff]  ;;  %7604 = vst [vmem:[#allocation43_spill] sm:$0xff] %v5704_v24 }
 0x169   :  { %4544 = vmatprep.mubr.msk.f32.mxu1 %vm45_vm1, %v689_v5  ;;  %v5706_v42 = vpop.permute.xlu0 %2225  ;;  %v5721_v5 = vld [vmem:[%s7453_s8 + $0x38] sm:$0xff] }
 0x16a   :  { %7605 = vst [vmem:[#allocation44_spill] sm:$0xff] %v5706_v42  ;;  %4611 = vmatprep.subr.mxu0 %v5721_v5 }
 0x16b   :  { %v5708_v23 = vpop.permute.xlu1 %2001  ;;  %4612 = vmatpush3.msra.mxu0 %v5721_v5 }
 0x16c   :  { %v690_v59 = vld [vmem:[#allocation2 + $0xf8] sm:$0xff]  ;;  %7606 = vst [vmem:[#allocation45_spill] sm:$0xff] %v5708_v23 }
 0x16d   :  { %4545 = vmatmul.mubr.msk.f32.gmra.mxu1 %vm45_vm1, %v690_v59  ;;  %v5710_v32 = vpop.permute.xlu0 %2230 }
 0x16e   :  { %7607 = vst [vmem:[#allocation46_spill] sm:$0xff] %v5710_v32  ;;  %v5740_v32 = vld [vmem:[%s7453_s8 + $0x30] sm:$0xff] }
 0x16f   :  { %v5712_v29 = vpop.permute.xlu1 %2006  ;;  %4613 = vmatprep.subr.mxu0 %v5740_v32 }
 0x170   :  { %7608 = vst [vmem:[#allocation47_spill] sm:$0xff] %v5712_v29  ;;  %4614 = vmatpush3.msra.mxu0 %v5740_v32 }
 0x171   :  { %v5714_v38 = vpop.permute.xlu0 %2235 }
 0x172   :  { %7609 = vst [vmem:[#allocation48_spill] sm:$0xff] %v5714_v38 }
 0x173   :  { %v5716_v39 = vpop.permute.xlu1 %2011 }
 0x174   :  { %7610 = vst [vmem:[#allocation49_spill] sm:$0xff] %v5716_v39 }
 0x175   :  { %v5723_v59 = vpop.permute.xlu0 %2240 }
 0x176   :  { %7611 = vst [vmem:[#allocation50_spill] sm:$0xff] %v5723_v59 }
 0x177   :  { %v5725_v4 = vpop.permute.xlu1 %2016 }
 0x178   :  { %7612 = vst [vmem:[#allocation51_spill] sm:$0xff] %v5725_v4 }
 0x179   :  { %v5729_v42 = vpop.permute.xlu0 %2245 }
 0x17a   :  { %7613 = vst [vmem:[#allocation52_spill] sm:$0xff] %v5729_v42 }
 0x17b   :  { %v5731_v23 = vpop.permute.xlu1 %2021 }
 0x17c   :  { %7614 = vst [vmem:[#allocation53_spill] sm:$0xff] %v5731_v23 }
 0x17d   :  { %v5733_v38 = vpop.permute.xlu0 %2250 }
 0x17e   :  { %7615 = vst [vmem:[#allocation54_spill] sm:$0xff] %v5733_v38  ;;  %v2488_v38 = vld [vmem:[%s7454_s9 + $0x38] sm:$0xff] }
 0x17f   :  { %v5735_v39 = vpop.permute.xlu1 %2026  ;;  %4547 = vmatprep.subr.mxu1 %v2488_v38 }
 0x180   :  { %7616 = vst [vmem:[#allocation55_spill] sm:$0xff] %v5735_v39  ;;  %4548 = vmatpush3.msra.mxu1 %v2488_v38  ;;  %v2487_v39 = vld [vmem:[%s7454_s9 + $0x30] sm:$0xff]  ;;  %v2485_v38 = vld [vmem:[%s7454_s9 + $0x20] sm:$0xff] }
 0x181   :  { %v5744_v59 = vpop.permute.xlu0 %2255  ;;  %4549 = vmatprep.subr.mxu1 %v2487_v39 }
 0x182   :  { %7617 = vst [vmem:[#allocation56_spill] sm:$0xff] %v5744_v59  ;;  %v5765_v59 = vld [vmem:[%s7453_s8 + $0x28] sm:$0xff]  ;;  %4550 = vmatpush3.msra.mxu1 %v2487_v39  ;;  %v2484_v39 = vld [vmem:[%s7454_s9 + $0x18] sm:$0xff] }
 0x183   :  { %v5746_v4 = vpop.permute.xlu1 %2031  ;;  %4615 = vmatprep.subr.mxu0 %v5765_v59 }
 0x184   :  { %7618 = vst [vmem:[#allocation57_spill] sm:$0xff] %v5746_v4  ;;  %4616 = vmatpush3.msra.mxu0 %v5765_v59 }
 0x185   :  { %v5748_v42 = vpop.permute.xlu0 %2260 }
 0x186   :  { %7619 = vst [vmem:[#allocation58_spill] sm:$0xff] %v5748_v42  ;;  %v2486_v42 = vld [vmem:[%s7454_s9 + $0x28] sm:$0xff] }
 0x187   :  { %v5750_v23 = vpop.permute.xlu1 %2036  ;;  %4551 = vmatprep.subr.mxu1 %v2486_v42 }
 0x188   :  { %7620 = vst [vmem:[#allocation59_spill] sm:$0xff] %v5750_v23  ;;  %4552 = vmatpush3.msra.mxu1 %v2486_v42  ;;  %v5788_v42 = vld [vmem:[%s7453_s8 + $0x18] sm:$0xff]  ;;  %v5802_v23 = vld [vmem:[%s7453_s8 + $0x10] sm:$0xff] }
 0x189   :  { %v5758_v29 = vpop.permute.xlu0 %2265  ;;  %4553 = vmatprep.subr.mxu1 %v2485_v38 }
 0x18a   :  { %7621 = vst [vmem:[#allocation60_spill] sm:$0xff] %v5758_v29  ;;  %v5778_v29 = vld [vmem:[%s7453_s8 + $0x20] sm:$0xff]  ;;  %4554 = vmatpush3.msra.mxu1 %v2485_v38  ;;  %v2483_v38 = vld [vmem:[%s7454_s9 + $0x10] sm:$0xff] }
 0x18b   :  { %v5760_v48 = vpop.permute.xlu1 %2041  ;;  %4617 = vmatprep.subr.mxu0 %v5778_v29  ;;  %4555 = vmatprep.subr.mxu1 %v2484_v39 }
 0x18c   :  { %7622 = vst [vmem:[#allocation61_spill] sm:$0xff] %v5760_v48  ;;  %4618 = vmatpush3.msra.mxu0 %v5778_v29  ;;  %4556 = vmatpush3.msra.mxu1 %v2484_v39  ;;  %v2482_v39 = vld [vmem:[%s7454_s9 + $0x8] sm:$0xff] }
 0x18d   :  { %v5790_v48 = vpop.permute.xlu0 %2270  ;;  %4619 = vmatprep.subr.mxu0 %v5788_v42  ;;  %4557 = vmatprep.subr.mxu1 %v2483_v38 }
 0x18e   :  { %7623 = vst [vmem:[#allocation62_spill] sm:$0xff] %v5790_v48  ;;  %4620 = vmatpush3.msra.mxu0 %v5788_v42  ;;  %4558 = vmatpush3.msra.mxu1 %v2483_v38  ;;  %v5812_v48 = vld [vmem:[%s7453_s8 + $0x8] sm:$0xff]  ;;  %v2481_v38 = vld [vmem:[%s7454_s9] sm:$0xff] }
 0x18f   :  { %v5792_v4 = vpop.permute.xlu1 %2046  ;;  %4621 = vmatprep.subr.mxu0 %v5802_v23  ;;  %7625 = vst [vmem:[#allocation64_spill] sm:$0xff] %v5812_v48  ;;  %4559 = vmatprep.subr.mxu1 %v2482_v39 }
 0x190   :  { %7624 = vst [vmem:[#allocation63_spill] sm:$0xff] %v5792_v4  ;;  %4622 = vmatpush3.msra.mxu0 %v5802_v23  ;;  %4560 = vmatpush3.msra.mxu1 %v2482_v39  ;;  %v5833_v39 = vadd.f32 1.0, %v5435_v55  ;;  %v2445_v55 = vld [vmem:[%s7455_s2 + $0x20] sm:$0xff] }
 0x191   :  { %4623 = vmatprep.subr.mxu0 %v5812_v48  ;;  %v5826_v13 = vpop.permute.xlu0 %2275  ;;  %4561 = vmatprep.subr.mxu1 %v2481_v38 }
 0x192   :  { %4624 = vmatpush3.msra.mxu0 %v5812_v48  ;;  %7627 = vst [vmem:[#allocation66_spill] sm:$0xff] %v5826_v13  ;;  %4562 = vmatpush3.msra.mxu1 %v2481_v38  ;;  %v2442_v13 = vld [vmem:[%s7455_s2 + $0x8] sm:$0xff] }
 0x193   :  { %v5828_v9 = vpop.permute.xlu1 %2051  ;;  %4625 = vmatprep.subr.mxu0 %v5824_v11  ;;  %4675 = vmatprep.subr.mxu1 %v5721_v5 }
 0x194   :  { %7628 = vst [vmem:[#allocation67_spill] sm:$0xff] %v5828_v9  ;;  %4626 = vmatpush3.msra.mxu0 %v5824_v11  ;;  %v2451_v11 = vld [vmem:[%s7455_s2 + $0x50] sm:$0xff] }
 0x195   :  { %4628 = vmatmul.mubr.msk.f32.vlgmr.msra.gmra.mxu0 %vm45_vm1, %v2442_v13  ;;  %v5850_v52 = vpop.permute.xlu0 %2280  ;;  %v2444_v13 = vld [vmem:[%s7455_s2 + $0x18] sm:$0xff] }
 0x196   :  { %7629 = vst [vmem:[#allocation68_spill] sm:$0xff] %v5850_v52  ;;  %4630 = vmatprep.mubr.msk.f32.mxu0 %vm45_vm1, %v2443_v30 }
 0x197   :  { %v5852_v38 = vpop.permute.xlu1 %2056 }
 0x198   :  { %7630 = vst [vmem:[#allocation69_spill] sm:$0xff] %v5852_v38 }
 0x199   :  { %4631 = vmatmul.mubr.msk.f32.gmra.mxu0 %vm45_vm1, %v2444_v13  ;;  %v5873_v38 = vpop.permute.xlu0 %2285  ;;  %v2446_v13 = vld [vmem:[%s7455_s2 + $0x28] sm:$0xff] }
 0x19a   :  { %7631 = vst [vmem:[#allocation70_spill] sm:$0xff] %v5873_v38  ;;  %4633 = vmatprep.mubr.msk.f32.mxu0 %vm45_vm1, %v2445_v55 }
 0x19b   :  { %v5875_v7 = vpop.permute.xlu1 %2061 }
 0x19c   :  { %7632 = vst [vmem:[#allocation71_spill] sm:$0xff] %v5875_v7 }
 0x19d   :  { %v5893_v38 = vpop.permute.xlu0 %2290  ;;  %4634 = vmatmul.mubr.msk.f32.gmra.mxu0 %vm45_vm1, %v2446_v13  ;;  %v2448_v13 = vld [vmem:[%s7455_s2 + $0x38] sm:$0xff] }
 0x19e   :  { %7633 = vst [vmem:[#allocation72_spill] sm:$0xff] %v5893_v38  ;;  %v2447_v38 = vld [vmem:[%s7455_s2 + $0x30] sm:$0xff] }
 0x19f   :  { %v5895_v7 = vpop.permute.xlu1 %2066  ;;  %4636 = vmatprep.mubr.msk.f32.mxu0 %vm45_vm1, %v2447_v38  ;;  %v2449_v38 = vld [vmem:[%s7455_s2 + $0x40] sm:$0xff] }
 0x1a0   :  { %7634 = vst [vmem:[#allocation73_spill] sm:$0xff] %v5895_v7 }
 0x1a1   :  { %v5903_v27 = vpop.permute.xlu0 %2295  ;;  %4637 = vmatmul.mubr.msk.f32.gmra.mxu0 %vm45_vm1, %v2448_v13  ;;  %v2450_v13 = vld [vmem:[%s7455_s2 + $0x48] sm:$0xff] }
 0x1a2   :  { %7635 = vst [vmem:[#allocation74_spill] sm:$0xff] %v5903_v27  ;;  %4639 = vmatprep.mubr.msk.f32.mxu0 %vm45_vm1, %v2449_v38 }
 0x1a3   :  { %v5905_v55 = vpop.permute.xlu1 %2071 }
 0x1a4   :  { %7636 = vst [vmem:[#allocation75_spill] sm:$0xff] %v5905_v55  ;;  %v5928_v55 = vadd.f32 1.0, %v5482_v50 }
 0x1a5   :  { %v5923_v27 = vpop.permute.xlu0 %2300  ;;  %4640 = vmatmul.mubr.msk.f32.gmra.mxu0 %vm45_vm1, %v2450_v13 }
 0x1a6   :  { %7637 = vst [vmem:[#allocation76_spill] sm:$0xff] %v5923_v27  ;;  %7639 = vst [vmem:[#allocation78_spill] sm:$0xff] %v5928_v55  ;;  %4642 = vmatprep.mubr.msk.f32.mxu0 %vm45_vm1, %v2451_v11 }
 0x1a9   :  { %v5946_v27 = vpop.permute.xlu0 %2305 }
 0x1aa   :  { %7641 = vst [vmem:[#allocation80_spill] sm:$0xff] %v5946_v27 }
 0x1ad   :  { %v5968_v27 = vpop.permute.xlu0 %1579 }
 0x1b5   :  { %v5815_v4 = vpop.f32.mrf.mxu1 }
 0x1b6   :  { %1739 = vrot.lane.b32.xlu1 %v5815_v4, %s4922_s6 }
 0x1b7   :  { %v1322_v24 = vpop.f32.mrf.mxu1 }
 0x1b8   :  { %v5843_v9 = vmul.f32 %v5833_v39, %v1322_v24  ;;  %1737 = vrot.lane.b32.xlu0 %v1322_v24, %s4922_s6 }
 0x1bd   :  { %v5854_v51 = vpop.f32.mrf.mxu1 }
 0x1be   :  { %1743 = vrot.lane.b32.xlu1 %v5854_v51, %s4922_s6 }
 0x1bf   :  { %v1332_v24 = vpop.f32.mrf.mxu1 }
 0x1c0   :  { %v5869_v52 = vmul.f32 %v5859_v58, %v1332_v24  ;;  %1741 = vrot.lane.b32.xlu0 %v1332_v24, %s4922_s6 }
 0x1c5   :  { %v4507_v3 = vpop.f32.mrf.mxu1 }
 0x1c6   :  { %v5881_v30 = vmul.f32 %v4507_v3, %v5878_v14  ;;  %1747 = vrot.lane.b32.xlu1 %v4507_v3, %s4922_s6  ;;  %v5901_v3 = vadd.f32 1.0, %v5470_v35 }
 0x1c7   :  { %v5887_v24 = vpop.f32.mrf.mxu1 }
 0x1c8   :  { %1745 = vrot.lane.b32.xlu0 %v5887_v24, %s4922_s6 }
 0x1cd   :  { %v4510_v20 = vpop.f32.mrf.mxu1 }
 0x1ce   :  { %v5908_v34 = vmul.f32 %v4510_v20, %v5901_v3  ;;  %1751 = vrot.lane.b32.xlu1 %v4510_v20, %s4922_s6  ;;  %v5925_v20 = vpop.permute.xlu1 %2076 }
 0x1cf   :  { %v5914_v7 = vpop.f32.mrf.mxu1  ;;  %7638 = vst [vmem:[#allocation77_spill] sm:$0xff] %v5925_v20  ;;  %v5951_v20 = vadd.f32 1.0, %v5494_v2  ;;  %v2452_v2 = vld [vmem:[%s7455_s2 + $0x58] sm:$0xff] }
 0x1d0   :  { %1749 = vrot.lane.b32.xlu0 %v5914_v7, %s4922_s6  ;;  %4643 = vmatmul.mubr.msk.f32.gmra.mxu0 %vm45_vm1, %v2452_v2 }
 0x1d1   :  { %7643 = vst [vmem:[#allocation82_spill] sm:$0xff] %v5951_v20 }
 0x1d5   :  { %v4513_v35 = vpop.f32.mrf.mxu1 }
 0x1d6   :  { %v5931_v6 = vmul.f32 %v4513_v35, %v5928_v55  ;;  %1755 = vrot.lane.b32.xlu1 %v4513_v35, %s4922_s6  ;;  %v5948_v35 = vpop.permute.xlu1 %2081  ;;  %v2453_v55 = vld [vmem:[%s7455_s2 + $0x60] sm:$0xff] }
 0x1d7   :  { %v5937_v62 = vpop.f32.mrf.mxu1  ;;  %7642 = vst [vmem:[#allocation81_spill] sm:$0xff] %v5948_v35  ;;  %v5976_v35 = vadd.f32 1.0, %v5506_v18  ;;  %4645 = vmatprep.mubr.msk.f32.mxu0 %vm45_vm1, %v2453_v55  ;;  %v2454_v18 = vld [vmem:[%s7455_s2 + $0x68] sm:$0xff] }
 0x1d8   :  { %7640 = vst [vmem:[#allocation79_spill] sm:$0xff] %v5931_v6  ;;  %1753 = vrot.lane.b32.xlu0 %v5937_v62, %s4922_s6  ;;  %4646 = vmatmul.mubr.msk.f32.gmra.mxu0 %vm45_vm1, %v2454_v18  ;;  %v2455_v18 = vld [vmem:[%s7455_s2 + $0x70] sm:$0xff] }
 0x1d9   :  { %7646 = vst [vmem:[#allocation85_spill] sm:$0xff] %v5976_v35  ;;  %4648 = vmatprep.mubr.msk.f32.mxu0 %vm45_vm1, %v2455_v18 }
 0x1da   :  { %v5953_v41 = vpop.permute.xlu1 %1583 }
 0x1dd   :  { %v4516_v50 = vpop.f32.mrf.mxu1 }
 0x1de   :  { %v5956_v38 = vmul.f32 %v4516_v50, %v5951_v20  ;;  %1759 = vrot.lane.b32.xlu1 %v4516_v50, %s4922_s6  ;;  %v5973_v50 = vpop.permute.xlu1 %1581 }
 0x1df   :  { %v5962_v13 = vpop.f32.mrf.mxu1 }
 0x1e0   :  { %7644 = vst [vmem:[#allocation83_spill] sm:$0xff] %v5956_v38  ;;  %7645 = vst [vmem:[#allocation84_spill] sm:$0xff] %v5962_v13  ;;  %1757 = vrot.lane.b32.xlu0 %v5962_v13, %s4922_s6  ;;  %v5978_v38 = vpop.permute.xlu0 %1577 }
 0x1e2   :  { %v5990_v2 = vpop.permute.xlu1 %1587 }
 0x1e5   :  { %v4519_v20 = vpop.f32.mrf.mxu1 }
 0x1e6   :  { %v5981_v11 = vmul.f32 %v4519_v20, %v5976_v35  ;;  %1763 = vrot.lane.b32.xlu1 %v4519_v20, %s4922_s6  ;;  %v5998_v20 = vpop.permute.xlu0 %1585  ;;  %v6000_v35 = vpop.permute.xlu1 %1591 }
 0x1e7   :  { %v5987_v13 = vpop.f32.mrf.mxu1 }
 0x1e8   :  { %7647 = vst [vmem:[#allocation86_spill] sm:$0xff] %v5981_v11  ;;  %7648 = vst [vmem:[#allocation87_spill] sm:$0xff] %v5987_v13  ;;  %1761 = vrot.lane.b32.xlu0 %v5987_v13, %s4922_s6  ;;  %v6003_v11 = vadd.f32 1.0, %v5518_v36  ;;  %v2456_v36 = vld [vmem:[%s7455_s2 + $0x78] sm:$0xff] }
 0x1e9   :  { %4649 = vmatmul.mubr.msk.f32.gmra.mxu0 %vm45_vm1, %v2456_v36  ;;  %v2457_v36 = vld [vmem:[%s7455_s2 + $0x80] sm:$0xff] }
 0x1ea   :  { %7649 = vst [vmem:[#allocation88_spill] sm:$0xff] %v6003_v11  ;;  %v6005_v55 = vpop.permute.xlu0 %1589  ;;  %v6016_v19 = vpop.permute.xlu1 %1595  ;;  %4651 = vmatprep.mubr.msk.f32.mxu0 %vm45_vm1, %v2457_v36 }
 0x1eb   :  { %7652 = vst [vmem:[#allocation91_spill] sm:$0xff] %v6016_v19 }
 0x1ed   :  { %v4522_v6 = vpop.f32.mrf.mxu1 }
 0x1ee   :  { %v6008_v12 = vmul.f32 %v4522_v6, %v6003_v11  ;;  %1767 = vrot.lane.b32.xlu1 %v4522_v6, %s4922_s6  ;;  %v6025_v6 = vpop.permute.xlu0 %1593  ;;  %v6027_v11 = vpop.permute.xlu1 %1599 }
 0x1ef   :  { %v6011_v13 = vpop.f32.mrf.mxu1  ;;  %7653 = vst [vmem:[#allocation92_spill] sm:$0xff] %v6025_v6 }
 0x1f0   :  { %7650 = vst [vmem:[#allocation89_spill] sm:$0xff] %v6008_v12  ;;  %7651 = vst [vmem:[#allocation90_spill] sm:$0xff] %v6011_v13  ;;  %1765 = vrot.lane.b32.xlu0 %v6011_v13, %s4922_s6  ;;  %v6030_v12 = vadd.f32 1.0, %v5530_v53  ;;  %v2458_v53 = vld [vmem:[%s7455_s2 + $0x88] sm:$0xff] }
 0x1f1   :  { %4652 = vmatmul.mubr.msk.f32.gmra.mxu0 %vm45_vm1, %v2458_v53  ;;  %v2459_v53 = vld [vmem:[%s7455_s2 + $0x90] sm:$0xff] }
 0x1f2   :  { %7654 = vst [vmem:[#allocation93_spill] sm:$0xff] %v6030_v12  ;;  %v6032_v19 = vpop.permute.xlu0 %1597  ;;  %v6043_v6 = vpop.permute.xlu1 %1603  ;;  %4654 = vmatprep.mubr.msk.f32.mxu0 %vm45_vm1, %v2459_v53 }
 0x1f3   :  { %7655 = vst [vmem:[#allocation94_spill] sm:$0xff] %v6032_v19  ;;  %7658 = vst [vmem:[#allocation97_spill] sm:$0xff] %v6043_v6 }
 0x1f5   :  { %v4525_v48 = vpop.f32.mrf.mxu1 }
 0x1f6   :  { %v6035_v13 = vmul.f32 %v4525_v48, %v6030_v12  ;;  %1771 = vrot.lane.b32.xlu1 %v4525_v48, %s4922_s6  ;;  %v6052_v48 = vpop.permute.xlu0 %1601  ;;  %v6054_v12 = vpop.permute.xlu1 %1607 }
 0x1f7   :  { %v6038_v18 = vpop.f32.mrf.mxu1  ;;  %7659 = vst [vmem:[#allocation98_spill] sm:$0xff] %v6052_v48 }
 0x1f8   :  { %7656 = vst [vmem:[#allocation95_spill] sm:$0xff] %v6035_v13  ;;  %7657 = vst [vmem:[#allocation96_spill] sm:$0xff] %v6038_v18  ;;  %1769 = vrot.lane.b32.xlu0 %v6038_v18, %s4922_s6  ;;  %v6057_v13 = vadd.f32 1.0, %v5542_v8  ;;  %v2460_v8 = vld [vmem:[%s7455_s2 + $0x98] sm:$0xff] }
 0x1f9   :  { %4655 = vmatmul.mubr.msk.f32.gmra.mxu0 %vm45_vm1, %v2460_v8  ;;  %v2461_v8 = vld [vmem:[%s7455_s2 + $0xa0] sm:$0xff] }
 0x1fa   :  { %7660 = vst [vmem:[#allocation99_spill] sm:$0xff] %v6057_v13  ;;  %v6059_v6 = vpop.permute.xlu0 %1605  ;;  %v6070_v48 = vpop.permute.xlu1 %1611  ;;  %4657 = vmatprep.mubr.msk.f32.mxu0 %vm45_vm1, %v2461_v8 }
 0x1fb   :  { %7661 = vst [vmem:[#allocation100_spill] sm:$0xff] %v6059_v6  ;;  %7664 = vst [vmem:[#allocation103_spill] sm:$0xff] %v6070_v48 }
 0x1fd   :  { %v4528_v19 = vpop.f32.mrf.mxu1 }
 0x1fe   :  { %v6062_v18 = vmul.f32 %v4528_v19, %v6057_v13  ;;  %1775 = vrot.lane.b32.xlu1 %v4528_v19, %s4922_s6  ;;  %v6079_v19 = vpop.permute.xlu0 %1609  ;;  %v6081_v13 = vpop.permute.xlu1 %1615 }
 0x1ff   :  { %v6065_v36 = vpop.f32.mrf.mxu1  ;;  %7665 = vst [vmem:[#allocation104_spill] sm:$0xff] %v6079_v19 }
 0x200   :  { %7662 = vst [vmem:[#allocation101_spill] sm:$0xff] %v6062_v18  ;;  %7663 = vst [vmem:[#allocation102_spill] sm:$0xff] %v6065_v36  ;;  %1773 = vrot.lane.b32.xlu0 %v6065_v36, %s4922_s6  ;;  %v6084_v18 = vadd.f32 1.0, %v5554_v26  ;;  %v2462_v26 = vld [vmem:[%s7455_s2 + $0xa8] sm:$0xff] }
 0x201   :  { %4658 = vmatmul.mubr.msk.f32.gmra.mxu0 %vm45_vm1, %v2462_v26  ;;  %v2463_v26 = vld [vmem:[%s7455_s2 + $0xb0] sm:$0xff] }
 0x202   :  { %7666 = vst [vmem:[#allocation105_spill] sm:$0xff] %v6084_v18  ;;  %v6086_v48 = vpop.permute.xlu0 %1613  ;;  %v6097_v19 = vpop.permute.xlu1 %1619  ;;  %4660 = vmatprep.mubr.msk.f32.mxu0 %vm45_vm1, %v2463_v26 }
 0x203   :  { %7667 = vst [vmem:[#allocation106_spill] sm:$0xff] %v6086_v48  ;;  %7670 = vst [vmem:[#allocation109_spill] sm:$0xff] %v6097_v19 }
 0x205   :  { %v4531_v6 = vpop.f32.mrf.mxu1 }
 0x206   :  { %v6089_v36 = vmul.f32 %v4531_v6, %v6084_v18  ;;  %1779 = vrot.lane.b32.xlu1 %v4531_v6, %s4922_s6  ;;  %v6106_v6 = vpop.permute.xlu0 %1617  ;;  %v6109_v18 = vadd.f32 1.0, %v5566_v45 }
 0x207   :  { %v6092_v53 = vpop.f32.mrf.mxu1 }
 0x208   :  { %7668 = vst [vmem:[#allocation107_spill] sm:$0xff] %v6089_v36  ;;  %7669 = vst [vmem:[#allocation108_spill] sm:$0xff] %v6092_v53  ;;  %1777 = vrot.lane.b32.xlu0 %v6092_v53, %s4922_s6  ;;  %v6111_v36 = vpop.permute.xlu1 %1623 }
 0x209   :  { %7671 = vst [vmem:[#allocation110_spill] sm:$0xff] %v6109_v18  ;;  %7672 = vst [vmem:[#allocation111_spill] sm:$0xff] %v6111_v36 }
 0x20a   :  { %v6117_v8 = vpop.permute.xlu0 %1621 }
 0x20b   :  { %7674 = vst [vmem:[#allocation113_spill] sm:$0xff] %v6117_v8  ;;  %v6136_v8 = vadd.f32 1.0, %v5576_v61  ;;  %v2466_v61 = vld [vmem:[%s7455_s2 + $0xc8] sm:$0xff] }
 0x20c   :  { %v6126_v45 = vpop.permute.xlu1 %1627 }
 0x20d   :  { %v4534_v48 = vpop.f32.mrf.mxu1  ;;  %7676 = vst [vmem:[#allocation115_spill] sm:$0xff] %v6126_v45  ;;  %7678 = vst [vmem:[#allocation117_spill] sm:$0xff] %v6136_v8 }
 0x20e   :  { %v6114_v19 = vmul.f32 %v4534_v48, %v6109_v18  ;;  %1783 = vrot.lane.b32.xlu1 %v4534_v48, %s4922_s6  ;;  %v2464_v18 = vld [vmem:[%s7455_s2 + $0xb8] sm:$0xff]  ;;  %v6133_v48 = vpop.permute.xlu0 %1625 }
 0x20f   :  { %v6119_v53 = vpop.f32.mrf.mxu1  ;;  %4661 = vmatmul.mubr.msk.f32.gmra.mxu0 %vm45_vm1, %v2464_v18  ;;  %7677 = vst [vmem:[#allocation116_spill] sm:$0xff] %v6133_v48 }
 0x210   :  { %7673 = vst [vmem:[#allocation112_spill] sm:$0xff] %v6114_v19  ;;  %7675 = vst [vmem:[#allocation114_spill] sm:$0xff] %v6119_v53  ;;  %1781 = vrot.lane.b32.xlu0 %v6119_v53, %s4922_s6  ;;  %v6142_v45 = vpop.permute.xlu1 %1631  ;;  %v2465_v53 = vld [vmem:[%s7455_s2 + $0xc0] sm:$0xff] }
 0x211   :  { %7680 = vst [vmem:[#allocation119_spill] sm:$0xff] %v6142_v45  ;;  %4663 = vmatprep.mubr.msk.f32.mxu0 %vm45_vm1, %v2465_v53 }
 0x212   :  { %v6151_v18 = vpop.permute.xlu0 %1629 }
 0x213   :  { %7682 = vst [vmem:[#allocation121_spill] sm:$0xff] %v6151_v18  ;;  %4664 = vmatmul.mubr.msk.f32.gmra.mxu0 %vm45_vm1, %v2466_v61  ;;  %v6168_v18 = vadd.f32 1.0, %v5604_v0 }
 0x214   :  { %v6161_v45 = vpop.permute.xlu1 %1635 }
 0x215   :  { %v4537_v36 = vpop.f32.mrf.mxu1  ;;  %7684 = vst [vmem:[#allocation123_spill] sm:$0xff] %v6161_v45  ;;  %7685 = vst [vmem:[#allocation124_spill] sm:$0xff] %v6168_v18  ;;  %v6180_v45 = vadd.f32 1.0, %v5611_v10 }
 0x216   :  { %v6139_v19 = vmul.f32 %v4537_v36, %v6136_v8  ;;  %1787 = vrot.lane.b32.xlu1 %v4537_v36, %s4922_s6  ;;  %v6159_v36 = vadd.f32 1.0, %v5595_v43  ;;  %v6170_v53 = vpop.permute.xlu0 %1633  ;;  %v1482_v43 = vadd.f32 1.0, %v5429_v49 }
 0x217   :  { %v6144_v26 = vpop.f32.mrf.mxu1  ;;  %7686 = vst [vmem:[#allocation125_spill] sm:$0xff] %v6170_v53  ;;  %7689 = vst [vmem:[#allocation128_spill] sm:$0xff] %v6180_v45 }
 0x218   :  { %7679 = vst [vmem:[#allocation118_spill] sm:$0xff] %v6139_v19  ;;  %7681 = vst [vmem:[#allocation120_spill] sm:$0xff] %v6144_v26  ;;  %1785 = vrot.lane.b32.xlu0 %v6144_v26, %s4922_s6  ;;  %v6176_v61 = vpop.permute.xlu1 %1639 }
 0x219   :  { %7683 = vst [vmem:[#allocation122_spill] sm:$0xff] %v6159_v36  ;;  %7688 = vst [vmem:[#allocation127_spill] sm:$0xff] %v6176_v61 }
 0x21d   :  { %v4540_v8 = vpop.f32.mrf.mxu1 }
 0x21e   :  { %v6164_v48 = vmul.f32 %v4540_v8, %v6159_v36  ;;  %1791 = vrot.lane.b32.xlu1 %v4540_v8, %s4922_s6  ;;  %v6182_v36 = vpop.permute.xlu0 %1637  ;;  %v1514_v8 = vmul.f32 %v5815_v4, %v1482_v43 }
 0x21f   :  { %v1452_v19 = vpop.f32.mrf.mxu1  ;;  %7690 = vst [vmem:[#allocation129_spill] sm:$0xff] %v6182_v36  ;;  %v1673_v36 = vadd.f32 %v5978_v38, %v5843_v9 }
 0x220   :  { %v6173_v26 = vmul.f32 %v6168_v18, %v1452_v19  ;;  %1789 = vrot.lane.b32.xlu0 %v1452_v19, %s4922_s6  ;;  %v6190_v18 = vadd.f32 1.0, %v5616_v25  ;;  %v6197_v10 = vadd.f32 %v5968_v27, %v1514_v8 }
 0x222   :  { %7687 = vst [vmem:[#allocation126_spill] sm:$0xff] %v6173_v26  ;;  %7692 = vst [vmem:[#allocation131_spill] sm:$0xff] %v6190_v18 }
 0x225   :  { %v4543_v0 = vpop.f32.mrf.mxu1 }
 0x226   :  { %v6186_v53 = vmul.f32 %v4543_v0, %v6180_v45  ;;  %1795 = vrot.lane.b32.xlu1 %v4543_v0, %s4922_s6  ;;  %v1484_v0 = vadd.f32 1.0, %v5438_v63 }
 0x227   :  { %v1462_v19 = vpop.f32.mrf.mxu1 }
 0x228   :  { %7691 = vst [vmem:[#allocation130_spill] sm:$0xff] %v6186_v53  ;;  %v6193_v61 = vmul.f32 %v6190_v18, %v1462_v19  ;;  %v1740_v26 = vpop.permute.xlu1 %1739  ;;  %1793 = vrot.lane.b32.xlu0 %v1462_v19, %s4922_s6  ;;  %v6207_v18 = vadd.f32 1.0, %v5626_v37  ;;  %v2090_v19 = vmul.f32 %v5601_v57, %v6197_v10  ;;  %v1516_v8 = vmul.f32 %v5854_v51, %v1484_v0 }
 0x229   :  { %v1834_v4 = vmul.f32 %v1740_v26, %v1482_v43  ;;  %v3619_v57 = vmul.f32 %v1673_v36, %v1673_v36 }
 0x22a   :  { %7693 = vst [vmem:[#allocation132_spill] sm:$0xff] %v6193_v61  ;;  %v1738_v45 = vpop.permute.xlu0 %1737  ;;  %7694 = vst [vmem:[#allocation133_spill] sm:$0xff] %v6207_v18  ;;  %v6229_v61 = vadd.f32 %v5953_v41, %v1516_v8 }
 0x22b   :  { %v6203_v25 = vadd.f32 %v1834_v4, %v5968_v27  ;;  %v1833_v53 = vmul.f32 %v1738_v45, %v5833_v39  ;;  %v1928_v27 = vld [vmem:[%s7450_s4 + $0xf8] sm:$0xff]  ;;  %v2089_v45 = vmul.f32 %v5586_v15, %v1673_v36  ;;  %v1675_v36 = vadd.f32 %v5973_v50, %v5869_v52 }
 0x22d   :  { %v2314_v43 = vmul.f32 %v5597_v47, %v6203_v25  ;;  %v1865_v9 = vadd.f32 %v1833_v53, %v5978_v38  ;;  %v4546_v26 = vpop.f32.mrf.mxu1  ;;  %v2152_v53 = vsub.f32 1.0, %v1928_v27 }
 0x22e   :  { %v6220_v39 = vmul.f32 %v4546_v26, %v6207_v18  ;;  %1799 = vrot.lane.b32.xlu1 %v4546_v26, %s4922_s6 }
 0x22f   :  { %v2346_v4 = vsub.f32 %v2090_v19, %v2314_v43  ;;  %v2313_v51 = vmul.f32 %v5588_v21, %v1865_v9  ;;  %v6224_v37 = vpop.f32.mrf.mxu1  ;;  %v3651_v47 = vmul.f32 %v1865_v9, %v1865_v9 }
 0x230   :  { %7695 = vst [vmem:[#allocation134_spill] sm:$0xff] %v6220_v39  ;;  %7696 = vst [vmem:[#allocation135_spill] sm:$0xff] %v6224_v37  ;;  %v1744_v38 = vpop.permute.xlu1 %1743  ;;  %1797 = vrot.lane.b32.xlu0 %v6224_v37, %s4922_s6  ;;  %v1485_v37 = vadd.f32 1.0, %v5455_v17 }
 0x231   :  { %v2345_v15 = vsub.f32 %v2089_v45, %v2313_v51  ;;  %v1836_v18 = vmul.f32 %v1744_v38, %v1484_v0  ;;  %v6231_v39 = vadd.f32 %v3651_v47, %v3619_v57  ;;  %v2378_v19 = vmul.f32 0.1, %v2346_v4  ;;  %v4888_v45 = vld [vmem:[#allocation2] sm:$0xff] }
 0x232   :  { %v1742_v21 = vpop.permute.xlu0 %1741  ;;  %2086 = vperm.xlu1 %4695, %v1928_v27   ;;  %v2092_v0 = vmul.f32 %v5638_v1, %v6229_v61  ;;  %v2091_v27 = vmul.f32 %v5624_v33, %v1675_v36 }
 0x233   :  { %v2377_v43 = vmul.f32 0.1, %v2345_v15  ;;  %v6236_v9 = vadd.f32 %v1836_v18, %v5953_v41  ;;  %v1835_v26 = vmul.f32 %v1742_v21, %v5859_v58  ;;  %v1517_v41 = vmul.f32 %v1485_v37, %v5887_v24  ;;  %v4889_v18 = vld [vmem:[#allocation2 + $0x8] sm:$0xff] }
 0x234   :  { %2310 = vperm.xlu0 %4694, %v2152_v53   ;;  %v2410_v4 = vadd.f32 %v4889_v18, %v2378_v19  ;;  %v3621_v58 = vmul.f32 %v1675_v36, %v1675_v36 }
 0x235   :  { %v2316_v8 = vmul.f32 %v5636_v54, %v6236_v9  ;;  %v1867_v52 = vadd.f32 %v1835_v26, %v5973_v50  ;;  %v2409_v57 = vadd.f32 %v4888_v45, %v2377_v43  ;;  %v1678_v54 = vadd.f32 %v5990_v2, %v5881_v30 }
 0x236   :  { %v6257_v24 = vadd.f32 %v5998_v20, %v1517_v41  ;;  %v1487_v43 = vadd.f32 1.0, %v5467_v31 }
 0x237   :  { %v2348_v51 = vsub.f32 %v2092_v0, %v2316_v8  ;;  %v2315_v47 = vmul.f32 %v5620_v28, %v1867_v52  ;;  %4563 = vmatprep.mubr.msk.f32.mxu1 %vm45_vm1, %v2409_v57  ;;  %v3653_v1 = vmul.f32 %v1867_v52, %v1867_v52  ;;  %v2094_v21 = vmul.f32 %v5652_v56, %v1678_v54  ;;  %v4890_v0 = vld [vmem:[#allocation2 + $0x10] sm:$0xff] }
 0x238   :  { %4564 = vmatmul.mubr.msk.f32.vlgmr.msra.gmra.mxu1 %vm45_vm1, %v2410_v4  ;;  %v1748_v50 = vpop.permute.xlu1 %1747 }
 0x239   :  { %v2347_v38 = vsub.f32 %v2091_v27, %v2315_v47  ;;  %v1838_v33 = vmul.f32 %v1748_v50, %v5878_v14  ;;  %v6253_v53 = vadd.f32 %v3653_v1, %v3621_v58  ;;  %4683 = vmatpush3.msra.mxu1 %v5721_v5  ;;  %v2380_v28 = vmul.f32 0.1, %v2348_v51  ;;  %v4892_v1 = vld [vmem:[#allocation2 + $0x20] sm:$0xff] }
 0x23a   :  { %v1746_v15 = vpop.permute.xlu0 %1745  ;;  %4676 = vmatprep.subr.mxu1 %v5740_v32  ;;  %v3624_v14 = vmul.f32 %v1678_v54, %v1678_v54 }
 0x23b   :  { %v2379_v36 = vmul.f32 0.1, %v2347_v38  ;;  %v1870_v30 = vadd.f32 %v1838_v33, %v5990_v2  ;;  %v1837_v19 = vmul.f32 %v1746_v15, %v1485_v37  ;;  %4684 = vmatpush3.msra.mxu1 %v5740_v32  ;;  %v2093_v37 = vmul.f32 %v5646_v22, %v6257_v24  ;;  %v4891_v32 = vld [vmem:[#allocation2 + $0x18] sm:$0xff]  ;;  %v7698_v33 = vld [vmem:[#allocation31_spill] sm:$0xff] }
 0x23c   :  { %4677 = vmatprep.subr.mxu1 %v5765_v59  ;;  %v2412_v56 = vadd.f32 %v4891_v32, %v2380_v28  ;;  %v1519_v2 = vmul.f32 %v1487_v43, %v5914_v7 }
 0x23d   :  { %v2318_v5 = vmul.f32 %v5650_v40, %v1870_v30  ;;  %v6267_v26 = vadd.f32 %v1837_v19, %v5998_v20  ;;  %v2411_v8 = vadd.f32 %v4890_v0, %v2379_v36  ;;  %v3656_v52 = vmul.f32 %v1870_v30, %v1870_v30  ;;  %4685 = vmatpush3.msra.mxu1 %v5765_v59  ;;  %v7700_v30 = vld [vmem:[#allocation79_spill] sm:$0xff] }
 0x23e   :  { %4678 = vmatprep.subr.mxu1 %v5778_v29  ;;  %v1680_v59 = vadd.f32 %v6000_v35, %v5908_v34  ;;  %v7701_v19 = vld [vmem:[#allocation91_spill] sm:$0xff] }
 0x23f   :  { %v2350_v45 = vsub.f32 %v2094_v21, %v2318_v5  ;;  %v2317_v40 = vmul.f32 %v5644_v16, %v6267_v26  ;;  %4566 = vmatprep.mubr.msk.f32.mxu1 %vm45_vm1, %v2411_v8  ;;  %v6277_v20 = vadd.f32 %v3656_v52, %v3624_v14  ;;  %4686 = vmatpush3.msra.mxu1 %v5778_v29  ;;  %v7702_v14 = vld [vmem:[#allocation78_spill] sm:$0xff]  ;;  %v7703_v5 = vld [vmem:[#allocation92_spill] sm:$0xff] }
 0x240   :  { %4567 = vmatmul.mubr.msk.f32.gmra.mxu1 %vm45_vm1, %v2412_v56  ;;  %v1752_v22 = vpop.permute.xlu1 %1751  ;;  %4679 = vmatprep.subr.mxu1 %v5788_v42  ;;  %v6286_v16 = vadd.f32 %v6005_v55, %v1519_v2  ;;  %v2096_v34 = vmul.f32 %v5666_v60, %v1680_v59  ;;  %v3626_v51 = vmul.f32 %v1680_v59, %v1680_v59  ;;  %v7697_v60 = vld [vmem:[#allocation64_spill] sm:$0xff] }
 0x241   :  { %v2349_v57 = vsub.f32 %v2093_v37, %v2317_v40  ;;  %v1840_v27 = vmul.f32 %v1752_v22, %v5901_v3  ;;  %v2382_v7 = vmul.f32 0.1, %v2350_v45  ;;  %4687 = vmatpush3.msra.mxu1 %v5788_v42  ;;  %v1489_v3 = vadd.f32 1.0, %v5479_v46  ;;  %v4893_v42 = vld [vmem:[#allocation2 + $0x28] sm:$0xff]  ;;  %v7704_v37 = vld [vmem:[#allocation65_spill] sm:$0xff]  ;;  %v7705_v45 = vld [vmem:[#allocation35_spill] sm:$0xff] }
 0x242   :  { %v1750_v41 = vpop.permute.xlu0 %1749  ;;  %4680 = vmatprep.subr.mxu1 %v5802_v23  ;;  %v2095_v28 = vmul.f32 %v7698_v33, %v6286_v16  ;;  %v7706_v22 = vld [vmem:[#allocation8_spill] sm:$0xff] }
 0x243   :  { %v2381_v18 = vmul.f32 0.1, %v2349_v57  ;;  %v1872_v4 = vadd.f32 %v1840_v27, %v6000_v35  ;;  %v1839_v58 = vmul.f32 %v1750_v41, %v1487_v43  ;;  %4688 = vmatpush3.msra.mxu1 %v5802_v23  ;;  %v1521_v35 = vmul.f32 %v1489_v3, %v5937_v62  ;;  %v7707_v27 = vld [vmem:[#allocation34_spill] sm:$0xff] }
 0x244   :  { %v2414_v38 = vadd.f32 %v4893_v42, %v2382_v7  ;;  %4681 = vmatprep.subr.mxu1 %v7697_v60  ;;  %v1682_v23 = vadd.f32 %v7701_v19, %v7700_v30  ;;  %v1491_v57 = vadd.f32 1.0, %v7706_v22  ;;  %v7713_v30 = vld [vmem:[#allocation3_spill] sm:$0xff] }
 0x245   :  { %v2320_v29 = vmul.f32 %v5664_v44, %v1872_v4  ;;  %v6295_v47 = vadd.f32 %v1839_v58, %v6005_v55  ;;  %v2413_v54 = vadd.f32 %v4892_v1, %v2381_v18  ;;  %v3658_v50 = vmul.f32 %v1872_v4, %v1872_v4  ;;  %v7699_v44 = vld [vmem:[#allocation30_spill] sm:$0xff]  ;;  %4689 = vmatpush3.msra.mxu1 %v7697_v60  ;;  %v4894_v18 = vld [vmem:[#allocation2 + $0x30] sm:$0xff]  ;;  %v7709_v1 = vld [vmem:[#allocation84_spill] sm:$0xff] }
 0x246   :  { %v6313_v0 = vadd.f32 %v7703_v5, %v1521_v35  ;;  %4682 = vmatprep.subr.mxu1 %v7704_v37  ;;  %v2098_v40 = vmul.f32 %v7705_v45, %v1682_v23  ;;  %v3628_v59 = vmul.f32 %v1682_v23, %v1682_v23  ;;  %v7710_v35 = vld [vmem:[#allocation32_spill] sm:$0xff]  ;;  %v7711_v60 = vld [vmem:[#allocation83_spill] sm:$0xff] }
 0x247   :  { %v2352_v15 = vsub.f32 %v2096_v34, %v2320_v29  ;;  %v2319_v36 = vmul.f32 %v7699_v44, %v6295_v47  ;;  %4569 = vmatprep.mubr.msk.f32.mxu1 %vm45_vm1, %v2413_v54  ;;  %v6305_v55 = vadd.f32 %v3658_v50, %v3626_v51  ;;  %4690 = vmatpush3.msra.mxu1 %v7704_v37  ;;  %v7708_v34 = vld [vmem:[#allocation33_spill] sm:$0xff]  ;;  %v4895_v29 = vld [vmem:[#allocation2 + $0x38] sm:$0xff]  ;;  %v7717_v45 = vld [vmem:[#allocation4_spill] sm:$0xff] }
 0x248   :  { %4570 = vmatmul.mubr.msk.f32.gmra.mxu1 %vm45_vm1, %v2414_v38  ;;  %v1756_v62 = vpop.permute.xlu1 %1755  ;;  %v2097_v51 = vmul.f32 %v7708_v34, %v6313_v0  ;;  %v1523_v54 = vmul.f32 %v1491_v57, %v7709_v1  ;;  %v1684_v33 = vadd.f32 %v6027_v11, %v7711_v60  ;;  %v7712_v44 = vld [vmem:[#allocation82_spill] sm:$0xff] }
 0x249   :  { %v2351_v21 = vsub.f32 %v2095_v28, %v2319_v36  ;;  %v1842_v43 = vmul.f32 %v1756_v62, %v7702_v14  ;;  %v2384_v8 = vmul.f32 0.1, %v2352_v15 }
 0x24a   :  { %v1754_v52 = vpop.permute.xlu0 %1753 }
 0x24b   :  { %v2383_v32 = vmul.f32 0.1, %v2351_v21  ;;  %v1874_v56 = vadd.f32 %v1842_v43, %v7701_v19  ;;  %v1841_v2 = vmul.f32 %v1754_v52, %v1489_v3  ;;  %v2416_v3 = vadd.f32 %v4895_v29, %v2384_v8  ;;  %v7714_v21 = vld [vmem:[#allocation94_spill] sm:$0xff]  ;;  %v7715_v52 = vld [vmem:[#allocation39_spill] sm:$0xff] }
 0x24c   :  { %v3811_v19 = vmul.f32 %v7713_v30, %v7713_v30  ;;  %v6339_v14 = vadd.f32 %v7714_v21, %v1523_v54  ;;  %v2100_v37 = vmul.f32 %v7715_v52, %v1684_v33  ;;  %v7721_v54 = vld [vmem:[#allocation36_spill] sm:$0xff] }
 0x24d   :  { %v2322_v7 = vmul.f32 %v7707_v27, %v1874_v56  ;;  %v6322_v41 = vadd.f32 %v1841_v2, %v7703_v5  ;;  %v2415_v4 = vadd.f32 %v4894_v18, %v2383_v32  ;;  %v3660_v58 = vmul.f32 %v1874_v56, %v1874_v56  ;;  %v7716_v32 = vld [vmem:[#allocation10_spill] sm:$0xff]  ;;  %v4896_v18 = vld [vmem:[#allocation2 + $0x40] sm:$0xff] }
 0x24e   :  { %v1493_v56 = vadd.f32 1.0, %v7716_v32  ;;  %v3812_v2 = vmul.f32 %v5429_v49, %v5429_v49 }
 0x24f   :  { %v2354_v50 = vsub.f32 %v2098_v40, %v2322_v7  ;;  %v2321_v42 = vmul.f32 %v7710_v35, %v6322_v41  ;;  %4572 = vmatprep.mubr.msk.f32.mxu1 %vm45_vm1, %v2415_v4  ;;  %v6330_v38 = vadd.f32 %v3660_v58, %v3628_v59  ;;  %v3813_v40 = vmul.f32 %v7717_v45, %v7717_v45  ;;  %v7718_v59 = vld [vmem:[#allocation38_spill] sm:$0xff]  ;;  %v7719_v58 = vld [vmem:[#allocation87_spill] sm:$0xff] }
 0x250   :  { %4573 = vmatmul.mubr.msk.f32.gmra.mxu1 %vm45_vm1, %v2416_v3  ;;  %v1760_v28 = vpop.permute.xlu1 %1759  ;;  %v1525_v34 = vmul.f32 %v1493_v56, %v7719_v58  ;;  %v7720_v3 = vld [vmem:[#allocation37_spill] sm:$0xff]  ;;  %v7722_v35 = vld [vmem:[#allocation86_spill] sm:$0xff] }
 0x251   :  { %v2353_v15 = vsub.f32 %v2097_v51, %v2321_v42  ;;  %v1844_v36 = vmul.f32 %v1760_v28, %v7712_v44  ;;  %v2386_v23 = vmul.f32 0.1, %v2354_v50  ;;  %v4897_v51 = vld [vmem:[#allocation2 + $0x48] sm:$0xff]  ;;  %v2099_v49 = vmul.f32 %v7720_v3, %v6339_v14  ;;  %v7723_v42 = vld [vmem:[#allocation97_spill] sm:$0xff] }
 0x252   :  { %v1758_v62 = vpop.permute.xlu0 %1757  ;;  %v1686_v60 = vadd.f32 %v7723_v42, %v7722_v35  ;;  %v3814_v28 = vmul.f32 %v5438_v63, %v5438_v63  ;;  %v7726_v63 = vld [vmem:[#allocation43_spill] sm:$0xff]  ;;  %v7733_v35 = vld [vmem:[#allocation40_spill] sm:$0xff] }
 0x253   :  { %v2385_v43 = vmul.f32 0.1, %v2353_v15  ;;  %v1876_v5 = vadd.f32 %v1844_v36, %v6027_v11  ;;  %v1843_v8 = vmul.f32 %v1758_v62, %v1491_v57  ;;  %3843 = vadd.xlane.f32.xlu0 %v3811_v19  ;;  %v3630_v57 = vmul.f32 %v1684_v33, %v1684_v33  ;;  %v7724_v36 = vld [vmem:[#allocation85_spill] sm:$0xff] }
 0x254   :  { %v2418_v29 = vadd.f32 %v4897_v51, %v2386_v23  ;;  %v3815_v19 = vmul.f32 %v5455_v17, %v5455_v17  ;;  %v7725_v23 = vld [vmem:[#allocation98_spill] sm:$0xff]  ;;  %v3817_v17 = vmul.f32 %v5467_v31, %v5467_v31 }
 0x255   :  { %v2324_v27 = vmul.f32 %v7718_v59, %v1876_v5  ;;  %v6350_v7 = vadd.f32 %v1843_v8, %v7714_v21  ;;  %v2417_v4 = vadd.f32 %v4896_v18, %v2385_v43  ;;  %v3662_v11 = vmul.f32 %v1876_v5, %v1876_v5 }
 0x256   :  { %3845 = vadd.xlane.f32.xlu1 %v3812_v2  ;;  %v6369_v62 = vadd.f32 %v7725_v23, %v1525_v34  ;;  %v7727_v2 = vld [vmem:[#allocation12_spill] sm:$0xff]  ;;  %v7730_v34 = vld [vmem:[#allocation41_spill] sm:$0xff] }
 0x257   :  { %v2356_v1 = vsub.f32 %v2100_v37, %v2324_v27  ;;  %v2323_v50 = vmul.f32 %v7721_v54, %v6350_v7  ;;  %4575 = vmatprep.mubr.msk.f32.mxu1 %vm45_vm1, %v2417_v4  ;;  %3847 = vadd.xlane.f32.xlu0 %v3813_v40  ;;  %v6363_v15 = vadd.f32 %v3662_v11, %v3630_v57  ;;  %v1495_v45 = vadd.f32 1.0, %v7727_v2  ;;  %v7728_v40 = vld [vmem:[#allocation5_spill] sm:$0xff]  ;;  %v7729_v27 = vld [vmem:[#allocation42_spill] sm:$0xff] }
 0x258   :  { %4576 = vmatmul.mubr.msk.f32.gmra.mxu1 %vm45_vm1, %v2418_v29  ;;  %v1764_v33 = vpop.permute.xlu1 %1763  ;;  %v2102_v37 = vmul.f32 %v7726_v63, %v1686_v60  ;;  %v3816_v59 = vmul.f32 %v7728_v40, %v7728_v40  ;;  %v4898_v11 = vld [vmem:[#allocation2 + $0x50] sm:$0xff]  ;;  %v2101_v51 = vmul.f32 %v7730_v34, %v6369_v62  ;;  %v4899_v29 = vld [vmem:[#allocation2 + $0x58] sm:$0xff]  ;;  %v3623_v63 = vmul.f32 %v6257_v24, %v6257_v24  ;;  %v7740_v24 = vld [vmem:[#allocation96_spill] sm:$0xff] }
 0x259   :  { %v2355_v44 = vsub.f32 %v2099_v49, %v2323_v50  ;;  %v1846_v30 = vmul.f32 %v1764_v33, %v7724_v36  ;;  %v2388_v21 = vmul.f32 0.1, %v2356_v1  ;;  %v7731_v49 = vld [vmem:[#allocation6_spill] sm:$0xff]  ;;  %v7734_v33 = vld [vmem:[#allocation89_spill] sm:$0xff]  ;;  %v3652_v36 = vmul.f32 %v6203_v25, %v6203_v25 }
 0x25a   :  { %v1762_v43 = vpop.permute.xlu0 %1761  ;;  %3849 = vadd.xlane.f32.xlu1 %v3814_v28  ;;  %v3818_v1 = vmul.f32 %v7731_v49, %v7731_v49  ;;  %v7732_v54 = vld [vmem:[#allocation90_spill] sm:$0xff]  ;;  %v3622_v25 = vmul.f32 %v6229_v61, %v6229_v61 }
 0x25b   :  { %v2387_v5 = vmul.f32 0.1, %v2355_v44  ;;  %v1878_v8 = vadd.f32 %v1846_v30, %v7723_v42  ;;  %v1845_v52 = vmul.f32 %v1762_v43, %v1493_v56  ;;  %3851 = vadd.xlane.f32.xlu0 %v3815_v19  ;;  %v3632_v56 = vmul.f32 %v1686_v60, %v1686_v60  ;;  %v7735_v19 = vld [vmem:[#allocation14_spill] sm:$0xff]  ;;  %v7736_v43 = vld [vmem:[#allocation88_spill] sm:$0xff] }
 0x25c   :  { %v2420_v3 = vadd.f32 %v4899_v29, %v2388_v21  ;;  %v1527_v31 = vmul.f32 %v1495_v45, %v7732_v54  ;;  %v1688_v60 = vadd.f32 %v6054_v12, %v7734_v33  ;;  %v3819_v44 = vmul.f32 %v5479_v46, %v5479_v46  ;;  %v7743_v33 = vld [vmem:[#allocation44_spill] sm:$0xff] }
 0x25d   :  { %v2326_v18 = vmul.f32 %v7729_v27, %v1878_v8  ;;  %v6380_v4 = vadd.f32 %v1845_v52, %v7725_v23  ;;  %v2419_v57 = vadd.f32 %v4898_v11, %v2387_v5  ;;  %v3664_v58 = vmul.f32 %v1878_v8, %v1878_v8  ;;  %v7737_v8 = vld [vmem:[#allocation7_spill] sm:$0xff] }
 0x25e   :  { %3853 = vadd.xlane.f32.xlu1 %v3816_v59  ;;  %v1497_v23 = vadd.f32 1.0, %v7735_v19  ;;  %v3820_v52 = vmul.f32 %v7737_v8, %v7737_v8  ;;  %v3620_v46 = vmul.f32 %v6197_v10, %v6197_v10  ;;  %v7738_v59 = vld [vmem:[#allocation100_spill] sm:$0xff]  ;;  %v7741_v10 = vld [vmem:[#allocation46_spill] sm:$0xff]  ;;  %v3634_v54 = vmul.f32 %v1688_v60, %v1688_v60 }
 0x25f   :  { %v2358_v50 = vsub.f32 %v2102_v37, %v2326_v18  ;;  %v2325_v42 = vmul.f32 %v7733_v35, %v6380_v4  ;;  %4578 = vmatprep.mubr.msk.f32.mxu1 %vm45_vm1, %v2419_v57  ;;  %3855 = vadd.xlane.f32.xlu0 %v3817_v17  ;;  %v6397_v30 = vadd.f32 %v3664_v58, %v3632_v56  ;;  %v7739_v57 = vld [vmem:[#allocation47_spill] sm:$0xff]  ;;  %v7747_v8 = vld [vmem:[#allocation16_spill] sm:$0xff] }
 0x260   :  { %4579 = vmatmul.mubr.msk.f32.gmra.mxu1 %vm45_vm1, %v2420_v3  ;;  %v1768_v28 = vpop.permute.xlu1 %1767  ;;  %v6410_v17 = vadd.f32 %v7738_v59, %v1527_v31  ;;  %v2104_v58 = vmul.f32 %v7739_v57, %v1688_v60  ;;  %v1529_v56 = vmul.f32 %v1497_v23, %v7740_v24  ;;  %v3684_v34 = vadd.f32 %v3652_v36, %v3620_v46  ;;  %v4900_v3 = vld [vmem:[#allocation2 + $0x60] sm:$0xff] }
 0x261   :  { %v2357_v21 = vsub.f32 %v2101_v51, %v2325_v42  ;;  %v1848_v5 = vmul.f32 %v1768_v28, %v7736_v43  ;;  %v2390_v37 = vmul.f32 0.1, %v2358_v50  ;;  %v3654_v51 = vmul.f32 %v6236_v9, %v6236_v9  ;;  %v7742_v9 = vld [vmem:[#allocation45_spill] sm:$0xff]  ;;  %v7744_v60 = vld [vmem:[#allocation95_spill] sm:$0xff] }
 0x262   :  { %v1766_v40 = vpop.permute.xlu0 %1765  ;;  %3857 = vadd.xlane.f32.xlu1 %v3818_v1  ;;  %v3655_v50 = vmul.f32 %v6267_v26, %v6267_v26  ;;  %v2103_v35 = vmul.f32 %v7742_v9, %v6410_v17  ;;  %v3659_v9 = vmul.f32 %v6322_v41, %v6322_v41 }
 0x263   :  { %v2389_v27 = vmul.f32 0.1, %v2357_v21  ;;  %v1880_v18 = vadd.f32 %v1848_v5, %v6054_v12  ;;  %v1847_v11 = vmul.f32 %v1766_v40, %v1495_v45  ;;  %3859 = vadd.xlane.f32.xlu0 %v3819_v44  ;;  %v3715_v12 = vsel %vm45_vm1, %v6231_v39, 0.0  ;;  %v4901_v45 = vld [vmem:[#allocation2 + $0x68] sm:$0xff]  ;;  %v7745_v44 = vld [vmem:[#allocation103_spill] sm:$0xff]  ;;  %v7748_v40 = vld [vmem:[#allocation93_spill] sm:$0xff] }
 0x264   :  { %v2422_v31 = vadd.f32 %v4901_v45, %v2390_v37  ;;  %v1690_v36 = vadd.f32 %v7745_v44, %v7744_v60  ;;  %v7746_v21 = vld [vmem:[#allocation104_spill] sm:$0xff]  ;;  %v3686_v26 = vadd.f32 %v3654_v51, %v3622_v25  ;;  %v3687_v57 = vadd.f32 %v3655_v50, %v3623_v63  ;;  %v7751_v63 = vld [vmem:[#allocation50_spill] sm:$0xff] }
 0x265   :  { %v2328_v29 = vmul.f32 %v7741_v10, %v1880_v18  ;;  %v6419_v61 = vadd.f32 %v1847_v11, %v7738_v59  ;;  %v2421_v49 = vadd.f32 %v4900_v3, %v2389_v27  ;;  %v3666_v1 = vmul.f32 %v1880_v18, %v1880_v18  ;;  %v7749_v10 = vld [vmem:[#allocation51_spill] sm:$0xff]  ;;  %v7750_v3 = vld [vmem:[#allocation49_spill] sm:$0xff]  ;;  %v4903_v45 = vld [vmem:[#allocation2 + $0x78] sm:$0xff] }
 0x266   :  { %3861 = vadd.xlane.f32.xlu1 %v3820_v52  ;;  %v6433_v39 = vadd.f32 %v7746_v21, %v1529_v56  ;;  %v1499_v52 = vadd.f32 1.0, %v7747_v8  ;;  %v3718_v59 = vsel %vm45_vm1, %v3684_v34, 0.0  ;;  %v3721_v11 = vsel %vm45_vm1, %v6253_v53, 0.0 }
 0x267   :  { %v2360_v42 = vsub.f32 %v2104_v58, %v2328_v29  ;;  %v2327_v28 = vmul.f32 %v7743_v33, %v6419_v61  ;;  %4581 = vmatprep.mubr.msk.f32.mxu1 %vm45_vm1, %v2421_v49  ;;  %3716 = vadd.xlane.f32.xlu0 %v3715_v12  ;;  %v6436_v5 = vadd.f32 %v3666_v1, %v3634_v54  ;;  %v3724_v53 = vsel %vm45_vm1, %v3686_v26, 0.0  ;;  %v4902_v54 = vld [vmem:[#allocation2 + $0x70] sm:$0xff] }
 0x268   :  { %4582 = vmatmul.mubr.msk.f32.gmra.mxu1 %vm45_vm1, %v2422_v31  ;;  %v1772_v43 = vpop.permute.xlu1 %1771  ;;  %v3657_v58 = vmul.f32 %v6295_v47, %v6295_v47  ;;  %v3625_v25 = vmul.f32 %v6286_v16, %v6286_v16  ;;  %v2106_v34 = vmul.f32 %v7749_v10, %v1690_v36  ;;  %v3636_v29 = vmul.f32 %v1690_v36, %v1690_v36  ;;  %v7754_v36 = vld [vmem:[#allocation101_spill] sm:$0xff] }
 0x269   :  { %v2359_v37 = vsub.f32 %v2103_v35, %v2327_v28  ;;  %v1850_v46 = vmul.f32 %v1772_v43, %v7748_v40  ;;  %v2392_v27 = vmul.f32 0.1, %v2360_v42  ;;  %v2105_v49 = vmul.f32 %v7750_v3, %v6433_v39  ;;  %v7752_v35 = vld [vmem:[#allocation102_spill] sm:$0xff]  ;;  %v7753_v28 = vld [vmem:[#allocation48_spill] sm:$0xff] }
 0x26a   :  { %v1770_v18 = vpop.permute.xlu0 %1769  ;;  %3719 = vadd.xlane.f32.xlu1 %v3718_v59  ;;  %v3689_v50 = vadd.f32 %v3657_v58, %v3625_v25  ;;  %v1531_v42 = vmul.f32 %v1499_v52, %v7752_v35  ;;  %v7755_v43 = vld [vmem:[#allocation18_spill] sm:$0xff]  ;;  %v3629_v40 = vmul.f32 %v6339_v14, %v6339_v14  ;;  %v7756_v59 = vld [vmem:[#allocation99_spill] sm:$0xff]  ;;  %v3661_v25 = vmul.f32 %v6350_v7, %v6350_v7  ;;  %v7759_v3 = vld [vmem:[#allocation108_spill] sm:$0xff] }
 0x26b   :  { %v2391_v24 = vmul.f32 0.1, %v2359_v37  ;;  %v1882_v56 = vadd.f32 %v1850_v46, %v7745_v44  ;;  %v1849_v51 = vmul.f32 %v1770_v18, %v1497_v23  ;;  %3722 = vadd.xlane.f32.xlu0 %v3721_v11  ;;  %v3727_v23 = vsel %vm45_vm1, %v3687_v57, 0.0  ;;  %v7762_v35 = vld [vmem:[#allocation52_spill] sm:$0xff] }
 0x26c   :  { %v2424_v31 = vadd.f32 %v4903_v45, %v2392_v27  ;;  %v3627_v44 = vmul.f32 %v6313_v0, %v6313_v0  ;;  %v1501_v26 = vadd.f32 1.0, %v7755_v43  ;;  %v3730_v18 = vsel %vm45_vm1, %v6277_v20, 0.0 }
 0x26d   :  { %v2330_v1 = vmul.f32 %v7751_v63, %v1882_v56  ;;  %v6454_v47 = vadd.f32 %v1849_v51, %v7746_v21  ;;  %v2423_v16 = vadd.f32 %v4902_v54, %v2391_v24  ;;  %v3668_v12 = vmul.f32 %v1882_v56, %v1882_v56  ;;  %v7757_v24 = vld [vmem:[#allocation106_spill] sm:$0xff]  ;;  %v4904_v54 = vld [vmem:[#allocation2 + $0x80] sm:$0xff] }
 0x26e   :  { %3725 = vadd.xlane.f32.xlu1 %v3724_v53  ;;  %v1692_v21 = vadd.f32 %v6081_v13, %v7754_v36  ;;  %v3733_v57 = vsel %vm45_vm1, %v3689_v50, 0.0  ;;  %v3691_v58 = vadd.f32 %v3659_v9, %v3627_v44  ;;  %v6480_v56 = vadd.f32 %v7757_v24, %v1531_v42  ;;  %v7760_v63 = vld [vmem:[#allocation54_spill] sm:$0xff]  ;;  %v7761_v50 = vld [vmem:[#allocation53_spill] sm:$0xff] }
 0x26f   :  { %v2362_v33 = vsub.f32 %v2106_v34, %v2330_v1  ;;  %v2329_v60 = vmul.f32 %v7753_v28, %v6454_v47  ;;  %4584 = vmatprep.mubr.msk.f32.mxu1 %vm45_vm1, %v2423_v16  ;;  %3728 = vadd.xlane.f32.xlu0 %v3727_v23  ;;  %v6469_v37 = vadd.f32 %v3668_v12, %v3636_v29  ;;  %v7758_v34 = vld [vmem:[#allocation55_spill] sm:$0xff]  ;;  %v3736_v53 = vsel %vm45_vm1, %v6305_v55, 0.0 }
 0x270   :  { %4585 = vmatmul.mubr.msk.f32.gmra.mxu1 %vm45_vm1, %v2424_v31  ;;  %v1776_v41 = vpop.permute.xlu1 %1775  ;;  %v2108_v29 = vmul.f32 %v7758_v34, %v1692_v21  ;;  %v3638_v20 = vmul.f32 %v1692_v21, %v1692_v21  ;;  %v3693_v45 = vadd.f32 %v3661_v25, %v3629_v40  ;;  %v3663_v31 = vmul.f32 %v6380_v4, %v6380_v4  ;;  %v7763_v28 = vld [vmem:[#allocation107_spill] sm:$0xff] }
 0x271   :  { %v2361_v46 = vsub.f32 %v2105_v49, %v2329_v60  ;;  %v1852_v27 = vmul.f32 %v1776_v41, %v7756_v59  ;;  %v2394_v0 = vmul.f32 0.1, %v2362_v33  ;;  %v1533_v49 = vmul.f32 %v1501_v26, %v7759_v3  ;;  %v7764_v60 = vld [vmem:[#allocation109_spill] sm:$0xff]  ;;  %v7765_v41 = vld [vmem:[#allocation20_spill] sm:$0xff] }
 0x272   :  { %v1774_v11 = vpop.permute.xlu0 %1773  ;;  %3731 = vadd.xlane.f32.xlu1 %v3730_v18  ;;  %v2107_v55 = vmul.f32 %v7761_v50, %v6480_v56  ;;  %v3631_v33 = vmul.f32 %v6369_v62, %v6369_v62  ;;  %v1694_v44 = vadd.f32 %v7764_v60, %v7763_v28  ;;  %v1503_v40 = vadd.f32 1.0, %v7765_v41  ;;  %v7766_v59 = vld [vmem:[#allocation105_spill] sm:$0xff]  ;;  %v7772_v50 = vld [vmem:[#allocation112_spill] sm:$0xff] }
 0x273   :  { %v2393_v51 = vmul.f32 0.1, %v2361_v46  ;;  %v1884_v14 = vadd.f32 %v1852_v27, %v6081_v13  ;;  %v1851_v10 = vmul.f32 %v1774_v11, %v1499_v52  ;;  %3734 = vadd.xlane.f32.xlu0 %v3733_v57  ;;  %v3739_v13 = vsel %vm45_vm1, %v3691_v58, 0.0  ;;  %v4905_v52 = vld [vmem:[#allocation2 + $0x88] sm:$0xff] }
 0x274   :  { %v2426_v23 = vadd.f32 %v4905_v52, %v2394_v0  ;;  %v6504_v36 = vadd.f32 %v6106_v6, %v1533_v49  ;;  %v3742_v18 = vsel %vm45_vm1, %v6330_v38, 0.0  ;;  %v3745_v11 = vsel %vm45_vm1, %v3693_v45, 0.0  ;;  %v7769_v49 = vld [vmem:[#allocation58_spill] sm:$0xff] }
 0x275   :  { %v2332_v1 = vmul.f32 %v7760_v63, %v1884_v14  ;;  %v6489_v7 = vadd.f32 %v1851_v10, %v7757_v24  ;;  %v2425_v16 = vadd.f32 %v4904_v54, %v2393_v51  ;;  %v3670_v12 = vmul.f32 %v1884_v14, %v1884_v14  ;;  %v7767_v10 = vld [vmem:[#allocation59_spill] sm:$0xff]  ;;  %v4906_v63 = vld [vmem:[#allocation2 + $0x90] sm:$0xff]  ;;  %v4907_v54 = vld [vmem:[#allocation2 + $0x98] sm:$0xff] }
 0x276   :  { %3737 = vadd.xlane.f32.xlu1 %v3736_v53  ;;  %v3695_v57 = vadd.f32 %v3663_v31, %v3631_v33  ;;  %v3665_v58 = vmul.f32 %v6419_v61, %v6419_v61  ;;  %v3633_v25 = vmul.f32 %v6410_v17, %v6410_v17  ;;  %v2110_v34 = vmul.f32 %v7767_v10, %v1694_v44  ;;  %v7770_v52 = vld [vmem:[#allocation114_spill] sm:$0xff] }
 0x277   :  { %v2364_v9 = vsub.f32 %v2108_v29, %v2332_v1  ;;  %v2331_v42 = vmul.f32 %v7762_v35, %v6489_v7  ;;  %4587 = vmatprep.mubr.msk.f32.mxu1 %vm45_vm1, %v2425_v16  ;;  %3740 = vadd.xlane.f32.xlu0 %v3739_v13  ;;  %v6507_v21 = vadd.f32 %v3670_v12, %v3638_v20  ;;  %v7768_v29 = vld [vmem:[#allocation57_spill] sm:$0xff]  ;;  %v3748_v3 = vsel %vm45_vm1, %v6363_v15, 0.0  ;;  %v7771_v15 = vld [vmem:[#allocation56_spill] sm:$0xff]  ;;  %v7774_v35 = vld [vmem:[#allocation22_spill] sm:$0xff] }
 0x278   :  { %4588 = vmatmul.mubr.msk.f32.gmra.mxu1 %vm45_vm1, %v2426_v23  ;;  %v1780_v4 = vpop.permute.xlu1 %1779  ;;  %v3640_v38 = vmul.f32 %v1694_v44, %v1694_v44  ;;  %v2109_v20 = vmul.f32 %v7768_v29, %v6504_v36  ;;  %v3697_v12 = vadd.f32 %v3665_v58, %v3633_v25  ;;  %v3667_v13 = vmul.f32 %v6454_v47, %v6454_v47  ;;  %v7775_v44 = vld [vmem:[#allocation110_spill] sm:$0xff]  ;;  %v7777_v25 = vld [vmem:[#allocation63_spill] sm:$0xff] }
 0x279   :  { %v2363_v46 = vsub.f32 %v2107_v55, %v2331_v42  ;;  %v1854_v27 = vmul.f32 %v1780_v4, %v7766_v59  ;;  %v2396_v62 = vmul.f32 0.1, %v2364_v9  ;;  %v1535_v23 = vmul.f32 %v1503_v40, %v7770_v52  ;;  %v7773_v55 = vld [vmem:[#allocation111_spill] sm:$0xff] }
 0x27a   :  { %v1778_v0 = vpop.permute.xlu0 %1777  ;;  %3743 = vadd.xlane.f32.xlu1 %v3742_v18  ;;  %v1696_v9 = vadd.f32 %v7773_v55, %v7772_v50  ;;  %v1505_v42 = vadd.f32 1.0, %v7774_v35  ;;  %v3637_v28 = vmul.f32 %v6480_v56, %v6480_v56  ;;  %v3760_v10 = vsel %vm45_vm1, %v6436_v5, 0.0  ;;  %v7783_v52 = vld [vmem:[#allocation115_spill] sm:$0xff]  ;;  %v7785_v50 = vld [vmem:[#allocation117_spill] sm:$0xff] }
 0x27b   :  { %v2395_v24 = vmul.f32 0.1, %v2363_v46  ;;  %v1886_v51 = vadd.f32 %v1854_v27, %v7764_v60  ;;  %v1853_v14 = vmul.f32 %v1778_v0, %v1501_v26  ;;  %3746 = vadd.xlane.f32.xlu0 %v3745_v11  ;;  %v3751_v26 = vsel %vm45_vm1, %v3695_v57, 0.0  ;;  %v7776_v0 = vld [vmem:[#allocation113_spill] sm:$0xff] }
 0x27c   :  { %v2428_v16 = vadd.f32 %v4907_v54, %v2396_v62  ;;  %v3754_v46 = vsel %vm45_vm1, %v6397_v30, 0.0  ;;  %v3757_v27 = vsel %vm45_vm1, %v3697_v12, 0.0  ;;  %v3669_v62 = vmul.f32 %v6489_v7, %v6489_v7  ;;  %v7778_v30 = vld [vmem:[#allocation120_spill] sm:$0xff]  ;;  %v4908_v7 = vld [vmem:[#allocation2 + $0xa0] sm:$0xff] }
 0x27d   :  { %v2334_v53 = vmul.f32 %v7769_v49, %v1886_v51  ;;  %v1885_v61 = vadd.f32 %v1853_v14, %v6106_v6  ;;  %v2427_v17 = vadd.f32 %v4906_v63, %v2395_v24  ;;  %v3672_v1 = vmul.f32 %v1886_v51, %v1886_v51 }
 0x27e   :  { %3749 = vadd.xlane.f32.xlu1 %v3748_v3  ;;  %v3635_v6 = vmul.f32 %v6433_v39, %v6433_v39  ;;  %v1695_v11 = vadd.f32 %v7776_v0, %v1535_v23  ;;  %v2112_v24 = vmul.f32 %v7777_v25, %v1696_v9  ;;  %v3642_v51 = vmul.f32 %v1696_v9, %v1696_v9 }
 0x27f   :  { %v2366_v45 = vsub.f32 %v2110_v34, %v2334_v53  ;;  %v2333_v31 = vmul.f32 %v7771_v15, %v1885_v61  ;;  %4590 = vmatprep.mubr.msk.f32.mxu1 %vm45_vm1, %v2427_v17  ;;  %3752 = vadd.xlane.f32.xlu0 %v3751_v26  ;;  %v6538_v47 = vadd.f32 %v3672_v1, %v3640_v38  ;;  %v7779_v34 = vld [vmem:[#allocation62_spill] sm:$0xff]  ;;  %v7780_v1 = vld [vmem:[#allocation61_spill] sm:$0xff]  ;;  %v3766_v9 = vsel %vm45_vm1, %v6469_v37, 0.0  ;;  %v7787_v37 = vld [vmem:[#allocation68_spill] sm:$0xff] }
 0x280   :  { %4591 = vmatmul.mubr.msk.f32.gmra.mxu1 %vm45_vm1, %v2428_v16  ;;  %v1784_v33 = vpop.permute.xlu1 %1783  ;;  %v3699_v18 = vadd.f32 %v3667_v13, %v3635_v6  ;;  %v1537_v14 = vmul.f32 %v1505_v42, %v7778_v30  ;;  %v3701_v63 = vadd.f32 %v3669_v62, %v3637_v28  ;;  %v3671_v17 = vmul.f32 %v1885_v61, %v1885_v61  ;;  %v7781_v16 = vld [vmem:[#allocation60_spill] sm:$0xff]  ;;  %v7782_v13 = vld [vmem:[#allocation118_spill] sm:$0xff] }
 0x281   :  { %v2365_v60 = vsub.f32 %v2109_v20, %v2333_v31  ;;  %v1856_v4 = vmul.f32 %v1784_v33, %v7775_v44  ;;  %v2398_v39 = vmul.f32 0.1, %v2366_v45  ;;  %v2111_v26 = vmul.f32 %v7780_v1, %v1695_v11  ;;  %v7784_v31 = vld [vmem:[#allocation116_spill] sm:$0xff] }
 0x282   :  { %v1782_v59 = vpop.permute.xlu0 %1781  ;;  %3755 = vadd.xlane.f32.xlu1 %v3754_v46  ;;  %v3763_v49 = vsel %vm45_vm1, %v3699_v18, 0.0  ;;  %v3639_v5 = vmul.f32 %v6504_v36, %v6504_v36  ;;  %v1698_v23 = vadd.f32 %v7783_v52, %v7782_v13  ;;  %v1697_v61 = vadd.f32 %v7784_v31, %v1537_v14  ;;  %v4911_v14 = vld [vmem:[#allocation2 + $0xb8] sm:$0xff] }
 0x283   :  { %v2397_v57 = vmul.f32 0.1, %v2365_v60  ;;  %v1888_v56 = vadd.f32 %v1856_v4, %v7773_v55  ;;  %v1855_v58 = vmul.f32 %v1782_v59, %v1503_v40  ;;  %3758 = vadd.xlane.f32.xlu0 %v3757_v27  ;;  %v4909_v40 = vld [vmem:[#allocation2 + $0xa8] sm:$0xff]  ;;  %v3769_v36 = vsel %vm45_vm1, %v3701_v63, 0.0  ;;  %v7786_v27 = vld [vmem:[#allocation69_spill] sm:$0xff]  ;;  %v7791_v63 = vld [vmem:[#allocation122_spill] sm:$0xff] }
 0x284   :  { %v2430_v53 = vadd.f32 %v4909_v40, %v2398_v39  ;;  %v3703_v60 = vadd.f32 %v3671_v17, %v3639_v5  ;;  %v3641_v59 = vmul.f32 %v1695_v11, %v1695_v11  ;;  %v2114_v18 = vmul.f32 %v7786_v27, %v1698_v23 }
 0x285   :  { %v2336_v38 = vmul.f32 %v7779_v34, %v1888_v56  ;;  %v1887_v29 = vadd.f32 %v1855_v58, %v7776_v0  ;;  %v2429_v20 = vadd.f32 %v4908_v7, %v2397_v57  ;;  %v3674_v3 = vmul.f32 %v1888_v56, %v1888_v56  ;;  %v4910_v58 = vld [vmem:[#allocation2 + $0xb0] sm:$0xff] }
 0x286   :  { %3761 = vadd.xlane.f32.xlu1 %v3760_v10  ;;  %v3644_v62 = vmul.f32 %v1698_v23, %v1698_v23  ;;  %v3772_v0 = vsel %vm45_vm1, %v6507_v21, 0.0  ;;  %v3643_v7 = vmul.f32 %v1697_v61, %v1697_v61  ;;  %v3778_v1 = vsel %vm45_vm1, %v6538_v47, 0.0 }
 0x287   :  { %v2368_v54 = vsub.f32 %v2112_v24, %v2336_v38  ;;  %v2335_v12 = vmul.f32 %v7781_v16, %v1887_v29  ;;  %4593 = vmatprep.mubr.msk.f32.mxu1 %vm45_vm1, %v2429_v20  ;;  %3764 = vadd.xlane.f32.xlu0 %v3763_v49  ;;  %v3706_v15 = vadd.f32 %v3674_v3, %v3642_v51  ;;  %v7788_v51 = vld [vmem:[#allocation67_spill] sm:$0xff]  ;;  %v7789_v38 = vld [vmem:[#allocation66_spill] sm:$0xff] }
 0x288   :  { %4594 = vmatmul.mubr.msk.f32.gmra.mxu1 %vm45_vm1, %v2430_v53  ;;  %v1788_v45 = vpop.permute.xlu1 %1787  ;;  %v3673_v44 = vmul.f32 %v1887_v29, %v1887_v29  ;;  %v2113_v30 = vmul.f32 %v7788_v51, %v1697_v61  ;;  %v7790_v20 = vld [vmem:[#allocation119_spill] sm:$0xff]  ;;  %v7795_v61 = vld [vmem:[#allocation73_spill] sm:$0xff]  ;;  %v7801_v51 = vld [vmem:[#allocation128_spill] sm:$0xff] }
 0x289   :  { %v2367_v6 = vsub.f32 %v2111_v26, %v2335_v12  ;;  %v1858_v55 = vmul.f32 %v1788_v45, %v7785_v50  ;;  %v2400_v33 = vmul.f32 0.1, %v2368_v54  ;;  %v1700_v3 = vadd.f32 %v7790_v20, %v6164_v48  ;;  %v7792_v26 = vld [vmem:[#allocation126_spill] sm:$0xff]  ;;  %v7793_v54 = vld [vmem:[#allocation121_spill] sm:$0xff]  ;;  %v7794_v45 = vld [vmem:[#allocation124_spill] sm:$0xff] }
 0x28a   :  { %v1786_v28 = vpop.permute.xlu0 %1785  ;;  %3767 = vadd.xlane.f32.xlu1 %v3766_v9  ;;  %v3705_v10 = vadd.f32 %v3673_v44, %v3641_v59  ;;  %v1699_v16 = vadd.f32 %v7793_v54, %v7792_v26  ;;  %v3784_v50 = vsel %vm45_vm1, %v3706_v15, 0.0  ;;  %v7797_v44 = vld [vmem:[#allocation71_spill] sm:$0xff] }
 0x28b   :  { %v2399_v4 = vmul.f32 0.1, %v2367_v6  ;;  %v1890_v46 = vadd.f32 %v1858_v55, %v7783_v52  ;;  %v1857_v39 = vmul.f32 %v1786_v28, %v1505_v42  ;;  %3770 = vadd.xlane.f32.xlu0 %v3769_v36  ;;  %v3775_v42 = vsel %vm45_vm1, %v3703_v60, 0.0  ;;  %v7796_v55 = vld [vmem:[#allocation72_spill] sm:$0xff]  ;;  %v4912_v28 = vld [vmem:[#allocation2 + $0xc0] sm:$0xff] }
 0x28c   :  { %v2432_v11 = vadd.f32 %v4911_v14, %v2400_v33  ;;  %v3781_v13 = vsel %vm45_vm1, %v3705_v10, 0.0  ;;  %v2116_v6 = vmul.f32 %v7795_v61, %v1700_v3  ;;  %v3646_v47 = vmul.f32 %v1700_v3, %v1700_v3  ;;  %v7803_v10 = vld [vmem:[#allocation125_spill] sm:$0xff]  ;;  %v4915_v61 = vld [vmem:[#allocation2 + $0xd8] sm:$0xff] }
 0x28d   :  { %v2338_v57 = vmul.f32 %v7787_v37, %v1890_v46  ;;  %v1889_v56 = vadd.f32 %v1857_v39, %v7784_v31  ;;  %v2431_v25 = vadd.f32 %v4910_v58, %v2399_v4  ;;  %v3676_v24 = vmul.f32 %v1890_v46, %v1890_v46  ;;  %v4913_v39 = vld [vmem:[#allocation2 + $0xc8] sm:$0xff]  ;;  %v7799_v37 = vld [vmem:[#allocation130_spill] sm:$0xff] }
 0x28e   :  { %3773 = vadd.xlane.f32.xlu1 %v3772_v0  ;;  %v2115_v4 = vmul.f32 %v7797_v44, %v1699_v16  ;;  %v3645_v27 = vmul.f32 %v1699_v16, %v1699_v16  ;;  %v7812_v44 = vld [vmem:[#allocation127_spill] sm:$0xff] }
 0x28f   :  { %v2370_v34 = vsub.f32 %v2114_v18, %v2338_v57  ;;  %v2337_v29 = vmul.f32 %v7789_v38, %v1889_v56  ;;  %4596 = vmatprep.mubr.msk.f32.mxu1 %vm45_vm1, %v2431_v25  ;;  %3776 = vadd.xlane.f32.xlu0 %v3775_v42  ;;  %v3675_v21 = vmul.f32 %v1889_v56, %v1889_v56  ;;  %v7800_v57 = vld [vmem:[#allocation123_spill] sm:$0xff] }
 0x290   :  { %4597 = vmatmul.mubr.msk.f32.gmra.mxu1 %vm45_vm1, %v2432_v11  ;;  %v1792_v49 = vpop.permute.xlu1 %1791  ;;  %v3708_v40 = vadd.f32 %v3676_v24, %v3644_v62  ;;  %v7798_v62 = vld [vmem:[#allocation70_spill] sm:$0xff]  ;;  %v1702_v56 = vadd.f32 %v7800_v57, %v7799_v37  ;;  %v7802_v11 = vld [vmem:[#allocation132_spill] sm:$0xff] }
 0x291   :  { %v2369_v53 = vsub.f32 %v2113_v30, %v2337_v29  ;;  %v1860_v17 = vmul.f32 %v1792_v49, %v7791_v63  ;;  %v2402_v12 = vmul.f32 0.1, %v2370_v34  ;;  %v3707_v52 = vadd.f32 %v3675_v21, %v3643_v7 }
 0x292   :  { %v1790_v5 = vpop.permute.xlu0 %1789  ;;  %3779 = vadd.xlane.f32.xlu1 %v3778_v1  ;;  %v3790_v42 = vsel %vm45_vm1, %v3708_v40, 0.0  ;;  %v1701_v34 = vadd.f32 %v7803_v10, %v7802_v11  ;;  %v3648_v26 = vmul.f32 %v1702_v56, %v1702_v56  ;;  %v7815_v11 = vld [vmem:[#allocation81_spill] sm:$0xff] }
 0x293   :  { %v2401_v48 = vmul.f32 0.1, %v2369_v53  ;;  %v1892_v23 = vadd.f32 %v1860_v17, %v7790_v20  ;;  %v1859_v31 = vmul.f32 %v1790_v5, %v7794_v45  ;;  %3782 = vadd.xlane.f32.xlu0 %v3781_v13  ;;  %v3787_v46 = vsel %vm45_vm1, %v3707_v52, 0.0  ;;  %v7804_v20 = vld [vmem:[#allocation131_spill] sm:$0xff]  ;;  %v7805_v53 = vld [vmem:[#allocation77_spill] sm:$0xff] }
 0x294   :  { %v2434_v59 = vadd.f32 %v4913_v39, %v2402_v12  ;;  %v2118_v63 = vmul.f32 %v7805_v53, %v1702_v56  ;;  %v7806_v17 = vld [vmem:[#allocation29_spill] sm:$0xff]  ;;  %v7809_v45 = vld [vmem:[#allocation135_spill] sm:$0xff] }
 0x295   :  { %v2340_v9 = vmul.f32 %v7796_v55, %v1892_v23  ;;  %v1891_v33 = vadd.f32 %v1859_v31, %v7793_v54  ;;  %v2433_v36 = vadd.f32 %v4912_v28, %v2401_v48  ;;  %v3678_v60 = vmul.f32 %v1892_v23, %v1892_v23  ;;  %v7807_v54 = vld [vmem:[#allocation76_spill] sm:$0xff]  ;;  %v4914_v5 = vld [vmem:[#allocation2 + $0xd0] sm:$0xff]  ;;  %v7808_v48 = vld [vmem:[#allocation75_spill] sm:$0xff] }
 0x296   :  { %3785 = vadd.xlane.f32.xlu1 %v3784_v50  ;;  %v1511_v1 = vadd.f32 1.0, %v7806_v17  ;;  %v2117_v23 = vmul.f32 %v7808_v48, %v1701_v34  ;;  %v7813_v39 = vld [vmem:[#allocation133_spill] sm:$0xff] }
 0x297   :  { %v2372_v18 = vsub.f32 %v2116_v6, %v2340_v9  ;;  %v2339_v0 = vmul.f32 %v7798_v62, %v1891_v33  ;;  %4599 = vmatprep.mubr.msk.f32.mxu1 %vm45_vm1, %v2433_v36  ;;  %3788 = vadd.xlane.f32.xlu0 %v3787_v46  ;;  %v3677_v15 = vmul.f32 %v1891_v33, %v1891_v33 }
 0x298   :  { %4600 = vmatmul.mubr.msk.f32.gmra.mxu1 %vm45_vm1, %v2434_v59  ;;  %v1796_v58 = vpop.permute.xlu1 %1795  ;;  %v3710_v25 = vadd.f32 %v3678_v60, %v3646_v47  ;;  %v1543_v31 = vmul.f32 %v1511_v1, %v7809_v45  ;;  %v7810_v47 = vld [vmem:[#allocation74_spill] sm:$0xff]  ;;  %v3647_v36 = vmul.f32 %v1701_v34, %v1701_v34  ;;  %v4917_v34 = vld [vmem:[#allocation2 + $0xe8] sm:$0xff] }
 0x299   :  { %v2371_v24 = vsub.f32 %v2115_v4, %v2339_v0  ;;  %v1862_v30 = vmul.f32 %v1796_v58, %v7801_v51  ;;  %v3709_v14 = vadd.f32 %v3677_v15, %v3645_v27  ;;  %v2404_v38 = vmul.f32 0.1, %v2372_v18  ;;  %v7811_v60 = vld [vmem:[#allocation134_spill] sm:$0xff]  ;;  %v7814_v18 = vld [vmem:[#allocation129_spill] sm:$0xff]  ;;  %v4916_v51 = vld [vmem:[#allocation2 + $0xe0] sm:$0xff] }
 0x29a   :  { %v1794_v29 = vpop.permute.xlu0 %1793  ;;  %3791 = vadd.xlane.f32.xlu1 %v3790_v42  ;;  %v3796_v40 = vsel %vm45_vm1, %v3710_v25, 0.0  ;;  %v1704_v4 = vadd.f32 %v7812_v44, %v7811_v60  ;;  %v1703_v62 = vadd.f32 %v7814_v18, %v1543_v31  ;;  %v2467_v31 = vld [vmem:[%s7455_s2 + $0xd0] sm:$0xff] }
 0x29b   :  { %v2403_v21 = vmul.f32 0.1, %v2371_v24  ;;  %v1894_v7 = vadd.f32 %v1862_v30, %v7800_v57  ;;  %v1861_v3 = vmul.f32 %v1794_v29, %v7804_v20  ;;  %v3793_v49 = vsel %vm45_vm1, %v3709_v14, 0.0  ;;  %v7816_v29 = vld [vmem:[#allocation80_spill] sm:$0xff] }
 0x29c   :  { %3794 = vadd.xlane.f32.xlu0 %v3793_v49  ;;  %v2436_v6 = vadd.f32 %v4915_v61, %v2404_v38  ;;  %v3650_v42 = vmul.f32 %v1704_v4, %v1704_v4  ;;  %v3649_v20 = vmul.f32 %v1703_v62, %v1703_v62  ;;  %v2468_v61 = vld [vmem:[%s7455_s2 + $0xd8] sm:$0xff] }
 0x29d   :  { %v2342_v16 = vmul.f32 %v7807_v54, %v1894_v7  ;;  %v1893_v12 = vadd.f32 %v1861_v3, %v7803_v10  ;;  %v2435_v13 = vadd.f32 %v4914_v5, %v2403_v21  ;;  %v3680_v52 = vmul.f32 %v1894_v7, %v1894_v7  ;;  %v4918_v54 = vld [vmem:[#allocation2 + $0xf0] sm:$0xff] }
 0x29e   :  { %3797 = vadd.xlane.f32.xlu1 %v3796_v40  ;;  %v2119_v10 = vmul.f32 %v7815_v11, %v1703_v62 }
 0x29f   :  { %v2374_v50 = vsub.f32 %v2118_v63, %v2342_v16  ;;  %v2341_v55 = vmul.f32 %v7810_v47, %v1893_v12  ;;  %4602 = vmatprep.mubr.msk.f32.mxu1 %vm45_vm1, %v2435_v13  ;;  %v3712_v9 = vadd.f32 %v3680_v52, %v3648_v26  ;;  %v3679_v33 = vmul.f32 %v1893_v12, %v1893_v12  ;;  %v2471_v47 = vld [vmem:[%s7455_s2 + $0xf0] sm:$0xff] }
 0x2a0   :  { %4603 = vmatmul.mubr.msk.f32.gmra.mxu1 %vm45_vm1, %v2436_v6  ;;  %v1800_v28 = vpop.permute.xlu1 %1799  ;;  %v2469_v6 = vld [vmem:[%s7455_s2 + $0xe0] sm:$0xff] }
 0x2a1   :  { %v2373_v46 = vsub.f32 %v2117_v23, %v2341_v55  ;;  %v1864_v59 = vmul.f32 %v1800_v28, %v7813_v39  ;;  %v3802_v27 = vsel %vm45_vm1, %v3712_v9, 0.0  ;;  %v2406_v0 = vmul.f32 0.1, %v2374_v50  ;;  %v4919_v23 = vld [vmem:[#allocation2 + $0xf8] sm:$0xff]  ;;  %v2470_v50 = vld [vmem:[%s7455_s2 + $0xe8] sm:$0xff] }
 0x2a2   :  { %3803 = vadd.xlane.f32.xlu1 %v3802_v27  ;;  %v1798_v15 = vpop.permute.xlu0 %1797  ;;  %v3711_v37 = vadd.f32 %v3679_v33, %v3647_v36  ;;  %v2472_v55 = vld [vmem:[%s7455_s2 + $0xf8] sm:$0xff] }
 0x2a3   :  { %v2405_v57 = vmul.f32 0.1, %v2373_v46  ;;  %v1896_v56 = vadd.f32 %v1864_v59, %v7812_v44  ;;  %v1863_v58 = vmul.f32 %v1798_v15, %v1511_v1  ;;  %v2438_v38 = vadd.f32 %v4917_v34, %v2406_v0  ;;  %v4629_v0 = vpop.f32.mrf.mxu0 }
 0x2a4   :  { %v3799_v25 = vsel %vm45_vm1, %v3711_v37, 0.0 }
 0x2a5   :  { %v1895_v24 = vadd.f32 %v1863_v58, %v7814_v18  ;;  %3800 = vadd.xlane.f32.xlu0 %v3799_v25  ;;  %v2437_v30 = vadd.f32 %v4916_v51, %v2405_v57  ;;  %v3682_v14 = vmul.f32 %v1896_v56, %v1896_v56  ;;  %v2972_v58 = vpop.f32.mrf.mxu0 }
 0x2a7   :  { %v2343_v21 = vmul.f32 %v7816_v29, %v1895_v24  ;;  %4605 = vmatprep.mubr.msk.f32.mxu1 %vm45_vm1, %v2437_v30  ;;  %v3714_v7 = vadd.f32 %v3682_v14, %v3650_v42  ;;  %v3681_v3 = vmul.f32 %v1895_v24, %v1895_v24  ;;  %v6678_v30 = vld [vmem:[%s7457_s10] ss:$0 sm:$0xff]  ;;  %v4632_v29 = vpop.f32.mrf.mxu0 }
 0x2a8   :  { %4606 = vmatmul.mubr.msk.f32.gmra.mxu1 %vm45_vm1, %v2438_v38 }
 0x2a9   :  { %v2375_v49 = vsub.f32 %v2119_v10, %v2343_v21  ;;  %v3808_v53 = vsel %vm45_vm1, %v3714_v7, 0.0  ;;  %v3713_v63 = vadd.f32 %v3681_v3, %v3649_v20 }
 0x2aa   :  { %3809 = vadd.xlane.f32.xlu1 %v3808_v53 }
 0x2ab   :  { %v2407_v1 = vmul.f32 0.1, %v2375_v49  ;;  %v3805_v40 = vsel %vm45_vm1, %v3713_v63, 0.0 }
 0x2ac   :  { %3806 = vadd.xlane.f32.xlu0 %v3805_v40 }
 0x2ad   :  { %v2087_v26 = vpop.permute.xlu1 %2086  ;;  %v2439_v16 = vadd.f32 %v4918_v54, %v2407_v1  ;;  %v2982_v1 = vpop.f32.mrf.mxu0 }
 0x2ae   :  { %v2120_v5 = vmul.f32 %v2087_v26, %v1704_v4 }
 0x2af   :  { %v2311_v12 = vpop.permute.xlu0 %2310  ;;  %4608 = vmatprep.mubr.msk.f32.mxu1 %vm45_vm1, %v2439_v16 }
 0x2b0   :  { %v2344_v13 = vmul.f32 %v2311_v12, %v1896_v56 }
 0x2b2   :  { %v2376_v52 = vsub.f32 %v2120_v5, %v2344_v13 }
 0x2b4   :  { %v2408_v48 = vmul.f32 0.1, %v2376_v52 }
 0x2b6   :  { %v2440_v45 = vadd.f32 %v4919_v23, %v2408_v48 }
 0x2b8   :  { %4609 = vmatmul.mubr.msk.f32.gmra.mxu1 %vm45_vm1, %v2440_v45  ;;  %v4635_v45 = vpop.f32.mrf.mxu0 }
 0x2b9   :  { %4666 = vmatprep.mubr.msk.f32.mxu1 %vm45_vm1, %v2467_v31 }
 0x2bc   :  { %4667 = vmatmul.mubr.msk.f32.vlgmr.msra.gmra.mxu1 %vm45_vm1, %v2468_v61 }
 0x2bd   :  { %4669 = vmatprep.mubr.msk.f32.mxu1 %vm45_vm1, %v2469_v6 }
 0x2c0   :  { %4670 = vmatmul.mubr.msk.f32.gmra.mxu1 %vm45_vm1, %v2470_v50 }
 0x2c1   :  { %4672 = vmatprep.mubr.msk.f32.mxu1 %vm45_vm1, %v2471_v47  ;;  %v2992_v47 = vpop.f32.mrf.mxu0 }
 0x2c4   :  { %4673 = vmatmul.mubr.msk.f32.gmra.mxu1 %vm45_vm1, %v2472_v55  ;;  %vm3170_vm1 = vcmask 39936  }
 0x2dc   :  { %v3844_v9 = vpop.xlane.xlu0 %3843 }
 0x2df   :  { %v3846_v33 = vpop.xlane.xlu1 %3845 }
 0x2e0   :  { %v3848_v28 = vpop.xlane.xlu0 %3847 }
 0x2e3   :  { %v3850_v36 = vpop.xlane.xlu1 %3849 }
 0x2e4   :  { %v3852_v60 = vpop.xlane.xlu0 %3851 }
 0x2e7   :  { %v3854_v44 = vpop.xlane.xlu1 %3853 }
 0x2e8   :  { %v3856_v4 = vpop.xlane.xlu0 %3855 }
 0x2eb   :  { %v3858_v46 = vpop.xlane.xlu1 %3857 }
 0x2ec   :  { %v3860_v39 = vpop.xlane.xlu0 %3859 }
 0x2ef   :  { %v3862_v59 = vpop.xlane.xlu1 %3861 }
 0x2f0   :  { %v3717_v27 = vpop.xlane.xlu0 %3716 }
 0x2f1   :  { %v3908_v18 = vsel %vm3907_vm4, %v3717_v27, %v3844_v9 }
 0x2f2   :  { %3941 = vst.msk [vmem:[%s7456_s12] sm:$0xff] %vm3940_vm5, %v3908_v18 }
 0x2f3   :  { %v3720_v62 = vpop.xlane.xlu1 %3719 }
 0x2f4   :  { %v3909_v15 = vsel %vm3907_vm4, %v3720_v62, %v3846_v33  ;;  %v3723_v37 = vpop.xlane.xlu0 %3722 }
 0x2f5   :  { %3942 = vst.msk [vmem:[%s7456_s12 + $0x8] sm:$0xff] %vm3940_vm5, %v3909_v15  ;;  %v3910_v57 = vsel %vm3907_vm4, %v3723_v37, %v3848_v28 }
 0x2f6   :  { %3943 = vst.msk [vmem:[%s7456_s12 + $0x10] sm:$0xff] %vm3940_vm5, %v3910_v57 }
 0x2f7   :  { %v3726_v56 = vpop.xlane.xlu1 %3725 }
 0x2f8   :  { %v3911_v25 = vsel %vm3907_vm4, %v3726_v56, %v3850_v36  ;;  %v3729_v24 = vpop.xlane.xlu0 %3728  ;;  %v4565_v51 = vpop.f32.mrf.mxu1 }
 0x2f9   :  { %3944 = vst.msk [vmem:[%s7456_s12 + $0x18] sm:$0xff] %vm3940_vm5, %v3911_v25  ;;  %v3912_v42 = vsel %vm3907_vm4, %v3729_v24, %v3852_v60  ;;  %v2978_v14 = vadd.f32 %v4629_v0, %v4565_v51  ;;  %v4638_v36 = vpop.f32.mrf.mxu0 }
 0x2fa   :  { %3945 = vst.msk [vmem:[%s7456_s12 + $0x20] sm:$0xff] %vm3940_vm5, %v3912_v42  ;;  %v2651_v11 = vpop.f32.mrf.mxu1 }
 0x2fb   :  { %v6690_v10 = vadd.f32 %v6678_v30, %v2978_v14  ;;  %v2973_v34 = vadd.f32 %v2972_v58, %v2651_v11  ;;  %v3732_v38 = vpop.xlane.xlu1 %3731 }
 0x2fc   :  { %v3913_v21 = vsel %vm3907_vm4, %v3732_v38, %v3854_v44  ;;  %v3735_v7 = vpop.xlane.xlu0 %3734 }
 0x2fd   :  { %v6694_v20 = vadd.f32 %v6678_v30, %v2973_v34  ;;  %3946 = vst.msk [vmem:[%s7456_s12 + $0x28] sm:$0xff] %vm3940_vm5, %v3913_v21  ;;  %v3914_v3 = vsel %vm3907_vm4, %v3735_v7, %v3856_v4  ;;  %v3174_v49 = vsel %vm3170_vm1, %v6690_v10, -inf }
 0x2fe   :  { %3947 = vst.msk [vmem:[%s7456_s12 + $0x30] sm:$0xff] %vm3940_vm5, %v3914_v3  ;;  %3175 = vmax.xlane.f32.xlu0 %v3174_v49 }
 0x2ff   :  { %7817 = vst [vmem:[#allocation64_spill] sm:$0xff] %v6694_v20  ;;  %v3738_v53 = vpop.xlane.xlu1 %3737  ;;  %v3171_v63 = vsel %vm3170_vm1, %v6694_v20, -inf }
 0x300   :  { %v3915_v40 = vsel %vm3907_vm4, %v3738_v53, %v3858_v46  ;;  %v3741_v26 = vpop.xlane.xlu0 %3740  ;;  %3172 = vmax.xlane.f32.xlu1 %v3171_v63  ;;  %v4568_v54 = vpop.f32.mrf.mxu1 }
 0x301   :  { %3948 = vst.msk [vmem:[%s7456_s12 + $0x38] sm:$0xff] %vm3940_vm5, %v3915_v40  ;;  %v3916_v16 = vsel %vm3907_vm4, %v3741_v26, %v3860_v39  ;;  %v2988_v12 = vadd.f32 %v4632_v29, %v4568_v54  ;;  %v3002_v39 = vpop.f32.mrf.mxu0 }
 0x302   :  { %3949 = vst.msk [vmem:[%s7456_s12 + $0x40] sm:$0xff] %vm3940_vm5, %v3916_v16  ;;  %v2661_v5 = vpop.f32.mrf.mxu1 }
 0x303   :  { %v6720_v13 = vadd.f32 %v6678_v30, %v2988_v12  ;;  %v2983_v52 = vadd.f32 %v2982_v1, %v2661_v5  ;;  %v3744_v48 = vpop.xlane.xlu1 %3743  ;;  %v4641_v0 = vpop.f32.mrf.mxu0 }
 0x304   :  { %v3917_v23 = vsel %vm3907_vm4, %v3744_v48, %v3862_v59 }
 0x305   :  { %7818 = vst [vmem:[#allocation31_spill] sm:$0xff] %v6720_v13  ;;  %v6724_v31 = vadd.f32 %v6678_v30, %v2983_v52  ;;  %3950 = vst.msk [vmem:[%s7456_s12 + $0x48] sm:$0xff] %vm3940_vm5, %v3917_v23  ;;  %v3180_v61 = vsel %vm3170_vm1, %v6720_v13, -inf  ;;  %v3012_v58 = vpop.f32.mrf.mxu0 }
 0x306   :  { %3181 = vmax.xlane.f32.xlu1 %v3180_v61 }
 0x307   :  { %7819 = vst [vmem:[#allocation30_spill] sm:$0xff] %v6724_v31  ;;  %v3177_v6 = vsel %vm3170_vm1, %v6724_v31, -inf  ;;  %v4644_v14 = vpop.f32.mrf.mxu0 }
 0x308   :  { %v4571_v50 = vpop.f32.mrf.mxu1  ;;  %3178 = vmax.xlane.f32.xlu0 %v3177_v6 }
 0x309   :  { %v2998_v55 = vadd.f32 %v4635_v45, %v4571_v50  ;;  %v3022_v21 = vpop.f32.mrf.mxu0 }
 0x30a   :  { %v2671_v9 = vpop.f32.mrf.mxu1 }
 0x30b   :  { %v6735_v33 = vadd.f32 %v6678_v30, %v2998_v55  ;;  %v2993_v28 = vadd.f32 %v2992_v47, %v2671_v9  ;;  %v4647_v63 = vpop.f32.mrf.mxu0 }
 0x30d   :  { %v6738_v60 = vadd.f32 %v6678_v30, %v2993_v28  ;;  %v3186_v44 = vsel %vm3170_vm1, %v6735_v33, -inf  ;;  %v3032_v16 = vpop.f32.mrf.mxu0 }
 0x30e   :  { %3187 = vmax.xlane.f32.xlu1 %v3186_v44 }
 0x30f   :  { %v3183_v4 = vsel %vm3170_vm1, %v6738_v60, -inf  ;;  %v4650_v23 = vpop.f32.mrf.mxu0 }
 0x310   :  { %v4574_v46 = vpop.f32.mrf.mxu1  ;;  %3184 = vmax.xlane.f32.xlu0 %v3183_v4 }
 0x311   :  { %v3008_v59 = vadd.f32 %v4638_v36, %v4574_v46  ;;  %v3042_v47 = vpop.f32.mrf.mxu0 }
 0x312   :  { %v2681_v27 = vpop.f32.mrf.mxu1 }
 0x313   :  { %v6745_v18 = vadd.f32 %v6678_v30, %v3008_v59  ;;  %v3003_v62 = vadd.f32 %v3002_v39, %v2681_v27  ;;  %v4653_v44 = vpop.f32.mrf.mxu0 }
 0x315   :  { %v6748_v15 = vadd.f32 %v6678_v30, %v3003_v62  ;;  %v3192_v37 = vsel %vm3170_vm1, %v6745_v18, -inf  ;;  %v3052_v27 = vpop.f32.mrf.mxu0 }
 0x316   :  { %3193 = vmax.xlane.f32.xlu1 %v3192_v37 }
 0x317   :  { %v3189_v57 = vsel %vm3170_vm1, %v6748_v15, -inf }
 0x318   :  { %v4577_v56 = vpop.f32.mrf.mxu1  ;;  %3190 = vmax.xlane.f32.xlu0 %v3189_v57 }
 0x319   :  { %v3018_v25 = vadd.f32 %v4641_v0, %v4577_v56  ;;  %v4656_v56 = vpop.f32.mrf.mxu0 }
 0x31a   :  { %v2691_v24 = vpop.f32.mrf.mxu1 }
 0x31b   :  { %v6755_v51 = vadd.f32 %v6678_v30, %v3018_v25  ;;  %v3013_v42 = vadd.f32 %v3012_v58, %v2691_v24 }
 0x31d   :  { %v6758_v11 = vadd.f32 %v6678_v30, %v3013_v42  ;;  %v3198_v34 = vsel %vm3170_vm1, %v6755_v51, -inf }
 0x31e   :  { %3199 = vmax.xlane.f32.xlu1 %v3198_v34 }
 0x31f   :  { %7820 = vst [vmem:[#allocation79_spill] sm:$0xff] %v6758_v11  ;;  %v3195_v38 = vsel %vm3170_vm1, %v6758_v11, -inf }
 0x320   :  { %v4580_v29 = vpop.f32.mrf.mxu1  ;;  %3196 = vmax.xlane.f32.xlu0 %v3195_v38 }
 0x321   :  { %v3028_v7 = vadd.f32 %v4644_v14, %v4580_v29  ;;  %v3062_v14 = vpop.f32.mrf.mxu0 }
 0x322   :  { %v2701_v3 = vpop.f32.mrf.mxu1 }
 0x323   :  { %v6765_v49 = vadd.f32 %v6678_v30, %v3028_v7  ;;  %v3023_v53 = vadd.f32 %v3022_v21, %v2701_v3  ;;  %v4659_v7 = vpop.f32.mrf.mxu0 }
 0x325   :  { %7821 = vst [vmem:[#allocation91_spill] sm:$0xff] %v6765_v49  ;;  %v6768_v1 = vadd.f32 %v6678_v30, %v3023_v53  ;;  %v3204_v40 = vsel %vm3170_vm1, %v6765_v49, -inf }
 0x326   :  { %3205 = vmax.xlane.f32.xlu1 %v3204_v40 }
 0x327   :  { %v3201_v26 = vsel %vm3170_vm1, %v6768_v1, -inf }
 0x328   :  { %v4583_v54 = vpop.f32.mrf.mxu1  ;;  %3202 = vmax.xlane.f32.xlu0 %v3201_v26  ;;  %v3072_v26 = vpop.f32.mrf.mxu0 }
 0x329   :  { %v3038_v12 = vadd.f32 %v4647_v63, %v4583_v54 }
 0x32a   :  { %v2711_v5 = vpop.f32.mrf.mxu1 }
 0x32b   :  { %v6775_v52 = vadd.f32 %v6678_v30, %v3038_v12  ;;  %v3033_v48 = vadd.f32 %v3032_v16, %v2711_v5 }
 0x32d   :  { %7822 = vst [vmem:[#allocation78_spill] sm:$0xff] %v6775_v52  ;;  %v6778_v45 = vadd.f32 %v6678_v30, %v3033_v48  ;;  %v3210_v61 = vsel %vm3170_vm1, %v6775_v52, -inf  ;;  %v4662_v48 = vpop.f32.mrf.mxu0 }
 0x32e   :  { %3211 = vmax.xlane.f32.xlu1 %v3210_v61 }
 0x32f   :  { %v3207_v6 = vsel %vm3170_vm1, %v6778_v45, -inf }
 0x330   :  { %v4586_v50 = vpop.f32.mrf.mxu1  ;;  %3208 = vmax.xlane.f32.xlu0 %v3207_v6 }
 0x331   :  { %v3048_v55 = vadd.f32 %v4650_v23, %v4586_v50  ;;  %v6817_v23 = vpop.xlane.xlu1 %3749  ;;  %v6824_v50 = vpop.xlane.xlu0 %3746 }
 0x332   :  { %v2721_v9 = vpop.f32.mrf.mxu1 }
 0x333   :  { %v6785_v28 = vadd.f32 %v6678_v30, %v3048_v55  ;;  %v3043_v36 = vadd.f32 %v3042_v47, %v2721_v9  ;;  %v3082_v9 = vpop.f32.mrf.mxu0 }
 0x335   :  { %7823 = vst [vmem:[#allocation92_spill] sm:$0xff] %v6785_v28  ;;  %v6788_v4 = vadd.f32 %v6678_v30, %v3043_v36  ;;  %v3216_v46 = vsel %vm3170_vm1, %v6785_v28, -inf }
 0x336   :  { %3217 = vmax.xlane.f32.xlu1 %v3216_v46  ;;  %v6828_v46 = vpop.xlane.xlu1 %3755 }
 0x337   :  { %v3213_v39 = vsel %vm3170_vm1, %v6788_v4, -inf }
 0x338   :  { %v4589_v59 = vpop.f32.mrf.mxu1  ;;  %3214 = vmax.xlane.f32.xlu0 %v3213_v39 }
 0x339   :  { %v3058_v62 = vadd.f32 %v4653_v44, %v4589_v59 }
 0x33a   :  { %v2731_v0 = vpop.f32.mrf.mxu1 }
 0x33b   :  { %v6795_v37 = vadd.f32 %v6678_v30, %v3058_v62  ;;  %v3053_v57 = vadd.f32 %v3052_v27, %v2731_v0  ;;  %v6833_v27 = vpop.xlane.xlu0 %3752  ;;  %v4665_v62 = vpop.f32.mrf.mxu0 }
 0x33d   :  { %7824 = vst [vmem:[#allocation65_spill] sm:$0xff] %v6795_v37  ;;  %v6798_v58 = vadd.f32 %v6678_v30, %v3053_v57  ;;  %v3222_v25 = vsel %vm3170_vm1, %v6795_v37, -inf }
 0x33e   :  { %3223 = vmax.xlane.f32.xlu1 %v3222_v25 }
 0x33f   :  { %v3219_v24 = vsel %vm3170_vm1, %v6798_v58, -inf }
 0x340   :  { %v4592_v42 = vpop.f32.mrf.mxu1  ;;  %3220 = vmax.xlane.f32.xlu0 %v3219_v24  ;;  %v3092_v24 = vpop.f32.mrf.mxu0 }
 0x341   :  { %v3068_v34 = vadd.f32 %v4656_v56, %v4592_v42  ;;  %v6842_v42 = vpop.xlane.xlu1 %3761 }
 0x342   :  { %v2741_v38 = vpop.f32.mrf.mxu1 }
 0x343   :  { %v6805_v29 = vadd.f32 %v6678_v30, %v3068_v34  ;;  %v3063_v21 = vadd.f32 %v3062_v14, %v2741_v38  ;;  %v6844_v34 = vpop.xlane.xlu0 %3758 }
 0x345   :  { %7825 = vst [vmem:[#allocation35_spill] sm:$0xff] %v6805_v29  ;;  %v6808_v3 = vadd.f32 %v6678_v30, %v3063_v21  ;;  %v3228_v53 = vsel %vm3170_vm1, %v6805_v29, -inf }
 0x346   :  { %3229 = vmax.xlane.f32.xlu1 %v3228_v53 }
 0x347   :  { %v3225_v63 = vsel %vm3170_vm1, %v6808_v3, -inf }
 0x348   :  { %v4595_v40 = vpop.f32.mrf.mxu1  ;;  %3226 = vmax.xlane.f32.xlu0 %v3225_v63 }
 0x349   :  { %v3078_v54 = vadd.f32 %v4659_v7, %v4595_v40  ;;  %v6854_v40 = vpop.xlane.xlu1 %3767 }
 0x34a   :  { %v2751_v16 = vpop.f32.mrf.mxu1 }
 0x34b   :  { %v6815_v12 = vadd.f32 %v6678_v30, %v3078_v54  ;;  %v3073_v5 = vadd.f32 %v3072_v26, %v2751_v16  ;;  %v6858_v54 = vpop.xlane.xlu0 %3764 }
 0x34d   :  { %7826 = vst [vmem:[#allocation8_spill] sm:$0xff] %v6815_v12  ;;  %v6820_v61 = vadd.f32 %v6678_v30, %v3073_v5  ;;  %v3234_v6 = vsel %vm3170_vm1, %v6815_v12, -inf  ;;  %v6860_v16 = vpop.xlane.xlu1 %3773 }
 0x34e   :  { %3235 = vmax.xlane.f32.xlu1 %v3234_v6 }
 0x34f   :  { %v3231_v47 = vsel %vm3170_vm1, %v6820_v61, -inf  ;;  %v6862_v5 = vpop.xlane.xlu0 %3770 }
 0x350   :  { %v4598_v55 = vpop.f32.mrf.mxu1  ;;  %3232 = vmax.xlane.f32.xlu0 %v3231_v47 }
 0x351   :  { %v3088_v36 = vadd.f32 %v4662_v48, %v4598_v55  ;;  %v6864_v48 = vpop.xlane.xlu1 %3779 }
 0x352   :  { %v2761_v44 = vpop.f32.mrf.mxu1 }
 0x353   :  { %v6831_v39 = vadd.f32 %v6678_v30, %v3088_v36  ;;  %v3083_v59 = vadd.f32 %v3082_v9, %v2761_v44  ;;  %v6866_v6 = vpop.xlane.xlu0 %3776 }
 0x355   :  { %7827 = vst [vmem:[#allocation34_spill] sm:$0xff] %v6831_v39  ;;  %v6836_v0 = vadd.f32 %v6678_v30, %v3083_v59  ;;  %v3240_v57 = vsel %vm3170_vm1, %v6831_v39, -inf  ;;  %v6868_v9 = vpop.xlane.xlu1 %3785 }
 0x356   :  { %3241 = vmax.xlane.f32.xlu1 %v3240_v57  ;;  %7830 = vst [vmem:[#allocation32_spill] sm:$0xff] %v6868_v9 }
 0x357   :  { %v3237_v56 = vsel %vm3170_vm1, %v6836_v0, -inf  ;;  %v6870_v36 = vpop.xlane.xlu0 %3782 }
 0x358   :  { %v4601_v25 = vpop.f32.mrf.mxu1  ;;  %3238 = vmax.xlane.f32.xlu0 %v3237_v56  ;;  %7831 = vst [vmem:[#allocation83_spill] sm:$0xff] %v6870_v36 }
 0x359   :  { %v3098_v14 = vadd.f32 %v4665_v62, %v4601_v25  ;;  %v6872_v62 = vpop.xlane.xlu1 %3791 }
 0x35a   :  { %v2771_v38 = vpop.f32.mrf.mxu1  ;;  %7832 = vst [vmem:[#allocation82_spill] sm:$0xff] %v6872_v62 }
 0x35b   :  { %v6847_v21 = vadd.f32 %v6678_v30, %v3098_v14  ;;  %v3093_v7 = vadd.f32 %v3092_v24, %v2771_v38  ;;  %v6874_v57 = vpop.xlane.xlu0 %3788 }
 0x35c   :  { %7833 = vst [vmem:[#allocation3_spill] sm:$0xff] %v6874_v57 }
 0x35d   :  { %7828 = vst [vmem:[#allocation33_spill] sm:$0xff] %v6847_v21  ;;  %v6850_v53 = vadd.f32 %v6678_v30, %v3093_v7  ;;  %v3246_v63 = vsel %vm3170_vm1, %v6847_v21, -inf  ;;  %v6876_v14 = vpop.xlane.xlu1 %3797 }
 0x35e   :  { %3247 = vmax.xlane.f32.xlu1 %v3246_v63  ;;  %7834 = vst [vmem:[#allocation94_spill] sm:$0xff] %v6876_v14 }
 0x35f   :  { %7829 = vst [vmem:[#allocation84_spill] sm:$0xff] %v6850_v53  ;;  %v3243_v26 = vsel %vm3170_vm1, %v6850_v53, -inf  ;;  %v6878_v7 = vpop.xlane.xlu0 %3794 }
 0x360   :  { %3244 = vmax.xlane.f32.xlu0 %v3243_v26  ;;  %v4604_v47 = vpop.f32.mrf.mxu1  ;;  %7835 = vst [vmem:[#allocation39_spill] sm:$0xff] %v6878_v7 }
 0x362   :  { %v2781_v55 = vpop.f32.mrf.mxu1 }
 0x363   :  { %v6888_v35 = vpop.xlane.xlu0 %3800 }
 0x364   :  { %7837 = vst [vmem:[#allocation4_spill] sm:$0xff] %v6888_v35 }
 0x368   :  { %v4607_v44 = vpop.f32.mrf.mxu1 }
 0x36a   :  { %v2791_v59 = vpop.f32.mrf.mxu1 }
 0x378   :  { %v4610_v56 = vpop.f32.mrf.mxu1 }
 0x37a   :  { %v2801_v25 = vpop.f32.mrf.mxu1 }
 0x37c   :  { %v4668_v24 = vpop.f32.mrf.mxu1 }
 0x37d   :  { %v3108_v38 = vadd.f32 %v4668_v24, %v4604_v47  ;;  %v6890_v47 = vpop.xlane.xlu1 %3803 }
 0x37e   :  { %v3102_v63 = vpop.f32.mrf.mxu1  ;;  %7838 = vst [vmem:[#allocation38_spill] sm:$0xff] %v6890_v47 }
 0x37f   :  { %v6881_v26 = vadd.f32 %v6678_v30, %v3108_v38  ;;  %v3103_v9 = vadd.f32 %v3102_v63, %v2781_v55 }
 0x380   :  { %v4671_v36 = vpop.f32.mrf.mxu1 }
 0x381   :  { %v6884_v17 = vadd.f32 %v6678_v30, %v3103_v9  ;;  %v3118_v62 = vadd.f32 %v4671_v36, %v4607_v44  ;;  %v3252_v57 = vsel %vm3170_vm1, %v6881_v26, -inf  ;;  %v6904_v47 = vpop.xlane.xlu1 %3809 }
 0x382   :  { %3253 = vmax.xlane.f32.xlu1 %v3252_v57  ;;  %v3112_v14 = vpop.f32.mrf.mxu1  ;;  %v6902_v57 = vpop.xlane.xlu0 %3806  ;;  %7841 = vst [vmem:[#allocation36_spill] sm:$0xff] %v6904_v47 }
 0x383   :  { %7836 = vst [vmem:[#allocation10_spill] sm:$0xff] %v6884_v17  ;;  %v6893_v24 = vadd.f32 %v6678_v30, %v3118_v62  ;;  %v3113_v38 = vadd.f32 %v3112_v14, %v2791_v59  ;;  %v3249_v55 = vsel %vm3170_vm1, %v6884_v17, -inf  ;;  %7840 = vst [vmem:[#allocation37_spill] sm:$0xff] %v6902_v57 }
 0x384   :  { %v4674_v63 = vpop.f32.mrf.mxu1  ;;  %3250 = vmax.xlane.f32.xlu0 %v3249_v55 }
 0x385   :  { %7839 = vst [vmem:[#allocation87_spill] sm:$0xff] %v6893_v24  ;;  %v6898_v9 = vadd.f32 %v6678_v30, %v3113_v38  ;;  %v3128_v36 = vadd.f32 %v4674_v63, %v4610_v56  ;;  %v3258_v44 = vsel %vm3170_vm1, %v6893_v24, -inf }
 0x386   :  { %3259 = vmax.xlane.f32.xlu1 %v3258_v44  ;;  %v3122_v35 = vpop.f32.mrf.mxu1 }
 0x387   :  { %v6907_v59 = vadd.f32 %v6678_v30, %v3128_v36  ;;  %v3123_v62 = vadd.f32 %v3122_v35, %v2801_v25  ;;  %v3255_v14 = vsel %vm3170_vm1, %v6898_v9, -inf  ;;  %v6916_v55 = vpop.xlane.xlu0 %3175  ;;  %v7842_v35 = vld [vmem:[#allocation9_spill] sm:$0xff] }
 0x388   :  { %3256 = vmax.xlane.f32.xlu0 %v3255_v14  ;;  %v3822_v25 = vmul.f32 %v7842_v35, %v7842_v35  ;;  %v3268_v44 = vsub.f32 %v6690_v10, %v6916_v55 }
 0x389   :  { %v6912_v38 = vadd.f32 %v6678_v30, %v3123_v62  ;;  %v3264_v56 = vsel %vm3170_vm1, %v6907_v59, -inf  ;;  %v6918_v63 = vpop.xlane.xlu1 %3172  ;;  %v3821_v30 = vmul.f32 %v7706_v22, %v7706_v22 }
 0x38a   :  { %3265 = vmax.xlane.f32.xlu1 %v3264_v56  ;;  %v3267_v62 = vsub.f32 %v6694_v20, %v6918_v63  ;;  %v7843_v56 = vld [vmem:[#allocation11_spill] sm:$0xff]  ;;  %v7844_v20 = vld [vmem:[#allocation13_spill] sm:$0xff] }
 0x38b   :  { %v3261_v36 = vsel %vm3170_vm1, %v6912_v38, -inf  ;;  %v3824_v57 = vmul.f32 %v7843_v56, %v7843_v56 }
 0x38c   :  { %3262 = vmax.xlane.f32.xlu0 %v3261_v36  ;;  %v3301_v36 = vmul.f32 1.442695, %v3268_v44  ;;  %v3299_v22 = vmul.f32 1.442695, %v3267_v62  ;;  %v3825_v44 = vmul.f32 %v7727_v2, %v7727_v2  ;;  %v7845_v62 = vld [vmem:[#allocation15_spill] sm:$0xff]  ;;  %v3827_v2 = vmul.f32 %v7735_v19, %v7735_v19 }
 0x38e   :  { %3865 = vadd.xlane.f32.xlu1 %v3822_v25  ;;  %v3823_v25 = vmul.f32 %v7716_v32, %v7716_v32  ;;  %4760 = vpow2.f32 %v3301_v36 }
 0x38f   :  { %v6930_v14 = vpop.xlane.xlu1 %3181  ;;  %4762 = vpow2.f32 %v3299_v22 }
 0x390   :  { %3863 = vadd.xlane.f32.xlu0 %v3821_v30  ;;  %v3270_v35 = vsub.f32 %v6720_v13, %v6930_v14  ;;  %v3826_v30 = vmul.f32 %v7844_v20, %v7844_v20 }
 0x391   :  { %v6936_v47 = vpop.xlane.xlu0 %3178 }
 0x392   :  { %3869 = vadd.xlane.f32.xlu1 %v3824_v57  ;;  %v3269_v7 = vsub.f32 %v6724_v31, %v6936_v47  ;;  %v3305_v56 = vmul.f32 1.442695, %v3270_v35  ;;  %v7846_v35 = vld [vmem:[#allocation17_spill] sm:$0xff] }
 0x393   :  { %v3830_v22 = vmul.f32 %v7846_v35, %v7846_v35 }
 0x394   :  { %3867 = vadd.xlane.f32.xlu0 %v3823_v25  ;;  %v3303_v13 = vmul.f32 1.442695, %v3269_v7  ;;  %v3828_v25 = vmul.f32 %v7845_v62, %v7845_v62  ;;  %4764 = vpow2.f32 %v3305_v56 }
 0x396   :  { %3873 = vadd.xlane.f32.xlu1 %v3826_v30  ;;  %4766 = vpow2.f32 %v3303_v13  ;;  %v3829_v30 = vmul.f32 %v7747_v8, %v7747_v8  ;;  %v3831_v8 = vmul.f32 %v7755_v43, %v7755_v43 }
 0x397   :  { %v6946_v57 = vpop.xlane.xlu1 %3187 }
 0x398   :  { %v3272_v32 = vsub.f32 %v6735_v33, %v6946_v57  ;;  %3871 = vadd.xlane.f32.xlu0 %v3825_v44 }
 0x399   :  { %v6952_v31 = vpop.xlane.xlu0 %3184 }
 0x39a   :  { %v3309_v20 = vmul.f32 1.442695, %v3272_v32  ;;  %v3271_v36 = vsub.f32 %v6738_v60, %v6952_v31  ;;  %3877 = vadd.xlane.f32.xlu1 %v3828_v25  ;;  %v7847_v32 = vld [vmem:[#allocation19_spill] sm:$0xff] }
 0x39b   :  { %v3832_v19 = vmul.f32 %v7847_v32, %v7847_v32  ;;  %v4761_v62 = vpop.eup %4760 }
 0x39c   :  { %v3307_v7 = vmul.f32 1.442695, %v3271_v36  ;;  %3875 = vadd.xlane.f32.xlu0 %v3827_v2  ;;  %4768 = vpow2.f32 %v3309_v20  ;;  %v4763_v36 = vpop.eup %4762 }
 0x39e   :  { %3881 = vadd.xlane.f32.xlu1 %v3830_v22  ;;  %4770 = vpow2.f32 %v3307_v7  ;;  %v3366_v7 = vsel %vm3170_vm1, %v4761_v62, 0.0 }
 0x39f   :  { %v6962_v56 = vpop.xlane.xlu1 %3193 }
 0x3a0   :  { %v3274_v44 = vsub.f32 %v6745_v18, %v6962_v56  ;;  %3879 = vadd.xlane.f32.xlu0 %v3829_v30  ;;  %v3363_v30 = vsel %vm3170_vm1, %v4763_v36, 0.0 }
 0x3a1   :  { %v6968_v13 = vpop.xlane.xlu0 %3190  ;;  %v4765_v35 = vpop.eup %4764 }
 0x3a2   :  { %v3313_v25 = vmul.f32 1.442695, %v3274_v44  ;;  %v3273_v20 = vsub.f32 %v6748_v15, %v6968_v13  ;;  %3885 = vadd.xlane.f32.xlu1 %v3832_v19  ;;  %v3372_v43 = vsel %vm3170_vm1, %v4765_v35, 0.0 }
 0x3a3   :  { %v4767_v44 = vpop.eup %4766 }
 0x3a4   :  { %4772 = vpow2.f32 %v3313_v25  ;;  %v3311_v2 = vmul.f32 1.442695, %v3273_v20  ;;  %3883 = vadd.xlane.f32.xlu0 %v3831_v8  ;;  %v3369_v8 = vsel %vm3170_vm1, %v4767_v44, 0.0 }
 0x3a6   :  { %4774 = vpow2.f32 %v3311_v2  ;;  %3367 = vadd.xlane.f32.xlu1 %v3366_v7 }
 0x3a7   :  { %v6975_v22 = vpop.xlane.xlu1 %3199 }
 0x3a8   :  { %v3276_v32 = vsub.f32 %v6755_v51, %v6975_v22  ;;  %3364 = vadd.xlane.f32.xlu0 %v3363_v30 }
 0x3a9   :  { %v6980_v19 = vpop.xlane.xlu0 %3196  ;;  %v4769_v25 = vpop.eup %4768 }
 0x3aa   :  { %v3317_v20 = vmul.f32 1.442695, %v3276_v32  ;;  %v3275_v62 = vsub.f32 %v6758_v11, %v6980_v19  ;;  %3373 = vadd.xlane.f32.xlu1 %v3372_v43  ;;  %v3378_v7 = vsel %vm3170_vm1, %v4769_v25, 0.0 }
 0x3ab   :  { %v4771_v2 = vpop.eup %4770 }
 0x3ac   :  { %4776 = vpow2.f32 %v3317_v20  ;;  %v3315_v36 = vmul.f32 1.442695, %v3275_v62  ;;  %3370 = vadd.xlane.f32.xlu0 %v3369_v8  ;;  %v3375_v35 = vsel %vm3170_vm1, %v4771_v2, 0.0 }
 0x3ae   :  { %4778 = vpow2.f32 %v3315_v36  ;;  %3379 = vadd.xlane.f32.xlu1 %v3378_v7 }
 0x3af   :  { %v6987_v30 = vpop.xlane.xlu1 %3205 }
 0x3b0   :  { %v3278_v32 = vsub.f32 %v6765_v49, %v6987_v30  ;;  %3376 = vadd.xlane.f32.xlu0 %v3375_v35 }
 0x3b1   :  { %v4773_v11 = vpop.eup %4772  ;;  %v6992_v43 = vpop.xlane.xlu0 %3202 }
 0x3b2   :  { %v3321_v44 = vmul.f32 1.442695, %v3278_v32  ;;  %v3277_v20 = vsub.f32 %v6768_v1, %v6992_v43  ;;  %v3384_v62 = vsel %vm3170_vm1, %v4773_v11, 0.0 }
 0x3b3   :  { %v4775_v25 = vpop.eup %4774  ;;  %3385 = vadd.xlane.f32.xlu1 %v3384_v62 }
 0x3b4   :  { %4780 = vpow2.f32 %v3321_v44  ;;  %v3319_v8 = vmul.f32 1.442695, %v3277_v20  ;;  %v3381_v36 = vsel %vm3170_vm1, %v4775_v25, 0.0 }
 0x3b5   :  { %3382 = vadd.xlane.f32.xlu0 %v3381_v36 }
 0x3b6   :  { %4782 = vpow2.f32 %v3319_v8 }
 0x3b7   :  { %v6998_v2 = vpop.xlane.xlu1 %3211 }
 0x3b8   :  { %7848 = vst [vmem:[#allocation86_spill] sm:$0xff] %v6998_v2  ;;  %v3280_v7 = vsub.f32 %v6775_v52, %v6998_v2 }
 0x3b9   :  { %v4777_v35 = vpop.eup %4776  ;;  %v7002_v32 = vpop.xlane.xlu0 %3208 }
 0x3ba   :  { %v3325_v49 = vmul.f32 1.442695, %v3280_v7  ;;  %v3279_v11 = vsub.f32 %v6778_v45, %v7002_v32  ;;  %v3390_v62 = vsel %vm3170_vm1, %v4777_v35, 0.0 }
 0x3bb   :  { %v4779_v44 = vpop.eup %4778  ;;  %3391 = vadd.xlane.f32.xlu1 %v3390_v62 }
 0x3bc   :  { %4784 = vpow2.f32 %v3325_v49  ;;  %v3323_v20 = vmul.f32 1.442695, %v3279_v11  ;;  %v3387_v25 = vsel %vm3170_vm1, %v4779_v44, 0.0 }
 0x3bd   :  { %3388 = vadd.xlane.f32.xlu0 %v3387_v25 }
 0x3be   :  { %4786 = vpow2.f32 %v3323_v20 }
 0x3bf   :  { %v7008_v8 = vpop.xlane.xlu1 %3217 }
 0x3c0   :  { %7849 = vst [vmem:[#allocation97_spill] sm:$0xff] %v7008_v8  ;;  %v3282_v36 = vsub.f32 %v6785_v28, %v7008_v8 }
 0x3c1   :  { %v4781_v52 = vpop.eup %4780  ;;  %v7012_v7 = vpop.xlane.xlu0 %3214 }
 0x3c2   :  { %v3329_v2 = vmul.f32 1.442695, %v3282_v36  ;;  %v3281_v35 = vsub.f32 %v6788_v4, %v7012_v7  ;;  %v3396_v62 = vsel %vm3170_vm1, %v4781_v52, 0.0 }
 0x3c3   :  { %v4783_v49 = vpop.eup %4782  ;;  %3397 = vadd.xlane.f32.xlu1 %v3396_v62 }
 0x3c4   :  { %4788 = vpow2.f32 %v3329_v2  ;;  %v3327_v11 = vmul.f32 1.442695, %v3281_v35  ;;  %v3393_v44 = vsel %vm3170_vm1, %v4783_v49, 0.0 }
 0x3c5   :  { %3394 = vadd.xlane.f32.xlu0 %v3393_v44 }
 0x3c6   :  { %4790 = vpow2.f32 %v3327_v11 }
 0x3c7   :  { %v7018_v20 = vpop.xlane.xlu1 %3223 }
 0x3c8   :  { %7850 = vst [vmem:[#allocation85_spill] sm:$0xff] %v7018_v20  ;;  %v3284_v25 = vsub.f32 %v6795_v37, %v7018_v20 }
 0x3c9   :  { %v4785_v28 = vpop.eup %4784  ;;  %v7022_v36 = vpop.xlane.xlu0 %3220 }
 0x3ca   :  { %v3333_v8 = vmul.f32 1.442695, %v3284_v25  ;;  %v3283_v52 = vsub.f32 %v6798_v58, %v7022_v36  ;;  %v3402_v62 = vsel %vm3170_vm1, %v4785_v28, 0.0 }
 0x3cb   :  { %v4787_v2 = vpop.eup %4786  ;;  %3403 = vadd.xlane.f32.xlu1 %v3402_v62 }
 0x3cc   :  { %4792 = vpow2.f32 %v3333_v8  ;;  %v3331_v35 = vmul.f32 1.442695, %v3283_v52  ;;  %v3399_v49 = vsel %vm3170_vm1, %v4787_v2, 0.0 }
 0x3cd   :  { %3400 = vadd.xlane.f32.xlu0 %v3399_v49 }
 0x3ce   :  { %4794 = vpow2.f32 %v3331_v35 }
 0x3cf   :  { %v7028_v11 = vpop.xlane.xlu1 %3229 }
 0x3d0   :  { %7851 = vst [vmem:[#allocation98_spill] sm:$0xff] %v7028_v11  ;;  %v3286_v44 = vsub.f32 %v6805_v29, %v7028_v11 }
 0x3d1   :  { %v4789_v37 = vpop.eup %4788  ;;  %v7032_v25 = vpop.xlane.xlu0 %3226 }
 0x3d2   :  { %v3337_v20 = vmul.f32 1.442695, %v3286_v44  ;;  %v3285_v28 = vsub.f32 %v6808_v3, %v7032_v25  ;;  %v3408_v62 = vsel %vm3170_vm1, %v4789_v37, 0.0 }
 0x3d3   :  { %v4791_v8 = vpop.eup %4790  ;;  %3409 = vadd.xlane.f32.xlu1 %v3408_v62 }
 0x3d4   :  { %4796 = vpow2.f32 %v3337_v20  ;;  %v3335_v52 = vmul.f32 1.442695, %v3285_v28  ;;  %v3405_v2 = vsel %vm3170_vm1, %v4791_v8, 0.0 }
 0x3d5   :  { %3406 = vadd.xlane.f32.xlu0 %v3405_v2 }
 0x3d6   :  { %4798 = vpow2.f32 %v3335_v52 }
 0x3d7   :  { %v7038_v35 = vpop.xlane.xlu1 %3235 }
 0x3d8   :  { %7852 = vst [vmem:[#allocation43_spill] sm:$0xff] %v7038_v35  ;;  %v3288_v49 = vsub.f32 %v6815_v12, %v7038_v35 }
 0x3d9   :  { %v4793_v29 = vpop.eup %4792  ;;  %v7042_v44 = vpop.xlane.xlu0 %3232 }
 0x3da   :  { %v3341_v11 = vmul.f32 1.442695, %v3288_v49  ;;  %v3287_v37 = vsub.f32 %v6820_v61, %v7042_v44  ;;  %v3414_v62 = vsel %vm3170_vm1, %v4793_v29, 0.0 }
 0x3db   :  { %v4795_v20 = vpop.eup %4794  ;;  %3415 = vadd.xlane.f32.xlu1 %v3414_v62 }
 0x3dc   :  { %4800 = vpow2.f32 %v3341_v11  ;;  %v3339_v28 = vmul.f32 1.442695, %v3287_v37  ;;  %v3411_v8 = vsel %vm3170_vm1, %v4795_v20, 0.0 }
 0x3dd   :  { %3412 = vadd.xlane.f32.xlu0 %v3411_v8 }
 0x3de   :  { %4802 = vpow2.f32 %v3339_v28 }
 0x3df   :  { %v7048_v52 = vpop.xlane.xlu1 %3241 }
 0x3e0   :  { %7853 = vst [vmem:[#allocation12_spill] sm:$0xff] %v7048_v52  ;;  %v3290_v2 = vsub.f32 %v6831_v39, %v7048_v52 }
 0x3e1   :  { %v4797_v12 = vpop.eup %4796  ;;  %v7052_v49 = vpop.xlane.xlu0 %3238 }
 0x3e2   :  { %v3345_v35 = vmul.f32 1.442695, %v3290_v2  ;;  %v3289_v29 = vsub.f32 %v6836_v0, %v7052_v49  ;;  %v3420_v62 = vsel %vm3170_vm1, %v4797_v12, 0.0 }
 0x3e3   :  { %v4799_v11 = vpop.eup %4798  ;;  %3421 = vadd.xlane.f32.xlu1 %v3420_v62 }
 0x3e4   :  { %4804 = vpow2.f32 %v3345_v35  ;;  %v3343_v37 = vmul.f32 1.442695, %v3289_v29  ;;  %v3417_v20 = vsel %vm3170_vm1, %v4799_v11, 0.0 }
 0x3e5   :  { %3418 = vadd.xlane.f32.xlu0 %v3417_v20 }
 0x3e6   :  { %4806 = vpow2.f32 %v3343_v37 }
 0x3e7   :  { %v7058_v28 = vpop.xlane.xlu1 %3247 }
 0x3e8   :  { %7854 = vst [vmem:[#allocation5_spill] sm:$0xff] %v7058_v28  ;;  %v3292_v8 = vsub.f32 %v6847_v21, %v7058_v28 }
 0x3e9   :  { %v4801_v39 = vpop.eup %4800  ;;  %v7062_v2 = vpop.xlane.xlu0 %3244 }
 0x3ea   :  { %v3349_v52 = vmul.f32 1.442695, %v3292_v8  ;;  %v3291_v12 = vsub.f32 %v6850_v53, %v7062_v2  ;;  %v3426_v62 = vsel %vm3170_vm1, %v4801_v39, 0.0 }
 0x3eb   :  { %v4803_v35 = vpop.eup %4802  ;;  %3427 = vadd.xlane.f32.xlu1 %v3426_v62 }
 0x3ec   :  { %4808 = vpow2.f32 %v3349_v52  ;;  %v3347_v29 = vmul.f32 1.442695, %v3291_v12  ;;  %v3423_v11 = vsel %vm3170_vm1, %v4803_v35, 0.0 }
 0x3ed   :  { %3424 = vadd.xlane.f32.xlu0 %v3423_v11 }
 0x3ee   :  { %4810 = vpow2.f32 %v3347_v29 }
 0x3f1   :  { %v4805_v37 = vpop.eup %4804 }
 0x3f2   :  { %v3432_v20 = vsel %vm3170_vm1, %v4805_v37, 0.0 }
 0x3f3   :  { %v4807_v21 = vpop.eup %4806  ;;  %3433 = vadd.xlane.f32.xlu1 %v3432_v20 }
 0x3f4   :  { %v3429_v8 = vsel %vm3170_vm1, %v4807_v21, 0.0 }
 0x3f5   :  { %3430 = vadd.xlane.f32.xlu0 %v3429_v8 }
 0x3f9   :  { %v4809_v28 = vpop.eup %4808 }
 0x3fa   :  { %v3438_v53 = vsel %vm3170_vm1, %v4809_v28, 0.0 }
 0x3fb   :  { %v4811_v39 = vpop.eup %4810  ;;  %3439 = vadd.xlane.f32.xlu1 %v3438_v53 }
 0x3fc   :  { %v3435_v52 = vsel %vm3170_vm1, %v4811_v39, 0.0 }
 0x3fd   :  { %3436 = vadd.xlane.f32.xlu0 %v3435_v52 }
 0x40b   :  { %v7072_v12 = vpop.xlane.xlu1 %3253 }
 0x40c   :  { %v3294_v62 = vsub.f32 %v6881_v26, %v7072_v12 }
 0x40d   :  { %v7076_v35 = vpop.xlane.xlu0 %3250 }
 0x40e   :  { %v3353_v29 = vmul.f32 1.442695, %v3294_v62  ;;  %v3293_v21 = vsub.f32 %v6884_v17, %v7076_v35 }
 0x40f   :  { %v7080_v11 = vpop.xlane.xlu1 %3259 }
 0x410   :  { %4812 = vpow2.f32 %v3353_v29  ;;  %v3351_v28 = vmul.f32 1.442695, %v3293_v21  ;;  %v3296_v53 = vsub.f32 %v6893_v24, %v7080_v11 }
 0x411   :  { %v7084_v37 = vpop.xlane.xlu0 %3256 }
 0x412   :  { %4814 = vpow2.f32 %v3351_v28  ;;  %v3357_v20 = vmul.f32 1.442695, %v3296_v53  ;;  %v3295_v8 = vsub.f32 %v6898_v9, %v7084_v37 }
 0x413   :  { %v7088_v39 = vpop.xlane.xlu1 %3265 }
 0x414   :  { %4816 = vpow2.f32 %v3357_v20  ;;  %v3355_v52 = vmul.f32 1.442695, %v3295_v8  ;;  %v3298_v62 = vsub.f32 %v6907_v59, %v7088_v39 }
 0x415   :  { %v7092_v17 = vpop.xlane.xlu0 %3262 }
 0x416   :  { %4818 = vpow2.f32 %v3355_v52  ;;  %v3361_v29 = vmul.f32 1.442695, %v3298_v62  ;;  %v3297_v21 = vsub.f32 %v6912_v38, %v7092_v17 }
 0x417   :  { %v3866_v24 = vpop.xlane.xlu1 %3865 }
 0x418   :  { %4820 = vpow2.f32 %v3361_v29  ;;  %v3359_v28 = vmul.f32 1.442695, %v3297_v21  ;;  %v3919_v53 = vsel %vm3907_vm4, %v6817_v23, %v3866_v24 }
 0x419   :  { %3952 = vst.msk [vmem:[%s7456_s12 + $0x58] sm:$0xff] %vm3940_vm5, %v3919_v53  ;;  %v3864_v20 = vpop.xlane.xlu0 %3863 }
 0x41a   :  { %4822 = vpow2.f32 %v3359_v28  ;;  %v3918_v8 = vsel %vm3907_vm4, %v6824_v50, %v3864_v20 }
 0x41b   :  { %3951 = vst.msk [vmem:[%s7456_s12 + $0x50] sm:$0xff] %vm3940_vm5, %v3918_v8  ;;  %v3870_v52 = vpop.xlane.xlu1 %3869 }
 0x41c   :  { %v3921_v62 = vsel %vm3907_vm4, %v6828_v46, %v3870_v52 }
 0x41d   :  { %v4813_v23 = vpop.eup %4812  ;;  %3954 = vst.msk [vmem:[%s7456_s12 + $0x68] sm:$0xff] %vm3940_vm5, %v3921_v62  ;;  %v3868_v24 = vpop.xlane.xlu0 %3867 }
 0x41e   :  { %v3920_v29 = vsel %vm3907_vm4, %v6833_v27, %v3868_v24  ;;  %v3444_v50 = vsel %vm3170_vm1, %v4813_v23, 0.0 }
 0x41f   :  { %v4815_v21 = vpop.eup %4814  ;;  %3953 = vst.msk [vmem:[%s7456_s12 + $0x60] sm:$0xff] %vm3940_vm5, %v3920_v29  ;;  %3445 = vadd.xlane.f32.xlu1 %v3444_v50  ;;  %v3874_v46 = vpop.xlane.xlu1 %3873 }
 0x420   :  { %v3923_v28 = vsel %vm3907_vm4, %v6842_v42, %v3874_v46  ;;  %v3441_v53 = vsel %vm3170_vm1, %v4815_v21, 0.0 }
 0x421   :  { %v4817_v20 = vpop.eup %4816  ;;  %3956 = vst.msk [vmem:[%s7456_s12 + $0x78] sm:$0xff] %vm3940_vm5, %v3923_v28  ;;  %3442 = vadd.xlane.f32.xlu0 %v3441_v53  ;;  %v3872_v27 = vpop.xlane.xlu0 %3871 }
 0x422   :  { %v3922_v8 = vsel %vm3907_vm4, %v6844_v34, %v3872_v27  ;;  %v3450_v52 = vsel %vm3170_vm1, %v4817_v20, 0.0  ;;  %v7855_v20 = vld [vmem:[#allocation21_spill] sm:$0xff] }
 0x423   :  { %v4819_v62 = vpop.eup %4818  ;;  %3955 = vst.msk [vmem:[%s7456_s12 + $0x70] sm:$0xff] %vm3940_vm5, %v3922_v8  ;;  %3451 = vadd.xlane.f32.xlu1 %v3450_v52  ;;  %v3878_v42 = vpop.xlane.xlu1 %3877  ;;  %v3834_v27 = vmul.f32 %v7855_v20, %v7855_v20  ;;  %v3833_v52 = vmul.f32 %v7765_v41, %v7765_v41 }
 0x424   :  { %v3925_v23 = vsel %vm3907_vm4, %v6854_v40, %v3878_v42  ;;  %v3447_v24 = vsel %vm3170_vm1, %v4819_v62, 0.0  ;;  %v7856_v42 = vld [vmem:[#allocation23_spill] sm:$0xff] }
 0x425   :  { %v4821_v29 = vpop.eup %4820  ;;  %3958 = vst.msk [vmem:[%s7456_s12 + $0x88] sm:$0xff] %vm3940_vm5, %v3925_v23  ;;  %3448 = vadd.xlane.f32.xlu0 %v3447_v24  ;;  %v3876_v34 = vpop.xlane.xlu0 %3875  ;;  %v3836_v23 = vmul.f32 %v7856_v42, %v7856_v42 }
 0x426   :  { %v3924_v50 = vsel %vm3907_vm4, %v6858_v54, %v3876_v34  ;;  %v3456_v21 = vsel %vm3170_vm1, %v4821_v29, 0.0 }
 0x427   :  { %v4823_v46 = vpop.eup %4822  ;;  %3957 = vst.msk [vmem:[%s7456_s12 + $0x80] sm:$0xff] %vm3940_vm5, %v3924_v50  ;;  %3457 = vadd.xlane.f32.xlu1 %v3456_v21  ;;  %v3882_v40 = vpop.xlane.xlu1 %3881  ;;  %v7858_v50 = vld [vmem:[#allocation24_spill] sm:$0xff] }
 0x428   :  { %v3927_v28 = vsel %vm3907_vm4, %v6860_v16, %v3882_v40  ;;  %v3453_v53 = vsel %vm3170_vm1, %v4823_v46, 0.0  ;;  %v3838_v21 = vmul.f32 %v7858_v50, %v7858_v50 }
 0x429   :  { %3960 = vst.msk [vmem:[%s7456_s12 + $0x98] sm:$0xff] %vm3940_vm5, %v3927_v28  ;;  %3454 = vadd.xlane.f32.xlu0 %v3453_v53  ;;  %v3880_v54 = vpop.xlane.xlu0 %3879  ;;  %v7860_v53 = vld [vmem:[#allocation26_spill] sm:$0xff] }
 0x42a   :  { %v3926_v8 = vsel %vm3907_vm4, %v6862_v5, %v3880_v54  ;;  %v3840_v54 = vmul.f32 %v7860_v53, %v7860_v53  ;;  %v7864_v53 = vld [vmem:[#allocation64_spill] sm:$0xff] }
 0x42b   :  { %3959 = vst.msk [vmem:[%s7456_s12 + $0x90] sm:$0xff] %vm3940_vm5, %v3926_v8  ;;  %3889 = vadd.xlane.f32.xlu1 %v3834_v27  ;;  %v3886_v16 = vpop.xlane.xlu1 %3885  ;;  %v7861_v27 = vld [vmem:[#allocation27_spill] sm:$0xff] }
 0x42c   :  { %v3929_v62 = vsel %vm3907_vm4, %v6864_v48, %v3886_v16  ;;  %v7857_v48 = vld [vmem:[#allocation22_spill] sm:$0xff]  ;;  %v3839_v8 = vmul.f32 %v7861_v27, %v7861_v27 }
 0x42d   :  { %3962 = vst.msk [vmem:[%s7456_s12 + $0xa8] sm:$0xff] %vm3940_vm5, %v3929_v62  ;;  %3887 = vadd.xlane.f32.xlu0 %v3833_v52  ;;  %v3884_v5 = vpop.xlane.xlu0 %3883  ;;  %v3835_v29 = vmul.f32 %v7857_v48, %v7857_v48  ;;  %v7862_v52 = vld [vmem:[#allocation28_spill] sm:$0xff] }
 0x42e   :  { %v3928_v24 = vsel %vm3907_vm4, %v6866_v6, %v3884_v5  ;;  %v7859_v6 = vld [vmem:[#allocation25_spill] sm:$0xff]  ;;  %v3842_v62 = vmul.f32 %v7862_v52, %v7862_v52 }
 0x42f   :  { %3961 = vst.msk [vmem:[%s7456_s12 + $0xa0] sm:$0xff] %vm3940_vm5, %v3928_v24  ;;  %3893 = vadd.xlane.f32.xlu1 %v3836_v23  ;;  %v3368_v41 = vpop.xlane.xlu1 %3367  ;;  %v3837_v40 = vmul.f32 %v7859_v6, %v7859_v6  ;;  %v7863_v5 = vld [vmem:[#allocation29_spill] sm:$0xff] }
 0x430   :  { %4824 = vlog2.f32 %v3368_v41  ;;  %v3841_v42 = vmul.f32 %v7863_v5, %v7863_v5 }
 0x431   :  { %3891 = vadd.xlane.f32.xlu0 %v3835_v29  ;;  %v3365_v34 = vpop.xlane.xlu0 %3364 }
 0x432   :  { %4826 = vlog2.f32 %v3365_v34 }
 0x433   :  { %3897 = vadd.xlane.f32.xlu1 %v3838_v21  ;;  %v3374_v46 = vpop.xlane.xlu1 %3373 }
 0x434   :  { %4828 = vlog2.f32 %v3374_v46 }
 0x435   :  { %3895 = vadd.xlane.f32.xlu0 %v3837_v40  ;;  %v3371_v28 = vpop.xlane.xlu0 %3370 }
 0x436   :  { %4830 = vlog2.f32 %v3371_v28 }
 0x437   :  { %3901 = vadd.xlane.f32.xlu1 %v3840_v54  ;;  %v3380_v20 = vpop.xlane.xlu1 %3379 }
 0x438   :  { %4832 = vlog2.f32 %v3380_v20 }
 0x439   :  { %3899 = vadd.xlane.f32.xlu0 %v3839_v8  ;;  %v3377_v16 = vpop.xlane.xlu0 %3376 }
 0x43a   :  { %4834 = vlog2.f32 %v3377_v16 }
 0x43b   :  { %3905 = vadd.xlane.f32.xlu1 %v3842_v62 }
 0x43c   :  { %v3386_v23 = vpop.xlane.xlu1 %3385 }
 0x43d   :  { %v4825_v24 = vpop.eup %4824  ;;  %4836 = vlog2.f32 %v3386_v23  ;;  %3903 = vadd.xlane.f32.xlu0 %v3841_v42 }
 0x43e   :  { %v3462_v41 = vmul.f32 0.6931472, %v4825_v24  ;;  %v3383_v48 = vpop.xlane.xlu0 %3382 }
 0x43f   :  { %v4827_v29 = vpop.eup %4826  ;;  %4838 = vlog2.f32 %v3383_v48 }
 0x440   :  { %v3524_v34 = vadd.f32 %v3462_v41, %v6916_v55  ;;  %v3460_v50 = vmul.f32 0.6931472, %v4827_v29 }
 0x441   :  { %v4829_v21 = vpop.eup %4828 }
 0x442   :  { %v3556_v46 = vsub.f32 %v6690_v10, %v3524_v34  ;;  %v3523_v6 = vadd.f32 %v3460_v50, %v6918_v63  ;;  %v3466_v40 = vmul.f32 0.6931472, %v4829_v21  ;;  %v7865_v10 = vld [vmem:[#allocation31_spill] sm:$0xff] }
 0x443   :  { %v4831_v28 = vpop.eup %4830 }
 0x444   :  { %3588 = vst.msk [vmem:[%s7458_s11 + $0x8] sm:$0xff] %vm3170_vm1, %v3556_v46  ;;  %v3555_v54 = vsub.f32 %v7864_v53, %v3523_v6  ;;  %v3526_v20 = vadd.f32 %v3466_v40, %v6930_v14  ;;  %v3464_v27 = vmul.f32 0.6931472, %v4831_v28  ;;  %v3392_v8 = vpop.xlane.xlu1 %3391  ;;  %v7866_v14 = vld [vmem:[#allocation30_spill] sm:$0xff] }
 0x445   :  { %v4833_v55 = vpop.eup %4832  ;;  %4840 = vlog2.f32 %v3392_v8 }
 0x446   :  { %3587 = vst.msk [vmem:[%s7458_s11] sm:$0xff] %vm3170_vm1, %v3555_v54  ;;  %v3558_v63 = vsub.f32 %v7865_v10, %v3526_v20  ;;  %v3525_v16 = vadd.f32 %v3464_v27, %v6936_v47  ;;  %v3470_v52 = vmul.f32 0.6931472, %v4833_v55  ;;  %v3389_v62 = vpop.xlane.xlu0 %3388 }
 0x447   :  { %v4835_v5 = vpop.eup %4834  ;;  %4842 = vlog2.f32 %v3389_v62 }
 0x448   :  { %3590 = vst.msk [vmem:[%s7458_s11 + $0x18] sm:$0xff] %vm3170_vm1, %v3558_v63  ;;  %v3557_v42 = vsub.f32 %v7866_v14, %v3525_v16  ;;  %v3528_v23 = vadd.f32 %v3470_v52, %v6946_v57  ;;  %v3468_v24 = vmul.f32 0.6931472, %v4835_v5  ;;  %v7868_v52 = vld [vmem:[#allocation91_spill] sm:$0xff] }
 0x44a   :  { %v4837_v41 = vpop.eup %4836  ;;  %3589 = vst.msk [vmem:[%s7458_s11 + $0x10] sm:$0xff] %vm3170_vm1, %v3557_v42  ;;  %v3560_v47 = vsub.f32 %v6735_v33, %v3528_v23  ;;  %v3527_v48 = vadd.f32 %v3468_v24, %v6952_v31 }
 0x44b   :  { %v3474_v29 = vmul.f32 0.6931472, %v4837_v41  ;;  %v7869_v41 = vld [vmem:[#allocation86_spill] sm:$0xff] }
 0x44c   :  { %v4839_v34 = vpop.eup %4838  ;;  %3592 = vst.msk [vmem:[%s7458_s11 + $0x28] sm:$0xff] %vm3170_vm1, %v3560_v47  ;;  %v3559_v57 = vsub.f32 %v6738_v60, %v3527_v48  ;;  %v3398_v50 = vpop.xlane.xlu1 %3397 }
 0x44d   :  { %v3530_v21 = vadd.f32 %v3474_v29, %v6962_v56  ;;  %v3472_v46 = vmul.f32 0.6931472, %v4839_v34  ;;  %4844 = vlog2.f32 %v3398_v50  ;;  %v7870_v29 = vld [vmem:[#allocation78_spill] sm:$0xff] }
 0x44e   :  { %3591 = vst.msk [vmem:[%s7458_s11 + $0x20] sm:$0xff] %vm3170_vm1, %v3559_v57  ;;  %v3395_v31 = vpop.xlane.xlu0 %3394 }
 0x44f   :  { %v3562_v33 = vsub.f32 %v6745_v18, %v3530_v21  ;;  %v3529_v6 = vadd.f32 %v3472_v46, %v6968_v13  ;;  %4846 = vlog2.f32 %v3395_v31 }
 0x451   :  { %3594 = vst.msk [vmem:[%s7458_s11 + $0x38] sm:$0xff] %vm3170_vm1, %v3562_v33  ;;  %v3561_v60 = vsub.f32 %v6748_v15, %v3529_v6  ;;  %v7867_v15 = vld [vmem:[#allocation79_spill] sm:$0xff]  ;;  %v7871_v33 = vld [vmem:[#allocation97_spill] sm:$0xff] }
 0x452   :  { %v4841_v56 = vpop.eup %4840 }
 0x453   :  { %3593 = vst.msk [vmem:[%s7458_s11 + $0x30] sm:$0xff] %vm3170_vm1, %v3561_v60  ;;  %v3478_v40 = vmul.f32 0.6931472, %v4841_v56  ;;  %v7872_v56 = vld [vmem:[#allocation92_spill] sm:$0xff] }
 0x454   :  { %v4843_v28 = vpop.eup %4842  ;;  %v3404_v53 = vpop.xlane.xlu1 %3403 }
 0x455   :  { %v3532_v18 = vadd.f32 %v3478_v40, %v6975_v22  ;;  %v3476_v13 = vmul.f32 0.6931472, %v4843_v28  ;;  %4848 = vlog2.f32 %v3404_v53 }
 0x456   :  { %v3401_v54 = vpop.xlane.xlu0 %3400 }
 0x457   :  { %v3564_v20 = vsub.f32 %v6755_v51, %v3532_v18  ;;  %v3531_v27 = vadd.f32 %v3476_v13, %v6980_v19  ;;  %4850 = vlog2.f32 %v3401_v54 }
 0x459   :  { %3596 = vst.msk [vmem:[%s7458_s11 + $0x48] sm:$0xff] %vm3170_vm1, %v3564_v20  ;;  %v3563_v8 = vsub.f32 %v7867_v15, %v3531_v27  ;;  %v7873_v20 = vld [vmem:[#allocation85_spill] sm:$0xff] }
 0x45a   :  { %v4845_v55 = vpop.eup %4844 }
 0x45b   :  { %3595 = vst.msk [vmem:[%s7458_s11 + $0x40] sm:$0xff] %vm3170_vm1, %v3563_v8  ;;  %v3482_v22 = vmul.f32 0.6931472, %v4845_v55  ;;  %v7874_v8 = vld [vmem:[#allocation65_spill] sm:$0xff] }
 0x45c   :  { %v4847_v10 = vpop.eup %4846  ;;  %v3410_v63 = vpop.xlane.xlu1 %3409 }
 0x45d   :  { %v3534_v51 = vadd.f32 %v3482_v22, %v6987_v30  ;;  %v3480_v19 = vmul.f32 0.6931472, %v4847_v10  ;;  %4852 = vlog2.f32 %v3410_v63 }
 0x45e   :  { %v3407_v16 = vpop.xlane.xlu0 %3406 }
 0x45f   :  { %v3566_v62 = vsub.f32 %v7868_v52, %v3534_v51  ;;  %v3533_v5 = vadd.f32 %v3480_v19, %v6992_v43  ;;  %4854 = vlog2.f32 %v3407_v16  ;;  %v7875_v16 = vld [vmem:[#allocation98_spill] sm:$0xff] }
 0x461   :  { %3598 = vst.msk [vmem:[%s7458_s11 + $0x58] sm:$0xff] %vm3170_vm1, %v3566_v62  ;;  %v3565_v14 = vsub.f32 %v6768_v1, %v3533_v5  ;;  %v7876_v5 = vld [vmem:[#allocation35_spill] sm:$0xff] }
 0x462   :  { %v4849_v42 = vpop.eup %4848 }
 0x463   :  { %3597 = vst.msk [vmem:[%s7458_s11 + $0x50] sm:$0xff] %vm3170_vm1, %v3565_v14  ;;  %v3486_v30 = vmul.f32 0.6931472, %v4849_v42 }
 0x464   :  { %v4851_v23 = vpop.eup %4850  ;;  %v3416_v24 = vpop.xlane.xlu1 %3415 }
 0x465   :  { %v3536_v47 = vadd.f32 %v3486_v30, %v7869_v41  ;;  %v3484_v43 = vmul.f32 0.6931472, %v4851_v23  ;;  %4856 = vlog2.f32 %v3416_v24 }
 0x466   :  { %v3413_v48 = vpop.xlane.xlu0 %3412 }
 0x467   :  { %v3568_v34 = vsub.f32 %v7870_v29, %v3536_v47  ;;  %v3535_v57 = vadd.f32 %v3484_v43, %v7002_v32  ;;  %4858 = vlog2.f32 %v3413_v48  ;;  %v7877_v47 = vld [vmem:[#allocation43_spill] sm:$0xff]  ;;  %v7878_v29 = vld [vmem:[#allocation8_spill] sm:$0xff] }
 0x469   :  { %3600 = vst.msk [vmem:[%s7458_s11 + $0x68] sm:$0xff] %vm3170_vm1, %v3568_v34  ;;  %v3567_v1 = vsub.f32 %v6778_v45, %v3535_v57 }
 0x46a   :  { %v4853_v50 = vpop.eup %4852 }
 0x46b   :  { %3599 = vst.msk [vmem:[%s7458_s11 + $0x60] sm:$0xff] %vm3170_vm1, %v3567_v1  ;;  %v3490_v21 = vmul.f32 0.6931472, %v4853_v50 }
 0x46c   :  { %v4855_v46 = vpop.eup %4854  ;;  %v3422_v31 = vpop.xlane.xlu1 %3421 }
 0x46d   :  { %v3538_v6 = vadd.f32 %v3490_v21, %v7871_v33  ;;  %v3488_v32 = vmul.f32 0.6931472, %v4855_v46  ;;  %4860 = vlog2.f32 %v3422_v31  ;;  %v7879_v46 = vld [vmem:[#allocation12_spill] sm:$0xff] }
 0x46e   :  { %v3419_v60 = vpop.xlane.xlu0 %3418 }
 0x46f   :  { %v3570_v40 = vsub.f32 %v7872_v56, %v3538_v6  ;;  %v3537_v28 = vadd.f32 %v3488_v32, %v7012_v7  ;;  %4862 = vlog2.f32 %v3419_v60 }
 0x471   :  { %3602 = vst.msk [vmem:[%s7458_s11 + $0x78] sm:$0xff] %vm3170_vm1, %v3570_v40  ;;  %v3569_v45 = vsub.f32 %v6788_v4, %v3537_v28  ;;  %v7881_v28 = vld [vmem:[#allocation5_spill] sm:$0xff] }
 0x472   :  { %v4857_v53 = vpop.eup %4856 }
 0x473   :  { %3601 = vst.msk [vmem:[%s7458_s11 + $0x70] sm:$0xff] %vm3170_vm1, %v3569_v45  ;;  %v3494_v18 = vmul.f32 0.6931472, %v4857_v53 }
 0x474   :  { %v4859_v13 = vpop.eup %4858  ;;  %v3428_v54 = vpop.xlane.xlu1 %3427 }
 0x475   :  { %v3540_v27 = vadd.f32 %v3494_v18, %v7873_v20  ;;  %v3492_v7 = vmul.f32 0.6931472, %v4859_v13  ;;  %4864 = vlog2.f32 %v3428_v54  ;;  %v7882_v18 = vld [vmem:[#allocation33_spill] sm:$0xff] }
 0x476   :  { %v3425_v15 = vpop.xlane.xlu0 %3424 }
 0x477   :  { %v3572_v55 = vsub.f32 %v7874_v8, %v3540_v27  ;;  %v3539_v22 = vadd.f32 %v3492_v7, %v7022_v36  ;;  %4866 = vlog2.f32 %v3425_v15 }
 0x479   :  { %3604 = vst.msk [vmem:[%s7458_s11 + $0x88] sm:$0xff] %vm3170_vm1, %v3572_v55  ;;  %v3571_v4 = vsub.f32 %v6798_v58, %v3539_v22  ;;  %v7884_v22 = vld [vmem:[#allocation32_spill] sm:$0xff] }
 0x47a   :  { %v4861_v10 = vpop.eup %4860 }
 0x47b   :  { %3603 = vst.msk [vmem:[%s7458_s11 + $0x80] sm:$0xff] %vm3170_vm1, %v3571_v4  ;;  %v3498_v63 = vmul.f32 0.6931472, %v4861_v10 }
 0x47c   :  { %v4863_v51 = vpop.eup %4862  ;;  %v3434_v19 = vpop.xlane.xlu1 %3433 }
 0x47d   :  { %v3542_v52 = vadd.f32 %v3498_v63, %v7875_v16  ;;  %v3496_v36 = vmul.f32 0.6931472, %v4863_v51  ;;  %4868 = vlog2.f32 %v3434_v19  ;;  %v7885_v19 = vld [vmem:[#allocation83_spill] sm:$0xff] }
 0x47e   :  { %v3431_v62 = vpop.xlane.xlu0 %3430 }
 0x47f   :  { %v3574_v14 = vsub.f32 %v7876_v5, %v3542_v52  ;;  %v3541_v42 = vadd.f32 %v3496_v36, %v7032_v25  ;;  %4870 = vlog2.f32 %v3431_v62 }
 0x481   :  { %3606 = vst.msk [vmem:[%s7458_s11 + $0x98] sm:$0xff] %vm3170_vm1, %v3574_v14  ;;  %v3573_v58 = vsub.f32 %v6808_v3, %v3541_v42  ;;  %v7886_v14 = vld [vmem:[#allocation82_spill] sm:$0xff] }
 0x482   :  { %v4865_v30 = vpop.eup %4864 }
 0x483   :  { %3605 = vst.msk [vmem:[%s7458_s11 + $0x90] sm:$0xff] %vm3170_vm1, %v3573_v58  ;;  %v3502_v23 = vmul.f32 0.6931472, %v4865_v30 }
 0x484   :  { %v4867_v24 = vpop.eup %4866  ;;  %v3440_v41 = vpop.xlane.xlu1 %3439 }
 0x485   :  { %v3544_v43 = vadd.f32 %v3502_v23, %v7877_v47  ;;  %v3500_v25 = vmul.f32 0.6931472, %v4867_v24  ;;  %4872 = vlog2.f32 %v3440_v41  ;;  %v7887_v47 = vld [vmem:[#allocation3_spill] sm:$0xff] }
 0x486   :  { %v3437_v48 = vpop.xlane.xlu0 %3436 }
 0x487   :  { %v3576_v34 = vsub.f32 %v7878_v29, %v3544_v43  ;;  %v3543_v57 = vadd.f32 %v3500_v25, %v7042_v44  ;;  %4874 = vlog2.f32 %v3437_v48  ;;  %v7880_v44 = vld [vmem:[#allocation34_spill] sm:$0xff] }
 0x488   :  { %v7888_v48 = vld [vmem:[#allocation10_spill] sm:$0xff] }
 0x489   :  { %3608 = vst.msk [vmem:[%s7458_s11 + $0xa8] sm:$0xff] %vm3170_vm1, %v3576_v34  ;;  %v3575_v3 = vsub.f32 %v6820_v61, %v3543_v57  ;;  %v7889_v34 = vld [vmem:[#allocation94_spill] sm:$0xff] }
 0x48a   :  { %v4869_v1 = vpop.eup %4868 }
 0x48b   :  { %3607 = vst.msk [vmem:[%s7458_s11 + $0xa0] sm:$0xff] %vm3170_vm1, %v3575_v3  ;;  %v3506_v50 = vmul.f32 0.6931472, %v4869_v1 }
 0x48c   :  { %v4871_v21 = vpop.eup %4870 }
 0x48d   :  { %v3546_v31 = vadd.f32 %v3506_v50, %v7879_v46  ;;  %v3504_v33 = vmul.f32 0.6931472, %v4871_v21  ;;  %v7890_v50 = vld [vmem:[#allocation87_spill] sm:$0xff] }
 0x48f   :  { %v3578_v6 = vsub.f32 %v7880_v44, %v3546_v31  ;;  %v3545_v32 = vadd.f32 %v3504_v33, %v7052_v49  ;;  %v7891_v31 = vld [vmem:[#allocation39_spill] sm:$0xff] }
 0x491   :  { %3610 = vst.msk [vmem:[%s7458_s11 + $0xb8] sm:$0xff] %vm3170_vm1, %v3578_v6  ;;  %v3577_v61 = vsub.f32 %v6836_v0, %v3545_v32  ;;  %v7883_v0 = vld [vmem:[#allocation84_spill] sm:$0xff] }
 0x492   :  { %v4873_v60 = vpop.eup %4872 }
 0x493   :  { %3609 = vst.msk [vmem:[%s7458_s11 + $0xb0] sm:$0xff] %vm3170_vm1, %v3577_v61  ;;  %v3510_v56 = vmul.f32 0.6931472, %v4873_v60  ;;  %v7892_v60 = vld [vmem:[#allocation38_spill] sm:$0xff] }
 0x494   :  { %v4875_v40 = vpop.eup %4874 }
 0x495   :  { %v3548_v45 = vadd.f32 %v3510_v56, %v7881_v28  ;;  %v3508_v53 = vmul.f32 0.6931472, %v4875_v40 }
 0x497   :  { %v3580_v49 = vsub.f32 %v7882_v18, %v3548_v45  ;;  %v3547_v13 = vadd.f32 %v3508_v53, %v7062_v2 }
 0x499   :  { %3612 = vst.msk [vmem:[%s7458_s11 + $0xc8] sm:$0xff] %vm3170_vm1, %v3580_v49  ;;  %v3579_v54 = vsub.f32 %v7883_v0, %v3547_v13  ;;  %v7894_v49 = vld [vmem:[#allocation36_spill] sm:$0xff]  ;;  %v7895_v13 = vld [vmem:[#allocation37_spill] sm:$0xff] }
 0x49b   :  { %3611 = vst.msk [vmem:[%s7458_s11 + $0xc0] sm:$0xff] %vm3170_vm1, %v3579_v54 }
 0x4a8   :  { %v3446_v20 = vpop.xlane.xlu1 %3445 }
 0x4a9   :  { %4876 = vlog2.f32 %v3446_v20 }
 0x4aa   :  { %v3443_v27 = vpop.xlane.xlu0 %3442 }
 0x4ab   :  { %4878 = vlog2.f32 %v3443_v27 }
 0x4ac   :  { %v3452_v7 = vpop.xlane.xlu1 %3451 }
 0x4ad   :  { %4880 = vlog2.f32 %v3452_v7 }
 0x4ae   :  { %v3449_v15 = vpop.xlane.xlu0 %3448 }
 0x4af   :  { %4882 = vlog2.f32 %v3449_v15 }
 0x4b0   :  { %v3458_v2 = vpop.xlane.xlu1 %3457 }
 0x4b1   :  { %4884 = vlog2.f32 %v3458_v2 }
 0x4b2   :  { %v3455_v8 = vpop.xlane.xlu0 %3454 }
 0x4b3   :  { %4886 = vlog2.f32 %v3455_v8 }
 0x4b4   :  { %v3890_v55 = vpop.xlane.xlu1 %3889 }
 0x4b5   :  { %v3931_v4 = vsel %vm3907_vm4, %v7884_v22, %v3890_v55 }
 0x4b6   :  { %v4877_v10 = vpop.eup %4876  ;;  %3964 = vst.msk [vmem:[%s7456_s12 + $0xb8] sm:$0xff] %vm3940_vm5, %v3931_v4  ;;  %v3888_v63 = vpop.xlane.xlu0 %3887 }
 0x4b7   :  { %v3514_v51 = vmul.f32 0.6931472, %v4877_v10  ;;  %v3930_v16 = vsel %vm3907_vm4, %v7885_v19, %v3888_v63 }
 0x4b8   :  { %v4879_v52 = vpop.eup %4878  ;;  %3963 = vst.msk [vmem:[%s7456_s12 + $0xb0] sm:$0xff] %vm3940_vm5, %v3930_v16  ;;  %v3894_v36 = vpop.xlane.xlu1 %3893 }
 0x4b9   :  { %v3550_v62 = vadd.f32 %v3514_v51, %v7072_v12  ;;  %v3512_v5 = vmul.f32 0.6931472, %v4879_v52  ;;  %v3933_v42 = vsel %vm3907_vm4, %v7886_v14, %v3894_v36 }
 0x4ba   :  { %v4881_v58 = vpop.eup %4880  ;;  %3966 = vst.msk [vmem:[%s7456_s12 + $0xc8] sm:$0xff] %vm3940_vm5, %v3933_v42  ;;  %v3892_v30 = vpop.xlane.xlu0 %3891 }
 0x4bb   :  { %v3582_v23 = vsub.f32 %v6881_v26, %v3550_v62  ;;  %v3549_v24 = vadd.f32 %v3512_v5, %v7076_v35  ;;  %v3518_v41 = vmul.f32 0.6931472, %v4881_v58  ;;  %v3932_v43 = vsel %vm3907_vm4, %v7887_v47, %v3892_v30 }
 0x4bc   :  { %v4883_v12 = vpop.eup %4882  ;;  %3965 = vst.msk [vmem:[%s7456_s12 + $0xc0] sm:$0xff] %vm3940_vm5, %v3932_v43  ;;  %v3898_v25 = vpop.xlane.xlu1 %3897 }
 0x4bd   :  { %3614 = vst.msk [vmem:[%s7458_s11 + $0xd8] sm:$0xff] %vm3170_vm1, %v3582_v23  ;;  %v3581_v26 = vsub.f32 %v7888_v48, %v3549_v24  ;;  %v3552_v35 = vadd.f32 %v3518_v41, %v7080_v11  ;;  %v3516_v29 = vmul.f32 0.6931472, %v4883_v12  ;;  %v3935_v57 = vsel %vm3907_vm4, %v7889_v34, %v3898_v25 }
 0x4be   :  { %v4885_v3 = vpop.eup %4884  ;;  %3968 = vst.msk [vmem:[%s7456_s12 + $0xd8] sm:$0xff] %vm3940_vm5, %v3935_v57  ;;  %v3896_v1 = vpop.xlane.xlu0 %3895 }
 0x4bf   :  { %3613 = vst.msk [vmem:[%s7458_s11 + $0xd0] sm:$0xff] %vm3170_vm1, %v3581_v26  ;;  %v3584_v21 = vsub.f32 %v7890_v50, %v3552_v35  ;;  %v3551_v11 = vadd.f32 %v3516_v29, %v7084_v37  ;;  %v3522_v46 = vmul.f32 0.6931472, %v4885_v3  ;;  %v3934_v33 = vsel %vm3907_vm4, %v7891_v31, %v3896_v1 }
 0x4c0   :  { %v4887_v44 = vpop.eup %4886  ;;  %3967 = vst.msk [vmem:[%s7456_s12 + $0xd0] sm:$0xff] %vm3940_vm5, %v3934_v33  ;;  %v3902_v6 = vpop.xlane.xlu1 %3901 }
 0x4c1   :  { %3616 = vst.msk [vmem:[%s7458_s11 + $0xe8] sm:$0xff] %vm3170_vm1, %v3584_v21  ;;  %v3583_v32 = vsub.f32 %v6898_v9, %v3551_v11  ;;  %v3554_v37 = vadd.f32 %v3522_v46, %v7088_v39  ;;  %v3520_v61 = vmul.f32 0.6931472, %v4887_v44  ;;  %v3937_v56 = vsel %vm3907_vm4, %v7892_v60, %v3902_v6  ;;  %v7893_v39 = vld [vmem:[#allocation4_spill] sm:$0xff] }
 0x4c2   :  { %3970 = vst.msk [vmem:[%s7456_s12 + $0xe8] sm:$0xff] %vm3940_vm5, %v3937_v56  ;;  %v3900_v40 = vpop.xlane.xlu0 %3899 }
 0x4c3   :  { %3615 = vst.msk [vmem:[%s7458_s11 + $0xe0] sm:$0xff] %vm3170_vm1, %v3583_v32  ;;  %v3586_v28 = vsub.f32 %v6907_v59, %v3554_v37  ;;  %v3553_v9 = vadd.f32 %v3520_v61, %v7092_v17  ;;  %v3936_v45 = vsel %vm3907_vm4, %v7893_v39, %v3900_v40 }
 0x4c4   :  { %3969 = vst.msk [vmem:[%s7456_s12 + $0xe0] sm:$0xff] %vm3940_vm5, %v3936_v45  ;;  %v3906_v53 = vpop.xlane.xlu1 %3905 }
 0x4c5   :  { %3618 = vst.msk [vmem:[%s7458_s11 + $0xf8] sm:$0xff] %vm3170_vm1, %v3586_v28  ;;  %v3585_v18 = vsub.f32 %v6912_v38, %v3553_v9  ;;  %v3939_v59 = vsel %vm3907_vm4, %v7894_v49, %v3906_v53 }
 0x4c6   :  { %3972 = vst.msk [vmem:[%s7456_s12 + $0xf8] sm:$0xff] %vm3940_vm5, %v3939_v59  ;;  %v3904_v17 = vpop.xlane.xlu0 %3903 }
 0x4c7   :  { %3617 = vst.msk [vmem:[%s7458_s11 + $0xf0] sm:$0xff] %vm3170_vm1, %v3585_v18  ;;  %v3938_v0 = vsel %vm3907_vm4, %v7895_v13, %v3904_v17 }
 0x4c8   :  { %3971 = vst.msk [vmem:[%s7456_s12 + $0xf0] sm:$0xff] %vm3940_vm5, %v3938_v0 }

</bundles_post_ra>
